<compile_context>
chip_gen: v7x
topology: tpu7x:2x2x1
jax: 0.10.0
libtpu: 0.0.40
codegen_flags: <defaults>
</compile_context>

<pallas_src>
import functools

import jax
import jax.numpy as jnp
from jax.experimental import pallas as pl
from jax.experimental.pallas import tpu as pltpu


def _round_up(x, m):
    return ((x + m - 1) // m) * m


# -----------------------------------------------------------------------------
# Fused kernel: conv1(3x3)+lrelu -> conv2(3x3)+lrelu -> conv3(1x1)
# -----------------------------------------------------------------------------
def denoise_kernel(xpad_ref, w1_ref, b1_ref, w2_ref, b2_ref, w3_ref, b3_ref,
                   out_ref, x1_sc, *, TH, W, We, slope):
    """One row-tile of the fused DenoiseNet forward.

    xpad_ref : (N, H+4, We+2, Cip) bf16  zero-padded NHWC input (VMEM resident)
    w1_ref   : (9*Cip, Cn)         bf16  conv1 weights, im2col (ky,kx,cin) order
    b1_ref   : (1, Cn)             f32
    w2_ref   : (9*Cn, Cn)          bf16  conv2 weights, im2col (ky,kx,cin) order
    b2_ref   : (1, Cn)             f32
    w3_ref   : (Cout, Cn)          bf16  conv3 weights (transposed)
    b3_ref   : (Cout, 1)           f32
    out_ref  : (N, Cout, TH*W)     f32   current output row tile, pixels on lanes
    x1_sc    : (N, TH+2, We, Cn)   bf16  conv1 activation + conv2 halo (scratch)
    """
    i = pl.program_id(0)
    N = out_ref.shape[0]
    Cip = xpad_ref.shape[-1]
    Cn = w2_ref.shape[-1]
    THe = TH + 2                        # conv2 needs a 1-row halo each side
    row0 = i * TH                       # first padded-input row of this tile

    # ---- conv1: 3x3, pad=1, ONE im2col matmul over the (THe x We) region -----
    Pe = N * THe * We
    taps1 = [
        xpad_ref[:, pl.ds(row0 + ky, THe), kx:kx + We, :].reshape(Pe, Cip)
        for ky in range(3) for kx in range(3)
    ]
    patch1 = jnp.concatenate(taps1, axis=-1)                 # (Pe, 9*Cip)
    x1 = jnp.dot(patch1, w1_ref[...], preferred_element_type=jnp.float32)
    x1 = x1 + b1_ref[...]
    x1 = jnp.where(x1 >= 0.0, x1, slope * x1)                # LeakyReLU(0.2)
    x1_sc[...] = x1.astype(jnp.bfloat16).reshape(N, THe, We, Cn)

    # conv2's zero-padding ring: static column zeroing every tile, row zeroing
    # only on the first/last tile (replaces the old full-tile iota mask).
    zcol = jnp.zeros((N, THe, 1, Cn), jnp.bfloat16)
    x1_sc[:, :, 0:1, :] = zcol                     # image column -1
    x1_sc[:, :, W + 1:W + 2, :] = zcol             # image column W

    @pl.when(i == 0)
    def _():                                       # image row -1
        x1_sc[:, 0:1, :, :] = jnp.zeros((N, 1, We, Cn), jnp.bfloat16)

    @pl.when(i == pl.num_programs(0) - 1)
    def _():                                       # image row H
        x1_sc[:, THe - 1:THe, :, :] = jnp.zeros((N, 1, We, Cn), jnp.bfloat16)

    # ---- conv2: 3x3, pad=1, ONE im2col matmul (dominant stage) ---------------
    P = N * TH * W
    taps2 = [
        x1_sc[:, ky:ky + TH, kx:kx + W, :].reshape(P, Cn)
        for ky in range(3) for kx in range(3)
    ]
    patch2 = jnp.concatenate(taps2, axis=-1)                 # (P, 9*Cn)
    x2 = jnp.dot(patch2, w2_ref[...], preferred_element_type=jnp.float32)
    x2 = x2 + b2_ref[...]
    x2 = jnp.where(x2 >= 0.0, x2, slope * x2)                # (P, Cn) f32

    # ---- conv3: 1x1, pixels on lanes -> lane-dense NCHW output stores --------
    THW = TH * W
    for n in range(N):                                       # N small & static
        x2n = jnp.transpose(x2[n * THW:(n + 1) * THW, :]).astype(jnp.bfloat16)
        yn = jnp.dot(w3_ref[...], x2n, preferred_element_type=jnp.float32)
        out_ref[n] = yn + b3_ref[...]                        # (Cout, TH*W)


# -----------------------------------------------------------------------------
# Tiling / VMEM derivation
# -----------------------------------------------------------------------------
def _vmem_budget_bytes():
    cap = 64 << 20                       # conservative fallback (v7x per-TC)
    try:
        info = pltpu.get_tpu_info()
        for name in ("vmem_capacity_bytes", "vmem_bytes", "vmem_size_bytes"):
            v = getattr(info, name, None)
            if v and (16 << 20) <= int(v) <= (256 << 20):
                cap = int(v)
                break
    except Exception:
        pass
    return (3 * cap) // 4                # headroom for the compiler


def _derive_tiling(N, H, W, Cip, Cn, Cout, budget):
    We = _round_up(W + 2, 16)            # conv1 extended width, bf16-aligned
    # Rough VMEM bytes per tile row (scratch + im2col transients + output).
    per_row = N * (
        We * Cn * 2                      # x1 scratch (bf16)
        + We * 9 * Cip * 2               # conv1 im2col patch (bf16)
        + We * Cn * 4                    # conv1 f32 result
        + W * 9 * Cn * 2                 # conv2 im2col patch (bf16)
        + W * Cn * (4 + 4 + 2)           # conv2 f32 result + transpose + bf16
        + 2 * Cout * W * 4               # double-buffered output block
    )
    fixed = (2 * N * (H + 4) * (We + 2) * Cip * 2            # resident input
             + 4 * (9 * Cip * Cn + 9 * Cn * Cn + Cn * Cout)  # weights
             + (8 << 20))                                    # compiler headroom
    max_th = max((budget - fixed) // per_row - 2, 1)

    # Legal row tiles: divide H and keep the output block lane-aligned.
    divs = [d for d in range(1, H + 1) if H % d == 0 and (d * W) % 128 == 0]
    fitting = [d for d in divs if d <= max_th]
    multi = [d for d in fitting if H // d >= 2]   # >=2 tiles: v7x megacore split
    if multi:
        th = max(multi)
    elif fitting:
        th = max(fitting)
    elif divs:
        th = min(divs)
    else:
        th = H                                    # single full-height tile
    return th, We


# -----------------------------------------------------------------------------
# Wrapper
# -----------------------------------------------------------------------------
def denoisenet_forward(x_nchw, params, *, relu_slope=0.2):
    """NCHW float32 input -> NCHW float32 output (PyTorch convention)."""
    N, Cin, H, W = x_nchw.shape
    w1, b1 = params["w1"], params["b1"]
    w2, b2 = params["w2"], params["b2"]
    w3, b3 = params["w3"], params["b3"]
    Cn = w1.shape[-1]
    Cout = w3.shape[-1]
    Cip = max(8, _round_up(Cin, 8))      # pad conv1 K with zero channels

    budget = _vmem_budget_bytes()
    TH, We = _derive_tiling(N, H, W, Cip, Cn, Cout, budget)
    THe = TH + 2
    Wp = We + 2

    # bf16 NHWC zero-padded input: rows +-2, cols 2/(Wp-W-2), channels -> Cip.
    # TODO(synk): very large images exceed full-residency VMEM; needs an
    # overlapping halo-row BlockSpec on H for that regime.
    x = jnp.transpose(x_nchw, (0, 2, 3, 1)).astype(jnp.bfloat16)
    xpad = jnp.pad(x, ((0, 0), (2, 2), (2, Wp - W - 2), (0, Cip - Cin)))

    # Weights in im2col layout (K flattened as (ky, kx, cin), matching the
    # in-kernel tap concatenation order); conv3 transposed for pixel-on-lane.
    w1r = jnp.pad(w1, ((0, 0), (0, 0), (0, Cip - Cin), (0, 0))) \
             .reshape(9 * Cip, Cn).astype(jnp.bfloat16)
    w2r = w2.reshape(9 * Cn, Cn).astype(jnp.bfloat16)
    w3t = jnp.transpose(w3).astype(jnp.bfloat16)              # (Cout, Cn)
    b1r = b1.reshape(1, Cn).astype(jnp.float32)
    b2r = b2.reshape(1, Cn).astype(jnp.float32)
    b3r = b3.reshape(Cout, 1).astype(jnp.float32)

    inputs = (xpad, w1r, b1r, w2r, b2r, w3t, b3r)

    def full_spec(a):
        return pl.BlockSpec(a.shape, lambda i, _nd=a.ndim: (0,) * _nd)

    grid_spec = pltpu.PrefetchScalarGridSpec(
        num_scalar_prefetch=0,
        grid=(H // TH,),
        in_specs=[full_spec(a) for a in inputs],
        out_specs=pl.BlockSpec((N, Cout, TH * W), lambda i: (0, 0, i)),
        scratch_shapes=[pltpu.VMEM((N, THe, We, Cn), jnp.bfloat16)],
    )

    kernel = functools.partial(denoise_kernel, TH=TH, W=W, We=We,
                               slope=float(relu_slope))
    y = pl.pallas_call(
        kernel,
        out_shape=jax.ShapeDtypeStruct((N, Cout, H * W), jnp.float32),
        grid_spec=grid_spec,
        compiler_params=pltpu.CompilerParams(
            dimension_semantics=("parallel",),     # split row tiles across TCs
            vmem_limit_bytes=int(max(budget, 32 << 20))),
    )(*inputs)

    # Trailing-dim split only: layout-free, no extra HBM transpose pass.
    return y.reshape(N, Cout, H, W)


# -----------------------------------------------------------------------------
# Parameter init (deterministic; mirrors nn.Conv2d default fan-in uniform).
# Weight layout (kh, kw, Cin, Cout) == torch_weight.permute(2, 3, 1, 0).
# -----------------------------------------------------------------------------
def init_denoisenet(key, in_channels=3, num_channels=48):
    def conv_init(k, kh, kw, ci, co):
        kw_, kb_ = jax.random.split(k)
        bound = 1.0 / float(kh * kw * ci) ** 0.5
        w = jax.random.uniform(kw_, (kh, kw, ci, co), jnp.float32, -bound, bound)
        b = jax.random.uniform(kb_, (co,), jnp.float32, -bound, bound)
        return w, b

    k1, k2, k3 = jax.random.split(key, 3)
    w1, b1 = conv_init(k1, 3, 3, in_channels, num_channels)
    w2, b2 = conv_init(k2, 3, 3, num_channels, num_channels)
    w3, b3 = conv_init(k3, 1, 1, num_channels, in_channels)
    return dict(w1=w1, b1=b1, w2=w2, b2=b2, w3=w3[0, 0], b3=b3)


# -----------------------------------------------------------------------------
# Pure-JAX reference with the same bf16-operand / f32-accumulate policy.
# -----------------------------------------------------------------------------
def denoisenet_ref(x_nchw, params, relu_slope=0.2):
    x = jnp.transpose(x_nchw, (0, 2, 3, 1)).astype(jnp.float32)
    N, H, W, _ = x.shape

    def conv3x3(t, w, b):
        tp = jnp.pad(t, ((0, 0), (1, 1), (1, 1), (0, 0)))
        wb = w.astype(jnp.bfloat16)
        acc = jnp.zeros((N, H, W, w.shape[-1]), jnp.float32)
        for ky in range(3):
            for kx in range(3):
                acc = acc + jnp.einsum(
                    "nhwc,cd->nhwd",
                    tp[:, ky:ky + H, kx:kx + W, :].astype(jnp.bfloat16),
                    wb[ky, kx], preferred_element_type=jnp.float32)
        return acc + b.reshape(1, 1, 1, -1)

    lrelu = lambda t: jnp.where(t >= 0.0, t, relu_slope * t)
    x1 = lrelu(conv3x3(x, params["w1"], params["b1"]))
    x2 = lrelu(conv3x3(x1, params["w2"], params["b2"]))
    y = jnp.einsum("nhwc,cd->nhwd",
                   x2.astype(jnp.bfloat16), params["w3"].astype(jnp.bfloat16),
                   preferred_element_type=jnp.float32) \
        + params["b3"].reshape(1, 1, 1, -1)
    return jnp.transpose(y, (0, 3, 1, 2))


# -----------------------------------------------------------------------------
if __name__ == "__main__":
    key = jax.random.PRNGKey(0)
    k_in, k_par = jax.random.split(key)

    N, Cin, H, W = 2, 3, 16, 16          # small NCHW input (PyTorch convention)
    num_channels = 48                    # module default

    x_nchw = jax.random.uniform(k_in, (N, Cin, H, W), jnp.float32)
    params = init_denoisenet(k_par, Cin, num_channels)

    fwd = jax.jit(denoisenet_forward)
    out = jax.block_until_ready(fwd(x_nchw, params))
    assert out.shape == (N, Cin, H, W)
    assert bool(jnp.all(jnp.isfinite(out)))

    ref = denoisenet_ref(x_nchw, params)
    err = float(jnp.max(jnp.abs(out - ref)))
    assert err < 5e-3, err

    print("KERNEL_OK")
</pallas_src>

<mosaic_0001>
module attributes {stable_mosaic.version = 11 : i64} {
  func.func @denoise_kernel(%arg0: i32, %arg1: memref<2x20x34x8xbf16, #tpu.memory_space<vmem>>, %arg2: memref<72x48xbf16, #tpu.memory_space<vmem>>, %arg3: memref<1x48xf32, #tpu.memory_space<vmem>>, %arg4: memref<432x48xbf16, #tpu.memory_space<vmem>>, %arg5: memref<1x48xf32, #tpu.memory_space<vmem>>, %arg6: memref<3x48xbf16, #tpu.memory_space<vmem>>, %arg7: memref<3x1xf32, #tpu.memory_space<vmem>>, %arg8: memref<2x3x128xf32, #tpu.memory_space<vmem>>, %arg9: memref<2x10x32x48xbf16, #tpu.memory_space<vmem>>) attributes {dimension_semantics = [#tpu.dimension_semantics<parallel>], iteration_bounds = array<i64: 2>, scalar_prefetch = 0 : i64, scratch_operands = 1 : i64, tpu.core_type = #tpu.core_type<tc>, window_params = [{pipeline_mode = #tpu.pipeline_mode<synchronous>, transform_indices = @transform_0, window_bounds = array<i64: 2, 20, 34, 8>}, {pipeline_mode = #tpu.pipeline_mode<synchronous>, transform_indices = @transform_1, window_bounds = array<i64: 72, 48>}, {pipeline_mode = #tpu.pipeline_mode<synchronous>, transform_indices = @transform_2, window_bounds = array<i64: 1, 48>}, {pipeline_mode = #tpu.pipeline_mode<synchronous>, transform_indices = @transform_3, window_bounds = array<i64: 432, 48>}, {pipeline_mode = #tpu.pipeline_mode<synchronous>, transform_indices = @transform_4, window_bounds = array<i64: 1, 48>}, {pipeline_mode = #tpu.pipeline_mode<synchronous>, transform_indices = @transform_5, window_bounds = array<i64: 3, 48>}, {pipeline_mode = #tpu.pipeline_mode<synchronous>, transform_indices = @transform_6, window_bounds = array<i64: 3, 1>}, {transform_indices = @transform_7, window_bounds = array<i64: 2, 3, 128>}]} {
    %c8_i32 = arith.constant 8 : i32
    %0 = arith.muli %arg0, %c8_i32 : i32
    %c0_i32 = arith.constant 0 : i32
    %1 = arith.addi %0, %c0_i32 : i32
    %c0 = arith.constant 0 : index
    %2 = arith.index_cast %1 : i32 to index
    %c0_0 = arith.constant 0 : index
    %c0_1 = arith.constant 0 : index
    %3 = vector.load %arg1[%c0, %2, %c0_0, %c0_1] : memref<2x20x34x8xbf16, #tpu.memory_space<vmem>>, vector<2x10x32x8xbf16>
    %4 = vector.shape_cast %3 : vector<2x10x32x8xbf16> to vector<640x8xbf16>
    %c0_i32_2 = arith.constant 0 : i32
    %5 = arith.addi %0, %c0_i32_2 : i32
    %c0_3 = arith.constant 0 : index
    %6 = arith.index_cast %5 : i32 to index
    %c1 = arith.constant 1 : index
    %c0_4 = arith.constant 0 : index
    %7 = vector.load %arg1[%c0_3, %6, %c1, %c0_4] : memref<2x20x34x8xbf16, #tpu.memory_space<vmem>>, vector<2x10x32x8xbf16>
    %8 = vector.shape_cast %7 : vector<2x10x32x8xbf16> to vector<640x8xbf16>
    %c0_i32_5 = arith.constant 0 : i32
    %9 = arith.addi %0, %c0_i32_5 : i32
    %c0_6 = arith.constant 0 : index
    %10 = arith.index_cast %9 : i32 to index
    %c2 = arith.constant 2 : index
    %c0_7 = arith.constant 0 : index
    %11 = vector.load %arg1[%c0_6, %10, %c2, %c0_7] : memref<2x20x34x8xbf16, #tpu.memory_space<vmem>>, vector<2x10x32x8xbf16>
    %12 = vector.shape_cast %11 : vector<2x10x32x8xbf16> to vector<640x8xbf16>
    %c1_i32 = arith.constant 1 : i32
    %13 = arith.addi %0, %c1_i32 : i32
    %c0_8 = arith.constant 0 : index
    %14 = arith.index_cast %13 : i32 to index
    %c0_9 = arith.constant 0 : index
    %c0_10 = arith.constant 0 : index
    %15 = vector.load %arg1[%c0_8, %14, %c0_9, %c0_10] : memref<2x20x34x8xbf16, #tpu.memory_space<vmem>>, vector<2x10x32x8xbf16>
    %16 = vector.shape_cast %15 : vector<2x10x32x8xbf16> to vector<640x8xbf16>
    %c1_i32_11 = arith.constant 1 : i32
    %17 = arith.addi %0, %c1_i32_11 : i32
    %c0_12 = arith.constant 0 : index
    %18 = arith.index_cast %17 : i32 to index
    %c1_13 = arith.constant 1 : index
    %c0_14 = arith.constant 0 : index
    %19 = vector.load %arg1[%c0_12, %18, %c1_13, %c0_14] : memref<2x20x34x8xbf16, #tpu.memory_space<vmem>>, vector<2x10x32x8xbf16>
    %20 = vector.shape_cast %19 : vector<2x10x32x8xbf16> to vector<640x8xbf16>
    %c1_i32_15 = arith.constant 1 : i32
    %21 = arith.addi %0, %c1_i32_15 : i32
    %c0_16 = arith.constant 0 : index
    %22 = arith.index_cast %21 : i32 to index
    %c2_17 = arith.constant 2 : index
    %c0_18 = arith.constant 0 : index
    %23 = vector.load %arg1[%c0_16, %22, %c2_17, %c0_18] : memref<2x20x34x8xbf16, #tpu.memory_space<vmem>>, vector<2x10x32x8xbf16>
    %24 = vector.shape_cast %23 : vector<2x10x32x8xbf16> to vector<640x8xbf16>
    %c2_i32 = arith.constant 2 : i32
    %25 = arith.addi %0, %c2_i32 : i32
    %c0_19 = arith.constant 0 : index
    %26 = arith.index_cast %25 : i32 to index
    %c0_20 = arith.constant 0 : index
    %c0_21 = arith.constant 0 : index
    %27 = vector.load %arg1[%c0_19, %26, %c0_20, %c0_21] : memref<2x20x34x8xbf16, #tpu.memory_space<vmem>>, vector<2x10x32x8xbf16>
    %28 = vector.shape_cast %27 : vector<2x10x32x8xbf16> to vector<640x8xbf16>
    %c2_i32_22 = arith.constant 2 : i32
    %29 = arith.addi %0, %c2_i32_22 : i32
    %c0_23 = arith.constant 0 : index
    %30 = arith.index_cast %29 : i32 to index
    %c1_24 = arith.constant 1 : index
    %c0_25 = arith.constant 0 : index
    %31 = vector.load %arg1[%c0_23, %30, %c1_24, %c0_25] : memref<2x20x34x8xbf16, #tpu.memory_space<vmem>>, vector<2x10x32x8xbf16>
    %32 = vector.shape_cast %31 : vector<2x10x32x8xbf16> to vector<640x8xbf16>
    %c2_i32_26 = arith.constant 2 : i32
    %33 = arith.addi %0, %c2_i32_26 : i32
    %c0_27 = arith.constant 0 : index
    %34 = arith.index_cast %33 : i32 to index
    %c2_28 = arith.constant 2 : index
    %c0_29 = arith.constant 0 : index
    %35 = vector.load %arg1[%c0_27, %34, %c2_28, %c0_29] : memref<2x20x34x8xbf16, #tpu.memory_space<vmem>>, vector<2x10x32x8xbf16>
    %36 = vector.shape_cast %35 : vector<2x10x32x8xbf16> to vector<640x8xbf16>
    %37 = tpu.concatenate %4, %8, %12, %16, %20, %24, %28, %32, %36 in 1 : vector<640x8xbf16>, vector<640x8xbf16>, vector<640x8xbf16>, vector<640x8xbf16>, vector<640x8xbf16>, vector<640x8xbf16>, vector<640x8xbf16>, vector<640x8xbf16>, vector<640x8xbf16> -> vector<640x72xbf16>
    %c0_30 = arith.constant 0 : index
    %c0_31 = arith.constant 0 : index
    %38 = vector.load %arg2[%c0_30, %c0_31] : memref<72x48xbf16, #tpu.memory_space<vmem>>, vector<72x48xbf16>
    %cst = arith.constant dense<0.000000e+00> : vector<640x48xf32>
    %39 = tpu.matmul %37, %38, %cst {dimension_numbers = #tpu.dot_dimension_numbers<[1], [0], [0], [1], [0, 0, 1, 1], [], []>} : vector<640x72xbf16>, vector<72x48xbf16>, vector<640x48xf32> -> vector<640x48xf32>
    %c0_32 = arith.constant 0 : index
    %c0_33 = arith.constant 0 : index
    %40 = vector.load %arg3[%c0_32, %c0_33] : memref<1x48xf32, #tpu.memory_space<vmem>>, vector<1x48xf32>
    %41 = vector.broadcast %40 : vector<1x48xf32> to vector<640x48xf32>
    %42 = arith.addf %39, %41 : vector<640x48xf32>
    %cst_34 = arith.constant 0.000000e+00 : f32
    %43 = vector.broadcast %cst_34 : f32 to vector<640x48xf32>
    %44 = arith.cmpf oge, %42, %43 : vector<640x48xf32>
    %cst_35 = arith.constant 2.000000e-01 : f32
    %45 = vector.broadcast %cst_35 : f32 to vector<640x48xf32>
    %46 = arith.mulf %45, %42 : vector<640x48xf32>
    %47 = arith.select %44, %42, %46 : vector<640x48xi1>, vector<640x48xf32>
    %48 = arith.truncf %47 : vector<640x48xf32> to vector<640x48xbf16>
    %49 = vector.shape_cast %48 : vector<640x48xbf16> to vector<2x10x32x48xbf16>
    %c0_36 = arith.constant 0 : index
    %c0_37 = arith.constant 0 : index
    %c0_38 = arith.constant 0 : index
    %c0_39 = arith.constant 0 : index
    %50 = vector.load %arg9[%c0_36, %c0_37, %c0_38, %c0_39] : memref<2x10x32x48xbf16, #tpu.memory_space<vmem>>, vector<2x10x32x48xbf16>
    tpu.vector_store %arg9[%c0_36, %c0_37, %c0_38, %c0_39], %49 {strides = array<i32>} : memref<2x10x32x48xbf16, #tpu.memory_space<vmem>>, vector<2x10x32x48xbf16>,
    %cst_40 = arith.constant 0.000000e+00 : bf16
    %51 = vector.broadcast %cst_40 : bf16 to vector<2x10x1x48xbf16>
    %c0_41 = arith.constant 0 : index
    %c0_42 = arith.constant 0 : index
    %c0_43 = arith.constant 0 : index
    %c0_44 = arith.constant 0 : index
    %52 = vector.load %arg9[%c0_41, %c0_42, %c0_43, %c0_44] : memref<2x10x32x48xbf16, #tpu.memory_space<vmem>>, vector<2x10x1x48xbf16>
    tpu.vector_store %arg9[%c0_41, %c0_42, %c0_43, %c0_44], %51 {strides = array<i32>} : memref<2x10x32x48xbf16, #tpu.memory_space<vmem>>, vector<2x10x1x48xbf16>,
    %c0_45 = arith.constant 0 : index
    %c0_46 = arith.constant 0 : index
    %c17 = arith.constant 17 : index
    %c0_47 = arith.constant 0 : index
    %53 = vector.load %arg9[%c0_45, %c0_46, %c17, %c0_47] : memref<2x10x32x48xbf16, #tpu.memory_space<vmem>>, vector<2x10x1x48xbf16>
    tpu.vector_store %arg9[%c0_45, %c0_46, %c17, %c0_47], %51 {strides = array<i32>} : memref<2x10x32x48xbf16, #tpu.memory_space<vmem>>, vector<2x10x1x48xbf16>,
    %c0_i32_48 = arith.constant 0 : i32
    %54 = arith.cmpi eq, %arg0, %c0_i32_48 : i32
    %55 = arith.extui %54 : i1 to i32
    %c0_i32_49 = arith.constant 0 : i32
    %56 = arith.cmpi ne, %55, %c0_i32_49 : i32
    scf.if %56 {
      %cst_111 = arith.constant 0.000000e+00 : bf16
      %111 = vector.broadcast %cst_111 : bf16 to vector<2x1x32x48xbf16>
      %c0_112 = arith.constant 0 : index
      %c0_113 = arith.constant 0 : index
      %c0_114 = arith.constant 0 : index
      %c0_115 = arith.constant 0 : index
      %112 = vector.load %arg9[%c0_112, %c0_113, %c0_114, %c0_115] : memref<2x10x32x48xbf16, #tpu.memory_space<vmem>>, vector<2x1x32x48xbf16>
      tpu.vector_store %arg9[%c0_112, %c0_113, %c0_114, %c0_115], %111 {strides = array<i32>} : memref<2x10x32x48xbf16, #tpu.memory_space<vmem>>, vector<2x1x32x48xbf16>,
    } else {
    }
    %c1_i32_50 = arith.constant 1 : i32
    %57 = arith.cmpi eq, %arg0, %c1_i32_50 : i32
    %58 = arith.extui %57 : i1 to i32
    %c0_i32_51 = arith.constant 0 : i32
    %59 = arith.cmpi ne, %58, %c0_i32_51 : i32
    scf.if %59 {
      %cst_111 = arith.constant 0.000000e+00 : bf16
      %111 = vector.broadcast %cst_111 : bf16 to vector<2x1x32x48xbf16>
      %c0_112 = arith.constant 0 : index
      %c9 = arith.constant 9 : index
      %c0_113 = arith.constant 0 : index
      %c0_114 = arith.constant 0 : index
      %112 = vector.load %arg9[%c0_112, %c9, %c0_113, %c0_114] : memref<2x10x32x48xbf16, #tpu.memory_space<vmem>>, vector<2x1x32x48xbf16>
      tpu.vector_store %arg9[%c0_112, %c9, %c0_113, %c0_114], %111 {strides = array<i32>} : memref<2x10x32x48xbf16, #tpu.memory_space<vmem>>, vector<2x1x32x48xbf16>,
    } else {
    }
    %c0_52 = arith.constant 0 : index
    %c0_53 = arith.constant 0 : index
    %c0_54 = arith.constant 0 : index
    %c0_55 = arith.constant 0 : index
    %60 = vector.load %arg9[%c0_52, %c0_53, %c0_54, %c0_55] : memref<2x10x32x48xbf16, #tpu.memory_space<vmem>>, vector<2x8x16x48xbf16>
    %61 = vector.shape_cast %60 : vector<2x8x16x48xbf16> to vector<256x48xbf16>
    %c0_56 = arith.constant 0 : index
    %c0_57 = arith.constant 0 : index
    %c1_58 = arith.constant 1 : index
    %c0_59 = arith.constant 0 : index
    %62 = vector.load %arg9[%c0_56, %c0_57, %c1_58, %c0_59] : memref<2x10x32x48xbf16, #tpu.memory_space<vmem>>, vector<2x8x16x48xbf16>
    %63 = vector.shape_cast %62 : vector<2x8x16x48xbf16> to vector<256x48xbf16>
    %c0_60 = arith.constant 0 : index
    %c0_61 = arith.constant 0 : index
    %c2_62 = arith.constant 2 : index
    %c0_63 = arith.constant 0 : index
    %64 = vector.load %arg9[%c0_60, %c0_61, %c2_62, %c0_63] : memref<2x10x32x48xbf16, #tpu.memory_space<vmem>>, vector<2x8x16x48xbf16>
    %65 = vector.shape_cast %64 : vector<2x8x16x48xbf16> to vector<256x48xbf16>
    %c0_64 = arith.constant 0 : index
    %c1_65 = arith.constant 1 : index
    %c0_66 = arith.constant 0 : index
    %c0_67 = arith.constant 0 : index
    %66 = vector.load %arg9[%c0_64, %c1_65, %c0_66, %c0_67] : memref<2x10x32x48xbf16, #tpu.memory_space<vmem>>, vector<2x8x16x48xbf16>
    %67 = vector.shape_cast %66 : vector<2x8x16x48xbf16> to vector<256x48xbf16>
    %c0_68 = arith.constant 0 : index
    %c1_69 = arith.constant 1 : index
    %c1_70 = arith.constant 1 : index
    %c0_71 = arith.constant 0 : index
    %68 = vector.load %arg9[%c0_68, %c1_69, %c1_70, %c0_71] : memref<2x10x32x48xbf16, #tpu.memory_space<vmem>>, vector<2x8x16x48xbf16>
    %69 = vector.shape_cast %68 : vector<2x8x16x48xbf16> to vector<256x48xbf16>
    %c0_72 = arith.constant 0 : index
    %c1_73 = arith.constant 1 : index
    %c2_74 = arith.constant 2 : index
    %c0_75 = arith.constant 0 : index
    %70 = vector.load %arg9[%c0_72, %c1_73, %c2_74, %c0_75] : memref<2x10x32x48xbf16, #tpu.memory_space<vmem>>, vector<2x8x16x48xbf16>
    %71 = vector.shape_cast %70 : vector<2x8x16x48xbf16> to vector<256x48xbf16>
    %c0_76 = arith.constant 0 : index
    %c2_77 = arith.constant 2 : index
    %c0_78 = arith.constant 0 : index
    %c0_79 = arith.constant 0 : index
    %72 = vector.load %arg9[%c0_76, %c2_77, %c0_78, %c0_79] : memref<2x10x32x48xbf16, #tpu.memory_space<vmem>>, vector<2x8x16x48xbf16>
    %73 = vector.shape_cast %72 : vector<2x8x16x48xbf16> to vector<256x48xbf16>
    %c0_80 = arith.constant 0 : index
    %c2_81 = arith.constant 2 : index
    %c1_82 = arith.constant 1 : index
    %c0_83 = arith.constant 0 : index
    %74 = vector.load %arg9[%c0_80, %c2_81, %c1_82, %c0_83] : memref<2x10x32x48xbf16, #tpu.memory_space<vmem>>, vector<2x8x16x48xbf16>
    %75 = vector.shape_cast %74 : vector<2x8x16x48xbf16> to vector<256x48xbf16>
    %c0_84 = arith.constant 0 : index
    %c2_85 = arith.constant 2 : index
    %c2_86 = arith.constant 2 : index
    %c0_87 = arith.constant 0 : index
    %76 = vector.load %arg9[%c0_84, %c2_85, %c2_86, %c0_87] : memref<2x10x32x48xbf16, #tpu.memory_space<vmem>>, vector<2x8x16x48xbf16>
    %77 = vector.shape_cast %76 : vector<2x8x16x48xbf16> to vector<256x48xbf16>
    %78 = tpu.concatenate %61, %63, %65, %67, %69, %71, %73, %75, %77 in 1 : vector<256x48xbf16>, vector<256x48xbf16>, vector<256x48xbf16>, vector<256x48xbf16>, vector<256x48xbf16>, vector<256x48xbf16>, vector<256x48xbf16>, vector<256x48xbf16>, vector<256x48xbf16> -> vector<256x432xbf16>
    %c0_88 = arith.constant 0 : index
    %c0_89 = arith.constant 0 : index
    %79 = vector.load %arg4[%c0_88, %c0_89] : memref<432x48xbf16, #tpu.memory_space<vmem>>, vector<432x48xbf16>
    %cst_90 = arith.constant dense<0.000000e+00> : vector<256x48xf32>
    %80 = tpu.matmul %78, %79, %cst_90 {dimension_numbers = #tpu.dot_dimension_numbers<[1], [0], [0], [1], [0, 0, 1, 1], [], []>} : vector<256x432xbf16>, vector<432x48xbf16>, vector<256x48xf32> -> vector<256x48xf32>
    %c0_91 = arith.constant 0 : index
    %c0_92 = arith.constant 0 : index
    %81 = vector.load %arg5[%c0_91, %c0_92] : memref<1x48xf32, #tpu.memory_space<vmem>>, vector<1x48xf32>
    %82 = vector.broadcast %81 : vector<1x48xf32> to vector<256x48xf32>
    %83 = arith.addf %80, %82 : vector<256x48xf32>
    %cst_93 = arith.constant 0.000000e+00 : f32
    %84 = vector.broadcast %cst_93 : f32 to vector<256x48xf32>
    %85 = arith.cmpf oge, %83, %84 : vector<256x48xf32>
    %cst_94 = arith.constant 2.000000e-01 : f32
    %86 = vector.broadcast %cst_94 : f32 to vector<256x48xf32>
    %87 = arith.mulf %86, %83 : vector<256x48xf32>
    %88 = arith.select %85, %83, %87 : vector<256x48xi1>, vector<256x48xf32>
    %89 = vector.extract_strided_slice %88 {offsets = [0, 0], sizes = [128, 48], strides = [1, 1]} : vector<256x48xf32> to vector<128x48xf32>
    %90 = tpu.transpose %89, [1, 0] : vector<128x48xf32> -> vector<48x128xf32>
    %91 = arith.truncf %90 : vector<48x128xf32> to vector<48x128xbf16>
    %c0_95 = arith.constant 0 : index
    %c0_96 = arith.constant 0 : index
    %92 = vector.load %arg6[%c0_95, %c0_96] : memref<3x48xbf16, #tpu.memory_space<vmem>>, vector<3x48xbf16>
    %cst_97 = arith.constant dense<0.000000e+00> : vector<3x128xf32>
    %93 = tpu.matmul %92, %91, %cst_97 {dimension_numbers = #tpu.dot_dimension_numbers<[1], [0], [0], [1], [0, 0, 1, 1], [], []>} : vector<3x48xbf16>, vector<48x128xbf16>, vector<3x128xf32> -> vector<3x128xf32>
    %c0_98 = arith.constant 0 : index
    %c0_99 = arith.constant 0 : index
    %94 = vector.load %arg7[%c0_98, %c0_99] : memref<3x1xf32, #tpu.memory_space<vmem>>, vector<3x1xf32>
    %95 = vector.broadcast %94 : vector<3x1xf32> to vector<3x128xf32>
    %96 = arith.addf %93, %95 : vector<3x128xf32>
    %c0_100 = arith.constant 0 : index
    %c0_101 = arith.constant 0 : index
    %c0_102 = arith.constant 0 : index
    %97 = vector.load %arg8[%c0_100, %c0_101, %c0_102] : memref<2x3x128xf32, #tpu.memory_space<vmem>>, vector<1x3x128xf32>
    %98 = vector.shape_cast %97 : vector<1x3x128xf32> to vector<3x128xf32>
    %99 = vector.shape_cast %96 : vector<3x128xf32> to vector<1x3x128xf32>
    tpu.vector_store %arg8[%c0_100, %c0_101, %c0_102], %99 {strides = array<i32>} : memref<2x3x128xf32, #tpu.memory_space<vmem>>, vector<1x3x128xf32>,
    %100 = vector.extract_strided_slice %88 {offsets = [128, 0], sizes = [128, 48], strides = [1, 1]} : vector<256x48xf32> to vector<128x48xf32>
    %101 = tpu.transpose %100, [1, 0] : vector<128x48xf32> -> vector<48x128xf32>
    %102 = arith.truncf %101 : vector<48x128xf32> to vector<48x128xbf16>
    %c0_103 = arith.constant 0 : index
    %c0_104 = arith.constant 0 : index
    %103 = vector.load %arg6[%c0_103, %c0_104] : memref<3x48xbf16, #tpu.memory_space<vmem>>, vector<3x48xbf16>
    %cst_105 = arith.constant dense<0.000000e+00> : vector<3x128xf32>
    %104 = tpu.matmul %103, %102, %cst_105 {dimension_numbers = #tpu.dot_dimension_numbers<[1], [0], [0], [1], [0, 0, 1, 1], [], []>} : vector<3x48xbf16>, vector<48x128xbf16>, vector<3x128xf32> -> vector<3x128xf32>
    %c0_106 = arith.constant 0 : index
    %c0_107 = arith.constant 0 : index
    %105 = vector.load %arg7[%c0_106, %c0_107] : memref<3x1xf32, #tpu.memory_space<vmem>>, vector<3x1xf32>
    %106 = vector.broadcast %105 : vector<3x1xf32> to vector<3x128xf32>
    %107 = arith.addf %104, %106 : vector<3x128xf32>
    %c1_108 = arith.constant 1 : index
    %c0_109 = arith.constant 0 : index
    %c0_110 = arith.constant 0 : index
    %108 = vector.load %arg8[%c1_108, %c0_109, %c0_110] : memref<2x3x128xf32, #tpu.memory_space<vmem>>, vector<1x3x128xf32>
    %109 = vector.shape_cast %108 : vector<1x3x128xf32> to vector<3x128xf32>
    %110 = vector.shape_cast %107 : vector<3x128xf32> to vector<1x3x128xf32>
    tpu.vector_store %arg8[%c1_108, %c0_109, %c0_110], %110 {strides = array<i32>} : memref<2x3x128xf32, #tpu.memory_space<vmem>>, vector<1x3x128xf32>,
    return
  }
  func.func @transform_0(%arg0: i32) -> (i32, i32, i32, i32) {
    %c0_i32 = arith.constant 0 : i32
    %c0_i32_0 = arith.constant 0 : i32
    %c0_i32_1 = arith.constant 0 : i32
    %c0_i32_2 = arith.constant 0 : i32
    %c0_i32_3 = arith.constant 0 : i32
    return %c0_i32, %c0_i32_0, %c0_i32_1, %c0_i32_2 : i32, i32, i32, i32
  }
  func.func @transform_1(%arg0: i32) -> (i32, i32) {
    %c0_i32 = arith.constant 0 : i32
    %c0_i32_0 = arith.constant 0 : i32
    %c0_i32_1 = arith.constant 0 : i32
    return %c0_i32, %c0_i32_0 : i32, i32
  }
  func.func @transform_2(%arg0: i32) -> (i32, i32) {
    %c0_i32 = arith.constant 0 : i32
    %c0_i32_0 = arith.constant 0 : i32
    %c0_i32_1 = arith.constant 0 : i32
    return %c0_i32, %c0_i32_0 : i32, i32
  }
  func.func @transform_3(%arg0: i32) -> (i32, i32) {
    %c0_i32 = arith.constant 0 : i32
    %c0_i32_0 = arith.constant 0 : i32
    %c0_i32_1 = arith.constant 0 : i32
    return %c0_i32, %c0_i32_0 : i32, i32
  }
  func.func @transform_4(%arg0: i32) -> (i32, i32) {
    %c0_i32 = arith.constant 0 : i32
    %c0_i32_0 = arith.constant 0 : i32
    %c0_i32_1 = arith.constant 0 : i32
    return %c0_i32, %c0_i32_0 : i32, i32
  }
  func.func @transform_5(%arg0: i32) -> (i32, i32) {
    %c0_i32 = arith.constant 0 : i32
    %c0_i32_0 = arith.constant 0 : i32
    %c0_i32_1 = arith.constant 0 : i32
    return %c0_i32, %c0_i32_0 : i32, i32
  }
  func.func @transform_6(%arg0: i32) -> (i32, i32) {
    %c0_i32 = arith.constant 0 : i32
    %c0_i32_0 = arith.constant 0 : i32
    %c0_i32_1 = arith.constant 0 : i32
    return %c0_i32, %c0_i32_0 : i32, i32
  }
  func.func @transform_7(%arg0: i32) -> (i32, i32, i32) {
    %c0_i32 = arith.constant 0 : i32
    %c0_i32_0 = arith.constant 0 : i32
    %c0_i32_1 = arith.constant 0 : i32
    return %c0_i32, %c0_i32_0, %arg0 : i32, i32, i32
  }
}

</mosaic_0001>

<bundles_post_ra>
// kernel: denoisenet_forward.1
= control target key start
LH: loop header
LB: loop body
LE: loop exit
PB: predicated region body
PF: predicated region fallthrough
CT: control target
= control target key end

     0   :  { %s11725_s24 = smov 0   ;;  %s11727_s25 = smov 0   ;;  %s17278_s0 = inlined_call_operand.vmem [shape: bf16[2,20,34,8], index: 0, kind: input, shape index: {}]   ;;  %s17279_s1 = inlined_call_operand.vmem [shape: bf16[72,48], index: 1, kind: input, shape index: {}]   ;;  %s17280_s2 = inlined_call_operand.vmem [shape: f32[1,48], index: 2, kind: input, shape index: {}]   ;;  %s17281_s3 = inlined_call_operand.vmem [shape: bf16[432,48], index: 3, kind: input, shape index: {}]   ;;  %s17282_s4 = inlined_call_operand.vmem [shape: f32[1,48], index: 4, kind: input, shape index: {}]   ;;  %s17283_s5 = inlined_call_operand.vmem [shape: bf16[3,48], index: 5, kind: input, shape index: {}]   ;;  %s17284_s6 = inlined_call_operand.vmem [shape: f32[3,1], index: 6, kind: input, shape index: {}]   ;;  %s17285_s7 = inlined_call_operand.vmem [shape: f32[2,3,256], index: 7, kind: output, shape index: {}]  }
   0x1   :  { %s11729_s26 = smov 0  }
   0x2 LB: > { %s11738_s27 = sadd.s32 4294967295, %s11667_s26   ;;  %s11740_s28 = sadd.s32 1, %s11667_s26   ;;  %s11667_s26 = sphi %s11729_s26, %s17736_s26   ;;  %s11663_s25 = sphi %s11727_s25, %s17735_s25   ;;  %s11659_s24 = sphi %s11725_s24, %s17734_s24  }
   0x3   : > { %s168_s29 = ssub.s32 %s11667_s26, %s11740_s28  ;;  %s171_s30 = sadd.s32 1, %s11663_s25 }
   0x4   : > { %p169_p0 = scmp.eq.s32.totalorder %s168_s29, 0  ;;  %p181_p1 = scmp.ne.s32.totalorder %s11663_s25, %s11659_s24 }
   0x5   : > { %p182_p2 = scmp.eq.s32.totalorder %s11738_s27, 1  ;;  %p10223_p3 = scmp.ge.s32.totalorder %s11667_s26, 1 }
   0x6   : > { %s11748_s8 = scalar_select %p169_p0, %s11663_s25, %s171_s30  }
   0x7   : > { %p11750_p4 = por %p182_p2, %p181_p1  ;;  %p227_p5 = scmp.lt.s32.totalorder %s11667_s26, 3 }
   0x9   : > { %p228_p6 = pnand %p10223_p3, %p227_p5 }
   0xb   : > { %231 = sbr.rel (%p228_p6) target bundleno = 2118 (0x846), region = 48 }
  0x12   : > { %s10991_s10 = smul.u32 160, %s11738_s27  ;;  %vm358_vm0 = vsmask.f32 3328  ;;  %vm359_vm1 = vsmask.f32 7440  ;;  %v17381_v24 = vmov 0 }
  0x13   : > { %vm11768_vm2 = vmor %vm358_vm0, %vm359_vm1  ;;  %s11669_s14 = smov 8   ;;  %vm1361_vm3 = vcmask 1042432   ;;  %vm1362_vm4 = vcmask 1046532   ;;  %s11670_s15 = smov 16   ;;  %vm6132_vm6 = vcmask 64512   ;;  %vm6253_vm7 = vcmask 130048  }
  0x14   : > { %s11758_s13 = scalar_lea.vmem %s17278_s0, %s10991_s10  ;;  %v17382_v24 = vsel %vm11768_vm2, 4294967295, %v17381_v24  ;;  %vm12232_vm5 = vmor %vm1361_vm3, %vm1362_vm4  ;;  %s11671_s16 = smov 24   ;;  %vm6334_vm8 = vcmask 195584   ;;  %vm6415_vm9 = vcmask 261120   ;;  %vm6496_vm10 = vcmask 326656  }
  0x15   : > { %v262_v0 = vld [vmem:[%s11758_s13 + $0x14] sm:$0xf]  ;;  %v263_v1 = vld [vmem:[%s11758_s13 + $0x18] sm:$0xf]  ;;  %v264_v2 = vld [vmem:[%s11758_s13 + $0x1c] sm:$0xf] }
  0x16   : > { %v406_v3 = vshrl.u32 %v262_v0, 16  ;;  %v409_v4 = vshll.u32 %v262_v0, 16  ;;  %v415_v5 = vshll.u32 %v263_v1, 16  ;;  %v419_v6 = vshrl.u32 %v263_v1, 16  ;;  %v258_v7 = vld [vmem:[%s11758_s13] sm:$0xf] }
  0x17   : > { %v425_v8 = vshll.u32 %v264_v2, 16  ;;  %v429_v9 = vshrl.u32 %v264_v2, 16  ;;  %v259_v10 = vld [vmem:[%s11758_s13 + $0x4] sm:$0xf]  ;;  %v260_v15 = vld [vmem:[%s11758_s13 + $0x8] sm:$0xf] }
  0x18   : > { %v408_v11 = vrot.slane %v406_v3, 4  ;;  %v411_v12 = vrot.slane %v409_v4, 5  ;;  %v417_v13 = vrot.slane %v415_v5, 5  ;;  %v421_v14 = vrot.slane %v419_v6, 4  ;;  %17383 = vst [vmem:[#allocation4_spill] sm:$0xff] %v17382_v24  ;;  %s250_s17 = sand.u32 1, %s11659_s24  }
  0x19   : > { %v427_v16 = vrot.slane %v425_v8, 5  ;;  %v431_v17 = vrot.slane %v429_v9, 4  ;;  %v362_v18 = vshrl.u32 %v258_v7, 16  ;;  %v365_v19 = vshll.u32 %v258_v7, 16  ;;  %v265_v29 = vld [vmem:[%s11758_s13 + $0x20] sm:$0xf] }
  0x1a   : > { %v412_v20 = vor.u32 %v411_v12, %v408_v11  ;;  %v422_v21 = vor.u32 %v421_v14, %v417_v13  ;;  %v371_v22 = vshll.u32 %v259_v10, 16  ;;  %v375_v23 = vshrl.u32 %v259_v10, 16  ;;  %v339_v34 = vld [vmem:[%s11758_s13 + $0x24] sm:$0x1]  ;;  %v261_v39 = vld [vmem:[%s11758_s13 + $0xc] sm:$0xf] }
  0x1b   : > { %v432_v25 = vor.u32 %v431_v17, %v427_v16  ;;  %v364_v26 = vrot.slane %v362_v18, 4  ;;  %v367_v27 = vrot.slane %v365_v19, 5  ;;  %v381_v28 = vshll.u32 %v260_v15, 16  ;;  %v338_v51 = vld [vmem:[%s11758_s13 + $0x10] sm:$0x1]  ;;  %s13264_s20 = sshll.u32 %s250_s17, 3 }
  0x1c   : > { %v413_v30 = vrot.slane %v412_v20, 4  ;;  %v423_v31 = vrot.slane %v422_v21, 4  ;;  %v373_v32 = vrot.slane %v371_v22, 5  ;;  %v377_v33 = vrot.slane %v375_v23, 4  ;;  %v268_v57 = vld [vmem:[%s11758_s13 + $0x30] sm:$0xf] }
  0x1d   : > { %v368_v35 = vor.u32 %v367_v27, %v364_v26  ;;  %v383_v36 = vrot.slane %v381_v28, 5  ;;  %v385_v37 = vshrl.u32 %v260_v15, 16  ;;  %v433_v38 = vrot.slane %v432_v25, 4  ;;  %v269_v58 = vld [vmem:[%s11758_s13 + $0x34] sm:$0xf]  ;;  %s11672_s23 = smov 32  }
  0x1e   : > { %v418_v40 = vsel %vm11768_vm2, %v413_v30, %v417_v13  ;;  %v428_v41 = vsel %vm11768_vm2, %v423_v31, %v427_v16  ;;  %v378_v42 = vor.u32 %v377_v33, %v373_v32  ;;  %v435_v43 = vshll.u32 %v265_v29, 16  ;;  %v340_v4 = vld [vmem:[%s11758_s13 + $0x38] sm:$0x1]  ;;  %v266_v12 = vld [vmem:[%s11758_s13 + $0x28] sm:$0xf]  ;;  %s11673_s29 = smov 40  }
  0x1f   : > { %v10574_v44 = vcombine.low %v418_v40, %v428_v41  ;;  %v369_v45 = vrot.slane %v368_v35, 4  ;;  %v387_v46 = vrot.slane %v385_v37, 4  ;;  %v439_v47 = vshrl.u32 %v265_v29, 16  ;;  %v267_v17 = vld [vmem:[%s11758_s13 + $0x2c] sm:$0xf]  ;;  %s11674_s11 = smov 48  }
  0x20   : > { %v379_v48 = vrot.slane %v378_v42, 4  ;;  %v437_v49 = vrot.slane %v435_v43, 5  ;;  %v445_v50 = vshll.u32 %v339_v34, 16  ;;  %v391_v52 = vshll.u32 %v261_v39, 16  ;;  %v272_v27 = vld [vmem:[%s11758_s13 + $0x44] sm:$0xf] }
  0x21   : > { %4616 = vrot.lane.b32.xlu1 %v10574_v44, %s11669_s14  ;;  %v374_v53 = vsel %vm11768_vm2, %v369_v45, %v373_v32  ;;  %v388_v54 = vor.u32 %v387_v46, %v383_v36  ;;  %v441_v55 = vrot.slane %v439_v47, 4  ;;  %v395_v56 = vshrl.u32 %v261_v39, 16  ;;  %v273_v32 = vld [vmem:[%s11758_s13 + $0x48] sm:$0xf]  ;;  %v341_v43 = vld [vmem:[%s11758_s13 + $0x4c] sm:$0x1] }
  0x22   : > { %v384_v59 = vsel %vm11768_vm2, %v379_v48, %v383_v36  ;;  %v438_v60 = vsel %vm11768_vm2, %v433_v38, %v437_v49  ;;  %v447_v61 = vrot.slane %v445_v50, 5  ;;  %v393_v62 = vrot.slane %v391_v52, 5  ;;  %v270_v46 = vld [vmem:[%s11758_s13 + $0x3c] sm:$0xf]  ;;  %v12355_v24 = vld [vmem:[%s11758_s13 + $0x70] sm:$0xf] }
  0x23   : > { %v10572_v63 = vcombine.low %v374_v53, %v384_v59  ;;  %v442_v0 = vor.u32 %v441_v55, %v437_v49  ;;  %v389_v1 = vrot.slane %v388_v54, 4  ;;  %v397_v2 = vrot.slane %v395_v56, 4  ;;  %17396 = vst [vmem:[#allocation15_spill] sm:$0xff] %v12355_v24  ;;  %s11675_s12 = smov 56   ;;  %p10938_p7 = scmp.ne.s32.totalorder %s11738_s27, 0 }
  0x24   : > { %v401_v3 = vshll.u32 %v338_v51, 16  ;;  %v469_v5 = vshll.u32 %v268_v57, 16  ;;  %v473_v6 = vshrl.u32 %v268_v57, 16  ;;  %v479_v7 = vshll.u32 %v269_v58, 16  ;;  %v271_v51 = vld [vmem:[%s11758_s13 + $0x40] sm:$0xf] }
  0x25   : > { %4612 = vrot.lane.b32.xlu0 %v10572_v63, %s11669_s14  ;;  %v443_v8 = vrot.slane %v442_v0, 4  ;;  %v394_v9 = vsel %vm11768_vm2, %v389_v1, %v393_v62  ;;  %v398_v10 = vor.u32 %v397_v2, %v393_v62  ;;  %v483_v11 = vshrl.u32 %v269_v58, 16  ;;  %v276_v0 = vld [vmem:[%s11758_s13 + $0x58] sm:$0xf] }
  0x26   : > { %v403_v13 = vrot.slane %v401_v3, 5  ;;  %v11794_v14 = vrot.slane %v469_v5, 5  ;;  %v475_v15 = vrot.slane %v473_v6, 4  ;;  %v481_v16 = vrot.slane %v479_v7, 5 }
  0x27   : > { %v448_v18 = vsel %vm11768_vm2, %v443_v8, %v447_v61  ;;  %v399_v19 = vrot.slane %v398_v10, 4  ;;  %v485_v20 = vrot.slane %v483_v11, 4  ;;  %v489_v21 = vshll.u32 %v340_v4, 16 }
  0x28   : > { %v10575_v22 = vcombine.low %v438_v60, %v448_v18  ;;  %v476_v23 = vor.u32 %v475_v15, %v11794_v14  ;;  %v450_v25 = vshrl.u32 %v266_v12, 16  ;;  %v453_v26 = vshll.u32 %v266_v12, 16 }
  0x29   : > { %v404_v28 = vsel %vm11768_vm2, %v399_v19, %v403_v13  ;;  %v486_v29 = vor.u32 %v485_v20, %v481_v16  ;;  %v491_v30 = vrot.slane %v489_v21, 5  ;;  %v459_v31 = vshll.u32 %v267_v17, 16  ;;  %v342_v19 = vld [vmem:[%s11758_s13 + $0x60] sm:$0x1]  ;;  %v274_v20 = vld [vmem:[%s11758_s13 + $0x50] sm:$0xf] }
  0x2a   : > { %4618 = vrot.lane.b32.xlu1 %v10575_v22, %s11669_s14  ;;  %v10573_v33 = vcombine.low %v394_v9, %v404_v28  ;;  %v477_v34 = vrot.slane %v476_v23, 4  ;;  %v452_v35 = vrot.slane %v450_v25, 4  ;;  %v455_v36 = vrot.slane %v453_v26, 5  ;;  %v277_v9 = vld [vmem:[%s11758_s13 + $0x5c] sm:$0xf] }
  0x2b   : > { %v487_v37 = vrot.slane %v486_v29, 4  ;;  %v461_v38 = vrot.slane %v459_v31, 5  ;;  %v463_v39 = vshrl.u32 %v267_v17, 16  ;;  %v513_v40 = vshll.u32 %v272_v27, 16  ;;  %v275_v29 = vld [vmem:[%s11758_s13 + $0x54] sm:$0xf] }
  0x2c   : > { %4614 = vrot.lane.b32.xlu0 %v10573_v33, %s11669_s14  ;;  %v482_v41 = vsel %vm11768_vm2, %v477_v34, %v481_v16  ;;  %v456_v42 = vor.u32 %v455_v36, %v452_v35  ;;  %v517_v44 = vshrl.u32 %v272_v27, 16  ;;  %v523_v45 = vshll.u32 %v273_v32, 16 }
  0x2d   : > { %v492_v47 = vsel %vm11768_vm2, %v487_v37, %v491_v30  ;;  %v465_v48 = vrot.slane %v463_v39, 4  ;;  %v11812_v49 = vrot.slane %v513_v40, 5  ;;  %v527_v50 = vshrl.u32 %v273_v32, 16 }
  0x2e   : > { %v10577_v52 = vcombine.low %v482_v41, %v492_v47  ;;  %v457_v53 = vrot.slane %v456_v42, 4  ;;  %v519_v54 = vrot.slane %v517_v44, 4  ;;  %v525_v55 = vrot.slane %v523_v45, 5  ;;  %v281_v47 = vld [vmem:[%s11758_s13 + $0x70] sm:$0xf] }
  0x2f   : > { %v466_v56 = vor.u32 %v465_v48, %v461_v38  ;;  %v529_v57 = vrot.slane %v527_v50, 4  ;;  %v533_v58 = vshll.u32 %v341_v43, 16  ;;  %v494_v59 = vshrl.u32 %v270_v46, 16  ;;  %v343_v48 = vld [vmem:[%s11758_s13 + $0x74] sm:$0x1] }
  0x30   : > { %4622 = vrot.lane.b32.xlu1 %v10577_v52, %s11669_s14  ;;  %v462_v60 = vsel %vm11768_vm2, %v457_v53, %v461_v38  ;;  %v520_v61 = vor.u32 %v519_v54, %v11812_v49  ;;  %v497_v62 = vshll.u32 %v270_v46, 16  ;;  %v503_v63 = vshll.u32 %v271_v51, 16  ;;  %v280_v38 = vld [vmem:[%s11758_s13 + $0x6c] sm:$0xf] }
  0x31   : > { %v467_v1 = vrot.slane %v466_v56, 4  ;;  %v530_v2 = vor.u32 %v529_v57, %v525_v55  ;;  %v535_v3 = vrot.slane %v533_v58, 5  ;;  %v496_v4 = vrot.slane %v494_v59, 4 }
  0x32   : > { %v521_v5 = vrot.slane %v520_v61, 4  ;;  %v499_v6 = vrot.slane %v497_v62, 5  ;;  %v505_v7 = vrot.slane %v503_v63, 5  ;;  %v507_v8 = vshrl.u32 %v271_v51, 16  ;;  %v278_v61 = vld [vmem:[%s11758_s13 + $0x64] sm:$0xf] }
  0x33   : > { %v472_v10 = vsel %vm11768_vm2, %v467_v1, %v11794_v14  ;;  %v531_v11 = vrot.slane %v530_v2, 4  ;;  %v557_v12 = vshll.u32 %v276_v0, 16  ;;  %v561_v13 = vshrl.u32 %v276_v0, 16  ;;  %v279_v2 = vld [vmem:[%s11758_s13 + $0x68] sm:$0xf] }
  0x34   : > { %v10576_v15 = vcombine.low %v462_v60, %v472_v10  ;;  %v526_v16 = vsel %vm11768_vm2, %v521_v5, %v525_v55  ;;  %v500_v17 = vor.u32 %v499_v6, %v496_v4  ;;  %v509_v18 = vrot.slane %v507_v8, 4 }
  0x35   : > { %v536_v21 = vsel %vm11768_vm2, %v531_v11, %v535_v3  ;;  %v11830_v22 = vrot.slane %v557_v12, 5  ;;  %v563_v23 = vrot.slane %v561_v13, 4  ;;  %v567_v25 = vshll.u32 %v277_v9, 16 }
  0x36   : > { %4620 = vrot.lane.b32.xlu0 %v10576_v15, %s11669_s14  ;;  %v10579_v14 = vcombine.low %v526_v16, %v536_v21  ;;  %v501_v26 = vrot.slane %v500_v17, 4  ;;  %v510_v27 = vor.u32 %v509_v18, %v505_v7  ;;  %v571_v28 = vshrl.u32 %v277_v9, 16 }
  0x37   : > { %v564_v30 = vor.u32 %v563_v23, %v11830_v22  ;;  %v569_v31 = vrot.slane %v567_v25, 5  ;;  %v577_v32 = vshll.u32 %v342_v19, 16  ;;  %v538_v33 = vshrl.u32 %v274_v20, 16 }
  0x38   : > { %4626 = vrot.lane.b32.xlu1 %v10579_v14, %s11669_s14  ;;  %v506_v34 = vsel %vm11768_vm2, %v501_v26, %v505_v7  ;;  %v511_v35 = vrot.slane %v510_v27, 4  ;;  %v573_v36 = vrot.slane %v571_v28, 4  ;;  %v541_v37 = vshll.u32 %v274_v20, 16  ;;  %v284_v7 = vld [vmem:[%s11758_s13 + $0x80] sm:$0xf] }
  0x39   : > { %v565_v39 = vrot.slane %v564_v30, 4  ;;  %v579_v40 = vrot.slane %v577_v32, 5  ;;  %v540_v41 = vrot.slane %v538_v33, 4  ;;  %v547_v42 = vshll.u32 %v275_v29, 16  ;;  %v285_v20 = vld [vmem:[%s11758_s13 + $0x84] sm:$0xf] }
  0x3a   : > { %v516_v43 = vsel %vm11768_vm2, %v511_v35, %v11812_v49  ;;  %v574_v44 = vor.u32 %v573_v36, %v569_v31  ;;  %v543_v45 = vrot.slane %v541_v37, 5  ;;  %v551_v46 = vshrl.u32 %v275_v29, 16  ;;  %v344_v27 = vld [vmem:[%s11758_s13 + $0x88] sm:$0x1]  ;;  %v282_v32 = vld [vmem:[%s11758_s13 + $0x78] sm:$0xf] }
  0x3b   : > { %v10578_v50 = vcombine.low %v506_v34, %v516_v43  ;;  %v570_v51 = vsel %vm11768_vm2, %v565_v39, %v569_v31  ;;  %v549_v52 = vrot.slane %v547_v42, 5  ;;  %v601_v53 = vshll.u32 %v280_v38, 16 }
  0x3c   : > { %v575_v54 = vrot.slane %v574_v44, 4  ;;  %v544_v55 = vor.u32 %v543_v45, %v540_v41  ;;  %v553_v56 = vrot.slane %v551_v46, 4  ;;  %v605_v57 = vshrl.u32 %v280_v38, 16 }
  0x3d   : > { %4624 = vrot.lane.b32.xlu0 %v10578_v50, %s11669_s14  ;;  %v11847_v49 = vrot.slane %v601_v53, 5  ;;  %v611_v58 = vshll.u32 %v281_v47, 16  ;;  %v615_v59 = vshrl.u32 %v281_v47, 16  ;;  %v621_v60 = vshll.u32 %v343_v48, 16  ;;  %v288_v50 = vld [vmem:[%s11758_s13 + $0x94] sm:$0xf] }
  0x3e   : > { %v580_v62 = vsel %vm11768_vm2, %v575_v54, %v579_v40  ;;  %v545_v63 = vrot.slane %v544_v55, 4  ;;  %v554_v0 = vor.u32 %v553_v56, %v549_v52  ;;  %v607_v1 = vrot.slane %v605_v57, 4  ;;  %v283_v40 = vld [vmem:[%s11758_s13 + $0x7c] sm:$0xf] }
  0x3f   : > { %v10581_v3 = vcombine.low %v570_v51, %v580_v62  ;;  %v613_v4 = vrot.slane %v611_v58, 5  ;;  %v617_v5 = vrot.slane %v615_v59, 4  ;;  %v623_v6 = vrot.slane %v621_v60, 5  ;;  %v289_v59 = vld [vmem:[%s11758_s13 + $0x98] sm:$0xf] }
  0x40   : > { %v550_v8 = vsel %vm11768_vm2, %v545_v63, %v549_v52  ;;  %v555_v9 = vrot.slane %v554_v0, 4  ;;  %v608_v10 = vor.u32 %v607_v1, %v11847_v49  ;;  %v582_v11 = vshrl.u32 %v278_v61, 16 }
  0x41   : > { %4630 = vrot.lane.b32.xlu1 %v10581_v3, %s11669_s14  ;;  %v618_v12 = vor.u32 %v617_v5, %v613_v4  ;;  %v585_v13 = vshll.u32 %v278_v61, 16  ;;  %v591_v15 = vshll.u32 %v279_v2, 16  ;;  %v595_v16 = vshrl.u32 %v279_v2, 16  ;;  %v345_v3 = vld [vmem:[%s11758_s13 + $0x9c] sm:$0x1] }
  0x42   : > { %v560_v17 = vsel %vm11768_vm2, %v555_v9, %v11830_v22  ;;  %v609_v18 = vrot.slane %v608_v10, 4  ;;  %v584_v19 = vrot.slane %v582_v11, 4  ;;  %v645_v21 = vshll.u32 %v284_v7, 16  ;;  %v286_v5 = vld [vmem:[%s11758_s13 + $0x8c] sm:$0xf] }
  0x43   : > { %v10580_v23 = vcombine.low %v550_v8, %v560_v17  ;;  %v619_v25 = vrot.slane %v618_v12, 4  ;;  %v587_v14 = vrot.slane %v585_v13, 5  ;;  %v593_v26 = vrot.slane %v591_v15, 5  ;;  %v287_v13 = vld [vmem:[%s11758_s13 + $0x90] sm:$0xf] }
  0x44   : > { %v614_v28 = vsel %vm11768_vm2, %v609_v18, %v613_v4  ;;  %v597_v29 = vrot.slane %v595_v16, 4  ;;  %v11865_v30 = vrot.slane %v645_v21, 5  ;;  %v649_v31 = vshrl.u32 %v284_v7, 16 }
  0x45   : > { %4628 = vrot.lane.b32.xlu0 %v10580_v23, %s11669_s14  ;;  %v624_v22 = vsel %vm11768_vm2, %v619_v25, %v623_v6  ;;  %v588_v33 = vor.u32 %v587_v14, %v584_v19  ;;  %v655_v34 = vshll.u32 %v285_v20, 16  ;;  %v659_v35 = vshrl.u32 %v285_v20, 16  ;;  %v292_v25 = vld [vmem:[%s11758_s13 + $0xa8] sm:$0xf] }
  0x46   : > { %v10583_v36 = vcombine.low %v614_v28, %v624_v22  ;;  %v598_v37 = vor.u32 %v597_v29, %v593_v26  ;;  %v651_v38 = vrot.slane %v649_v31, 4  ;;  %v665_v39 = vshll.u32 %v344_v27, 16 }
  0x47   : > { %v589_v41 = vrot.slane %v588_v33, 4  ;;  %v657_v42 = vrot.slane %v655_v34, 5  ;;  %v661_v43 = vrot.slane %v659_v35, 4  ;;  %v626_v44 = vshrl.u32 %v282_v32, 16  ;;  %v293_v33 = vld [vmem:[%s11758_s13 + $0xac] sm:$0xf] }
  0x48   : > { %4634 = vrot.lane.b32.xlu1 %v10583_v36, %s11669_s14  ;;  %v599_v45 = vrot.slane %v598_v37, 4  ;;  %v652_v46 = vor.u32 %v651_v38, %v11865_v30  ;;  %v667_v47 = vrot.slane %v665_v39, 5  ;;  %v629_v48 = vshll.u32 %v282_v32, 16 }
  0x49   : > { %v594_v51 = vsel %vm11768_vm2, %v589_v41, %v593_v26  ;;  %v662_v52 = vor.u32 %v661_v43, %v657_v42  ;;  %v628_v53 = vrot.slane %v626_v44, 4  ;;  %v635_v54 = vshll.u32 %v283_v40, 16  ;;  %v346_v41 = vld [vmem:[%s11758_s13 + $0xb0] sm:$0x1]  ;;  %v290_v43 = vld [vmem:[%s11758_s13 + $0xa0] sm:$0xf] }
  0x4a   : > { %v604_v55 = vsel %vm11768_vm2, %v599_v45, %v11847_v49  ;;  %v653_v56 = vrot.slane %v652_v46, 4  ;;  %v631_v57 = vrot.slane %v629_v48, 5  ;;  %v639_v58 = vshrl.u32 %v283_v40, 16 }
  0x4b   : > { %v10582_v60 = vcombine.low %v594_v51, %v604_v55  ;;  %v663_v61 = vrot.slane %v662_v52, 4  ;;  %v637_v62 = vrot.slane %v635_v54, 5  ;;  %v689_v63 = vshll.u32 %v288_v50, 16  ;;  %v291_v52 = vld [vmem:[%s11758_s13 + $0xa4] sm:$0xf] }
  0x4c   : > { %v658_v0 = vsel %vm11768_vm2, %v653_v56, %v657_v42  ;;  %v632_v1 = vor.u32 %v631_v57, %v628_v53  ;;  %v641_v2 = vrot.slane %v639_v58, 4  ;;  %v693_v4 = vshrl.u32 %v288_v50, 16 }
  0x4d   : > { %4632 = vrot.lane.b32.xlu0 %v10582_v60, %s11669_s14  ;;  %v668_v49 = vsel %vm11768_vm2, %v663_v61, %v667_v47  ;;  %v11888_v6 = vrot.slane %v689_v63, 5  ;;  %v699_v7 = vshll.u32 %v289_v59, 16  ;;  %v703_v8 = vshrl.u32 %v289_v59, 16  ;;  %v296_v61 = vld [vmem:[%s11758_s13 + $0xbc] sm:$0xf] }
  0x4e   : > { %v10585_v9 = vcombine.low %v658_v0, %v668_v49  ;;  %v633_v10 = vrot.slane %v632_v1, 4  ;;  %v642_v11 = vor.u32 %v641_v2, %v637_v62  ;;  %v695_v12 = vrot.slane %v693_v4, 4  ;;  %v297_v49 = vld [vmem:[%s11758_s13 + $0xc0] sm:$0xf] }
  0x4f   : > { %v701_v15 = vrot.slane %v699_v7, 5  ;;  %v705_v16 = vrot.slane %v703_v8, 4  ;;  %v709_v17 = vshll.u32 %v345_v3, 16  ;;  %v670_v18 = vshrl.u32 %v286_v5, 16 }
  0x50   : > { %4638 = vrot.lane.b32.xlu1 %v10585_v9, %s11669_s14  ;;  %v638_v19 = vsel %vm11768_vm2, %v633_v10, %v637_v62  ;;  %v643_v20 = vrot.slane %v642_v11, 4  ;;  %v696_v21 = vor.u32 %v695_v12, %v11888_v6  ;;  %v673_v23 = vshll.u32 %v286_v5, 16 }
  0x51   : > { %v706_v14 = vor.u32 %v705_v16, %v701_v15  ;;  %v711_v26 = vrot.slane %v709_v17, 5  ;;  %v672_v27 = vrot.slane %v670_v18, 4  ;;  %v679_v28 = vshll.u32 %v287_v13, 16  ;;  %v294_v17 = vld [vmem:[%s11758_s13 + $0xb4] sm:$0xf] }
  0x52   : > { %v648_v29 = vsel %vm11768_vm2, %v643_v20, %v11865_v30  ;;  %v697_v31 = vrot.slane %v696_v21, 4  ;;  %v675_v32 = vrot.slane %v673_v23, 5  ;;  %v683_v22 = vshrl.u32 %v287_v13, 16 }
  0x53   : > { %v10584_v34 = vcombine.low %v638_v19, %v648_v29  ;;  %v707_v35 = vrot.slane %v706_v14, 4  ;;  %v681_v36 = vrot.slane %v679_v28, 5  ;;  %v733_v37 = vshll.u32 %v292_v25, 16 }
  0x54   : > { %v702_v38 = vsel %vm11768_vm2, %v697_v31, %v701_v15  ;;  %v676_v39 = vor.u32 %v675_v32, %v672_v27  ;;  %v685_v40 = vrot.slane %v683_v22, 4  ;;  %v737_v42 = vshrl.u32 %v292_v25, 16  ;;  %v347_v15 = vld [vmem:[%s11758_s13 + $0xc4] sm:$0x1] }
  0x55   : > { %4636 = vrot.lane.b32.xlu0 %v10584_v34, %s11669_s14  ;;  %v712_v30 = vsel %vm11768_vm2, %v707_v35, %v711_v26  ;;  %v11907_v44 = vrot.slane %v733_v37, 5  ;;  %v743_v45 = vshll.u32 %v293_v33, 16  ;;  %v747_v46 = vshrl.u32 %v293_v33, 16  ;;  %v295_v26 = vld [vmem:[%s11758_s13 + $0xb8] sm:$0xf] }
  0x56   : > { %v10587_v47 = vcombine.low %v702_v38, %v712_v30  ;;  %v677_v48 = vrot.slane %v676_v39, 4  ;;  %v686_v50 = vor.u32 %v685_v40, %v681_v36  ;;  %v739_v51 = vrot.slane %v737_v42, 4  ;;  %v300_v35 = vld [vmem:[%s11758_s13 + $0x198] sm:$0xf]  ;;  %v301_v40 = vld [vmem:[%s11758_s13 + $0x19c] sm:$0xf] }
  0x57   : > { %v745_v53 = vrot.slane %v743_v45, 5  ;;  %v749_v54 = vrot.slane %v747_v46, 4  ;;  %v753_v55 = vshll.u32 %v346_v41, 16  ;;  %v714_v56 = vshrl.u32 %v290_v43, 16  ;;  %v348_v45 = vld [vmem:[%s11758_s13 + $0x1a0] sm:$0x1] }
  0x58   : > { %4642 = vrot.lane.b32.xlu1 %v10587_v47, %s11669_s14  ;;  %v682_v57 = vsel %vm11768_vm2, %v677_v48, %v681_v36  ;;  %v687_v58 = vrot.slane %v686_v50, 4  ;;  %v740_v59 = vor.u32 %v739_v51, %v11907_v44  ;;  %v717_v60 = vshll.u32 %v290_v43, 16  ;;  %v298_v51 = vld [vmem:[%s11758_s13 + $0x190] sm:$0xf] }
  0x59   : > { %v750_v62 = vor.u32 %v749_v54, %v745_v53  ;;  %v755_v63 = vrot.slane %v753_v55, 5  ;;  %v716_v0 = vrot.slane %v714_v56, 4  ;;  %v723_v1 = vshll.u32 %v291_v52, 16  ;;  %v299_v56 = vld [vmem:[%s11758_s13 + $0x194] sm:$0xf] }
  0x5a   : > { %v692_v2 = vsel %vm11768_vm2, %v687_v58, %v11888_v6  ;;  %v741_v3 = vrot.slane %v740_v59, 4  ;;  %v719_v4 = vrot.slane %v717_v60, 5  ;;  %v727_v5 = vshrl.u32 %v291_v52, 16 }
  0x5b   : > { %v10586_v7 = vcombine.low %v682_v57, %v692_v2  ;;  %v751_v8 = vrot.slane %v750_v62, 4  ;;  %v725_v9 = vrot.slane %v723_v1, 5  ;;  %v777_v10 = vshll.u32 %v296_v61, 16 }
  0x5c   : > { %v746_v11 = vsel %vm11768_vm2, %v741_v3, %v745_v53  ;;  %v720_v12 = vor.u32 %v719_v4, %v716_v0  ;;  %v729_v13 = vrot.slane %v727_v5, 4  ;;  %v781_v16 = vshrl.u32 %v296_v61, 16 }
  0x5d   : > { %4640 = vrot.lane.b32.xlu0 %v10586_v7, %s11669_s14  ;;  %v756_v6 = vsel %vm11768_vm2, %v751_v8, %v755_v63  ;;  %v11926_v18 = vrot.slane %v777_v10, 5  ;;  %v787_v19 = vshll.u32 %v297_v49, 16  ;;  %v791_v20 = vshrl.u32 %v297_v49, 16  ;;  %v304_v8 = vld [vmem:[%s11758_s13 + $0x1ac] sm:$0xf] }
  0x5e   : > { %v10589_v21 = vcombine.low %v746_v11, %v756_v6  ;;  %v721_v23 = vrot.slane %v720_v12, 4  ;;  %v730_v25 = vor.u32 %v729_v13, %v725_v9  ;;  %v783_v14 = vrot.slane %v781_v16, 4  ;;  %v305_v6 = vld [vmem:[%s11758_s13 + $0x1b0] sm:$0xf] }
  0x5f   : > { %v789_v27 = vrot.slane %v787_v19, 5  ;;  %v793_v28 = vrot.slane %v791_v20, 4  ;;  %v797_v29 = vshll.u32 %v347_v15, 16  ;;  %v758_v31 = vshrl.u32 %v294_v17, 16 }
  0x60   : > { %4646 = vrot.lane.b32.xlu1 %v10589_v21, %s11669_s14  ;;  %v726_v32 = vsel %vm11768_vm2, %v721_v23, %v725_v9  ;;  %v731_v22 = vrot.slane %v730_v25, 4  ;;  %v784_v33 = vor.u32 %v783_v14, %v11926_v18  ;;  %v761_v34 = vshll.u32 %v294_v17, 16 }
  0x61   : > { %v794_v36 = vor.u32 %v793_v28, %v789_v27  ;;  %v799_v37 = vrot.slane %v797_v29, 5  ;;  %v760_v38 = vrot.slane %v758_v31, 4  ;;  %v767_v39 = vshll.u32 %v295_v26, 16  ;;  %v302_v29 = vld [vmem:[%s11758_s13 + $0x1a4] sm:$0xf] }
  0x62   : > { %v736_v41 = vsel %vm11768_vm2, %v731_v22, %v11907_v44  ;;  %v785_v42 = vrot.slane %v784_v33, 4  ;;  %v763_v43 = vrot.slane %v761_v34, 5  ;;  %v771_v30 = vshrl.u32 %v295_v26, 16 }
  0x63   : > { %v10588_v46 = vcombine.low %v726_v32, %v736_v41  ;;  %v795_v47 = vrot.slane %v794_v36, 4  ;;  %v769_v48 = vrot.slane %v767_v39, 5  ;;  %v821_v50 = vshll.u32 %v300_v35, 16 }
  0x64   : > { %v790_v52 = vsel %vm11768_vm2, %v785_v42, %v789_v27  ;;  %v764_v53 = vor.u32 %v763_v43, %v760_v38  ;;  %v773_v54 = vrot.slane %v771_v30, 4  ;;  %v825_v55 = vshrl.u32 %v300_v35, 16  ;;  %v349_v27 = vld [vmem:[%s11758_s13 + $0x1b4] sm:$0x1] }
  0x65   : > { %4644 = vrot.lane.b32.xlu0 %v10588_v46, %s11669_s14  ;;  %v800_v44 = vsel %vm11768_vm2, %v795_v47, %v799_v37  ;;  %v11946_v57 = vrot.slane %v821_v50, 5  ;;  %v831_v58 = vshll.u32 %v301_v40, 16  ;;  %v835_v59 = vshrl.u32 %v301_v40, 16  ;;  %v303_v37 = vld [vmem:[%s11758_s13 + $0x1a8] sm:$0xf] }
  0x66   : > { %v10591_v60 = vcombine.low %v790_v52, %v800_v44  ;;  %v765_v61 = vrot.slane %v764_v53, 4  ;;  %v774_v62 = vor.u32 %v773_v54, %v769_v48  ;;  %v827_v63 = vrot.slane %v825_v55, 4  ;;  %v308_v46 = vld [vmem:[%s11758_s13 + $0x1c0] sm:$0xf] }
  0x67   : > { %v833_v0 = vrot.slane %v831_v58, 5  ;;  %v837_v1 = vrot.slane %v835_v59, 4  ;;  %v841_v2 = vshll.u32 %v348_v45, 16  ;;  %v802_v3 = vshrl.u32 %v298_v51, 16 }
  0x68   : > { %4650 = vrot.lane.b32.xlu1 %v10591_v60, %s11669_s14  ;;  %v770_v4 = vsel %vm11768_vm2, %v765_v61, %v769_v48  ;;  %v775_v5 = vrot.slane %v774_v62, 4  ;;  %v828_v49 = vor.u32 %v827_v63, %v11946_v57  ;;  %v805_v7 = vshll.u32 %v298_v51, 16 }
  0x69   : > { %v838_v9 = vor.u32 %v837_v1, %v833_v0  ;;  %v843_v10 = vrot.slane %v841_v2, 5  ;;  %v804_v11 = vrot.slane %v802_v3, 4  ;;  %v811_v12 = vshll.u32 %v299_v56, 16  ;;  %v306_v2 = vld [vmem:[%s11758_s13 + $0x1b8] sm:$0xf] }
  0x6a   : > { %v780_v13 = vsel %vm11768_vm2, %v775_v5, %v11926_v18  ;;  %v829_v15 = vrot.slane %v828_v49, 4  ;;  %v807_v16 = vrot.slane %v805_v7, 5  ;;  %v815_v17 = vshrl.u32 %v299_v56, 16  ;;  %v309_v56 = vld [vmem:[%s11758_s13 + $0x1c4] sm:$0xf] }
  0x6b   : > { %v10590_v19 = vcombine.low %v770_v4, %v780_v13  ;;  %v839_v20 = vrot.slane %v838_v9, 4  ;;  %v813_v21 = vrot.slane %v811_v12, 5  ;;  %v865_v23 = vshll.u32 %v304_v8, 16 }
  0x6c   : > { %v834_v25 = vsel %vm11768_vm2, %v829_v15, %v833_v0  ;;  %v808_v14 = vor.u32 %v807_v16, %v804_v11  ;;  %v817_v26 = vrot.slane %v815_v17, 4  ;;  %v869_v28 = vshrl.u32 %v304_v8, 16  ;;  %v350_v0 = vld [vmem:[%s11758_s13 + $0x1c8] sm:$0x1] }
  0x6d   : > { %4648 = vrot.lane.b32.xlu0 %v10590_v19, %s11669_s14  ;;  %v844_v18 = vsel %vm11768_vm2, %v839_v20, %v843_v10  ;;  %v11964_v31 = vrot.slane %v865_v23, 5  ;;  %v875_v32 = vshll.u32 %v305_v6, 16  ;;  %v879_v22 = vshrl.u32 %v305_v6, 16  ;;  %v307_v10 = vld [vmem:[%s11758_s13 + $0x1bc] sm:$0xf] }
  0x6e   : > { %v10593_v33 = vcombine.low %v834_v25, %v844_v18  ;;  %v809_v34 = vrot.slane %v808_v14, 4  ;;  %v818_v35 = vor.u32 %v817_v26, %v813_v21  ;;  %v871_v36 = vrot.slane %v869_v28, 4  ;;  %v312_v20 = vld [vmem:[%s11758_s13 + $0x1d4] sm:$0xf]  ;;  %v313_v18 = vld [vmem:[%s11758_s13 + $0x1d8] sm:$0xf] }
  0x6f   : > { %v877_v38 = vrot.slane %v875_v32, 5  ;;  %v881_v39 = vrot.slane %v879_v22, 4  ;;  %v885_v40 = vshll.u32 %v349_v27, 16  ;;  %v846_v41 = vshrl.u32 %v302_v29, 16 }
  0x70   : > { %4654 = vrot.lane.b32.xlu1 %v10593_v33, %s11669_s14  ;;  %v814_v42 = vsel %vm11768_vm2, %v809_v34, %v813_v21  ;;  %v819_v43 = vrot.slane %v818_v35, 4  ;;  %v872_v30 = vor.u32 %v871_v36, %v11964_v31  ;;  %v849_v45 = vshll.u32 %v302_v29, 16 }
  0x71   : > { %v882_v47 = vor.u32 %v881_v39, %v877_v38  ;;  %v887_v48 = vrot.slane %v885_v40, 5  ;;  %v848_v50 = vrot.slane %v846_v41, 4  ;;  %v855_v51 = vshll.u32 %v303_v37, 16  ;;  %v310_v40 = vld [vmem:[%s11758_s13 + $0x1cc] sm:$0xf] }
  0x72   : > { %v824_v52 = vsel %vm11768_vm2, %v819_v43, %v11946_v57  ;;  %v873_v53 = vrot.slane %v872_v30, 4  ;;  %v851_v54 = vrot.slane %v849_v45, 5  ;;  %v859_v55 = vshrl.u32 %v303_v37, 16 }
  0x73   : > { %v10592_v44 = vcombine.low %v814_v42, %v824_v52  ;;  %v883_v58 = vrot.slane %v882_v47, 4  ;;  %v857_v59 = vrot.slane %v855_v51, 5  ;;  %v909_v60 = vshll.u32 %v308_v46, 16 }
  0x74   : > { %v878_v61 = vsel %vm11768_vm2, %v873_v53, %v877_v38  ;;  %v852_v62 = vor.u32 %v851_v54, %v848_v50  ;;  %v861_v63 = vrot.slane %v859_v55, 4  ;;  %v913_v1 = vshrl.u32 %v308_v46, 16  ;;  %v351_v38 = vld [vmem:[%s11758_s13 + $0x1dc] sm:$0x1] }
  0x75   : > { %4652 = vrot.lane.b32.xlu0 %v10592_v44, %s11669_s14  ;;  %v888_v57 = vsel %vm11768_vm2, %v883_v58, %v887_v48  ;;  %v11983_v3 = vrot.slane %v909_v60, 5  ;;  %v919_v4 = vshll.u32 %v309_v56, 16  ;;  %v923_v5 = vshrl.u32 %v309_v56, 16  ;;  %v311_v48 = vld [vmem:[%s11758_s13 + $0x1d0] sm:$0xf] }
  0x76   : > { %v10595_v49 = vcombine.low %v878_v61, %v888_v57  ;;  %v853_v7 = vrot.slane %v852_v62, 4  ;;  %v862_v8 = vor.u32 %v861_v63, %v857_v59  ;;  %v915_v9 = vrot.slane %v913_v1, 4  ;;  %v12010_v58 = vld [vmem:[%s11758_s13 + $0x1e8] sm:$0xf]  ;;  %v12016_v57 = vld [vmem:[%s11758_s13 + $0x1ec] sm:$0xf] }
  0x77   : > { %v921_v11 = vrot.slane %v919_v4, 5  ;;  %v925_v12 = vrot.slane %v923_v5, 4  ;;  %v929_v13 = vshll.u32 %v350_v0, 16  ;;  %v890_v15 = vshrl.u32 %v306_v2, 16 }
  0x78   : > { %4658 = vrot.lane.b32.xlu1 %v10595_v49, %s11669_s14  ;;  %v858_v16 = vsel %vm11768_vm2, %v853_v7, %v857_v59  ;;  %v863_v17 = vrot.slane %v862_v8, 4  ;;  %v916_v6 = vor.u32 %v915_v9, %v11983_v3  ;;  %v893_v19 = vshll.u32 %v306_v2, 16 }
  0x79   : > { %v926_v21 = vor.u32 %v925_v12, %v921_v11  ;;  %v931_v23 = vrot.slane %v929_v13, 5  ;;  %v892_v25 = vrot.slane %v890_v15, 4  ;;  %v899_v14 = vshll.u32 %v307_v10, 16  ;;  %v314_v12 = vld [vmem:[%s11758_s13 + $0x1e0] sm:$0xf] }
  0x7a   : > { %v868_v26 = vsel %vm11768_vm2, %v863_v17, %v11964_v31  ;;  %v917_v27 = vrot.slane %v916_v6, 4  ;;  %v895_v28 = vrot.slane %v893_v19, 5  ;;  %v903_v29 = vshrl.u32 %v307_v10, 16 }
  0x7b   : > { %v10594_v32 = vcombine.low %v858_v16, %v868_v26  ;;  %v927_v22 = vrot.slane %v926_v21, 4  ;;  %v901_v33 = vrot.slane %v899_v14, 5  ;;  %v953_v34 = vshll.u32 %v312_v20, 16 }
  0x7c   : > { %v922_v35 = vsel %vm11768_vm2, %v917_v27, %v921_v11  ;;  %v896_v36 = vor.u32 %v895_v28, %v892_v25  ;;  %v905_v37 = vrot.slane %v903_v29, 4  ;;  %v957_v39 = vshrl.u32 %v312_v20, 16  ;;  %v12022_v11 = vld [vmem:[%s11758_s13 + $0x1f0] sm:$0x1] }
  0x7d   : > { %4656 = vrot.lane.b32.xlu0 %v10594_v32, %s11669_s14  ;;  %v932_v31 = vsel %vm11768_vm2, %v927_v22, %v931_v23  ;;  %v12002_v41 = vrot.slane %v953_v34, 5  ;;  %v963_v42 = vshll.u32 %v313_v18, 16  ;;  %v967_v43 = vshrl.u32 %v313_v18, 16  ;;  %v12034_v23 = vld [vmem:[%s11758_s13 + $0x1e4] sm:$0xf] }
  0x7e   : > { %v10597_v30 = vcombine.low %v922_v35, %v932_v31  ;;  %v897_v45 = vrot.slane %v896_v36, 4  ;;  %v906_v46 = vor.u32 %v905_v37, %v901_v33  ;;  %v959_v47 = vrot.slane %v957_v39, 4  ;;  %v12042_v22 = vld [vmem:[%s11758_s13 + $0x1fc] sm:$0xf]  ;;  %v12050_v31 = vld [vmem:[%s11758_s13 + $0x200] sm:$0xf] }
  0x7f   : > { %v965_v50 = vrot.slane %v963_v42, 5  ;;  %v969_v51 = vrot.slane %v967_v43, 4  ;;  %v973_v52 = vshll.u32 %v351_v38, 16  ;;  %v934_v53 = vshrl.u32 %v310_v40, 16 }
  0x80   : > { %4662 = vrot.lane.b32.xlu1 %v10597_v30, %s11669_s14  ;;  %v902_v54 = vsel %vm11768_vm2, %v897_v45, %v901_v33  ;;  %v907_v55 = vrot.slane %v906_v46, 4  ;;  %v960_v56 = vor.u32 %v959_v47, %v12002_v41  ;;  %v937_v44 = vshll.u32 %v310_v40, 16 }
  0x81   : > { %v970_v59 = vor.u32 %v969_v51, %v965_v50  ;;  %v975_v60 = vrot.slane %v973_v52, 5  ;;  %v936_v61 = vrot.slane %v934_v53, 4  ;;  %v943_v62 = vshll.u32 %v311_v48, 16  ;;  %v318_v51 = vld [vmem:[%s11758_s13 + $0x1f4] sm:$0xf] }
  0x82   : > { %v912_v63 = vsel %vm11768_vm2, %v907_v55, %v11983_v3  ;;  %v961_v0 = vrot.slane %v960_v56, 4  ;;  %v939_v1 = vrot.slane %v937_v44, 5  ;;  %v947_v2 = vshrl.u32 %v311_v48, 16 }
  0x83   : > { %v10596_v4 = vcombine.low %v902_v54, %v912_v63  ;;  %v971_v5 = vrot.slane %v970_v59, 4  ;;  %v945_v49 = vrot.slane %v943_v62, 5  ;;  %v997_v7 = vshll.u32 %v12010_v58, 16 }
  0x84   : > { %v966_v8 = vsel %vm11768_vm2, %v961_v0, %v965_v50  ;;  %v940_v9 = vor.u32 %v939_v1, %v936_v61  ;;  %v949_v10 = vrot.slane %v947_v2, 4  ;;  %v1001_v3 = vshrl.u32 %v12010_v58, 16  ;;  %v12056_v50 = vld [vmem:[%s11758_s13 + $0x204] sm:$0x1]  ;;  %v12068_v61 = vld [vmem:[%s11758_s13 + $0x1f8] sm:$0xf] }
  0x85   : > { %4660 = vrot.lane.b32.xlu0 %v10596_v4, %s11669_s14  ;;  %v976_v13 = vsel %vm11768_vm2, %v971_v5, %v975_v60  ;;  %v12029_v15 = vrot.slane %v997_v7, 5  ;;  %v1007_v16 = vshll.u32 %v12016_v57, 16  ;;  %v1011_v17 = vshrl.u32 %v12016_v57, 16  ;;  %v12076_v7 = vld [vmem:[%s11758_s13 + $0x210] sm:$0xf] }
  0x86   : > { %v10599_v6 = vcombine.low %v966_v8, %v976_v13  ;;  %v941_v19 = vrot.slane %v940_v9, 4  ;;  %v950_v20 = vor.u32 %v949_v10, %v945_v49  ;;  %v1003_v21 = vrot.slane %v1001_v3, 4 }
  0x87   : > { %v1009_v25 = vrot.slane %v1007_v16, 5  ;;  %v1013_v14 = vrot.slane %v1011_v17, 4  ;;  %v1017_v26 = vshll.u32 %v12022_v11, 16  ;;  %v978_v27 = vshrl.u32 %v314_v12, 16 }
  0x88   : > { %4666 = vrot.lane.b32.xlu1 %v10599_v6, %s11669_s14  ;;  %v946_v28 = vsel %vm11768_vm2, %v941_v19, %v945_v49  ;;  %v951_v29 = vrot.slane %v950_v20, 4  ;;  %v1004_v18 = vor.u32 %v1003_v21, %v12029_v15  ;;  %v981_v32 = vshll.u32 %v314_v12, 16  ;;  %v12084_v6 = vld [vmem:[%s11758_s13 + $0x214] sm:$0xf] }
  0x89   : > { %v1014_v33 = vor.u32 %v1013_v14, %v1009_v25  ;;  %v1019_v34 = vrot.slane %v1017_v26, 5  ;;  %v980_v35 = vrot.slane %v978_v27, 4  ;;  %v987_v36 = vshll.u32 %v12034_v23, 16 }
  0x8a   : > { %v956_v37 = vsel %vm11768_vm2, %v951_v29, %v12002_v41  ;;  %v1005_v38 = vrot.slane %v1004_v18, 4  ;;  %v983_v39 = vrot.slane %v981_v32, 5  ;;  %v991_v40 = vshrl.u32 %v12034_v23, 16  ;;  %v322_v29 = vld [vmem:[%s11758_s13 + $0x208] sm:$0xf] }
  0x8b   : > { %v10598_v42 = vcombine.low %v946_v28, %v956_v37  ;;  %v1015_v43 = vrot.slane %v1014_v33, 4  ;;  %v989_v30 = vrot.slane %v987_v36, 5  ;;  %v1041_v45 = vshll.u32 %v12042_v22, 16  ;;  %v12090_v28 = vld [vmem:[%s11758_s13 + $0x218] sm:$0x1] }
  0x8c   : > { %v1010_v46 = vsel %vm11768_vm2, %v1005_v38, %v1009_v25  ;;  %v984_v47 = vor.u32 %v983_v39, %v980_v35  ;;  %v993_v48 = vrot.slane %v991_v40, 4  ;;  %v1045_v41 = vshrl.u32 %v12042_v22, 16  ;;  %v12102_v39 = vld [vmem:[%s11758_s13 + $0x20c] sm:$0xf] }
  0x8d   : > { %4664 = vrot.lane.b32.xlu0 %v10598_v42, %s11669_s14  ;;  %v1020_v52 = vsel %vm11768_vm2, %v1015_v43, %v1019_v34  ;;  %v12063_v53 = vrot.slane %v1041_v45, 5  ;;  %v1051_v54 = vshll.u32 %v12050_v31, 16  ;;  %v1055_v55 = vshrl.u32 %v12050_v31, 16 }
  0x8e   : > { %v10601_v56 = vcombine.low %v1010_v46, %v1020_v52  ;;  %v985_v44 = vrot.slane %v984_v47, 4  ;;  %v994_v59 = vor.u32 %v993_v48, %v989_v30  ;;  %v1047_v60 = vrot.slane %v1045_v41, 4  ;;  %v12110_v41 = vld [vmem:[%s11758_s13 + $0x224] sm:$0xf] }
  0x8f   : > { %v1053_v62 = vrot.slane %v1051_v54, 5  ;;  %v1057_v63 = vrot.slane %v1055_v55, 4  ;;  %v1061_v0 = vshll.u32 %v12056_v50, 16  ;;  %v1022_v1 = vshrl.u32 %v318_v51, 16 }
  0x90   : > { %4670 = vrot.lane.b32.xlu1 %v10601_v56, %s11669_s14  ;;  %v990_v2 = vsel %vm11768_vm2, %v985_v44, %v989_v30  ;;  %v995_v4 = vrot.slane %v994_v59, 4  ;;  %v1048_v5 = vor.u32 %v1047_v60, %v12063_v53  ;;  %v1025_v49 = vshll.u32 %v318_v51, 16 }
  0x91   : > { %v1058_v8 = vor.u32 %v1057_v63, %v1053_v62  ;;  %v1063_v9 = vrot.slane %v1061_v0, 5  ;;  %v1024_v10 = vrot.slane %v1022_v1, 4  ;;  %v1031_v3 = vshll.u32 %v12068_v61, 16 }
  0x92   : > { %v1000_v12 = vsel %vm11768_vm2, %v995_v4, %v12029_v15  ;;  %v1049_v13 = vrot.slane %v1048_v5, 4  ;;  %v1027_v16 = vrot.slane %v1025_v49, 5  ;;  %v1035_v17 = vshrl.u32 %v12068_v61, 16 }
  0x93   : > { %v10600_v19 = vcombine.low %v990_v2, %v1000_v12  ;;  %v1059_v20 = vrot.slane %v1058_v8, 4  ;;  %v1033_v21 = vrot.slane %v1031_v3, 5  ;;  %v1085_v25 = vshll.u32 %v12076_v7, 16  ;;  %v12124_v8 = vld [vmem:[%s11758_s13 + $0x22c] sm:$0x1] }
  0x94   : > { %v1054_v14 = vsel %vm11768_vm2, %v1049_v13, %v1053_v62  ;;  %v1028_v26 = vor.u32 %v1027_v16, %v1024_v10  ;;  %v1037_v27 = vrot.slane %v1035_v17, 4  ;;  %v1089_v15 = vshrl.u32 %v12076_v7, 16  ;;  %v12118_v62 = vld [vmem:[%s11758_s13 + $0x228] sm:$0xf] }
  0x95   : > { %4668 = vrot.lane.b32.xlu0 %v10600_v19, %s11669_s14  ;;  %v1064_v18 = vsel %vm11768_vm2, %v1059_v20, %v1063_v9  ;;  %v12097_v32 = vrot.slane %v1085_v25, 5  ;;  %v1095_v33 = vshll.u32 %v12084_v6, 16  ;;  %v1099_v34 = vshrl.u32 %v12084_v6, 16  ;;  %v326_v9 = vld [vmem:[%s11758_s13 + $0x21c] sm:$0xf] }
  0x96   : > { %v10603_v35 = vcombine.low %v1054_v14, %v1064_v18  ;;  %v1029_v36 = vrot.slane %v1028_v26, 4  ;;  %v1038_v37 = vor.u32 %v1037_v27, %v1033_v21  ;;  %v1091_v38 = vrot.slane %v1089_v15, 4 }
  0x97   : > { %v1097_v40 = vrot.slane %v1095_v33, 5  ;;  %v1101_v42 = vrot.slane %v1099_v34, 4  ;;  %v1105_v43 = vshll.u32 %v12090_v28, 16  ;;  %v1066_v30 = vshrl.u32 %v322_v29, 16  ;;  %v12144_v34 = vld [vmem:[%s11758_s13 + $0x238] sm:$0xf] }
  0x98   : > { %4674 = vrot.lane.b32.xlu1 %v10603_v35, %s11669_s14  ;;  %v1034_v45 = vsel %vm11768_vm2, %v1029_v36, %v1033_v21  ;;  %v1039_v46 = vrot.slane %v1038_v37, 4  ;;  %v1092_v47 = vor.u32 %v1091_v38, %v12097_v32  ;;  %v1069_v48 = vshll.u32 %v322_v29, 16  ;;  %v12136_v21 = vld [vmem:[%s11758_s13 + $0x220] sm:$0xf]  ;;  %17384 = vst [vmem:[#allocation5_spill] sm:$0xff] %v12144_v34 }
  0x99   : > { %v1102_v51 = vor.u32 %v1101_v42, %v1097_v40  ;;  %v1107_v52 = vrot.slane %v1105_v43, 5  ;;  %v1068_v54 = vrot.slane %v1066_v30, 4  ;;  %v1075_v55 = vshll.u32 %v12102_v39, 16 }
  0x9a   : > { %v1044_v56 = vsel %vm11768_vm2, %v1039_v46, %v12063_v53  ;;  %v1093_v44 = vrot.slane %v1092_v47, 4  ;;  %v1071_v59 = vrot.slane %v1069_v48, 5  ;;  %v1079_v60 = vshrl.u32 %v12102_v39, 16 }
  0x9b   : > { %v10602_v63 = vcombine.low %v1034_v45, %v1044_v56  ;;  %v1103_v0 = vrot.slane %v1102_v51, 4  ;;  %v1077_v1 = vrot.slane %v1075_v55, 5  ;;  %v1129_v2 = vshll.u32 %v12110_v41, 16  ;;  %v12152_v45 = vld [vmem:[%s11758_s13 + $0x23c] sm:$0xf] }
  0x9c   : > { %v1098_v4 = vsel %vm11768_vm2, %v1093_v44, %v1097_v40  ;;  %v1072_v5 = vor.u32 %v1071_v59, %v1068_v54  ;;  %v1081_v49 = vrot.slane %v1079_v60, 4  ;;  %v1133_v53 = vshrl.u32 %v12110_v41, 16  ;;  %17385 = vst [vmem:[#allocation6_spill] sm:$0xff] %v12152_v45  ;;  %v12158_v56 = vld [vmem:[%s11758_s13 + $0x240] sm:$0x1] }
  0x9d   : > { %4672 = vrot.lane.b32.xlu0 %v10602_v63, %s11669_s14  ;;  %v1108_v10 = vsel %vm11768_vm2, %v1103_v0, %v1107_v52  ;;  %v12131_v3 = vrot.slane %v1129_v2, 5  ;;  %v1139_v12 = vshll.u32 %v12118_v62, 16  ;;  %v1143_v13 = vshrl.u32 %v12118_v62, 16  ;;  %17386 = vst [vmem:[#allocation7_spill] sm:$0xff] %v12158_v56  ;;  %v330_v44 = vld [vmem:[%s11758_s13 + $0x230] sm:$0xf] }
  0x9e   : > { %v10605_v16 = vcombine.low %v1098_v4, %v1108_v10  ;;  %v1073_v17 = vrot.slane %v1072_v5, 4  ;;  %v1082_v19 = vor.u32 %v1081_v49, %v1077_v1  ;;  %v1135_v20 = vrot.slane %v1133_v53, 4  ;;  %v12170_v49 = vld [vmem:[%s11758_s13 + $0x234] sm:$0xf] }
  0x9f   : > { %v1141_v25 = vrot.slane %v1139_v12, 5  ;;  %v1145_v14 = vrot.slane %v1143_v13, 4  ;;  %v1149_v26 = vshll.u32 %v12124_v8, 16  ;;  %v1110_v27 = vshrl.u32 %v326_v9, 16  ;;  %17387 = vst [vmem:[#allocation8_spill] sm:$0xff] %v12170_v49 }
  0xa0   : > { %4678 = vrot.lane.b32.xlu1 %v10605_v16, %s11669_s14  ;;  %v1078_v15 = vsel %vm11768_vm2, %v1073_v17, %v1077_v1  ;;  %v1083_v29 = vrot.slane %v1082_v19, 4  ;;  %v1136_v18 = vor.u32 %v1135_v20, %v12131_v3  ;;  %v1113_v33 = vshll.u32 %v326_v9, 16  ;;  %v12178_v20 = vld [vmem:[%s11758_s13 + $0x24c] sm:$0xf] }
  0xa1   : > { %v1146_v35 = vor.u32 %v1145_v14, %v1141_v25  ;;  %v1151_v36 = vrot.slane %v1149_v26, 5  ;;  %v1112_v37 = vrot.slane %v1110_v27, 4  ;;  %v1119_v38 = vshll.u32 %v12136_v21, 16  ;;  %17388 = vst [vmem:[#allocation9_spill] sm:$0xff] %v12178_v20 }
  0xa2   : > { %v1088_v40 = vsel %vm11768_vm2, %v1083_v29, %v12097_v32  ;;  %v1137_v42 = vrot.slane %v1136_v18, 4  ;;  %v1115_v43 = vrot.slane %v1113_v33, 5  ;;  %v1123_v30 = vshrl.u32 %v12136_v21, 16 }
  0xa3   : > { %v10604_v46 = vcombine.low %v1078_v15, %v1088_v40  ;;  %v1147_v47 = vrot.slane %v1146_v35, 4  ;;  %v1121_v48 = vrot.slane %v1119_v38, 5  ;;  %v1173_v51 = vshll.u32 %v12144_v34, 16  ;;  %v12186_v35 = vld [vmem:[%s11758_s13 + $0x250] sm:$0xf] }
  0xa4   : > { %v1142_v52 = vsel %vm11768_vm2, %v1137_v42, %v1141_v25  ;;  %v1116_v54 = vor.u32 %v1115_v43, %v1112_v37  ;;  %v1125_v55 = vrot.slane %v1123_v30, 4  ;;  %v1177_v32 = vshrl.u32 %v12144_v34, 16  ;;  %17389 = vst [vmem:[#allocation10_spill] sm:$0xff] %v12186_v35  ;;  %v1250_v34 = vld [vmem:[%s11758_s13 + $0xb4] sm:$0xe] }
  0xa5   : > { %4676 = vrot.lane.b32.xlu0 %v10604_v46, %s11669_s14  ;;  %v1152_v59 = vsel %vm11768_vm2, %v1147_v47, %v1151_v36  ;;  %v12165_v60 = vrot.slane %v1173_v51, 5  ;;  %v1183_v63 = vshll.u32 %v12152_v45, 16  ;;  %v1187_v0 = vshrl.u32 %v12152_v45, 16  ;;  %v12192_v46 = vld [vmem:[%s11758_s13 + $0x254] sm:$0x1] }
  0xa6   : > { %v10607_v1 = vcombine.low %v1142_v52, %v1152_v59  ;;  %v1117_v2 = vrot.slane %v1116_v54, 4  ;;  %v1126_v4 = vor.u32 %v1125_v55, %v1121_v48  ;;  %v1179_v5 = vrot.slane %v1177_v32, 4  ;;  %17390 = vst [vmem:[#allocation11_spill] sm:$0xff] %v12192_v46  ;;  %v334_v47 = vld [vmem:[%s11758_s13 + $0x244] sm:$0xf] }
  0xa7   : > { %v1185_v53 = vrot.slane %v1183_v63, 5  ;;  %v1189_v9 = vrot.slane %v1187_v0, 4  ;;  %v1193_v10 = vshll.u32 %v12158_v56, 16  ;;  %v1154_v12 = vshrl.u32 %v330_v44, 16  ;;  %v12204_v63 = vld [vmem:[%s11758_s13 + $0x248] sm:$0xf] }
  0xa8   : > { %4682 = vrot.lane.b32.xlu1 %v10607_v1, %s11669_s14  ;;  %v1122_v13 = vsel %vm11768_vm2, %v1117_v2, %v1121_v48  ;;  %v1127_v16 = vrot.slane %v1126_v4, 4  ;;  %v1180_v17 = vor.u32 %v1179_v5, %v12165_v60  ;;  %v1157_v19 = vshll.u32 %v330_v44, 16  ;;  %17391 = vst [vmem:[#allocation12_spill] sm:$0xff] %v12204_v63  ;;  %v11479_v56 = vld [vmem:[%s11758_s13 + $0x9c] sm:$0x1] }
  0xa9   : > { %v1190_v25 = vor.u32 %v1189_v9, %v1185_v53  ;;  %v1195_v14 = vrot.slane %v1193_v10, 5  ;;  %v1156_v26 = vrot.slane %v1154_v12, 4  ;;  %v1163_v27 = vshll.u32 %v12170_v49, 16 }
  0xaa   : > { %v1132_v15 = vsel %vm11768_vm2, %v1127_v16, %v12131_v3  ;;  %v1181_v29 = vrot.slane %v1180_v17, 4  ;;  %v1159_v18 = vrot.slane %v1157_v19, 5  ;;  %v1167_v33 = vshrl.u32 %v12170_v49, 16  ;;  %v11471_v49 = vld [vmem:[%s11758_s13 + $0x74] sm:$0x1] }
  0xab   : > { %v10606_v36 = vcombine.low %v1122_v13, %v1132_v15  ;;  %v1191_v37 = vrot.slane %v1190_v25, 4  ;;  %v1165_v38 = vrot.slane %v1163_v27, 5  ;;  %v1217_v40 = vshll.u32 %v12178_v20, 16 }
  0xac   : > { %v1186_v42 = vsel %vm11768_vm2, %v1181_v29, %v1185_v53  ;;  %v1160_v43 = vor.u32 %v1159_v18, %v1156_v26  ;;  %v1169_v30 = vrot.slane %v1167_v33, 4  ;;  %v1221_v3 = vshrl.u32 %v12178_v20, 16  ;;  %v1241_v18 = vld [vmem:[%s11758_s13] sm:$0xe] }
  0xad   : > { %4680 = vrot.lane.b32.xlu0 %v10606_v36, %s11669_s14  ;;  %v1196_v48 = vsel %vm11768_vm2, %v1191_v37, %v1195_v14  ;;  %v12199_v51 = vrot.slane %v1217_v40, 5  ;;  %v1227_v52 = vshll.u32 %v12186_v35, 16  ;;  %v1231_v54 = vshrl.u32 %v12186_v35, 16 }
  0xae   : > { %v10609_v55 = vcombine.low %v1186_v42, %v1196_v48  ;;  %v1161_v32 = vrot.slane %v1160_v43, 4  ;;  %v1170_v44 = vor.u32 %v1169_v30, %v1165_v38  ;;  %v1223_v59 = vrot.slane %v1221_v3, 4  ;;  %v12227_v42 = vld [vmem:[%s11758_s13 + $0xc] sm:$0xf]  ;;  %v11451_v30 = vld [vmem:[%s11758_s13 + $0x10] sm:$0x1] }
  0xaf   : > { %v1229_v0 = vrot.slane %v1227_v52, 5  ;;  %v1233_v1 = vrot.slane %v1231_v54, 4  ;;  %v1237_v2 = vshll.u32 %v12192_v46, 16  ;;  %v1198_v4 = vshrl.u32 %v334_v47, 16 }
  0xb0   : > { %4686 = vrot.lane.b32.xlu1 %v10609_v55, %s11669_s14  ;;  %v1166_v5 = vsel %vm11768_vm2, %v1161_v32, %v1165_v38  ;;  %v1171_v53 = vrot.slane %v1170_v44, 4  ;;  %v1224_v9 = vor.u32 %v1223_v59, %v12199_v51  ;;  %v1201_v10 = vshll.u32 %v334_v47, 16  ;;  %v12223_v38 = vld [vmem:[%s11758_s13 + $0x8] sm:$0xf]  ;;  %v12237_v59 = vld [vmem:[%s11758_s13 + $0x4] sm:$0xf] }
  0xb1   : > { %v1234_v12 = vor.u32 %v1233_v1, %v1229_v0  ;;  %v1239_v13 = vrot.slane %v1237_v2, 5  ;;  %v1200_v16 = vrot.slane %v1198_v4, 4  ;;  %v1207_v17 = vshll.u32 %v12204_v63, 16  ;;  %v12241_v1 = vld [vmem:[%s11758_s13 + $0x1c] sm:$0xf] }
  0xb2   : > { %v1176_v19 = vsel %vm11768_vm2, %v1171_v53, %v12165_v60  ;;  %v1225_v25 = vrot.slane %v1224_v9, 4  ;;  %v1203_v14 = vrot.slane %v1201_v10, 5  ;;  %v1211_v26 = vshrl.u32 %v12204_v63, 16  ;;  %v12248_v53 = vld [vmem:[%s11758_s13 + $0x20] sm:$0xf] }
  0xb3   : > { %v10608_v27 = vcombine.low %v1166_v5, %v1176_v19  ;;  %v1235_v15 = vrot.slane %v1234_v12, 4  ;;  %v1209_v29 = vrot.slane %v1207_v17, 5  ;;  %v1369_v40 = vrot.slane %v12223_v38, 5  ;;  %v11455_v10 = vld [vmem:[%s11758_s13 + $0x24] sm:$0x1] }
  0xb4   : > { %v1230_v33 = vsel %vm11768_vm2, %v1225_v25, %v1229_v0  ;;  %v1204_v36 = vor.u32 %v1203_v14, %v1200_v16  ;;  %v1213_v37 = vrot.slane %v1211_v26, 4  ;;  %v1372_v43 = vrot.slane %v12227_v42, 5  ;;  %v12253_v16 = vpop.permute.xlu1 %4616 }
  0xb5   : > { %4684 = vrot.lane.b32.xlu0 %v10608_v27, %s11669_s14  ;;  %v1240_v60 = vsel %vm11768_vm2, %v1235_v15, %v1239_v13  ;;  %v1375_v3 = vrot.slane %v11451_v30, 5  ;;  %v10228_v55 = vrot.slane %v1241_v18, 9  ;;  %v1371_v32 = vrot.slane %v1369_v40, 4  ;;  %v1242_v13 = vld [vmem:[%s11758_s13 + $0x14] sm:$0xe] }
  0xb6   : > { %v10611_v47 = vcombine.low %v1230_v33, %v1240_v60  ;;  %v1205_v48 = vrot.slane %v1204_v36, 4  ;;  %v1214_v52 = vor.u32 %v1213_v37, %v1209_v29  ;;  %v1374_v44 = vrot.slane %v1372_v43, 4  ;;  %v12267_v37 = vld [vmem:[%s11758_s13 + $0x18] sm:$0xf] }
  0xb7   : > { %v1366_v0 = vrot.slane %v12237_v59, 5  ;;  %v1382_v2 = vrot.slane %v12241_v1, 5  ;;  %v1385_v9 = vrot.slane %v12248_v53, 5  ;;  %v1388_v12 = vrot.slane %v11455_v10, 5 }
  0xb8   : > { %4690 = vrot.lane.b32.xlu1 %v10611_v47, %s11669_s14  ;;  %v1210_v4 = vsel %vm11768_vm2, %v1205_v48, %v1209_v29  ;;  %v1215_v5 = vrot.slane %v1214_v52, 4  ;;  %v1373_v17 = vsel %vm12232_vm5, %v1371_v32, %v1372_v43  ;;  %v1376_v19 = vsel %vm12232_vm5, %v1374_v44, %v1375_v3  ;;  %v1243_v43 = vld [vmem:[%s11758_s13 + $0x28] sm:$0xe]  ;;  %v12284_v32 = vld [vmem:[%s11758_s13 + $0x34] sm:$0xf] }
  0xb9   : > { %v1367_v25 = vsel %vm12232_vm5, %v10228_v55, %v1366_v0  ;;  %v1368_v14 = vrot.slane %v1366_v0, 4  ;;  %v10613_v27 = vcombine.low %v1373_v17, %v1376_v19  ;;  %v1384_v15 = vrot.slane %v1382_v2, 4  ;;  %v12287_v0 = vpop.permute.xlu0 %4612  ;;  %v12294_v17 = vpop.permute.xlu1 %4618 }
  0xba   : > { %v1220_v26 = vsel %vm11768_vm2, %v1215_v5, %v12199_v51  ;;  %v1387_v29 = vrot.slane %v1385_v9, 4  ;;  %v10229_v36 = vrot.slane %v1242_v13, 9  ;;  %v1379_v60 = vrot.slane %v12267_v37, 5  ;;  %v11459_v5 = vld [vmem:[%s11758_s13 + $0x38] sm:$0x1] }
  0xbb   : > { %v10610_v18 = vcombine.low %v1210_v4, %v1220_v26  ;;  %v1370_v33 = vsel %vm12232_vm5, %v1368_v14, %v1369_v40  ;;  %v1386_v51 = vsel %vm12232_vm5, %v1384_v15, %v1385_v9  ;;  %v12277_v40 = vld [vmem:[%s11758_s13 + $0x30] sm:$0xf]  ;;  %v1398_v44 = vrot.slane %v12284_v32, 5  ;;  %v12299_v14 = vld [vmem:[%s11758_s13 + $0x44] sm:$0xf] }
  0xbc   : > { %4814 = vrot.lane.b32.xlu1 %v10613_v27, %s11670_s15  ;;  %v10612_v30 = vcombine.low %v1367_v25, %v1370_v33  ;;  %v1389_v3 = vsel %vm12232_vm5, %v1387_v29, %v1388_v12  ;;  %v1395_v47 = vrot.slane %v12277_v40, 5  ;;  %v1380_v52 = vsel %vm12232_vm5, %v10229_v36, %v1379_v60  ;;  %v12291_v12 = vld [vmem:[%s11758_s13 + $0x2c] sm:$0xf]  ;;  %v12303_v27 = vld [vmem:[%s11758_s13 + $0x48] sm:$0xf] }
  0xbd   : > { %4688 = vrot.lane.b32.xlu0 %v10610_v18, %s11669_s14  ;;  %v10615_v48 = vcombine.low %v1386_v51, %v1389_v3  ;;  %v1381_v55 = vrot.slane %v1379_v60, 4  ;;  %v1401_v9 = vrot.slane %v11459_v5, 5  ;;  %v10230_v10 = vrot.slane %v1243_v43, 9  ;;  %v1244_v29 = vld [vmem:[%s11758_s13 + $0x3c] sm:$0xe]  ;;  %s11676_s14 = smov 64  }
  0xbe   : > { %v1397_v4 = vrot.slane %v1395_v47, 4  ;;  %v1392_v13 = vrot.slane %v12291_v12, 5  ;;  %v1400_v25 = vrot.slane %v1398_v44, 4  ;;  %v1408_v26 = vrot.slane %v12299_v14, 5  ;;  %v11463_v3 = vld [vmem:[%s11758_s13 + $0x4c] sm:$0x1] }
  0xbf   : > { %v1383_v19 = vsel %vm12232_vm5, %v1381_v55, %v1382_v2  ;;  %v1411_v15 = vrot.slane %v12303_v27, 5  ;;  %v1414_v55 = vrot.slane %v11463_v3, 5  ;;  %vm6577_vm11 = vcmask 392192  }
  0xc0   : > { %4818 = vrot.lane.b32.xlu1 %v10615_v48, %s11670_s15  ;;  %v10614_v18 = vcombine.low %v1380_v52, %v1383_v19  ;;  %v1399_v33 = vsel %vm12232_vm5, %v1397_v4, %v1398_v44  ;;  %v1393_v2 = vsel %vm12232_vm5, %v10230_v10, %v1392_v13  ;;  %v1394_v36 = vrot.slane %v1392_v13, 4  ;;  %v12319_v4 = vld [vmem:[%s11758_s13 + $0x40] sm:$0xf]  ;;  %v1245_v10 = vld [vmem:[%s11758_s13 + $0x50] sm:$0xe] }
  0xc1   : > { %4812 = vrot.lane.b32.xlu0 %v10612_v30, %s11670_s15  ;;  %v1402_v60 = vsel %vm12232_vm5, %v1400_v25, %v1401_v9  ;;  %v1410_v43 = vrot.slane %v1408_v26, 4  ;;  %v1413_v51 = vrot.slane %v1411_v15, 4  ;;  %v10231_v44 = vrot.slane %v1244_v29, 9  ;;  %v12328_v19 = vld [vmem:[%s11758_s13 + $0x58] sm:$0xf] }
  0xc2   : > { %v10617_v48 = vcombine.low %v1399_v33, %v1402_v60  ;;  %v1396_v52 = vsel %vm12232_vm5, %v1394_v36, %v1395_v47  ;;  %v1405_v5 = vrot.slane %v12319_v4, 5  ;;  %v1421_v25 = vrot.slane %v12328_v19, 5  ;;  %v12331_v47 = vpop.permute.xlu0 %4614  ;;  %v12340_v60 = vpop.permute.xlu1 %4622 }
  0xc3   : > { %v10616_v30 = vcombine.low %v1393_v2, %v1396_v52  ;;  %v1412_v9 = vsel %vm12232_vm5, %v1410_v43, %v1411_v15  ;;  %v1415_v13 = vsel %vm12232_vm5, %v1413_v51, %v1414_v55  ;;  %v12337_v15 = vld [vmem:[%s11758_s13 + $0x5c] sm:$0xf]  ;;  %v11467_v51 = vld [vmem:[%s11758_s13 + $0x60] sm:$0x1]  ;;  %v10232_v55 = vrot.slane %v1245_v10, 9 }
  0xc4   : > { %4822 = vrot.lane.b32.xlu1 %v10617_v48, %s11670_s15  ;;  %v10619_v29 = vcombine.low %v1412_v9, %v1415_v13  ;;  %v1406_v33 = vsel %vm12232_vm5, %v10231_v44, %v1405_v5  ;;  %v1407_v2 = vrot.slane %v1405_v5, 4  ;;  %v1424_v36 = vrot.slane %v12337_v15, 5  ;;  %v12345_v48 = vld [vmem:[%s11758_s13 + $0x54] sm:$0xf]  ;;  %v12351_v9 = vld [vmem:[%s11758_s13 + $0x6c] sm:$0xf] }
  0xc5   : > { %4816 = vrot.lane.b32.xlu0 %v10614_v18, %s11670_s15  ;;  %v1423_v43 = vrot.slane %v1421_v25, 4  ;;  %v1427_v3 = vrot.slane %v11467_v51, 5  ;;  %17394 = vst [vmem:[#allocation13_spill] sm:$0xff] %v12345_v48  ;;  %v1418_v52 = vrot.slane %v12345_v48, 5  ;;  %17395 = vst [vmem:[#allocation14_spill] sm:$0xff] %v12351_v9  ;;  %v1434_v13 = vrot.slane %v12351_v9, 5 }
  0xc6   : > { %v1409_v44 = vsel %vm12232_vm5, %v1407_v2, %v1408_v26  ;;  %v1426_v5 = vrot.slane %v1424_v36, 4  ;;  %v1437_v18 = vrot.slane %v12355_v24, 5  ;;  %v1246_v51 = vld [vmem:[%s11758_s13 + $0x64] sm:$0xe]  ;;  %v1440_v9 = vrot.slane %v11471_v49, 5 }
  0xc7   : > { %v10618_v10 = vcombine.low %v1406_v33, %v1409_v44  ;;  %v1425_v63 = vsel %vm12232_vm5, %v1423_v43, %v1424_v36  ;;  %v1419_v46 = vsel %vm12232_vm5, %v10232_v55, %v1418_v52  ;;  %v1420_v26 = vrot.slane %v1418_v52, 4  ;;  %v12371_v55 = vld [vmem:[%s11758_s13 + $0x68] sm:$0xf]  ;;  %v1247_v52 = vld [vmem:[%s11758_s13 + $0x78] sm:$0xe] }
  0xc8   : > { %4826 = vrot.lane.b32.xlu1 %v10619_v29, %s11670_s15  ;;  %v1428_v2 = vsel %vm12232_vm5, %v1426_v5, %v1427_v3  ;;  %v1436_v35 = vrot.slane %v1434_v13, 4  ;;  %v1439_v20 = vrot.slane %v1437_v18, 4  ;;  %v10233_v43 = vrot.slane %v1246_v51, 9  ;;  %17397 = vst [vmem:[#allocation16_spill] sm:$0xff] %v12371_v55  ;;  %v12375_v3 = vpop.permute.xlu0 %4620  ;;  %v12385_v5 = vpop.permute.xlu1 %4626 }
  0xc9   : > { %4820 = vrot.lane.b32.xlu0 %v10616_v30, %s11670_s15  ;;  %v10621_v33 = vcombine.low %v1425_v63, %v1428_v2  ;;  %v1422_v36 = vsel %vm12232_vm5, %v1420_v26, %v1421_v25  ;;  %v1431_v29 = vrot.slane %v12371_v55, 5  ;;  %v12382_v30 = vld [vmem:[%s11758_s13 + $0x80] sm:$0xf]  ;;  %v12390_v2 = vld [vmem:[%s11758_s13 + $0x84] sm:$0xf]  ;;  %v1466_v48 = vrot.slane %v11479_v56, 5 }
  0xca   : > { %v10620_v44 = vcombine.low %v1419_v46, %v1422_v36  ;;  %v1438_v49 = vsel %vm12232_vm5, %v1436_v35, %v1437_v18  ;;  %v1441_v63 = vsel %vm12232_vm5, %v1439_v20, %v1440_v9  ;;  %17398 = vst [vmem:[#allocation17_spill] sm:$0xff] %v12382_v30  ;;  %v1447_v25 = vrot.slane %v12382_v30, 5  ;;  %17399 = vst [vmem:[#allocation18_spill] sm:$0xff] %v12390_v2  ;;  %v11475_v9 = vld [vmem:[%s11758_s13 + $0x88] sm:$0x1] }
  0xcb   : > { %v10623_v51 = vcombine.low %v1438_v49, %v1441_v63  ;;  %v1432_v26 = vsel %vm12232_vm5, %v10233_v43, %v1431_v29  ;;  %v1433_v46 = vrot.slane %v1431_v29, 4  ;;  %v1450_v35 = vrot.slane %v12390_v2, 5  ;;  %v12396_v30 = vld [vmem:[%s11758_s13 + $0x7c] sm:$0xf]  ;;  %v12403_v63 = vld [vmem:[%s11758_s13 + $0x94] sm:$0xf] }
  0xcc   : > { %4830 = vrot.lane.b32.xlu1 %v10621_v33, %s11670_s15  ;;  %v1449_v20 = vrot.slane %v1447_v25, 4  ;;  %v1453_v18 = vrot.slane %v11475_v9, 5  ;;  %v10234_v36 = vrot.slane %v1247_v52, 9  ;;  %17400 = vst [vmem:[#allocation19_spill] sm:$0xff] %v12396_v30  ;;  %v1444_v49 = vrot.slane %v12396_v30, 5  ;;  %17401 = vst [vmem:[#allocation20_spill] sm:$0xff] %v12403_v63 }
  0xcd   : > { %4824 = vrot.lane.b32.xlu0 %v10618_v10, %s11670_s15  ;;  %v1435_v43 = vsel %vm12232_vm5, %v1433_v46, %v1434_v13  ;;  %v1452_v29 = vrot.slane %v1450_v35, 4  ;;  %v1460_v2 = vrot.slane %v12403_v63, 5  ;;  %v12407_v33 = vld [vmem:[%s11758_s13 + $0x98] sm:$0xf]  ;;  %v1248_v9 = vld [vmem:[%s11758_s13 + $0x8c] sm:$0xe]  ;;  %v12416_v63 = vpop.permute.xlu0 %4624 }
  0xce   : > { %17402 = vst [vmem:[#allocation21_spill] sm:$0xff] %v12407_v33  ;;  %v1463_v52 = vrot.slane %v12407_v33, 5  ;;  %v10622_v55 = vcombine.low %v1432_v26, %v1435_v43  ;;  %v1451_v30 = vsel %vm12232_vm5, %v1449_v20, %v1450_v35  ;;  %v1446_v24 = vrot.slane %v1444_v49, 4  ;;  %v12422_v20 = vld [vmem:[%s11758_s13 + $0x90] sm:$0xf]  ;;  %v12425_v43 = vpop.permute.xlu1 %4630 }
  0xcf   : > { %v1454_v10 = vsel %vm12232_vm5, %v1452_v29, %v1453_v18  ;;  %v1462_v13 = vrot.slane %v1460_v2, 4  ;;  %v1445_v26 = vsel %vm12232_vm5, %v10234_v36, %v1444_v49  ;;  %v10235_v35 = vrot.slane %v1248_v9, 9  ;;  %17403 = vst [vmem:[#allocation22_spill] sm:$0xff] %v12422_v20  ;;  %17404 = vst [vmem:[#allocation23_spill] sm:$0xff] %v12425_v43  ;;  %v12435_v36 = vld [vmem:[%s11758_s13 + $0xa8] sm:$0xf] }
  0xd0   : > { %v1465_v46 = vrot.slane %v1463_v52, 4  ;;  %4834 = vrot.lane.b32.xlu1 %v10623_v51, %s11670_s15  ;;  %v10625_v33 = vcombine.low %v1451_v30, %v1454_v10  ;;  %v1457_v18 = vrot.slane %v12422_v20, 5  ;;  %v1448_v56 = vsel %vm12232_vm5, %v1446_v24, %v1447_v25  ;;  %17405 = vst [vmem:[#allocation24_spill] sm:$0xff] %v12435_v36  ;;  %v12439_v9 = vld [vmem:[%s11758_s13 + $0xac] sm:$0xf] }
  0xd1   : > { %4828 = vrot.lane.b32.xlu0 %v10620_v44, %s11670_s15  ;;  %v1464_v30 = vsel %vm12232_vm5, %v1462_v13, %v1463_v52  ;;  %v1473_v49 = vrot.slane %v12435_v36, 5  ;;  %17406 = vst [vmem:[#allocation25_spill] sm:$0xff] %v12439_v9  ;;  %v1476_v10 = vrot.slane %v12439_v9, 5  ;;  %v1249_v20 = vld [vmem:[%s11758_s13 + $0xa0] sm:$0xe]  ;;  %vm6658_vm12 = vcmask 457728  }
  0xd2   : > { %v1467_v51 = vsel %vm12232_vm5, %v1465_v46, %v1466_v48  ;;  %v1459_v29 = vrot.slane %v1457_v18, 4  ;;  %v11483_v43 = vld [vmem:[%s11758_s13 + $0xb0] sm:$0x1]  ;;  %v12445_v25 = vld [vmem:[%s11758_s13 + $0xa4] sm:$0xf]  ;;  %v10624_v48 = vcombine.low %v1445_v26, %v1448_v56  ;;  %v1458_v46 = vsel %vm12232_vm5, %v10235_v35, %v1457_v18 }
  0xd3   : > { %v1475_v44 = vrot.slane %v1473_v49, 4  ;;  %v1479_v24 = vrot.slane %v11483_v43, 5  ;;  %17407 = vst [vmem:[#allocation26_spill] sm:$0xff] %v12445_v25  ;;  %v1470_v52 = vrot.slane %v12445_v25, 5  ;;  %v10627_v13 = vcombine.low %v1464_v30, %v1467_v51  ;;  %v12462_v56 = vld [vmem:[%s11758_s13 + $0xbc] sm:$0xf] }
  0xd4   : > { %4838 = vrot.lane.b32.xlu1 %v10625_v33, %s11670_s15  ;;  %v1478_v36 = vrot.slane %v1476_v10, 4  ;;  %v1461_v43 = vsel %vm12232_vm5, %v1459_v29, %v1460_v2  ;;  %v10236_v45 = vrot.slane %v1249_v20, 9  ;;  %v12457_v33 = vpop.permute.xlu0 %4628  ;;  %17408 = vst [vmem:[#allocation27_spill] sm:$0xff] %v12462_v56  ;;  %v1486_v35 = vrot.slane %v12462_v56, 5  ;;  %v12468_v18 = vld [vmem:[%s11758_s13 + $0xc0] sm:$0xf] }
  0xd5   : > { %4832 = vrot.lane.b32.xlu0 %v10622_v55, %s11670_s15  ;;  %v1477_v9 = vsel %vm12232_vm5, %v1475_v44, %v1476_v10  ;;  %v1472_v25 = vrot.slane %v1470_v52, 4  ;;  %v12465_v55 = vpop.permute.xlu1 %4634  ;;  %17409 = vst [vmem:[#allocation28_spill] sm:$0xff] %v12468_v18  ;;  %v1489_v2 = vrot.slane %v12468_v18, 5  ;;  %v11487_v20 = vld [vmem:[%s11758_s13 + $0xc4] sm:$0x1]  ;;  %v10626_v51 = vcombine.low %v1458_v46, %v1461_v43 }
  0xd6   : > { %v1480_v26 = vsel %vm12232_vm5, %v1478_v36, %v1479_v24  ;;  %v1492_v30 = vrot.slane %v11487_v20, 5  ;;  %v1488_v29 = vrot.slane %v1486_v35, 4  ;;  %v10237_v10 = vrot.slane %v1250_v34, 9  ;;  %v12479_v18 = vld [vmem:[%s11758_s13 + $0xb8] sm:$0xf] }
  0xd7   : > { %v10629_v36 = vcombine.low %v1477_v9, %v1480_v26  ;;  %v1471_v44 = vsel %vm12232_vm5, %v10236_v45, %v1470_v52  ;;  %v1474_v24 = vsel %vm12232_vm5, %v1472_v25, %v1473_v49  ;;  %v1491_v56 = vrot.slane %v1489_v2, 4  ;;  %17410 = vst [vmem:[#allocation29_spill] sm:$0xff] %v12479_v18  ;;  %v12485_v9 = vld [vmem:[%s11758_s13 + $0x198] sm:$0xf]  ;;  %v12489_v46 = vld [vmem:[%s11758_s13 + $0x19c] sm:$0xf] }
  0xd8   : > { %4842 = vrot.lane.b32.xlu1 %v10627_v13, %s11670_s15  ;;  %v1483_v20 = vrot.slane %v12479_v18, 5  ;;  %v1490_v13 = vsel %vm12232_vm5, %v1488_v29, %v1489_v2  ;;  %17411 = vst [vmem:[#allocation30_spill] sm:$0xff] %v12485_v9  ;;  %v1499_v34 = vrot.slane %v12485_v9, 5  ;;  %17412 = vst [vmem:[#allocation31_spill] sm:$0xff] %v12489_v46  ;;  %v11491_v45 = vld [vmem:[%s11758_s13 + $0x1a0] sm:$0x1]  ;;  %v12496_v26 = vpop.permute.xlu0 %4632 }
  0xd9   : > { %4836 = vrot.lane.b32.xlu0 %v10624_v48, %s11670_s15  ;;  %v1502_v48 = vrot.slane %v12489_v46, 5  ;;  %v1505_v52 = vrot.slane %v11491_v45, 5  ;;  %v1251_v49 = vld [vmem:[%s11758_s13 + $0x190] sm:$0xe]  ;;  %v1493_v25 = vsel %vm12232_vm5, %v1491_v56, %v1492_v30  ;;  %17413 = vst [vmem:[#allocation32_spill] sm:$0xff] %v12496_v26  ;;  %v12501_v18 = vpop.permute.xlu1 %4638  ;;  %v10628_v45 = vcombine.low %v1471_v44, %v1474_v24 }
  0xda   : > { %v1485_v43 = vrot.slane %v1483_v20, 4  ;;  %v10631_v2 = vcombine.low %v1490_v13, %v1493_v25  ;;  %v1484_v29 = vsel %vm12232_vm5, %v10237_v10, %v1483_v20  ;;  %v1501_v9 = vrot.slane %v1499_v34, 4  ;;  %17414 = vst [vmem:[#allocation33_spill] sm:$0xff] %v12501_v18  ;;  %v12507_v26 = vld [vmem:[%s11758_s13 + $0x194] sm:$0xf] }
  0xdb   : > { %v1504_v46 = vrot.slane %v1502_v48, 4  ;;  %v10238_v30 = vrot.slane %v1251_v49, 9  ;;  %17415 = vst [vmem:[#allocation34_spill] sm:$0xff] %v12507_v26  ;;  %v1252_v13 = vld [vmem:[%s11758_s13 + $0x1a4] sm:$0xe]  ;;  %vm6944_vm13 = vcmask 1043456  }
  0xdc   : > { %4846 = vrot.lane.b32.xlu1 %v10629_v36, %s11670_s15  ;;  %v1487_v56 = vsel %vm12232_vm5, %v1485_v43, %v1486_v35  ;;  %v1496_v36 = vrot.slane %v12507_v26, 5  ;;  %v1503_v10 = vsel %vm12232_vm5, %v1501_v9, %v1502_v48  ;;  %v12517_v24 = vld [vmem:[%s11758_s13 + $0x1ac] sm:$0xf]  ;;  %v12521_v49 = vld [vmem:[%s11758_s13 + $0x1b0] sm:$0xf]  ;;  %vm6739_vm14 = vcmask 523264  }
  0xdd   : > { %4840 = vrot.lane.b32.xlu0 %v10626_v51, %s11670_s15  ;;  %v1506_v20 = vsel %vm12232_vm5, %v1504_v46, %v1505_v52  ;;  %v10630_v25 = vcombine.low %v1484_v29, %v1487_v56  ;;  %17416 = vst [vmem:[#allocation35_spill] sm:$0xff] %v12517_v24  ;;  %v1512_v35 = vrot.slane %v12517_v24, 5  ;;  %17417 = vst [vmem:[#allocation36_spill] sm:$0xff] %v12521_v49  ;;  %v1515_v43 = vrot.slane %v12521_v49, 5  ;;  %v11495_v9 = vld [vmem:[%s11758_s13 + $0x1b4] sm:$0x1] }
  0xde   : > { %v1498_v51 = vrot.slane %v1496_v36, 4  ;;  %v10633_v44 = vcombine.low %v1503_v10, %v1506_v20  ;;  %v1518_v48 = vrot.slane %v11495_v9, 5  ;;  %v1497_v46 = vsel %vm12232_vm5, %v10238_v30, %v1496_v36  ;;  %v12531_v29 = vld [vmem:[%s11758_s13 + $0x1a8] sm:$0xf]  ;;  %v12534_v10 = vpop.permute.xlu0 %4636  ;;  %v12536_v9 = vpop.permute.xlu1 %4642  ;;  %v12539_v49 = vld [vmem:[%s11758_s13 + $0x1c0] sm:$0xf] }
  0xdf   : > { %17418 = vst [vmem:[#allocation37_spill] sm:$0xff] %v12531_v29  ;;  %v1509_v56 = vrot.slane %v12531_v29, 5  ;;  %17419 = vst [vmem:[#allocation38_spill] sm:$0xff] %v12534_v10  ;;  %v1514_v20 = vrot.slane %v1512_v35, 4  ;;  %v1517_v24 = vrot.slane %v1515_v43, 4  ;;  %v1525_v30 = vrot.slane %v12539_v49, 5 }
  0xe0   : > { %4850 = vrot.lane.b32.xlu1 %v10631_v2, %s11670_s15  ;;  %v1500_v52 = vsel %vm12232_vm5, %v1498_v51, %v1499_v34  ;;  %v10239_v2 = vrot.slane %v1252_v13, 9  ;;  %17420 = vst [vmem:[#allocation39_spill] sm:$0xff] %v12536_v9  ;;  %17421 = vst [vmem:[#allocation40_spill] sm:$0xff] %v12539_v49  ;;  %v1253_v36 = vld [vmem:[%s11758_s13 + $0x1b8] sm:$0xe]  ;;  %vm6863_vm15 = vcmask 588800  }
  0xe1   : > { %4844 = vrot.lane.b32.xlu0 %v10628_v45, %s11670_s15  ;;  %v1511_v45 = vrot.slane %v1509_v56, 4  ;;  %v10632_v34 = vcombine.low %v1497_v46, %v1500_v52  ;;  %v1516_v13 = vsel %vm12232_vm5, %v1514_v20, %v1515_v43  ;;  %v1519_v51 = vsel %vm12232_vm5, %v1517_v24, %v1518_v48  ;;  %v12549_v10 = vld [vmem:[%s11758_s13 + $0x1c4] sm:$0xf]  ;;  %v11499_v52 = vld [vmem:[%s11758_s13 + $0x1c8] sm:$0x1] }
  0xe2   : > { %17422 = vst [vmem:[#allocation41_spill] sm:$0xff] %v12549_v10  ;;  %v1528_v9 = vrot.slane %v12549_v10, 5  ;;  %v10635_v49 = vcombine.low %v1516_v13, %v1519_v51  ;;  %v1527_v46 = vrot.slane %v1525_v30, 4  ;;  %v1531_v29 = vrot.slane %v11499_v52, 5  ;;  %v12559_v20 = vld [vmem:[%s11758_s13 + $0x1bc] sm:$0xf] }
  0xe3   : > { %v1513_v43 = vsel %vm12232_vm5, %v1511_v45, %v1512_v35  ;;  %v10240_v48 = vrot.slane %v1253_v36, 9  ;;  %17423 = vst [vmem:[#allocation42_spill] sm:$0xff] %v12559_v20  ;;  %v1522_v10 = vrot.slane %v12559_v20, 5  ;;  %v11501_v26 = vld [vmem:[%s11758_s13 + $0x14] sm:$0xf]  ;;  %v12571_v35 = vpop.permute.xlu0 %4640  ;;  %vm7621_vm3 = vcmask 385024  }
  0xe4   : > { %4854 = vrot.lane.b32.xlu1 %v10633_v44, %s11670_s15  ;;  %v1510_v44 = vsel %vm12232_vm5, %v10239_v2, %v1509_v56  ;;  %v1530_v24 = vrot.slane %v1528_v9, 4  ;;  %v1529_v13 = vsel %vm12232_vm5, %v1527_v46, %v1528_v9  ;;  %v12567_v2 = vld [vmem:[%s11758_s13 + $0x1d4] sm:$0xf]  ;;  %v1254_v51 = vld [vmem:[%s11758_s13 + $0x1cc] sm:$0xe]  ;;  %17425 = vst [vmem:[#allocation44_spill] sm:$0xff] %v12571_v35  ;;  %v12580_v9 = vpop.permute.xlu1 %4646 }
  0xe5   : > { %4848 = vrot.lane.b32.xlu0 %v10630_v25, %s11670_s15  ;;  %v10534_v25 = vcombine.low %v11501_v26, %v12267_v37  ;;  %17424 = vst [vmem:[#allocation43_spill] sm:$0xff] %v12567_v2  ;;  %v1538_v56 = vrot.slane %v12567_v2, 5  ;;  %v1524_v36 = vrot.slane %v1522_v10, 4  ;;  %v12577_v37 = vld [vmem:[%s11758_s13 + $0x1d8] sm:$0xf]  ;;  %17427 = vst [vmem:[#allocation46_spill] sm:$0xff] %v12580_v9  ;;  %v10634_v46 = vcombine.low %v1510_v44, %v1513_v43 }
  0xe6   : > { %v1532_v45 = vsel %vm12232_vm5, %v1530_v24, %v1531_v29  ;;  %17426 = vst [vmem:[#allocation45_spill] sm:$0xff] %v12577_v37  ;;  %v1541_v26 = vrot.slane %v12577_v37, 5  ;;  %v1523_v2 = vsel %vm12232_vm5, %v10240_v48, %v1522_v10  ;;  %v11504_v20 = vld [vmem:[%s11758_s13 + $0x1dc] sm:$0x1]  ;;  %v10241_v18 = vrot.slane %v1254_v51, 9 }
  0xe7   : > { %v10637_v52 = vcombine.low %v1529_v13, %v1532_v45  ;;  %v1526_v29 = vsel %vm12232_vm5, %v1524_v36, %v1525_v30  ;;  %v1544_v35 = vrot.slane %v11504_v20, 5  ;;  %v12591_v9 = vld [vmem:[%s11758_s13 + $0x1d0] sm:$0xf]  ;;  %v11506_v44 = vld [vmem:[%s11758_s13] sm:$0xf]  ;;  %v1551_v30 = vrot.slane %v12010_v58, 5 }
  0xe8   : > { %4858 = vrot.lane.b32.xlu1 %v10635_v49, %s11670_s15  ;;  %v1540_v49 = vrot.slane %v1538_v56, 4  ;;  %v1543_v24 = vrot.slane %v1541_v26, 4  ;;  %v10532_v43 = vcombine.low %v11506_v44, %v12237_v59  ;;  %v1554_v48 = vrot.slane %v12016_v57, 5  ;;  %v1255_v20 = vld [vmem:[%s11758_s13 + $0x1e0] sm:$0xe]  ;;  %v12607_v59 = vpop.permute.xlu0 %4644 }
  0xe9   : > { %4852 = vrot.lane.b32.xlu0 %v10632_v34, %s11670_s15  ;;  %v1535_v34 = vrot.slane %v12591_v9, 5  ;;  %v12604_v13 = vsel %vm6132_vm6, %v10534_v25, %v12253_v16  ;;  %v10636_v51 = vcombine.low %v1523_v2, %v1526_v29  ;;  %v1557_v57 = vrot.slane %v12022_v11, 5 }
  0xea   : > { %v1542_v37 = vsel %vm12232_vm5, %v1540_v49, %v1541_v26  ;;  %v1545_v10 = vsel %vm12232_vm5, %v1543_v24, %v1544_v35  ;;  %v1553_v26 = vrot.slane %v1551_v30, 4  ;;  %v1556_v58 = vrot.slane %v1554_v48, 4 }
  0xeb   : > { %v10639_v45 = vcombine.low %v1542_v37, %v1545_v10  ;;  %v1537_v36 = vrot.slane %v1535_v34, 4  ;;  %v1536_v35 = vsel %vm12232_vm5, %v10241_v18, %v1535_v34  ;;  %v10535_v16 = vcombine.low %v12241_v1, %v12248_v53  ;;  %v1256_v53 = vld [vmem:[%s11758_s13 + $0x1f4] sm:$0xe] }
  0xec   : > { %4862 = vrot.lane.b32.xlu1 %v10637_v52, %s11670_s15  ;;  %v12612_v52 = vpop.permute.xlu1 %4650  ;;  %v10242_v2 = vrot.slane %v1255_v20, 9  ;;  %v1548_v37 = vrot.slane %v12034_v23, 5  ;;  %v10533_v18 = vcombine.low %v12223_v38, %v12227_v42  ;;  %v1555_v11 = vsel %vm12232_vm5, %v1553_v26, %v1554_v48 }
  0xed   : > { %4856 = vrot.lane.b32.xlu0 %v10634_v46, %s11670_s15  ;;  %v1539_v25 = vsel %vm12232_vm5, %v1537_v36, %v1538_v56  ;;  %v12621_v46 = vsel %vm6132_vm6, %v10532_v43, %v12287_v0  ;;  %v1558_v1 = vsel %vm12232_vm5, %v1556_v58, %v1557_v57  ;;  %v10537_v23 = vcombine.low %v12277_v40, %v12284_v32  ;;  %v12646_v43 = vpop.permute.xlu0 %4648 }
  0xee   : > { %v10638_v0 = vcombine.low %v1536_v35, %v1539_v25  ;;  %v10641_v56 = vcombine.low %v1555_v11, %v1558_v1  ;;  %v1550_v49 = vrot.slane %v1548_v37, 4  ;;  %v1549_v38 = vsel %vm12232_vm5, %v10242_v2, %v1548_v37  ;;  %v11508_v37 = vld [vmem:[%s11758_s13 + $0x3c] sm:$0xf] }
  0xef   : > { %v1564_v42 = vrot.slane %v12042_v22, 5  ;;  %v1567_v29 = vrot.slane %v12050_v31, 5  ;;  %v1570_v24 = vrot.slane %v12056_v50, 5  ;;  %v12641_v34 = vsel %vm6132_vm6, %v10535_v16, %v12294_v17  ;;  %v11507_v31 = vld [vmem:[%s11758_s13 + $0x28] sm:$0xf] }
  0xf0   : > { %4866 = vrot.lane.b32.xlu1 %v10639_v45, %s11670_s15  ;;  %v1552_v40 = vsel %vm12232_vm5, %v1550_v49, %v1551_v30  ;;  %v10243_v32 = vrot.slane %v1256_v53, 9  ;;  %v1561_v44 = vrot.slane %v12068_v61, 5  ;;  %v12650_v22 = vsel %vm6132_vm6, %v10533_v18, %v12331_v47  ;;  %v12655_v48 = vpop.permute.xlu1 %4654  ;;  %v1258_v1 = vld [vmem:[%s11758_s13 + $0x21c] sm:$0xe] }
  0xf1   : > { %4860 = vrot.lane.b32.xlu0 %v10636_v51, %s11670_s15  ;;  %v10536_v50 = vcombine.low %v11507_v31, %v12291_v12  ;;  %v1566_v17 = vrot.slane %v1564_v42, 4  ;;  %v1569_v10 = vrot.slane %v1567_v29, 4  ;;  %v12659_v30 = vsel %vm6132_vm6, %v10537_v23, %v12340_v60  ;;  %v1257_v51 = vld [vmem:[%s11758_s13 + $0x208] sm:$0xe]  ;;  %v12685_v53 = vpop.permute.xlu0 %4652 }
  0xf2   : > { %v10640_v61 = vcombine.low %v1549_v38, %v1552_v40  ;;  %v1563_v20 = vrot.slane %v1561_v44, 4  ;;  %v1577_v47 = vrot.slane %v12076_v7, 5  ;;  %v1562_v36 = vsel %vm12232_vm5, %v10243_v32, %v1561_v44  ;;  %v17428_v32 = vld [vmem:[#allocation5_spill] sm:$0xff]  ;;  %v17429_v44 = vld [vmem:[#allocation6_spill] sm:$0xff] }
  0xf3   : > { %v1568_v12 = vsel %vm12232_vm5, %v1566_v17, %v1567_v29  ;;  %v1571_v45 = vsel %vm12232_vm5, %v1569_v10, %v1570_v24  ;;  %v1580_v60 = vrot.slane %v12084_v6, 5  ;;  %v1583_v7 = vrot.slane %v12090_v28, 5  ;;  %v11509_v17 = vld [vmem:[%s11758_s13 + $0x50] sm:$0xf]  ;;  %v17430_v10 = vld [vmem:[#allocation13_spill] sm:$0xff] }
  0xf4   : > { %4870 = vrot.lane.b32.xlu1 %v10641_v56, %s11670_s15  ;;  %v10643_v35 = vcombine.low %v1568_v12, %v1571_v45  ;;  %v1565_v26 = vsel %vm12232_vm5, %v1563_v20, %v1564_v42  ;;  %v1579_v58 = vrot.slane %v1577_v47, 4  ;;  %v10539_v57 = vcombine.low %v12299_v14, %v12303_v27  ;;  %v12692_v23 = vpop.permute.xlu1 %4658 }
  0xf5   : > { %4864 = vrot.lane.b32.xlu0 %v10638_v0, %s11670_s15  ;;  %v1582_v16 = vrot.slane %v1580_v60, 4  ;;  %v10244_v25 = vrot.slane %v1257_v51, 9  ;;  %v1574_v2 = vrot.slane %v12102_v39, 5  ;;  %v10538_v18 = vcombine.low %v11508_v37, %v12319_v4  ;;  %v12725_v51 = vpop.permute.xlu0 %4656 }
  0xf6   : > { %v10642_v6 = vcombine.low %v1562_v36, %v1565_v26  ;;  %v1581_v11 = vsel %vm12232_vm5, %v1579_v58, %v1580_v60  ;;  %v1590_v28 = vrot.slane %v12110_v41, 5  ;;  %v1593_v4 = vrot.slane %v12118_v62, 5  ;;  %v17432_v60 = vld [vmem:[#allocation7_spill] sm:$0xff] }
  0xf7   : > { %v1584_v14 = vsel %vm12232_vm5, %v1582_v16, %v1583_v7  ;;  %v1575_v39 = vsel %vm12232_vm5, %v10244_v25, %v1574_v2  ;;  %v1576_v27 = vrot.slane %v1574_v2, 4  ;;  %v12696_v0 = vsel %vm6132_vm6, %v10536_v50, %v12375_v3  ;;  %v1259_v50 = vld [vmem:[%s11758_s13 + $0x230] sm:$0xe]  ;;  %v17433_v58 = vld [vmem:[#allocation15_spill] sm:$0xff]  ;;  %v17434_v7 = vld [vmem:[#allocation14_spill] sm:$0xff] }
  0xf8   : > { %4874 = vrot.lane.b32.xlu1 %v10643_v35, %s11670_s15  ;;  %v10541_v41 = vcombine.low %v12328_v19, %v12337_v15  ;;  %v10645_v56 = vcombine.low %v1581_v11, %v1584_v14  ;;  %v1592_v49 = vrot.slane %v1590_v28, 4  ;;  %v1595_v42 = vrot.slane %v1593_v4, 4  ;;  %v12732_v26 = vpop.permute.xlu1 %4662  ;;  %v17435_v2 = vld [vmem:[#allocation8_spill] sm:$0xff] }
  0xf9   : > { %4868 = vrot.lane.b32.xlu0 %v10640_v61, %s11670_s15  ;;  %v1578_v38 = vsel %vm12232_vm5, %v1576_v27, %v1577_v47  ;;  %v1596_v29 = vrot.slane %v12124_v8, 5  ;;  %v10245_v62 = vrot.slane %v1258_v1, 9  ;;  %v12705_v24 = vsel %vm6132_vm6, %v10539_v57, %v12385_v5  ;;  %v1260_v27 = vld [vmem:[%s11758_s13 + $0x244] sm:$0xe] }
  0xfa   : > { %v10644_v19 = vcombine.low %v1575_v39, %v1578_v38  ;;  %v1594_v15 = vsel %vm12232_vm5, %v1592_v49, %v1593_v4  ;;  %v1587_v3 = vrot.slane %v12136_v21, 5  ;;  %v12714_v40 = vsel %vm6132_vm6, %v10538_v18, %v12416_v63  ;;  %v17431_v63 = vld [vmem:[#allocation23_spill] sm:$0xff]  ;;  %v11510_v18 = vld [vmem:[%s11758_s13 + $0x64] sm:$0xf] }
  0xfb   : > { %v1597_v8 = vsel %vm12232_vm5, %v1595_v42, %v1596_v29  ;;  %v1603_v5 = vrot.slane %v17428_v32, 5  ;;  %v1606_v31 = vrot.slane %v17429_v44, 5  ;;  %v10540_v61 = vcombine.low %v11509_v17, %v17430_v10  ;;  %v17437_v4 = vld [vmem:[#allocation18_spill] sm:$0xff]  ;;  %v17439_v29 = vld [vmem:[#allocation9_spill] sm:$0xff]  ;;  %v12768_v17 = vpop.permute.xlu0 %4660  ;;  %v17443_v10 = vld [vmem:[#allocation32_spill] sm:$0xff] }
  0xfc   : > { %4878 = vrot.lane.b32.xlu1 %v10645_v56, %s11670_s15  ;;  %v10647_v20 = vcombine.low %v1594_v15, %v1597_v8  ;;  %v1588_v21 = vsel %vm12232_vm5, %v10245_v62, %v1587_v3  ;;  %v1589_v47 = vrot.slane %v1587_v3, 4  ;;  %v12729_v12 = vsel %vm6132_vm6, %v10541_v41, %v17431_v63  ;;  %v17438_v41 = vld [vmem:[#allocation17_spill] sm:$0xff]  ;;  %v17441_v3 = vld [vmem:[#allocation11_spill] sm:$0xff] }
  0xfd   : > { %4872 = vrot.lane.b32.xlu0 %v10642_v6, %s11670_s15  ;;  %v1605_v45 = vrot.slane %v1603_v5, 4  ;;  %v1608_v36 = vrot.slane %v1606_v31, 4  ;;  %v1609_v35 = vrot.slane %v17432_v60, 5  ;;  %v10543_v57 = vcombine.low %v17434_v7, %v17433_v58  ;;  %v17436_v6 = vld [vmem:[#allocation16_spill] sm:$0xff]  ;;  %v17444_v63 = vld [vmem:[#allocation33_spill] sm:$0xff] }
  0xfe   : > { %v1591_v16 = vsel %vm12232_vm5, %v1589_v47, %v1590_v28  ;;  %v10246_v25 = vrot.slane %v1259_v50, 9  ;;  %v1600_v37 = vrot.slane %v17435_v2, 5  ;;  %v10542_v11 = vcombine.low %v11510_v18, %v17436_v6  ;;  %v12774_v47 = vpop.permute.xlu1 %4666  ;;  %v17447_v7 = vld [vmem:[#allocation21_spill] sm:$0xff]  ;;  %v17449_v2 = vld [vmem:[#allocation22_spill] sm:$0xff] }
  0xff   : > { %v10646_v1 = vcombine.low %v1588_v21, %v1591_v16  ;;  %v1607_v14 = vsel %vm12232_vm5, %v1605_v45, %v1606_v31  ;;  %v1610_v39 = vsel %vm12232_vm5, %v1608_v36, %v1609_v35  ;;  %v10545_v56 = vcombine.low %v17438_v41, %v17437_v4  ;;  %v17442_v31 = vld [vmem:[#allocation12_spill] sm:$0xff]  ;;  %v11511_v45 = vld [vmem:[%s11758_s13 + $0x78] sm:$0xf]  ;;  %v17446_v36 = vld [vmem:[#allocation19_spill] sm:$0xff] }
 0x100   : > { %4882 = vrot.lane.b32.xlu1 %v10647_v20, %s11670_s15  ;;  %v10649_v49 = vcombine.low %v1607_v14, %v1610_v39  ;;  %v1601_v28 = vsel %vm12232_vm5, %v10246_v25, %v1600_v37  ;;  %v1602_v38 = vrot.slane %v1600_v37, 4  ;;  %v12754_v42 = vsel %vm6132_vm6, %v10540_v61, %v12457_v33  ;;  %v11512_v25 = vld [vmem:[%s11758_s13 + $0x8c] sm:$0xf]  ;;  %v17450_v14 = vld [vmem:[#allocation25_spill] sm:$0xff]  ;;  %v17451_v39 = vld [vmem:[#allocation24_spill] sm:$0xff] }
 0x101   : > { %4876 = vrot.lane.b32.xlu0 %v10644_v19, %s11670_s15  ;;  %v1616_v62 = vrot.slane %v17439_v29, 5  ;;  %v17440_v19 = vld [vmem:[#allocation10_spill] sm:$0xff]  ;;  %v1622_v8 = vrot.slane %v17441_v3, 5  ;;  %v12761_v32 = vsel %vm6132_vm6, %v10543_v57, %v12465_v55  ;;  %v10247_v44 = vrot.slane %v1260_v27, 9  ;;  %v17448_v57 = vld [vmem:[#allocation20_spill] sm:$0xff]  ;;  %v17454_v29 = vld [vmem:[#allocation27_spill] sm:$0xff] }
 0x102   : > { %v1619_v15 = vrot.slane %v17440_v19, 5  ;;  %v1604_v33 = vsel %vm12232_vm5, %v1602_v38, %v1603_v5  ;;  %v1613_v50 = vrot.slane %v17442_v31, 5  ;;  %v12772_v61 = vsel %vm6132_vm6, %v10542_v11, %v17443_v10  ;;  %v12793_v11 = vld [vmem:[%s11758_s13 + $0x1c] sm:$0xf]  ;;  %v11513_v4 = vld [vmem:[%s11758_s13 + $0xa0] sm:$0xf] }
 0x103   : > { %v10648_v55 = vcombine.low %v1601_v28, %v1604_v33  ;;  %v1618_v20 = vrot.slane %v1616_v62, 4  ;;  %v12778_v5 = vsel %vm6132_vm6, %v10545_v56, %v17444_v63  ;;  %v10544_v60 = vcombine.low %v11511_v45, %v17446_v36  ;;  %v17452_v41 = vld [vmem:[#allocation26_spill] sm:$0xff]  ;;  %v17453_v38 = vld [vmem:[#allocation28_spill] sm:$0xff]  ;;  %v17455_v3 = vld [vmem:[#allocation29_spill] sm:$0xff] }
 0x104   : > { %4886 = vrot.lane.b32.xlu1 %v10649_v49, %s11670_s15  ;;  %v1621_v21 = vrot.slane %v1619_v15, 4  ;;  %17445 = vst [vmem:[#allocation5_spill] sm:$0xff] %v12778_v5  ;;  %v1614_v35 = vsel %vm12232_vm5, %v10247_v44, %v1613_v50  ;;  %v1615_v58 = vrot.slane %v1613_v50, 4  ;;  %v10547_v16 = vcombine.low %v17448_v57, %v17447_v7  ;;  %v17456_v33 = vld [vmem:[#allocation31_spill] sm:$0xff]  ;;  %v17457_v44 = vld [vmem:[#allocation30_spill] sm:$0xff]  ;;  %v17459_v45 = vld [vmem:[#allocation36_spill] sm:$0xff] }
 0x105   : > { %4880 = vrot.lane.b32.xlu0 %v10646_v1, %s11670_s15  ;;  %v10546_v37 = vcombine.low %v11512_v25, %v17449_v2  ;;  %v1620_v18 = vsel %vm12232_vm5, %v1618_v20, %v1619_v15  ;;  %v12796_v1 = vld [vmem:[%s11758_s13 + $0x20] sm:$0xf]  ;;  %v10549_v27 = vcombine.low %v17451_v39, %v17450_v14  ;;  %v10548_v56 = vcombine.low %v11513_v4, %v17452_v41  ;;  %v11514_v15 = vld [vmem:[%s11758_s13 + $0xb4] sm:$0xf]  ;;  %v12813_v20 = vld [vmem:[%s11758_s13 + $0x18] sm:$0xf] }
 0x106   : > { %v1623_v6 = vsel %vm12232_vm5, %v1621_v21, %v1622_v8  ;;  %v1617_v28 = vsel %vm12232_vm5, %v1615_v58, %v1616_v62  ;;  %v10551_v19 = vcombine.low %v17454_v29, %v17453_v38  ;;  %v10550_v8 = vcombine.low %v11514_v15, %v17455_v3  ;;  %v10250_v10 = vld [vmem:[%s11758_s13 + $0x14] sm:$0xf]  ;;  %v11515_v21 = vld [vmem:[%s11758_s13 + $0x190] sm:$0xf]  ;;  %v17458_v63 = vld [vmem:[#allocation34_spill] sm:$0xff] }
 0x107   : > { %v10651_v49 = vcombine.low %v1620_v18, %v1623_v6  ;;  %v10553_v31 = vcombine.low %v17457_v44, %v17456_v33  ;;  %v10650_v50 = vcombine.low %v1614_v35, %v1617_v28  ;;  %v17460_v62 = vld [vmem:[#allocation35_spill] sm:$0xff]  ;;  %v11516_v58 = vld [vmem:[%s11758_s13 + $0x1a4] sm:$0xf]  ;;  %v17461_v7 = vld [vmem:[#allocation37_spill] sm:$0xff]  ;;  %v10653_v25 = vcombine.low %v12793_v11, %v12796_v1  ;;  %v12824_v35 = vpop.permute.xlu0 %4664 }
 0x108   : > { %v10555_v36 = vcombine.low %v17460_v62, %v17459_v45  ;;  %v10554_v57 = vcombine.low %v11516_v58, %v17461_v7  ;;  %v17462_v2 = vld [vmem:[#allocation38_spill] sm:$0xff]  ;;  %v17464_v6 = vld [vmem:[#allocation39_spill] sm:$0xff]  ;;  %v17466_v39 = vld [vmem:[#allocation44_spill] sm:$0xff]  ;;  %v1752_v41 = vshrl.u32 %v12793_v11, 16  ;;  %v1762_v3 = vshrl.u32 %v12796_v1, 16 }
 0x109   : > { %4884 = vrot.lane.b32.xlu0 %v10648_v55, %s11670_s15  ;;  %v10552_v55 = vcombine.low %v11515_v21, %v17458_v63  ;;  %4890 = vrot.lane.b32.xlu1 %v10651_v49, %s11670_s15  ;;  %v12828_v18 = vsel %vm6132_vm6, %v10544_v60, %v17462_v2  ;;  %v12832_v14 = vsel %vm6132_vm6, %v10547_v16, %v17464_v6  ;;  %v12839_v49 = vpop.permute.xlu1 %4670  ;;  %v17468_v28 = vld [vmem:[#allocation46_spill] sm:$0xff]  ;;  %v1758_v16 = vshll.u32 %v12796_v1, 16  ;;  %v12853_v29 = vld [vmem:[%s11758_s13 + $0x30] sm:$0xf]  ;;  %v12856_v15 = vld [vmem:[%s11758_s13 + $0x34] sm:$0xf] }
 0x10a   : > { %17463 = vst [vmem:[#allocation6_spill] sm:$0xff] %v12828_v18  ;;  %17465 = vst [vmem:[#allocation13_spill] sm:$0xff] %v12832_v14  ;;  %v12836_v4 = vsel %vm6132_vm6, %v10546_v37, %v17466_v39  ;;  %v12843_v38 = vsel %vm6132_vm6, %v10549_v27, %v17468_v28  ;;  %v12847_v60 = vsel %vm6132_vm6, %v10548_v56, %v12607_v59  ;;  %v17479_v45 = vld [vmem:[#allocation42_spill] sm:$0xff]  ;;  %v17485_v7 = vld [vmem:[#allocation43_spill] sm:$0xff]  ;;  %vm7684_vm4 = vsmask.f32 7938 }
 0x10b   : > { %17467 = vst [vmem:[#allocation23_spill] sm:$0xff] %v12836_v4  ;;  %17469 = vst [vmem:[#allocation7_spill] sm:$0xff] %v12843_v38  ;;  %v10652_v37 = vcombine.low %v10250_v10, %v12813_v20  ;;  %v12860_v27 = vsel %vm6132_vm6, %v10551_v19, %v12612_v52  ;;  %v12864_v59 = vsel %vm6132_vm6, %v10550_v8, %v12646_v43  ;;  %v1729_v43 = vshrl.u32 %v10250_v10, 16  ;;  %v12886_v19 = vld [vmem:[%s11758_s13 + $0x2c] sm:$0xf]  ;;  %v12901_v58 = vpop.permute.xlu0 %4668 }
 0x10c   : > { %17470 = vst [vmem:[#allocation15_spill] sm:$0xff] %v12847_v60  ;;  %17471 = vst [vmem:[#allocation14_spill] sm:$0xff] %v12860_v27  ;;  %v12868_v56 = vsel %vm6132_vm6, %v10553_v31, %v12655_v48  ;;  %v12873_v33 = vsel %vm6132_vm6, %v10552_v55, %v12685_v53  ;;  %v12877_v44 = vsel %vm6132_vm6, %v10555_v36, %v12692_v23  ;;  %v10254_v48 = vld [vmem:[%s11758_s13 + $0x28] sm:$0xf]  ;;  %v12888_v8 = vrot.slane %v1752_v41, 4  ;;  %v17477_v31 = vld [vmem:[#allocation41_spill] sm:$0xff] }
 0x10d   : > { %4888 = vrot.lane.b32.xlu0 %v10650_v50, %s11670_s15  ;;  %17472 = vst [vmem:[#allocation8_spill] sm:$0xff] %v12864_v59  ;;  %17473 = vst [vmem:[#allocation16_spill] sm:$0xff] %v12868_v56  ;;  %v12881_v52 = vsel %vm6132_vm6, %v10554_v57, %v12725_v51  ;;  %5034 = vrot.lane.b32.xlu1 %v10653_v25, %s11671_s16  ;;  %v1732_v53 = vshll.u32 %v10250_v10, 16  ;;  %v17478_v50 = vld [vmem:[#allocation40_spill] sm:$0xff]  ;;  %v10655_v23 = vcombine.low %v12853_v29, %v12856_v15  ;;  %v11517_v55 = vld [vmem:[%s11758_s13 + $0x1b8] sm:$0xf]  ;;  %v12911_v6 = vpop.permute.xlu1 %4674 }
 0x10e   : > { %17474 = vst [vmem:[#allocation18_spill] sm:$0xff] %v12873_v33  ;;  %17475 = vst [vmem:[#allocation17_spill] sm:$0xff] %v12877_v44  ;;  %v10557_v21 = vcombine.low %v17478_v50, %v17477_v31  ;;  %v12894_v63 = vrot.slane %v1758_v16, 5  ;;  %v10556_v62 = vcombine.low %v11517_v55, %v17479_v45  ;;  %v1792_v36 = vshll.u32 %v12853_v29, 16  ;;  %v12909_v2 = vld [vmem:[%s11758_s13 + $0x44] sm:$0xf] }
 0x10f   : > { %17476 = vst [vmem:[#allocation9_spill] sm:$0xff] %v12881_v52  ;;  %v12903_v10 = vrot.slane %v1762_v3, 4  ;;  %v10654_v25 = vcombine.low %v10254_v48, %v12886_v19  ;;  %17480 = vst [vmem:[#allocation10_spill] sm:$0xff] %v12909_v2  ;;  %v12913_v39 = vrot.slane %v1729_v43, 4  ;;  %v1773_v28 = vshrl.u32 %v10254_v48, 16  ;;  %v17484_v45 = vld [vmem:[#allocation45_spill] sm:$0xff] }
 0x110   : > { %v1776_v16 = vshll.u32 %v10254_v48, 16  ;;  %v12920_v3 = vrot.slane %v1732_v53, 5  ;;  %v12924_v31 = vsel %vm6132_vm6, %v10557_v21, %v12732_v26  ;;  %v1796_v50 = vshrl.u32 %v12853_v29, 16  ;;  %v12950_v26 = vpop.permute.xlu0 %4672  ;;  %v11520_v27 = vld [vmem:[%s11758_s13 + $0x1ec] sm:$0xf] }
 0x111   : > { %5032 = vrot.lane.b32.xlu0 %v10652_v37, %s11671_s16  ;;  %5038 = vrot.lane.b32.xlu1 %v10655_v23, %s11671_s16  ;;  %v12918_v37 = vld [vmem:[%s11758_s13 + $0x48] sm:$0xf]  ;;  %17482 = vst [vmem:[#allocation12_spill] sm:$0xff] %v12924_v31  ;;  %v1802_v43 = vshll.u32 %v12856_v15, 16  ;;  %v12930_v23 = vsel %vm6132_vm6, %v10556_v62, %v12768_v17  ;;  %v12932_v55 = vrot.slane %v1792_v36, 5  ;;  %v1806_v48 = vshrl.u32 %v12856_v15, 16 }
 0x112   : > { %17481 = vst [vmem:[#allocation11_spill] sm:$0xff] %v12918_v37  ;;  %17483 = vst [vmem:[#allocation32_spill] sm:$0xff] %v12930_v23  ;;  %v1782_v53 = vshll.u32 %v12886_v19, 16  ;;  %v1786_v21 = vshrl.u32 %v12886_v19, 16  ;;  %v10559_v51 = vcombine.low %v17485_v7, %v17484_v45  ;;  %v10657_v41 = vcombine.low %v12909_v2, %v12918_v37  ;;  %v10258_v17 = vld [vmem:[%s11758_s13 + $0x3c] sm:$0xf]  ;;  %v12959_v36 = vpop.permute.xlu1 %4678 }
 0x113   : > { %v12945_v62 = vld [vmem:[%s11758_s13 + $0x40] sm:$0xf]  ;;  %v1775_v57 = vrot.slane %v1773_v28, 4  ;;  %v1778_v23 = vrot.slane %v1776_v16, 5  ;;  %v11518_v31 = vld [vmem:[%s11758_s13 + $0x1cc] sm:$0xf] }
 0x114   : > { %17486 = vst [vmem:[#allocation33_spill] sm:$0xff] %v12945_v62  ;;  %v12952_v52 = vrot.slane %v1796_v50, 4  ;;  %v12954_v7 = vrot.slane %v1802_v43, 5  ;;  %v1836_v45 = vshll.u32 %v12909_v2, 16  ;;  %v1840_v44 = vshrl.u32 %v12909_v2, 16 }
 0x115   : > { %5036 = vrot.lane.b32.xlu0 %v10654_v25, %s11671_s16  ;;  %v10558_v25 = vcombine.low %v11518_v31, %v12591_v9  ;;  %5042 = vrot.lane.b32.xlu1 %v10657_v41, %s11671_s16  ;;  %v12961_v28 = vrot.slane %v1806_v48, 4  ;;  %v12963_v16 = vrot.slane %v1782_v53, 5  ;;  %v10656_v31 = vcombine.low %v10258_v17, %v12945_v62  ;;  %v12968_v50 = vld [vmem:[%s11758_s13 + $0x58] sm:$0xf]  ;;  %v12977_v48 = vld [vmem:[%s11758_s13 + $0x5c] sm:$0xf] }
 0x116   : > { %17487 = vst [vmem:[#allocation19_spill] sm:$0xff] %v12968_v50  ;;  %v12970_v43 = vrot.slane %v1786_v21, 4  ;;  %v12974_v33 = vsel %vm6132_vm6, %v10559_v51, %v12774_v47  ;;  %v1817_v41 = vshrl.u32 %v10258_v17, 16  ;;  %v1820_v56 = vshll.u32 %v10258_v17, 16  ;;  %17489 = vst [vmem:[#allocation20_spill] sm:$0xff] %v12977_v48 }
 0x117   : > { %17488 = vst [vmem:[#allocation21_spill] sm:$0xff] %v12974_v33  ;;  %v1779_v53 = vor.u32 %v1778_v23, %v1775_v57  ;;  %v12981_v9 = vsel %vm6132_vm6, %v10558_v25, %v12824_v35  ;;  %v1846_v59 = vshll.u32 %v12918_v37, 16  ;;  %v1850_v21 = vshrl.u32 %v12918_v37, 16  ;;  %v10262_v47 = vld [vmem:[%s11758_s13 + $0x50] sm:$0xf] }
 0x118   : > { %17490 = vst [vmem:[#allocation22_spill] sm:$0xff] %v12981_v9  ;;  %v12987_v51 = vrot.slane %v1836_v45, 5  ;;  %v12989_v17 = vrot.slane %v1840_v44, 4  ;;  %v1826_v57 = vshll.u32 %v12945_v62, 16  ;;  %v12994_v23 = vld [vmem:[%s11758_s13 + $0x54] sm:$0xf]  ;;  %v10659_v60 = vcombine.low %v12968_v50, %v12977_v48  ;;  %v13002_v45 = vpop.permute.xlu0 %4676 }
 0x119   : > { %5040 = vrot.lane.b32.xlu0 %v10656_v31, %s11671_s16  ;;  %17493 = vst [vmem:[#allocation26_spill] sm:$0xff] %v12994_v23  ;;  %v1830_v25 = vshrl.u32 %v12945_v62, 16  ;;  %v11519_v9 = vld [vmem:[%s11758_s13 + $0x1e8] sm:$0xf]  ;;  %v1819_v44 = vrot.slane %v1817_v41, 4  ;;  %v1822_v38 = vrot.slane %v1820_v56, 5 }
 0x11a   : > { %17491 = vst [vmem:[#allocation25_spill] sm:$0xff] %v12987_v51  ;;  %17492 = vst [vmem:[#allocation24_spill] sm:$0xff] %v12989_v17  ;;  %v10561_v31 = vcombine.low %v11519_v9, %v11520_v27  ;;  %v11521_v33 = vld [vmem:[%s11758_s13 + $0x1e0] sm:$0xf]  ;;  %v11522_v4 = vld [vmem:[%s11758_s13 + $0x1e4] sm:$0xf]  ;;  %v13007_v2 = vpop.permute.xlu1 %4682  ;;  %5046 = vrot.lane.b32.xlu1 %v10659_v60, %s11671_s16  ;;  %v10658_v9 = vcombine.low %v10262_v47, %v12994_v23 }
 0x11b   : > { %v10560_v14 = vcombine.low %v11521_v33, %v11522_v4  ;;  %v1880_v18 = vshll.u32 %v12968_v50, 16  ;;  %17494 = vst [vmem:[#allocation28_spill] sm:$0xff] %v13007_v2  ;;  %v13009_v35 = vrot.slane %v1779_v53, 4  ;;  %v13011_v37 = vrot.slane %v1846_v59, 5  ;;  %v13021_v17 = vld [vmem:[%s11758_s13 + $0x6c] sm:$0xf] }
 0x11c   : > { %v1861_v27 = vshrl.u32 %v10262_v47, 16  ;;  %v13015_v41 = vrot.slane %v1850_v21, 4  ;;  %v13017_v56 = vrot.slane %v1826_v57, 5  ;;  %v1864_v33 = vshll.u32 %v10262_v47, 16  ;;  %17498 = vst [vmem:[#allocation30_spill] sm:$0xff] %v13021_v17 }
 0x11d   : > { %17495 = vst [vmem:[#allocation27_spill] sm:$0xff] %v13011_v37  ;;  %v13023_v53 = vrot.slane %v1830_v25, 4  ;;  %v13027_v59 = vsel %vm6132_vm6, %v10561_v31, %v12839_v49  ;;  %v1884_v60 = vshrl.u32 %v12968_v50, 16  ;;  %v1890_v21 = vshll.u32 %v12977_v48, 16  ;;  %5044 = vrot.lane.b32.xlu0 %v10658_v9, %s11671_s16  ;;  %v13033_v57 = vld [vmem:[%s11758_s13 + $0x70] sm:$0xf] }
 0x11e   : > { %17496 = vst [vmem:[#allocation29_spill] sm:$0xff] %v13015_v41  ;;  %17497 = vst [vmem:[#allocation31_spill] sm:$0xff] %v13017_v56  ;;  %v1823_v47 = vor.u32 %v1822_v38, %v1819_v44  ;;  %v13037_v25 = vsel %vm6132_vm6, %v10560_v14, %v12901_v58  ;;  %v13039_v4 = vrot.slane %v1880_v18, 5  ;;  %v1894_v49 = vshrl.u32 %v12977_v48, 16  ;;  %v10266_v31 = vld [vmem:[%s11758_s13 + $0x64] sm:$0xf] }
 0x11f   : > { %17499 = vst [vmem:[#allocation34_spill] sm:$0xff] %v13023_v53  ;;  %17500 = vst [vmem:[#allocation36_spill] sm:$0xff] %v13027_v59  ;;  %v1863_v59 = vrot.slane %v1861_v27, 4  ;;  %v1870_v41 = vshll.u32 %v12994_v23, 16  ;;  %v1874_v9 = vshrl.u32 %v12994_v23, 16  ;;  %v13049_v38 = vpop.permute.xlu0 %4680  ;;  %v1866_v44 = vrot.slane %v1864_v33, 5 }
 0x120   : > { %17501 = vst [vmem:[#allocation35_spill] sm:$0xff] %v13033_v57  ;;  %17502 = vst [vmem:[#allocation37_spill] sm:$0xff] %v13037_v25  ;;  %v13047_v37 = vld [vmem:[%s11758_s13 + $0x68] sm:$0xf]  ;;  %v11523_v51 = vld [vmem:[%s11758_s13 + $0x1fc] sm:$0xf]  ;;  %v10661_v62 = vcombine.low %v13021_v17, %v13033_v57 }
 0x121   : > { %17503 = vst [vmem:[#allocation38_spill] sm:$0xff] %v13039_v4  ;;  %17504 = vst [vmem:[#allocation39_spill] sm:$0xff] %v13047_v37  ;;  %v11524_v14 = vld [vmem:[%s11758_s13 + $0x200] sm:$0xf]  ;;  %v11525_v18 = vld [vmem:[%s11758_s13 + $0x1f4] sm:$0xf] }
 0x122   : > { %17505 = vst [vmem:[#allocation44_spill] sm:$0xff] %v13049_v38  ;;  %v10563_v58 = vcombine.low %v11523_v51, %v11524_v14  ;;  %v11526_v25 = vld [vmem:[%s11758_s13 + $0x1f8] sm:$0xf]  ;;  %v13057_v2 = vpop.permute.xlu1 %4686  ;;  %v13059_v27 = vrot.slane %v1884_v60, 4  ;;  %v13061_v50 = vrot.slane %v1890_v21, 5  ;;  %v1924_v5 = vshll.u32 %v13021_v17, 16  ;;  %5050 = vrot.lane.b32.xlu1 %v10661_v62, %s11671_s16 }
 0x123   : > { %v10562_v4 = vcombine.low %v11525_v18, %v11526_v25  ;;  %17506 = vst [vmem:[#allocation46_spill] sm:$0xff] %v13057_v2  ;;  %v1928_v33 = vshrl.u32 %v13021_v17, 16  ;;  %v13065_v38 = vrot.slane %v1823_v47, 4  ;;  %v13067_v51 = vrot.slane %v1894_v49, 4  ;;  %v13090_v49 = vld [vmem:[%s11758_s13 + $0x84] sm:$0xf] }
 0x124   : > { %17507 = vst [vmem:[#allocation41_spill] sm:$0xff] %v13059_v27  ;;  %17508 = vst [vmem:[#allocation40_spill] sm:$0xff] %v13061_v50  ;;  %v10660_v14 = vcombine.low %v10266_v31, %v13047_v37  ;;  %v13072_v60 = vrot.slane %v1870_v41, 5  ;;  %v1905_v18 = vshrl.u32 %v10266_v31, 16  ;;  %v1908_v2 = vshll.u32 %v10266_v31, 16 }
 0x125   : > { %17509 = vst [vmem:[#allocation42_spill] sm:$0xff] %v13065_v38  ;;  %17510 = vst [vmem:[#allocation45_spill] sm:$0xff] %v13067_v51  ;;  %v1867_v50 = vor.u32 %v1866_v44, %v1863_v59  ;;  %v13075_v27 = vrot.slane %v1874_v9, 4  ;;  %v13079_v47 = vsel %vm6132_vm6, %v10563_v58, %v12911_v6  ;;  %v13083_v62 = vsel %vm6132_vm6, %v10562_v4, %v12950_v26  ;;  %v13087_v41 = vld [vmem:[%s11758_s13 + $0x80] sm:$0xf] }
 0x126   : > { %17511 = vst [vmem:[#allocation43_spill] sm:$0xff] %v13072_v60  ;;  %17513 = vst [vmem:[#allocation48_spill] sm:$0xff] %v13079_v47  ;;  %5048 = vrot.lane.b32.xlu0 %v10660_v14, %s11671_s16  ;;  %v13092_v59 = vrot.slane %v1924_v5, 5  ;;  %v13094_v31 = vrot.slane %v1928_v33, 4  ;;  %v1934_v6 = vshll.u32 %v13033_v57, 16  ;;  %v1938_v9 = vshrl.u32 %v13033_v57, 16 }
 0x127   : > { %17512 = vst [vmem:[#allocation47_spill] sm:$0xff] %v13075_v27  ;;  %17514 = vst [vmem:[#allocation49_spill] sm:$0xff] %v13083_v62  ;;  %v10270_v44 = vld [vmem:[%s11758_s13 + $0x78] sm:$0xf]  ;;  %v13099_v26 = vpop.permute.xlu0 %4684  ;;  %v1914_v58 = vshll.u32 %v13047_v37, 16  ;;  %v1918_v14 = vshrl.u32 %v13047_v37, 16  ;;  %v10663_v4 = vcombine.low %v13087_v41, %v13090_v49 }
 0x128   : > { %17515 = vst [vmem:[#allocation50_spill] sm:$0xff] %v13087_v41  ;;  %17516 = vst [vmem:[#allocation51_spill] sm:$0xff] %v13090_v49  ;;  %v11527_v25 = vld [vmem:[%s11758_s13 + $0x210] sm:$0xf]  ;;  %v11528_v5 = vld [vmem:[%s11758_s13 + $0x214] sm:$0xf] }
 0x129   : > { %17517 = vst [vmem:[#allocation52_spill] sm:$0xff] %v13092_v59  ;;  %17518 = vst [vmem:[#allocation53_spill] sm:$0xff] %v13094_v31  ;;  %v10565_v21 = vcombine.low %v11527_v25, %v11528_v5  ;;  %v13107_v59 = vld [vmem:[%s11758_s13 + $0x7c] sm:$0xf]  ;;  %v1907_v31 = vrot.slane %v1905_v18, 4  ;;  %v1910_v62 = vrot.slane %v1908_v2, 5  ;;  %5054 = vrot.lane.b32.xlu1 %v10663_v4, %s11671_s16 }
 0x12a   : > { %17519 = vst [vmem:[#allocation54_spill] sm:$0xff] %v13099_v26  ;;  %17520 = vst [vmem:[#allocation55_spill] sm:$0xff] %v13107_v59  ;;  %v13109_v33 = vpop.permute.xlu1 %4690  ;;  %v11529_v47 = vld [vmem:[%s11758_s13 + $0x208] sm:$0xf]  ;;  %v11530_v48 = vld [vmem:[%s11758_s13 + $0x20c] sm:$0xf]  ;;  %v10662_v2 = vcombine.low %v10270_v44, %v13107_v59 }
 0x12b   : > { %17521 = vst [vmem:[#allocation56_spill] sm:$0xff] %v13109_v33  ;;  %v10564_v51 = vcombine.low %v11529_v47, %v11530_v48  ;;  %v13115_v26 = vrot.slane %v1867_v50, 4  ;;  %v1968_v17 = vshll.u32 %v13087_v41, 16  ;;  %v1949_v23 = vshrl.u32 %v10270_v44, 16  ;;  %v13125_v48 = vld [vmem:[%s11758_s13 + $0x94] sm:$0xf] }
 0x12c   : > { %v1952_v25 = vshll.u32 %v10270_v44, 16  ;;  %v13118_v5 = vrot.slane %v1934_v6, 5  ;;  %v1972_v18 = vshrl.u32 %v13087_v41, 16  ;;  %17524 = vst [vmem:[#allocation59_spill] sm:$0xff] %v13125_v48  ;;  %v13127_v47 = vrot.slane %v1938_v9, 4  ;;  %5052 = vrot.lane.b32.xlu0 %v10662_v2, %s11671_s16 }
 0x12d   : > { %17522 = vst [vmem:[#allocation57_spill] sm:$0xff] %v13115_v26  ;;  %v13129_v50 = vrot.slane %v1914_v58, 5  ;;  %v13131_v27 = vrot.slane %v1918_v14, 4  ;;  %v1911_v57 = vor.u32 %v1910_v62, %v1907_v31  ;;  %v13141_v44 = vsel %vm6132_vm6, %v10565_v21, %v12959_v36  ;;  %v10274_v31 = vld [vmem:[%s11758_s13 + $0x8c] sm:$0xf] }
 0x12e   : > { %17523 = vst [vmem:[#allocation58_spill] sm:$0xff] %v13118_v5  ;;  %17525 = vst [vmem:[#allocation60_spill] sm:$0xff] %v13127_v47  ;;  %v13135_v5 = vld [vmem:[%s11758_s13 + $0x98] sm:$0xf]  ;;  %v13137_v33 = vpop.permute.xlu1 %4814  ;;  %v13145_v9 = vsel %vm6132_vm6, %v10564_v51, %v13002_v45  ;;  %v1978_v4 = vshll.u32 %v13090_v49, 16  ;;  %v13151_v14 = vrot.slane %v1968_v17, 5 }
 0x12f   : > { %17526 = vst [vmem:[#allocation61_spill] sm:$0xff] %v13129_v50  ;;  %17527 = vst [vmem:[#allocation62_spill] sm:$0xff] %v13131_v27  ;;  %v13149_v58 = vpop.permute.xlu0 %4688  ;;  %v1982_v6 = vshrl.u32 %v13090_v49, 16  ;;  %v1951_v47 = vrot.slane %v1949_v23, 4  ;;  %v1954_v62 = vrot.slane %v1952_v25, 5  ;;  %v13155_v37 = vrot.slane %v1972_v18, 4 }
 0x130   : > { %17528 = vst [vmem:[#allocation63_spill] sm:$0xff] %v13135_v5  ;;  %17529 = vst [vmem:[#allocation64_spill] sm:$0xff] %v13141_v44  ;;  %v1958_v36 = vshll.u32 %v13107_v59, 16  ;;  %v1962_v45 = vshrl.u32 %v13107_v59, 16  ;;  %v10665_v51 = vcombine.low %v13125_v48, %v13135_v5  ;;  %v13162_v21 = vld [vmem:[%s11758_s13 + $0x90] sm:$0xf] }
 0x131   : > { %17530 = vst [vmem:[#allocation65_spill] sm:$0xff] %v13145_v9  ;;  %17531 = vst [vmem:[#allocation66_spill] sm:$0xff] %v13149_v58  ;;  %v2012_v23 = vshll.u32 %v13125_v48, 16  ;;  %v2016_v25 = vshrl.u32 %v13125_v48, 16  ;;  %v13170_v58 = vrot.slane %v1911_v57, 4  ;;  %v13172_v9 = vrot.slane %v1978_v4, 5 }
 0x132   : > { %17532 = vst [vmem:[#allocation67_spill] sm:$0xff] %v13151_v14  ;;  %17533 = vst [vmem:[#allocation68_spill] sm:$0xff] %v13155_v37  ;;  %v13168_v18 = vpop.permute.xlu1 %4818  ;;  %5058 = vrot.lane.b32.xlu1 %v10665_v51, %s11671_s16  ;;  %v1993_v44 = vshrl.u32 %v10274_v31, 16  ;;  %v1996_v37 = vshll.u32 %v10274_v31, 16  ;;  %v13177_v17 = vrot.slane %v1982_v6, 4  ;;  %v1955_v2 = vor.u32 %v1954_v62, %v1951_v47 }
 0x133   : > { %17534 = vst [vmem:[#allocation69_spill] sm:$0xff] %v13162_v21  ;;  %17535 = vst [vmem:[#allocation70_spill] sm:$0xff] %v13170_v58  ;;  %v13175_v14 = vpop.permute.xlu0 %4812  ;;  %v2022_v49 = vshll.u32 %v13135_v5, 16  ;;  %v10664_v41 = vcombine.low %v10274_v31, %v13162_v21  ;;  %v13182_v27 = vld [vmem:[%s11758_s13 + $0xa8] sm:$0xf]  ;;  %v13184_v57 = vrot.slane %v1958_v36, 5 }
 0x134   : > { %17536 = vst [vmem:[#allocation71_spill] sm:$0xff] %v13172_v9  ;;  %17537 = vst [vmem:[#allocation72_spill] sm:$0xff] %v13177_v17  ;;  %v13186_v4 = vrot.slane %v1962_v45, 4  ;;  %v2026_v9 = vshrl.u32 %v13135_v5, 16  ;;  %v13191_v58 = vld [vmem:[%s11758_s13 + $0xac] sm:$0xf] }
 0x135   : > { %17538 = vst [vmem:[#allocation73_spill] sm:$0xff] %v13182_v27  ;;  %17539 = vst [vmem:[#allocation74_spill] sm:$0xff] %v13184_v57  ;;  %v13193_v6 = vrot.slane %v2012_v23, 5  ;;  %v13195_v47 = vrot.slane %v2016_v25, 4  ;;  %v2002_v31 = vshll.u32 %v13162_v21, 16  ;;  %5056 = vrot.lane.b32.xlu0 %v10664_v41, %s11671_s16  ;;  %v1995_v51 = vrot.slane %v1993_v44, 4 }
 0x136   : > { %17540 = vst [vmem:[#allocation75_spill] sm:$0xff] %v13186_v4  ;;  %17541 = vst [vmem:[#allocation76_spill] sm:$0xff] %v13191_v58  ;;  %v10278_v36 = vld [vmem:[%s11758_s13 + $0xa0] sm:$0xf]  ;;  %v13201_v17 = vpop.permute.xlu1 %4822  ;;  %v1998_v59 = vrot.slane %v1996_v37, 5  ;;  %v2006_v4 = vshrl.u32 %v13162_v21, 16  ;;  %v10667_v41 = vcombine.low %v13182_v27, %v13191_v58 }
 0x137   : > { %17542 = vst [vmem:[#allocation77_spill] sm:$0xff] %v13193_v6  ;;  %17543 = vst [vmem:[#allocation78_spill] sm:$0xff] %v13195_v47  ;;  %v13206_v57 = vld [vmem:[%s11758_s13 + $0xa4] sm:$0xf]  ;;  %v13208_v23 = vpop.permute.xlu0 %4816  ;;  %v13210_v25 = vrot.slane %v1955_v2, 4  ;;  %v13212_v62 = vrot.slane %v2022_v49, 5 }
 0x138   : > { %17544 = vst [vmem:[#allocation79_spill] sm:$0xff] %v13206_v57  ;;  %v2056_v48 = vshll.u32 %v13182_v27, 16  ;;  %v13217_v47 = vrot.slane %v2026_v9, 4  ;;  %v2060_v44 = vshrl.u32 %v13182_v27, 16  ;;  %v2037_v37 = vshrl.u32 %v10278_v36, 16  ;;  %5062 = vrot.lane.b32.xlu1 %v10667_v41, %s11671_s16 }
 0x139   : > { %17545 = vst [vmem:[#allocation80_spill] sm:$0xff] %v13210_v25  ;;  %17546 = vst [vmem:[#allocation81_spill] sm:$0xff] %v13212_v62  ;;  %v2040_v45 = vshll.u32 %v10278_v36, 16  ;;  %v13220_v5 = vrot.slane %v2002_v31, 5  ;;  %v2066_v2 = vshll.u32 %v13191_v58, 16  ;;  %v10666_v49 = vcombine.low %v10278_v36, %v13206_v57 }
 0x13a   : > { %17547 = vst [vmem:[#allocation82_spill] sm:$0xff] %v13217_v47  ;;  %v13226_v62 = vpop.permute.xlu1 %4826  ;;  %v1999_v25 = vor.u32 %v1998_v59, %v1995_v51  ;;  %v13228_v9 = vrot.slane %v2006_v4, 4  ;;  %v2039_v47 = vrot.slane %v2037_v37, 4  ;;  %v13232_v31 = vrot.slane %v2056_v48, 5 }
 0x13b   : > { %17548 = vst [vmem:[#allocation83_spill] sm:$0xff] %v13220_v5  ;;  %v2042_v50 = vrot.slane %v2040_v45, 5  ;;  %v13230_v26 = vpop.permute.xlu0 %4820  ;;  %v2070_v6 = vshrl.u32 %v13191_v58, 16  ;;  %5060 = vrot.lane.b32.xlu0 %v10666_v49, %s11671_s16  ;;  %v1735_v36 = vor.u32 %v12920_v3, %v12913_v39  ;;  %v1738_v41 = vshll.u32 %v12813_v20, 16  ;;  %v10282_v45 = vld [vmem:[%s11758_s13 + $0xb4] sm:$0xf] }
 0x13c   : > { %17549 = vst [vmem:[#allocation84_spill] sm:$0xff] %v13228_v9  ;;  %17550 = vst [vmem:[#allocation85_spill] sm:$0xff] %v13232_v31  ;;  %v13239_v21 = vrot.slane %v2060_v44, 4  ;;  %v2046_v4 = vshll.u32 %v13206_v57, 16  ;;  %v17552_v51 = vshrl.u32 %v12813_v20, 16  ;;  %v13246_v37 = vrot.slane %v2066_v2, 5 }
 0x13d   : > { %v1736_v31 = vrot.slane %v1735_v36, 4  ;;  %v1740_v49 = vrot.slane %v1738_v41, 5  ;;  %v1748_v39 = vshll.u32 %v12793_v11, 16  ;;  %v11393_v44 = vld [vmem:[%s17279_s1] sm:$0xff]   ;;  %v13255_v59 = vrot.slane %v1999_v25, 4 }
 0x13e   : > { %17551 = vst [vmem:[#allocation86_spill] sm:$0xff] %v13239_v21  ;;  %v1744_v48 = vrot.slane %v17552_v51, 4  ;;  %17553 = vst [vmem:[#allocation87_spill] sm:$0xff] %v13246_v37  ;;  %v13249_v3 = vpop.permute.xlu1 %4830  ;;  %v2043_v51 = vor.u32 %v2042_v50, %v2039_v47  ;;  %v2050_v2 = vshrl.u32 %v13206_v57, 16  ;;  %v13260_v37 = vld [vmem:[%s11758_s13 + $0xb8] sm:$0xf]  ;;  %11157 = vmatprep.subr.bf16.mxu0 %v11393_v44 }
 0x13f   : > { %17554 = vst [vmem:[#allocation88_spill] sm:$0xff] %v13255_v59  ;;  %17555 = vst [vmem:[#allocation89_spill] sm:$0xff] %v13260_v37  ;;  %v13262_v36 = vpop.permute.xlu0 %4824  ;;  %v13266_v41 = vrot.slane %v2070_v6, 4  ;;  %v1750_v5 = vrot.slane %v1748_v39, 5  ;;  %v10350_v25 = vld [vmem:[%s11758_s13 + $0x14] sm:$0xe]  ;;  %11158 = vmatpush3.bf16.msra.mxu0 %v11393_v44  ;;  %v1741_v60 = vsel %vm11768_vm2, %v1736_v31, %v1740_v49  ;;  %v10668_v27 = vcombine.low %v10282_v45, %v13260_v37 }
 0x140   : > { %v1745_v9 = vor.u32 %v1744_v48, %v1740_v49  ;;  %v13270_v59 = vrot.slane %v2046_v4, 5  ;;  %v2081_v50 = vshrl.u32 %v10282_v45, 16  ;;  %v2084_v47 = vshll.u32 %v10282_v45, 16  ;;  %v10330_v48 = vld [vmem:[%s11758_s13 + $0x24] sm:$0x1] }
 0x141   : > { %17556 = vst [vmem:[#allocation90_spill] sm:$0xff] %v13266_v41  ;;  %v2090_v21 = vshll.u32 %v13260_v37, 16  ;;  %v1755_v6 = vor.u32 %v12888_v8, %v1750_v5  ;;  %v13280_v41 = vrot.slane %v2043_v51, 4  ;;  %v13282_v4 = vrot.slane %v2050_v2, 4  ;;  %5064 = vrot.lane.b32.xlu0 %v10668_v27, %s11671_s16  ;;  %v13298_v2 = vld [vmem:[%s11758_s13 + $0x28] sm:$0xf] }
 0x142   : > { %17557 = vst [vmem:[#allocation91_spill] sm:$0xff] %v13270_v59  ;;  %v1746_v53 = vrot.slane %v1745_v9, 4  ;;  %v13278_v39 = vpop.permute.xlu1 %4834  ;;  %v2094_v57 = vshrl.u32 %v13260_v37, 16  ;;  %v10370_v44 = vrot.slane %v10350_v25, 9  ;;  %v11394_v9 = vld [vmem:[%s17279_s1 + $0x8] sm:$0xff]   ;;  %v17561_v45 = vrot.slane %v12813_v20, 5 }
 0x143   : > { %17559 = vst [vmem:[#allocation4_spill] sm:$0xff] %v13280_v41  ;;  %17560 = vst [vmem:[#allocation92_spill] sm:$0xff] %v13282_v4  ;;  %v13285_v59 = vpop.permute.xlu0 %4828  ;;  %v1756_v31 = vrot.slane %v1755_v6, 4  ;;  %v1765_v51 = vor.u32 %v12903_v10, %v12894_v63  ;;  %v13300_v4 = vrot.slane %v2081_v50, 4  ;;  %11159 = vmatprep.subr.bf16.mxu0 %v11394_v9  ;;  %v13309_v27 = vrot.slane %v2084_v47, 5 }
 0x144   : > { %v1751_v8 = vsel %vm11768_vm2, %v1746_v53, %v1750_v5  ;;  %v2732_v49 = vrot.slane %v17561_v45, 4  ;;  %v17562_v41 = vmov %v17561_v45  ;;  %v1768_v53 = vshll.u32 %v10330_v48, 16  ;;  %v13307_v5 = vld [vmem:[%s11758_s13 + $0x2c] sm:$0xf]  ;;  %11160 = vmatpush3.bf16.msra.mxu0 %v11394_v9  ;;  %v11395_v45 = vld [vmem:[%s17279_s1 + $0x10] sm:$0xff]  }
 0x145   : > { %v10692_v25 = vcombine.low %v1741_v60, %v1751_v8  ;;  %v2731_v38 = vsel %vm12232_vm5, %v10370_v44, %v17562_v41  ;;  %v13311_v6 = vrot.slane %v2090_v21, 5  ;;  %v17564_v10 = vrot.slane %v12793_v11, 5  ;;  %11161 = vmatprep.subr.bf16.mxu0 %v11395_v45 }
 0x146   : > { %v1766_v50 = vrot.slane %v1765_v51, 4  ;;  %v13317_v8 = vpop.permute.xlu1 %4838  ;;  %v1761_v21 = vsel %vm11768_vm2, %v1756_v31, %v12894_v63  ;;  %v1770_v41 = vrot.slane %v1768_v53, 5  ;;  %v3093_v47 = vshrl.u32 %v13298_v2, 16 }
 0x147   : > { %17563 = vst [vmem:[#allocation93_spill] sm:$0xff] %v13311_v6  ;;  %v2734_v60 = vsel %vm12232_vm5, %v2732_v49, %v17564_v10  ;;  %17565 = vst [vmem:[#allocation94_spill] sm:$0xff] %v13317_v8  ;;  %5232 = vrot.lane.b32.xlu1 %v10692_v25, %s11672_s23  ;;  %v13324_v44 = vpop.permute.xlu0 %4832  ;;  %v13329_v49 = vrot.slane %v2094_v57, 4  ;;  %v3096_v9 = vshll.u32 %v13298_v2, 16  ;;  %v3106_v51 = vshrl.u32 %v13307_v5, 16 }
 0x148   : > { %v10732_v20 = vcombine.low %v2731_v38, %v2734_v60  ;;  %v17567_v38 = vmov %v17564_v10  ;;  %v13336_v10 = vld [vmem:[%s11758_s13 + $0x30] sm:$0xf]  ;;  %v1771_v63 = vsel %vm11768_vm2, %v1766_v50, %v1770_v41  ;;  %v3095_v31 = vrot.slane %v3093_v47, 4  ;;  %v13343_v57 = vld [vmem:[%s11758_s13 + $0x34] sm:$0xf]  ;;  %11162 = vmatpush3.bf16.msra.mxu0 %v11395_v45  ;;  %v11396_v45 = vld [vmem:[%s17279_s1 + $0x18] sm:$0xff]  }
 0x149   : > { %17566 = vst [vmem:[#allocation95_spill] sm:$0xff] %v13329_v49  ;;  %v2735_v25 = vrot.slane %v17567_v38, 4  ;;  %v17568_v53 = vrot.slane %v12796_v1, 5  ;;  %v2739_v6 = vrot.slane %v10330_v48, 5  ;;  %v10693_v49 = vcombine.low %v1761_v21, %v1771_v63  ;;  %v10492_v47 = vld [vmem:[%s11758_s13 + $0x28] sm:$0xe]  ;;  %11163 = vmatprep.subr.bf16.mxu0 %v11396_v45 }
 0x14a   : > { %v3098_v8 = vrot.slane %v3096_v9, 5  ;;  %v13349_v56 = vpop.permute.xlu1 %4842  ;;  %v10772_v48 = vcombine.low %v13298_v2, %v13307_v5  ;;  %v3102_v21 = vshll.u32 %v13307_v5, 16  ;;  %v3108_v41 = vrot.slane %v3106_v51, 4 }
 0x14b   : > { %v2738_v60 = vrot.slane %v17568_v53, 4  ;;  %v17569_v11 = vmov %v17568_v53  ;;  %5432 = vrot.lane.b32.xlu1 %v10732_v20, %s11673_s29  ;;  %v13358_v1 = vpop.permute.xlu0 %4836  ;;  %5234 = vrot.lane.b32.xlu0 %v10693_v49, %s11672_s23  ;;  %v3112_v2 = vshll.u32 %v13336_v10, 16  ;;  %v13372_v63 = vsel %vm6253_vm7, %v12650_v22, %v13137_v33 }
 0x14c   : > { %v2737_v38 = vsel %vm12232_vm5, %v2735_v25, %v17569_v11  ;;  %v3099_v9 = vor.u32 %v3098_v8, %v3095_v31  ;;  %v3126_v25 = vshrl.u32 %v13343_v57, 16  ;;  %v3104_v53 = vrot.slane %v3102_v21, 5  ;;  %v10472_v31 = vld [vmem:[%s11758_s13 + $0x38] sm:$0x1]  ;;  %11164 = vmatpush3.bf16.msra.mxu0 %v11396_v45 }
 0x14d   : > { %v2740_v50 = vsel %vm12232_vm5, %v2738_v60, %v2739_v6  ;;  %v2087_v6 = vor.u32 %v13309_v27, %v13300_v4  ;;  %v3114_v49 = vrot.slane %v3112_v2, 5  ;;  %v10512_v11 = vrot.slane %v10492_v47, 9 }
 0x14e   : > { %v10733_v20 = vcombine.low %v2737_v38, %v2740_v50  ;;  %v3100_v60 = vrot.slane %v3099_v9, 4  ;;  %v4094_v8 = vrot.slane %v13307_v5, 5  ;;  %v13376_v38 = vpop.permute.xlu1 %4846  ;;  %v3109_v4 = vor.u32 %v3108_v41, %v3104_v53 }
 0x14f   : > { %5652 = vrot.lane.b32.xlu1 %v10772_v48, %s11674_s11  ;;  %v4097_v27 = vrot.slane %v13336_v10, 5  ;;  %v3116_v22 = vshrl.u32 %v13336_v10, 16  ;;  %v3122_v33 = vshll.u32 %v13343_v57, 16  ;;  %v13382_v50 = vpop.permute.xlu0 %4840  ;;  %v10773_v21 = vcombine.low %v13336_v10, %v13343_v57 }
 0x150   : > { %5434 = vrot.lane.b32.xlu0 %v10733_v20, %s11673_s29  ;;  %v3105_v5 = vsel %vm11768_vm2, %v3100_v60, %v3104_v53  ;;  %v4096_v47 = vrot.slane %v4094_v8, 4  ;;  %v3128_v48 = vrot.slane %v3126_v25, 4  ;;  %v3110_v41 = vrot.slane %v3109_v4, 4 }
 0x151   : > { %v3118_v45 = vrot.slane %v3116_v22, 4  ;;  %v3124_v9 = vrot.slane %v3122_v33, 5  ;;  %v3132_v2 = vshll.u32 %v10472_v31, 16  ;;  %v13389_v51 = vrot.slane %v2087_v6, 4 }
 0x152   : > { %v13394_v37 = vsel %vm6253_vm7, %v12621_v46, %v13175_v14  ;;  %v4095_v20 = vsel %vm12232_vm5, %v10512_v11, %v4094_v8  ;;  %v1785_v10 = vsel %vm11768_vm2, %v13009_v35, %v12963_v16  ;;  %v13402_v25 = vpop.permute.xlu1 %4850  ;;  %v3115_v53 = vsel %vm11768_vm2, %v3110_v41, %v3114_v49  ;;  %v10351_v46 = vld [vmem:[%s11758_s13 + $0x28] sm:$0xe] }
 0x153   : > { %17570 = vst [vmem:[#allocation96_spill] sm:$0xff] %v13389_v51  ;;  %17571 = vst [vmem:[#allocation97_spill] sm:$0xff] %v13394_v37  ;;  %v4098_v6 = vsel %vm12232_vm5, %v4096_v47, %v4097_v27  ;;  %v3119_v60 = vor.u32 %v3118_v45, %v3114_v49  ;;  %v3129_v4 = vor.u32 %v3128_v48, %v3124_v9  ;;  %v13409_v14 = vpop.permute.xlu0 %4844  ;;  %v3134_v11 = vrot.slane %v3132_v2, 5 }
 0x154   : > { %v10812_v22 = vcombine.low %v3105_v5, %v3115_v53  ;;  %5654 = vrot.lane.b32.xlu0 %v10773_v21, %s11674_s11  ;;  %v1789_v35 = vor.u32 %v12970_v43, %v12963_v16  ;;  %v4099_v8 = vrot.slane %v4097_v27, 4  ;;  %v4100_v41 = vrot.slane %v13343_v57, 5 }
 0x155   : > { %v3120_v33 = vrot.slane %v3119_v60, 4  ;;  %v3130_v51 = vrot.slane %v3129_v4, 4  ;;  %v4103_v37 = vrot.slane %v10472_v31, 5  ;;  %v13418_v49 = vsel %vm6253_vm7, %v12641_v34, %v13168_v18  ;;  %v10331_v31 = vld [vmem:[%s11758_s13 + $0x38] sm:$0x1] }
 0x156   : > { %5852 = vrot.lane.b32.xlu1 %v10812_v22, %s11675_s12  ;;  %v10852_v5 = vcombine.low %v4095_v20, %v4098_v6  ;;  %v1790_v21 = vrot.slane %v1789_v35, 4  ;;  %v10371_v47 = vrot.slane %v10351_v46, 9  ;;  %v13421_v16 = vpop.permute.xlu1 %4854  ;;  %v4101_v34 = vsel %vm12232_vm5, %v4099_v8, %v4100_v41  ;;  %v13448_v46 = vld [vmem:[%s11758_s13 + $0x3c] sm:$0xf]  ;;  %v13451_v22 = vld [vmem:[%s11758_s13 + $0x40] sm:$0xf] }
 0x157   : > { %v3125_v43 = vsel %vm11768_vm2, %v3120_v33, %v3124_v9  ;;  %v3135_v57 = vsel %vm11768_vm2, %v3130_v51, %v3134_v11  ;;  %v4102_v18 = vrot.slane %v4100_v41, 4  ;;  %v13430_v27 = vpop.permute.xlu0 %4848  ;;  %v17572_v2 = vrot.slane %v12886_v19, 5 }
 0x158   : > { %v10813_v48 = vcombine.low %v3125_v43, %v3135_v57  ;;  %v1795_v45 = vsel %vm11768_vm2, %v1790_v21, %v12932_v55  ;;  %v1799_v60 = vor.u32 %v12952_v52, %v12932_v55  ;;  %v1809_v4 = vor.u32 %v12961_v28, %v12954_v7 }
 0x159   : > { %v2744_v9 = vsel %vm12232_vm5, %v10371_v47, %v17572_v2  ;;  %v17573_v20 = vmov %v17572_v2  ;;  %v10694_v53 = vcombine.low %v1785_v10, %v1795_v45  ;;  %v4104_v6 = vsel %vm12232_vm5, %v4102_v18, %v4103_v37  ;;  %v13489_v18 = vld [vmem:[%s11758_s13 + $0x44] sm:$0xf] }
 0x15a   : > { %v2745_v51 = vrot.slane %v17573_v20, 4  ;;  %v13456_v11 = vsel %vm6253_vm7, %v12604_v13, %v13208_v23  ;;  %6052 = vrot.lane.b32.xlu1 %v10852_v5, %s11676_s14  ;;  %5854 = vrot.lane.b32.xlu0 %v10813_v48, %s11675_s12  ;;  %v10853_v19 = vcombine.low %v4101_v34, %v4104_v6  ;;  %v17574_v52 = vrot.slane %v12853_v29, 5  ;;  %v13464_v37 = vpop.permute.xlu1 %4858 }
 0x15b   : > { %v1812_v28 = vshll.u32 %v10331_v31, 16  ;;  %v13469_v13 = vsel %vm6253_vm7, %v12659_v30, %v13201_v17  ;;  %v1800_v10 = vrot.slane %v1799_v60, 4  ;;  %v1810_v35 = vrot.slane %v1809_v4, 4  ;;  %v13471_v8 = vpop.permute.xlu0 %4852  ;;  %v10493_v4 = vld [vmem:[%s11758_s13 + $0x3c] sm:$0xe] }
 0x15c   : > { %v2747_v55 = vsel %vm12232_vm5, %v2745_v51, %v17574_v52  ;;  %v3137_v41 = vshrl.u32 %v13448_v46, 16  ;;  %v3140_v5 = vshll.u32 %v13448_v46, 16  ;;  %v3150_v21 = vshrl.u32 %v13451_v22, 16 }
 0x15d   : > { %v10734_v23 = vcombine.low %v2744_v9, %v2747_v55  ;;  %v1814_v33 = vrot.slane %v1812_v28, 5  ;;  %v13479_v47 = vsel %vm6253_vm7, %v12696_v0, %v13230_v26  ;;  %v1805_v30 = vsel %vm11768_vm2, %v1800_v10, %v12954_v7  ;;  %v13496_v7 = vld [vmem:[%s11758_s13 + $0x48] sm:$0xf] }
 0x15e   : > { %v17575_v17 = vmov %v17574_v52  ;;  %v17576_v57 = vrot.slane %v12856_v15, 5  ;;  %5236 = vrot.lane.b32.xlu1 %v10694_v53, %s11672_s23  ;;  %6054 = vrot.lane.b32.xlu0 %v10853_v19, %s11676_s14  ;;  %v3139_v26 = vrot.slane %v3137_v41, 4  ;;  %v3142_v48 = vrot.slane %v3140_v5, 5  ;;  %v13498_v29 = vpop.permute.xlu1 %4862 }
 0x15f   : > { %v2748_v43 = vrot.slane %v17575_v17, 4  ;;  %v1815_v0 = vsel %vm11768_vm2, %v1810_v35, %v1814_v33  ;;  %v2752_v45 = vrot.slane %v10331_v31, 5  ;;  %v13503_v2 = vsel %vm6253_vm7, %v12705_v24, %v13226_v62  ;;  %v13514_v53 = vpop.permute.xlu0 %4856 }
 0x160   : > { %v2751_v34 = vrot.slane %v17576_v57, 4  ;;  %v13508_v9 = vsel %vm6253_vm7, %v12714_v40, %v13262_v36  ;;  %v10695_v20 = vcombine.low %v1805_v30, %v1815_v0  ;;  %v17577_v51 = vmov %v17576_v57 }
 0x161   : > { %v2750_v31 = vsel %vm12232_vm5, %v2748_v43, %v17577_v51  ;;  %v3143_v60 = vor.u32 %v3142_v48, %v3139_v26  ;;  %v3146_v24 = vshll.u32 %v13451_v22, 16  ;;  %v3152_v62 = vrot.slane %v3150_v21, 4 }
 0x162   : > { %v2753_v6 = vsel %vm12232_vm5, %v2751_v34, %v2752_v45  ;;  %v13523_v40 = vsel %vm6253_vm7, %v12729_v12, %v13249_v3  ;;  %v3156_v36 = vshll.u32 %v13489_v18, 16  ;;  %v3170_v19 = vshrl.u32 %v13496_v7, 16  ;;  %5436 = vrot.lane.b32.xlu1 %v10734_v23, %s11673_s29  ;;  %5238 = vrot.lane.b32.xlu0 %v10695_v20, %s11672_s23  ;;  %v10473_v3 = vld [vmem:[%s11758_s13 + $0x4c] sm:$0x1]  ;;  %v13537_v10 = vpop.permute.xlu1 %4866  ;;  %v17579_v20 = vld [vmem:[#allocation42_spill] sm:$0xff] }
 0x163   : > { %v10735_v15 = vcombine.low %v2750_v31, %v2753_v6  ;;  %v13530_v52 = vsel %vm6253_vm7, %v12754_v42, %v13285_v59  ;;  %v10774_v55 = vcombine.low %v13448_v46, %v13451_v22  ;;  %v3144_v28 = vrot.slane %v3143_v60, 4  ;;  %v13546_v23 = vpop.permute.xlu0 %4860  ;;  %v17578_v45 = vld [vmem:[#allocation31_spill] sm:$0xff] }
 0x164   : > { %v3148_v12 = vrot.slane %v3146_v24, 5  ;;  %v13542_v35 = vsel %vm6253_vm7, %v12761_v32, %v13278_v39  ;;  %v10513_v33 = vrot.slane %v10493_v4, 9  ;;  %v4107_v42 = vrot.slane %v13451_v22, 5 }
 0x165   : > { %v4110_v59 = vrot.slane %v13489_v18, 5  ;;  %v3158_v5 = vrot.slane %v3156_v36, 5  ;;  %v3160_v46 = vshrl.u32 %v13489_v18, 16  ;;  %v3166_v21 = vshll.u32 %v13496_v7, 16 }
 0x166   : > { %v3153_v41 = vor.u32 %v3152_v62, %v3148_v12  ;;  %v10775_v30 = vcombine.low %v13489_v18, %v13496_v7  ;;  %v4109_v17 = vrot.slane %v4107_v42, 4  ;;  %v3172_v43 = vrot.slane %v3170_v19, 4  ;;  %5656 = vrot.lane.b32.xlu1 %v10774_v55, %s11674_s11  ;;  %5438 = vrot.lane.b32.xlu0 %v10735_v15, %s11673_s29  ;;  %v13556_v0 = vpop.permute.xlu1 %4870  ;;  %v17580_v62 = vld [vmem:[#allocation34_spill] sm:$0xff]  ;;  %v10352_v19 = vld [vmem:[%s11758_s13 + $0x3c] sm:$0xe] }
 0x167   : > { %v3176_v32 = vshll.u32 %v10473_v3, 16  ;;  %v3149_v39 = vsel %vm11768_vm2, %v3144_v28, %v3148_v12  ;;  %v3162_v57 = vrot.slane %v3160_v46, 4  ;;  %v3168_v34 = vrot.slane %v3166_v21, 5  ;;  %v13571_v31 = vpop.permute.xlu0 %4864  ;;  %v17581_v55 = vld [vmem:[#allocation94_spill] sm:$0xff]  ;;  %v17582_v28 = vld [vmem:[#allocation5_spill] sm:$0xff] }
 0x168   : > { %v3154_v22 = vrot.slane %v3153_v41, 4  ;;  %v13561_v18 = vsel %vm6253_vm7, %v12772_v61, %v13324_v44  ;;  %v4108_v26 = vsel %vm12232_vm5, %v10513_v33, %v4107_v42  ;;  %v4111_v48 = vsel %vm12232_vm5, %v4109_v17, %v4110_v59 }
 0x169   : > { %v1829_v51 = vsel %vm11768_vm2, %v17579_v20, %v17578_v45  ;;  %v3163_v60 = vor.u32 %v3162_v57, %v3158_v5  ;;  %v3173_v24 = vor.u32 %v3172_v43, %v3168_v34  ;;  %v3178_v61 = vrot.slane %v3176_v32, 5  ;;  %v17583_v32 = vld [vmem:[#allocation33_spill] sm:$0xff]  ;;  %v10332_v57 = vld [vmem:[%s11758_s13 + $0x4c] sm:$0x1] }
 0x16a   : > { %v3159_v6 = vsel %vm11768_vm2, %v3154_v22, %v3158_v5  ;;  %v1833_v4 = vor.u32 %v17580_v62, %v17578_v45  ;;  %v4112_v15 = vrot.slane %v4110_v59, 4  ;;  %v4113_v36 = vrot.slane %v13496_v7, 5  ;;  %5658 = vrot.lane.b32.xlu0 %v10775_v30, %s11674_s11  ;;  %v13590_v17 = vpop.permute.xlu1 %4874 }
 0x16b   : > { %v10814_v44 = vcombine.low %v3149_v39, %v3159_v6  ;;  %v13582_v12 = vsel %vm6253_vm7, %v17582_v28, %v17581_v55  ;;  %v3164_v33 = vrot.slane %v3163_v60, 4  ;;  %v3174_v42 = vrot.slane %v3173_v24, 4  ;;  %v13588_v21 = vpop.permute.xlu0 %4868  ;;  %v17586_v6 = vld [vmem:[#allocation24_spill] sm:$0xff] }
 0x16c   : > { %v4116_v41 = vrot.slane %v10473_v3, 5  ;;  %v10854_v5 = vcombine.low %v4108_v26, %v4111_v48  ;;  %v1834_v46 = vrot.slane %v1833_v4, 4  ;;  %v4114_v7 = vsel %vm12232_vm5, %v4112_v15, %v4113_v36  ;;  %v17585_v48 = vld [vmem:[#allocation25_spill] sm:$0xff]  ;;  %v17588_v4 = vld [vmem:[#allocation10_spill] sm:$0xff] }
 0x16d   : > { %5856 = vrot.lane.b32.xlu1 %v10814_v44, %s11675_s12  ;;  %v4115_v59 = vrot.slane %v4113_v36, 4  ;;  %v3169_v30 = vsel %vm11768_vm2, %v3164_v33, %v3168_v34  ;;  %v3179_v3 = vsel %vm11768_vm2, %v3174_v42, %v3178_v61  ;;  %v10372_v43 = vrot.slane %v10352_v19, 9  ;;  %v13607_v34 = vld [vmem:[%s11758_s13 + $0x50] sm:$0xf]  ;;  %v13618_v19 = vld [vmem:[%s11758_s13 + $0x54] sm:$0xf] }
 0x16e   : > { %v17584_v39 = vrot.slane %v17583_v32, 5  ;;  %v10815_v26 = vcombine.low %v3169_v30, %v3179_v3  ;;  %v1839_v45 = vsel %vm11768_vm2, %v1834_v46, %v17585_v48  ;;  %v1843_v60 = vor.u32 %v17586_v6, %v17585_v48  ;;  %v17591_v33 = vld [vmem:[#allocation29_spill] sm:$0xff] }
 0x16f   : > { %v4117_v20 = vsel %vm12232_vm5, %v4115_v59, %v4116_v41  ;;  %v10696_v24 = vcombine.low %v1829_v51, %v1839_v45  ;;  %v17589_v15 = vrot.slane %v17588_v4, 5  ;;  %v17590_v51 = vld [vmem:[#allocation27_spill] sm:$0xff]  ;;  %v1856_v41 = vshll.u32 %v10332_v57, 16  ;;  %v13624_v46 = vpop.permute.xlu0 %4872  ;;  %v17593_v59 = vld [vmem:[#allocation6_spill] sm:$0xff] }
 0x170   : > { %v2758_v22 = vrot.slane %v17584_v39, 4  ;;  %v10855_v61 = vcombine.low %v4114_v7, %v4117_v20  ;;  %v17587_v44 = vmov %v17584_v39  ;;  %5858 = vrot.lane.b32.xlu0 %v10815_v26, %s11675_s12  ;;  %v1844_v28 = vrot.slane %v1843_v60, 4  ;;  %v13626_v7 = vpop.permute.xlu1 %4878 }
 0x171   : > { %v2757_v62 = vsel %vm12232_vm5, %v10372_v43, %v17587_v44  ;;  %6056 = vrot.lane.b32.xlu1 %v10854_v5, %s11676_s14  ;;  %v1853_v42 = vor.u32 %v17591_v33, %v17590_v51  ;;  %17592 = vst [vmem:[#allocation31_spill] sm:$0xff] %v13626_v7  ;;  %v13631_v30 = vsel %vm6253_vm7, %v17593_v59, %v13358_v1  ;;  %v17594_v5 = vld [vmem:[#allocation13_spill] sm:$0xff]  ;;  %v3181_v43 = vshrl.u32 %v13607_v34, 16  ;;  %v17595_v1 = vld [vmem:[#allocation23_spill] sm:$0xff] }
 0x172   : > { %v2760_v36 = vsel %vm12232_vm5, %v2758_v22, %v17589_v15  ;;  %v13636_v3 = vsel %vm6253_vm7, %v17594_v5, %v13349_v56  ;;  %v3184_v32 = vshll.u32 %v13607_v34, 16  ;;  %v1849_v39 = vsel %vm11768_vm2, %v1844_v28, %v17590_v51  ;;  %v13652_v44 = vld [vmem:[%s11758_s13 + $0x58] sm:$0xf]  ;;  %v13666_v33 = vld [vmem:[%s11758_s13 + $0x5c] sm:$0xf] }
 0x173   : > { %v10736_v55 = vcombine.low %v2757_v62, %v2760_v36  ;;  %v1854_v22 = vrot.slane %v1853_v42, 4  ;;  %v1858_v26 = vrot.slane %v1856_v41, 5  ;;  %v3194_v48 = vshrl.u32 %v13618_v19, 16  ;;  %v17597_v62 = vld [vmem:[#allocation7_spill] sm:$0xff]  ;;  %v13668_v42 = vpop.permute.xlu0 %4876 }
 0x174   : > { %v13647_v45 = vsel %vm6253_vm7, %v17595_v1, %v13382_v50  ;;  %v3183_v56 = vrot.slane %v3181_v43, 4  ;;  %v3186_v20 = vrot.slane %v3184_v32, 5  ;;  %v17596_v6 = vmov %v17589_v15  ;;  %6058 = vrot.lane.b32.xlu0 %v10855_v61, %s11676_s14  ;;  %v17598_v36 = vld [vmem:[#allocation11_spill] sm:$0xff]  ;;  %17600 = vst [vmem:[#allocation42_spill] sm:$0xff] %v13668_v42  ;;  %v13670_v41 = vpop.permute.xlu1 %4882  ;;  %v10494_v1 = vld [vmem:[%s11758_s13 + $0x50] sm:$0xe] }
 0x175   : > { %v2761_v60 = vrot.slane %v17596_v6, 4  ;;  %v13657_v15 = vsel %vm6253_vm7, %v17597_v62, %v13376_v38  ;;  %5240 = vrot.lane.b32.xlu1 %v10696_v24, %s11672_s23  ;;  %v1859_v50 = vsel %vm11768_vm2, %v1854_v22, %v1858_v26  ;;  %v17599_v28 = vrot.slane %v17598_v36, 5  ;;  %17601 = vst [vmem:[#allocation34_spill] sm:$0xff] %v13670_v41  ;;  %v17602_v38 = vld [vmem:[#allocation15_spill] sm:$0xff]  ;;  %v17605_v6 = vld [vmem:[#allocation8_spill] sm:$0xff] }
 0x176   : > { %v2765_v4 = vrot.slane %v10332_v57, 5  ;;  %v13675_v24 = vsel %vm6253_vm7, %v17602_v38, %v13409_v14  ;;  %v10697_v59 = vcombine.low %v1849_v39, %v1859_v50  ;;  %v3187_v43 = vor.u32 %v3186_v20, %v3183_v56  ;;  %v17604_v14 = vld [vmem:[#allocation14_spill] sm:$0xff] }
 0x177   : > { %v2764_v51 = vrot.slane %v17599_v28, 4  ;;  %v17603_v61 = vmov %v17599_v28  ;;  %v3190_v32 = vshll.u32 %v13618_v19, 16  ;;  %v3196_v22 = vrot.slane %v3194_v48, 4  ;;  %v13702_v28 = vpop.permute.xlu0 %4880 }
 0x178   : > { %v2763_v5 = vsel %vm12232_vm5, %v2761_v60, %v17603_v61  ;;  %v3200_v26 = vshll.u32 %v13652_v44, 16  ;;  %v13689_v39 = vsel %vm6253_vm7, %v17604_v14, %v13402_v25  ;;  %v13694_v60 = vsel %vm6253_vm7, %v17605_v6, %v13430_v27  ;;  %5242 = vrot.lane.b32.xlu0 %v10697_v59, %s11672_s23  ;;  %v10474_v25 = vld [vmem:[%s11758_s13 + $0x60] sm:$0x1]  ;;  %17606 = vst [vmem:[#allocation94_spill] sm:$0xff] %v13702_v28  ;;  %v17614_v28 = vld [vmem:[#allocation17_spill] sm:$0xff] }
 0x179   : > { %v2766_v57 = vsel %vm12232_vm5, %v2764_v51, %v2765_v4  ;;  %v3214_v20 = vshrl.u32 %v13666_v33, 16  ;;  %5440 = vrot.lane.b32.xlu1 %v10736_v55, %s11673_s29  ;;  %v10776_v48 = vcombine.low %v13607_v34, %v13618_v19  ;;  %v3188_v62 = vrot.slane %v3187_v43, 4  ;;  %v17607_v55 = vld [vmem:[#allocation16_spill] sm:$0xff]  ;;  %v13713_v43 = vpop.permute.xlu1 %4886 }
 0x17a   : > { %v10737_v56 = vcombine.low %v2763_v5, %v2766_v57  ;;  %v3192_v50 = vrot.slane %v3190_v32, 5  ;;  %v3202_v36 = vrot.slane %v3200_v26, 5  ;;  %v10514_v51 = vrot.slane %v10494_v1, 9  ;;  %17608 = vst [vmem:[#allocation5_spill] sm:$0xff] %v13713_v43  ;;  %v17609_v57 = vld [vmem:[#allocation18_spill] sm:$0xff] }
 0x17b   : > { %v4120_v27 = vrot.slane %v13618_v19, 5  ;;  %v4123_v4 = vrot.slane %v13652_v44, 5  ;;  %v3204_v38 = vshrl.u32 %v13652_v44, 16  ;;  %v13710_v59 = vsel %vm6253_vm7, %v17607_v55, %v13421_v16  ;;  %v17610_v55 = vld [vmem:[#allocation43_spill] sm:$0xff] }
 0x17c   : > { %v3197_v61 = vor.u32 %v3196_v22, %v3192_v50  ;;  %v3210_v34 = vshll.u32 %v13666_v33, 16  ;;  %v3216_v5 = vrot.slane %v3214_v20, 4  ;;  %v13718_v32 = vsel %vm6253_vm7, %v17609_v57, %v13471_v8  ;;  %5442 = vrot.lane.b32.xlu0 %v10737_v56, %s11673_s29  ;;  %v13734_v57 = vpop.permute.xlu0 %4884 }
 0x17d   : > { %v4122_v19 = vrot.slane %v4120_v27, 4  ;;  %v3206_v26 = vrot.slane %v3204_v38, 4  ;;  %v3220_v1 = vshll.u32 %v10474_v25, 16  ;;  %5660 = vrot.lane.b32.xlu1 %v10776_v48, %s11674_s11  ;;  %v3193_v16 = vsel %vm11768_vm2, %v3188_v62, %v3192_v50  ;;  %v17611_v48 = vld [vmem:[#allocation57_spill] sm:$0xff]  ;;  %17612 = vst [vmem:[#allocation33_spill] sm:$0xff] %v13734_v57 }
 0x17e   : > { %v3198_v22 = vrot.slane %v3197_v61, 4  ;;  %v10777_v14 = vcombine.low %v13652_v44, %v13666_v33  ;;  %v3212_v6 = vrot.slane %v3210_v34, 5  ;;  %v4121_v8 = vsel %vm12232_vm5, %v10514_v51, %v4120_v27  ;;  %v17613_v61 = vld [vmem:[#allocation47_spill] sm:$0xff] }
 0x17f   : > { %v4124_v20 = vsel %vm12232_vm5, %v4122_v19, %v4123_v4  ;;  %v3207_v38 = vor.u32 %v3206_v26, %v3202_v36  ;;  %v1873_v56 = vsel %vm11768_vm2, %v17611_v48, %v17610_v55  ;;  %v3222_v44 = vrot.slane %v3220_v1, 5  ;;  %v10353_v26 = vld [vmem:[%s11758_s13 + $0x50] sm:$0xe] }
 0x180   : > { %v3203_v62 = vsel %vm11768_vm2, %v3198_v22, %v3202_v36  ;;  %v3217_v50 = vor.u32 %v3216_v5, %v3212_v6  ;;  %v1877_v34 = vor.u32 %v17613_v61, %v17610_v55  ;;  %v4125_v43 = vrot.slane %v4123_v4, 4  ;;  %5662 = vrot.lane.b32.xlu0 %v10777_v14, %s11674_s11  ;;  %v13748_v22 = vpop.permute.xlu1 %4890  ;;  %v17617_v55 = vld [vmem:[#allocation26_spill] sm:$0xff] }
 0x181   : > { %v10816_v51 = vcombine.low %v3193_v16, %v3203_v62  ;;  %v3208_v27 = vrot.slane %v3207_v38, 4  ;;  %v4126_v19 = vrot.slane %v13666_v33, 5  ;;  %v13745_v48 = vsel %vm6253_vm7, %v17614_v28, %v13464_v37  ;;  %17615 = vst [vmem:[#allocation25_spill] sm:$0xff] %v13748_v22  ;;  %v17616_v28 = vld [vmem:[#allocation38_spill] sm:$0xff] }
 0x182   : > { %v3218_v36 = vrot.slane %v3217_v50, 4  ;;  %v1878_v5 = vrot.slane %v1877_v34, 4  ;;  %v4129_v1 = vrot.slane %v10474_v25, 5  ;;  %v10856_v4 = vcombine.low %v4121_v8, %v4124_v20  ;;  %v10333_v8 = vld [vmem:[%s11758_s13 + $0x60] sm:$0x1] }
 0x183   : > { %5860 = vrot.lane.b32.xlu1 %v10816_v51, %s11675_s12  ;;  %v3213_v33 = vsel %vm11768_vm2, %v3208_v27, %v3212_v6  ;;  %v4127_v16 = vsel %vm12232_vm5, %v4125_v43, %v4126_v19  ;;  %v4128_v38 = vrot.slane %v4126_v19, 4  ;;  %v10373_v14 = vrot.slane %v10353_v26, 9  ;;  %v17619_v43 = vld [vmem:[#allocation41_spill] sm:$0xff]  ;;  %v13768_v51 = vld [vmem:[%s11758_s13 + $0x64] sm:$0xf] }
 0x184   : > { %v3223_v37 = vsel %vm11768_vm2, %v3218_v36, %v3222_v44  ;;  %v1883_v25 = vsel %vm11768_vm2, %v1878_v5, %v17616_v28  ;;  %v17618_v62 = vrot.slane %v17617_v55, 5  ;;  %v1887_v34 = vor.u32 %v17619_v43, %v17616_v28  ;;  %v13770_v44 = vpop.permute.xlu0 %4888  ;;  %v17621_v27 = vld [vmem:[#allocation9_spill] sm:$0xff]  ;;  %v17623_v36 = vld [vmem:[#allocation19_spill] sm:$0xff] }
 0x185   : > { %v10817_v20 = vcombine.low %v3213_v33, %v3223_v37  ;;  %v10698_v61 = vcombine.low %v1873_v56, %v1883_v25  ;;  %v4130_v6 = vsel %vm12232_vm5, %v4128_v38, %v4129_v1  ;;  %17620 = vst [vmem:[#allocation24_spill] sm:$0xff] %v13770_v44  ;;  %v13775_v19 = vsel %vm6253_vm7, %v17621_v27, %v13514_v53  ;;  %v17625_v33 = vld [vmem:[#allocation40_spill] sm:$0xff]  ;;  %v17626_v38 = vld [vmem:[#allocation45_spill] sm:$0xff]  ;;  %v13788_v28 = vld [vmem:[%s11758_s13 + $0x68] sm:$0xf] }
 0x186   : > { %v2771_v50 = vrot.slane %v17618_v62, 4  ;;  %v17622_v26 = vmov %v17618_v62  ;;  %v17624_v5 = vrot.slane %v17623_v36, 5  ;;  %v1897_v37 = vor.u32 %v17626_v38, %v17625_v33  ;;  %v17627_v62 = vld [vmem:[#allocation12_spill] sm:$0xff] }
 0x187   : > { %v2770_v56 = vsel %vm12232_vm5, %v10373_v14, %v17622_v26  ;;  %6060 = vrot.lane.b32.xlu1 %v10856_v4, %s11676_s14  ;;  %5862 = vrot.lane.b32.xlu0 %v10817_v20, %s11675_s12  ;;  %v10857_v53 = vcombine.low %v4127_v16, %v4130_v6  ;;  %v1888_v55 = vrot.slane %v1887_v34, 4  ;;  %v1900_v14 = vshll.u32 %v10333_v8, 16  ;;  %v17628_v4 = vld [vmem:[#allocation32_spill] sm:$0xff]  ;;  %v13811_v34 = vld [vmem:[%s11758_s13 + $0x6c] sm:$0xf] }
 0x188   : > { %v2773_v1 = vsel %vm12232_vm5, %v2771_v50, %v17624_v5  ;;  %v13795_v43 = vsel %vm6253_vm7, %v17627_v62, %v13498_v29  ;;  %v1898_v50 = vrot.slane %v1897_v37, 4  ;;  %v3225_v27 = vshrl.u32 %v13768_v51, 16  ;;  %v13799_v5 = vpop.permute.xlu1 %5034  ;;  %v17630_v62 = vld [vmem:[#allocation20_spill] sm:$0xff] }
 0x189   : > { %v10738_v25 = vcombine.low %v2770_v56, %v2773_v1  ;;  %v3228_v26 = vshll.u32 %v13768_v51, 16  ;;  %v13804_v16 = vsel %vm6253_vm7, %v17628_v4, %v13546_v23  ;;  %v1893_v20 = vsel %vm11768_vm2, %v1888_v55, %v17625_v33  ;;  %v13818_v23 = vld [vmem:[%s11758_s13 + $0x70] sm:$0xf]  ;;  %v17632_v4 = vld [vmem:[#allocation21_spill] sm:$0xff]  ;;  %v17633_v55 = vld [vmem:[#allocation22_spill] sm:$0xff] }
 0x18a   : > { %v1902_v6 = vrot.slane %v1900_v14, 5  ;;  %v3238_v29 = vshrl.u32 %v13788_v28, 16  ;;  %v3227_v56 = vrot.slane %v3225_v27, 4  ;;  %v17629_v38 = vrot.slane %v17623_v36, 5  ;;  %v13834_v27 = vpop.permute.xlu0 %5032 }
 0x18b   : > { %v3230_v1 = vrot.slane %v3228_v26, 5  ;;  %v17631_v44 = vrot.slane %v17630_v62, 5  ;;  %v13823_v33 = vsel %vm6253_vm7, %v17632_v4, %v13537_v10  ;;  %v13828_v14 = vsel %vm6253_vm7, %v17633_v55, %v13571_v31  ;;  %5244 = vrot.lane.b32.xlu1 %v10698_v61, %s11672_s23  ;;  %6062 = vrot.lane.b32.xlu0 %v10857_v53, %s11676_s14  ;;  %v10495_v55 = vld [vmem:[%s11758_s13 + $0x64] sm:$0xe] }
 0x18c   : > { %v2774_v37 = vrot.slane %v17629_v38, 4  ;;  %v1903_v36 = vsel %vm11768_vm2, %v1898_v50, %v1902_v6  ;;  %v17634_v10 = vrot.slane %v17630_v62, 5  ;;  %v3234_v31 = vshll.u32 %v13788_v28, 16  ;;  %v17635_v6 = vld [vmem:[#allocation36_spill] sm:$0xff] }
 0x18d   : > { %v2777_v22 = vrot.slane %v17631_v44, 4  ;;  %v2778_v44 = vrot.slane %v10333_v8, 5  ;;  %v10699_v26 = vcombine.low %v1893_v20, %v1903_v36  ;;  %v3231_v4 = vor.u32 %v3230_v1, %v3227_v56  ;;  %v10475_v56 = vld [vmem:[%s11758_s13 + $0x74] sm:$0x1]  ;;  %v13852_v1 = vpop.permute.xlu1 %5038 }
 0x18e   : > { %v2776_v38 = vsel %vm12232_vm5, %v2774_v37, %v17634_v10  ;;  %v3240_v53 = vrot.slane %v3238_v29, 4  ;;  %v3244_v50 = vshll.u32 %v13811_v34, 16  ;;  %v3258_v8 = vshrl.u32 %v13818_v23, 16  ;;  %v17636_v10 = vld [vmem:[#allocation37_spill] sm:$0xff]  ;;  %v17638_v29 = vld [vmem:[#allocation48_spill] sm:$0xff] }
 0x18f   : > { %v2779_v61 = vsel %vm12232_vm5, %v2777_v22, %v2778_v44  ;;  %v13849_v20 = vsel %vm6253_vm7, %v17635_v6, %v13556_v0  ;;  %v3232_v36 = vrot.slane %v3231_v4, 4  ;;  %v3236_v37 = vrot.slane %v3234_v31, 5  ;;  %5444 = vrot.lane.b32.xlu1 %v10738_v25, %s11673_s29  ;;  %5246 = vrot.lane.b32.xlu0 %v10699_v26, %s11672_s23  ;;  %v13872_v25 = vpop.permute.xlu0 %5036 }
 0x190   : > { %v10739_v62 = vcombine.low %v2776_v38, %v2779_v61  ;;  %v13857_v22 = vsel %vm6253_vm7, %v17636_v10, %v13588_v21  ;;  %v13862_v44 = vsel %vm6253_vm7, %v17638_v29, %v13590_v17  ;;  %v10778_v0 = vcombine.low %v13768_v51, %v13788_v28 }
 0x191   : > { %17637 = vst [vmem:[#allocation10_spill] sm:$0xff] %v13857_v22  ;;  %17639 = vst [vmem:[#allocation27_spill] sm:$0xff] %v13862_v44  ;;  %v10515_v38 = vrot.slane %v10495_v55, 9  ;;  %v3241_v4 = vor.u32 %v3240_v53, %v3236_v37  ;;  %v3246_v31 = vrot.slane %v3244_v50, 5  ;;  %v4133_v61 = vrot.slane %v13788_v28, 5  ;;  %v13893_v42 = vpop.permute.xlu1 %5042 }
 0x192   : > { %v4136_v21 = vrot.slane %v13811_v34, 5  ;;  %v3248_v6 = vshrl.u32 %v13811_v34, 16  ;;  %v3254_v10 = vshll.u32 %v13818_v23, 16  ;;  %v3260_v17 = vrot.slane %v3258_v8, 4 }
 0x193   : > { %v3264_v29 = vshll.u32 %v10475_v56, 16  ;;  %v3237_v26 = vsel %vm11768_vm2, %v3232_v36, %v3236_v37  ;;  %v3242_v51 = vrot.slane %v3241_v4, 4  ;;  %v4134_v55 = vsel %vm12232_vm5, %v10515_v38, %v4133_v61  ;;  %5664 = vrot.lane.b32.xlu1 %v10778_v0, %s11674_s11  ;;  %5446 = vrot.lane.b32.xlu0 %v10739_v62, %s11673_s29  ;;  %v17640_v37 = vld [vmem:[#allocation61_spill] sm:$0xff]  ;;  %v17641_v4 = vld [vmem:[#allocation70_spill] sm:$0xff]  ;;  %v5041_v22 = vpop.permute.xlu0 %5040 }
 0x194   : > { %v4135_v53 = vrot.slane %v4133_v61, 4  ;;  %v10779_v28 = vcombine.low %v13811_v34, %v13818_v23  ;;  %v3250_v50 = vrot.slane %v3248_v6, 4  ;;  %v3256_v8 = vrot.slane %v3254_v10, 5  ;;  %v17642_v0 = vld [vmem:[#allocation62_spill] sm:$0xff] }
 0x195   : > { %v3266_v57 = vrot.slane %v3264_v29, 5  ;;  %v3247_v41 = vsel %vm11768_vm2, %v3242_v51, %v3246_v31  ;;  %v1917_v38 = vsel %vm11768_vm2, %v17641_v4, %v17640_v37  ;;  %v1921_v62 = vor.u32 %v17642_v0, %v17640_v37  ;;  %v10354_v61 = vld [vmem:[%s11758_s13 + $0x64] sm:$0xe] }
 0x196   : > { %v4137_v36 = vsel %vm12232_vm5, %v4135_v53, %v4136_v21  ;;  %v10818_v34 = vcombine.low %v3237_v26, %v3247_v41  ;;  %v3251_v10 = vor.u32 %v3250_v50, %v3246_v31  ;;  %v3261_v29 = vor.u32 %v3260_v17, %v3256_v8  ;;  %v17643_v41 = vld [vmem:[#allocation49_spill] sm:$0xff]  ;;  %v17644_v17 = vld [vmem:[#allocation52_spill] sm:$0xff] }
 0x197   : > { %v10858_v6 = vcombine.low %v4134_v55, %v4137_v36  ;;  %v1922_v51 = vrot.slane %v1921_v62, 4  ;;  %v4138_v7 = vrot.slane %v4136_v21, 4  ;;  %v4139_v53 = vrot.slane %v13818_v23, 5  ;;  %5666 = vrot.lane.b32.xlu0 %v10779_v28, %s11674_s11  ;;  %v10334_v26 = vld [vmem:[%s11758_s13 + $0x74] sm:$0x1] }
 0x198   : > { %v4142_v44 = vrot.slane %v10475_v56, 5  ;;  %5864 = vrot.lane.b32.xlu1 %v10818_v34, %s11675_s12  ;;  %v3252_v4 = vrot.slane %v3251_v10, 4  ;;  %v3262_v37 = vrot.slane %v3261_v29, 4  ;;  %v10374_v0 = vrot.slane %v10354_v61, 9  ;;  %v13919_v36 = vld [vmem:[%s11758_s13 + $0x78] sm:$0xf] }
 0x199   : > { %v13901_v31 = vsel %vm6253_vm7, %v17643_v41, %v13624_v46  ;;  %v1927_v23 = vsel %vm11768_vm2, %v1922_v51, %v17644_v17  ;;  %v4140_v56 = vsel %vm12232_vm5, %v4138_v7, %v4139_v53  ;;  %v4141_v21 = vrot.slane %v4139_v53, 4  ;;  %v17645_v61 = vld [vmem:[#allocation39_spill] sm:$0xff]  ;;  %v17649_v29 = vld [vmem:[#allocation53_spill] sm:$0xff]  ;;  %v17651_v53 = vld [vmem:[#allocation60_spill] sm:$0xff] }
 0x19a   : > { %v3257_v55 = vsel %vm11768_vm2, %v3252_v4, %v3256_v8  ;;  %v3267_v28 = vsel %vm11768_vm2, %v3262_v37, %v3266_v57  ;;  %v10700_v50 = vcombine.low %v1917_v38, %v1927_v23  ;;  %v13916_v46 = vsel %vm6334_vm8, %v13372_v63, %v13799_v5  ;;  %v5047_v38 = vpop.permute.xlu1 %5046  ;;  %v17648_v63 = vld [vmem:[#allocation97_spill] sm:$0xff]  ;;  %v17652_v23 = vld [vmem:[#allocation30_spill] sm:$0xff] }
 0x19b   : > { %v10819_v62 = vcombine.low %v3257_v55, %v3267_v28  ;;  %v4143_v7 = vsel %vm12232_vm5, %v4141_v21, %v4142_v44  ;;  %v17646_v34 = vrot.slane %v17645_v61, 5  ;;  %v13933_v5 = vsel %vm6334_vm8, %v17648_v63, %v13834_v27  ;;  %v17650_v44 = vld [vmem:[#allocation58_spill] sm:$0xff]  ;;  %v13940_v41 = vld [vmem:[%s11758_s13 + $0x7c] sm:$0xf] }
 0x19c   : > { %6064 = vrot.lane.b32.xlu1 %v10858_v6, %s11676_s14  ;;  %v1931_v51 = vor.u32 %v17649_v29, %v17644_v17  ;;  %v1941_v4 = vor.u32 %v17651_v53, %v17650_v44  ;;  %v1944_v37 = vshll.u32 %v10334_v26, 16  ;;  %v17653_v21 = vrot.slane %v17652_v23, 5  ;;  %v13974_v53 = vld [vmem:[%s11758_s13 + $0x84] sm:$0xf] }
 0x19d   : > { %v2783_v8 = vsel %vm12232_vm5, %v10374_v0, %v17646_v34  ;;  %v17647_v10 = vmov %v17646_v34  ;;  %5866 = vrot.lane.b32.xlu0 %v10819_v62, %s11675_s12  ;;  %v10859_v0 = vcombine.low %v4140_v56, %v4143_v7  ;;  %v13950_v27 = vsel %vm6334_vm8, %v13418_v49, %v13852_v1  ;;  %v5045_v62 = vpop.permute.xlu0 %5044 }
 0x19e   : > { %v2784_v57 = vrot.slane %v17647_v10, 4  ;;  %v3269_v17 = vshrl.u32 %v13919_v36, 16  ;;  %v1932_v28 = vrot.slane %v1931_v51, 4  ;;  %v1942_v61 = vrot.slane %v1941_v4, 4  ;;  %v13971_v51 = vld [vmem:[%s11758_s13 + $0x80] sm:$0xf] }
 0x19f   : > { %v1946_v34 = vrot.slane %v1944_v37, 5  ;;  %v13956_v56 = vsel %vm6334_vm8, %v13456_v11, %v13872_v25  ;;  %v3272_v10 = vshll.u32 %v13919_v36, 16  ;;  %v3282_v49 = vshrl.u32 %v13940_v41, 16  ;;  %v17655_v11 = vld [vmem:[#allocation35_spill] sm:$0xff] }
 0x1a0   : > { %v2786_v6 = vsel %vm12232_vm5, %v2784_v57, %v17653_v21  ;;  %v3271_v7 = vrot.slane %v3269_v17, 4  ;;  %5248 = vrot.lane.b32.xlu1 %v10700_v50, %s11672_s23  ;;  %v1937_v1 = vsel %vm11768_vm2, %v1932_v28, %v17650_v44  ;;  %v17654_v57 = vmov %v17653_v21  ;;  %v5051_v21 = vpop.permute.xlu1 %5050 }
 0x1a1   : > { %v10740_v55 = vcombine.low %v2783_v8, %v2786_v6  ;;  %v1947_v8 = vsel %vm11768_vm2, %v1942_v61, %v1946_v34  ;;  %v2787_v63 = vrot.slane %v17654_v57, 4  ;;  %v17656_v25 = vrot.slane %v17655_v11, 5  ;;  %6066 = vrot.lane.b32.xlu0 %v10859_v0, %s11676_s14  ;;  %v10496_v61 = vld [vmem:[%s11758_s13 + $0x78] sm:$0xe]  ;;  %v5049_v57 = vpop.permute.xlu0 %5048 }
 0x1a2   : > { %v10701_v50 = vcombine.low %v1937_v1, %v1947_v8  ;;  %v3274_v4 = vrot.slane %v3272_v10, 5  ;;  %v10780_v44 = vcombine.low %v13919_v36, %v13940_v41  ;;  %v2791_v37 = vrot.slane %v10334_v26, 5 }
 0x1a3   : > { %v2790_v29 = vrot.slane %v17656_v25, 4  ;;  %v17657_v23 = vmov %v17656_v25  ;;  %v13986_v17 = vsel %vm6334_vm8, %v13469_v13, %v13893_v42  ;;  %v3278_v0 = vshll.u32 %v13940_v41, 16 }
 0x1a4   : > { %v2789_v6 = vsel %vm12232_vm5, %v2787_v63, %v17657_v23  ;;  %v3284_v28 = vrot.slane %v3282_v49, 4  ;;  %v3275_v26 = vor.u32 %v3274_v4, %v3271_v7  ;;  %v3288_v34 = vshll.u32 %v13971_v51, 16  ;;  %5448 = vrot.lane.b32.xlu1 %v10740_v55, %s11673_s29  ;;  %v10476_v49 = vld [vmem:[%s11758_s13 + $0x88] sm:$0x1] }
 0x1a5   : > { %v2792_v36 = vsel %vm12232_vm5, %v2790_v29, %v2791_v37  ;;  %v3302_v10 = vshrl.u32 %v13974_v53, 16  ;;  %v13997_v8 = vsel %vm6334_vm8, %v13479_v47, %v5041_v22  ;;  %v3280_v13 = vrot.slane %v3278_v0, 5  ;;  %5250 = vrot.lane.b32.xlu0 %v10701_v50, %s11672_s23 }
 0x1a6   : > { %v10741_v1 = vcombine.low %v2789_v6, %v2792_v36  ;;  %v10781_v42 = vcombine.low %v13971_v51, %v13974_v53  ;;  %v3276_v7 = vrot.slane %v3275_v26, 4  ;;  %v3290_v63 = vrot.slane %v3288_v34, 5  ;;  %v5055_v6 = vpop.permute.xlu1 %5054  ;;  %v17658_v26 = vld [vmem:[#allocation74_spill] sm:$0xff]  ;;  %v17659_v34 = vld [vmem:[#allocation80_spill] sm:$0xff] }
 0x1a7   : > { %v14005_v11 = vsel %vm6334_vm8, %v13503_v2, %v5047_v38  ;;  %v10516_v55 = vrot.slane %v10496_v61, 9  ;;  %v3285_v25 = vor.u32 %v3284_v28, %v3280_v13  ;;  %v4146_v29 = vrot.slane %v13940_v41, 5 }
 0x1a8   : > { %v4149_v47 = vrot.slane %v13971_v51, 5  ;;  %v3292_v22 = vshrl.u32 %v13971_v51, 16  ;;  %v14012_v4 = vsel %vm6334_vm8, %v13508_v9, %v5045_v62  ;;  %v3298_v50 = vshll.u32 %v13974_v53, 16  ;;  %5668 = vrot.lane.b32.xlu1 %v10780_v44, %s11674_s11 }
 0x1a9   : > { %v3304_v37 = vrot.slane %v3302_v10, 4  ;;  %v3308_v23 = vshll.u32 %v10476_v49, 16  ;;  %v3281_v2 = vsel %vm11768_vm2, %v3276_v7, %v3280_v13  ;;  %v3286_v38 = vrot.slane %v3285_v25, 4  ;;  %5450 = vrot.lane.b32.xlu0 %v10741_v1, %s11673_s29  ;;  %v5053_v1 = vpop.permute.xlu0 %5052  ;;  %v10355_v25 = vld [vmem:[%s11758_s13 + $0x78] sm:$0xe] }
 0x1aa   : > { %v4148_v41 = vrot.slane %v4146_v29, 4  ;;  %v3294_v0 = vrot.slane %v3292_v22, 4  ;;  %v4147_v9 = vsel %vm12232_vm5, %v10516_v55, %v4146_v29  ;;  %v3300_v62 = vrot.slane %v3298_v50, 5 }
 0x1ab   : > { %v3310_v51 = vrot.slane %v3308_v23, 5  ;;  %v14023_v28 = vsel %vm6334_vm8, %v13523_v40, %v5051_v21  ;;  %v3291_v44 = vsel %vm11768_vm2, %v3286_v38, %v3290_v63  ;;  %v1961_v10 = vsel %vm11768_vm2, %v17659_v34, %v17658_v26  ;;  %v17660_v40 = vld [vmem:[#allocation75_spill] sm:$0xff] }
 0x1ac   : > { %v4150_v61 = vsel %vm12232_vm5, %v4148_v41, %v4149_v47  ;;  %v3295_v36 = vor.u32 %v3294_v0, %v3290_v63  ;;  %v10820_v13 = vcombine.low %v3281_v2, %v3291_v44  ;;  %v3305_v7 = vor.u32 %v3304_v37, %v3300_v62  ;;  %v17661_v41 = vld [vmem:[#allocation67_spill] sm:$0xff] }
 0x1ad   : > { %v14035_v55 = vsel %vm6334_vm8, %v13530_v52, %v5049_v57  ;;  %v1965_v21 = vor.u32 %v17660_v40, %v17658_v26  ;;  %v4151_v22 = vrot.slane %v4149_v47, 4  ;;  %v4152_v63 = vrot.slane %v13974_v53, 5  ;;  %5670 = vrot.lane.b32.xlu0 %v10781_v42, %s11674_s11  ;;  %v5059_v57 = vpop.permute.xlu1 %5058  ;;  %v10335_v44 = vld [vmem:[%s11758_s13 + $0x88] sm:$0x1]  ;;  %v14068_v40 = vld [vmem:[%s11758_s13 + $0x8c] sm:$0xf] }
 0x1ae   : > { %v3296_v29 = vrot.slane %v3295_v36, 4  ;;  %v4155_v50 = vrot.slane %v10476_v49, 5  ;;  %5868 = vrot.lane.b32.xlu1 %v10820_v13, %s11675_s12  ;;  %v10860_v23 = vcombine.low %v4147_v9, %v4150_v61  ;;  %v3306_v37 = vrot.slane %v3305_v7, 4  ;;  %v17664_v61 = vld [vmem:[#allocation68_spill] sm:$0xff]  ;;  %v5057_v7 = vpop.permute.xlu0 %5056 }
 0x1af   : > { %v1966_v2 = vrot.slane %v1965_v21, 4  ;;  %v14045_v52 = vsel %vm6334_vm8, %v13542_v35, %v5055_v6  ;;  %v4153_v53 = vsel %vm12232_vm5, %v4151_v22, %v4152_v63  ;;  %v4154_v49 = vrot.slane %v4152_v63, 4  ;;  %v17662_v35 = vld [vmem:[#allocation55_spill] sm:$0xff] }
 0x1b0   : > { %v3301_v47 = vsel %vm11768_vm2, %v3296_v29, %v3300_v62  ;;  %v10375_v38 = vrot.slane %v10355_v25, 9  ;;  %v3311_v42 = vsel %vm11768_vm2, %v3306_v37, %v3310_v51  ;;  %v17663_v6 = vrot.slane %v17662_v35, 5  ;;  %v17666_v25 = vld [vmem:[#allocation50_spill] sm:$0xff]  ;;  %v17668_v63 = vld [vmem:[#allocation71_spill] sm:$0xff] }
 0x1b1   : > { %v1971_v0 = vsel %vm11768_vm2, %v1966_v2, %v17661_v41  ;;  %v1975_v62 = vor.u32 %v17664_v61, %v17661_v41  ;;  %v10821_v36 = vcombine.low %v3301_v47, %v3311_v42  ;;  %v4156_v34 = vsel %vm12232_vm5, %v4154_v49, %v4155_v50  ;;  %v17669_v50 = vld [vmem:[#allocation72_spill] sm:$0xff] }
 0x1b2   : > { %v2797_v9 = vrot.slane %v17663_v6, 4  ;;  %v10702_v26 = vcombine.low %v1961_v10, %v1971_v0  ;;  %v17665_v13 = vmov %v17663_v6  ;;  %6068 = vrot.lane.b32.xlu1 %v10860_v23, %s11676_s14  ;;  %v14073_v21 = vsel %vm6334_vm8, %v13561_v18, %v5053_v1  ;;  %v10413_v2 = vld [vmem:[%s11758_s13 + $0x90] sm:$0xf]  ;;  %v5063_v0 = vpop.permute.xlu1 %5062 }
 0x1b3   : > { %v2796_v51 = vsel %vm12232_vm5, %v10375_v38, %v17665_v13  ;;  %v17667_v29 = vrot.slane %v17666_v25, 5  ;;  %v1976_v22 = vrot.slane %v1975_v62, 4  ;;  %v1985_v37 = vor.u32 %v17669_v50, %v17668_v63  ;;  %5870 = vrot.lane.b32.xlu0 %v10821_v36, %s11675_s12  ;;  %v17671_v36 = vld [vmem:[#allocation51_spill] sm:$0xff] }
 0x1b4   : > { %v10861_v47 = vcombine.low %v4153_v53, %v4156_v34  ;;  %v1988_v23 = vshll.u32 %v10335_v44, 16  ;;  %v14085_v18 = vsel %vm6334_vm8, %v13582_v12, %v5059_v57  ;;  %v3313_v42 = vshrl.u32 %v14068_v40, 16 }
 0x1b5   : > { %v2799_v10 = vsel %vm12232_vm5, %v2797_v9, %v17667_v29  ;;  %v1981_v1 = vsel %vm11768_vm2, %v1976_v22, %v17668_v63  ;;  %v1986_v38 = vrot.slane %v1985_v37, 4  ;;  %v3316_v41 = vshll.u32 %v14068_v40, 16  ;;  %v14099_v9 = vld [vmem:[%s11758_s13 + $0x94] sm:$0xf]  ;;  %v5061_v22 = vpop.permute.xlu0 %5060 }
 0x1b6   : > { %v10742_v49 = vcombine.low %v2796_v51, %v2799_v10  ;;  %v1990_v35 = vrot.slane %v1988_v23, 5  ;;  %v14094_v53 = vsel %vm6334_vm8, %v13631_v30, %v5057_v7  ;;  %v3326_v6 = vshrl.u32 %v10413_v2, 16  ;;  %5252 = vrot.lane.b32.xlu1 %v10702_v26, %s11672_s23 }
 0x1b7   : > { %v17670_v12 = vmov %v17667_v29  ;;  %v3315_v61 = vrot.slane %v3313_v42, 4  ;;  %v3318_v62 = vrot.slane %v3316_v41, 5  ;;  %v17672_v34 = vrot.slane %v17671_v36, 5  ;;  %v14105_v29 = vld [vmem:[%s11758_s13 + $0x98] sm:$0xf]  ;;  %6070 = vrot.lane.b32.xlu0 %v10861_v47, %s11676_s14 }
 0x1b8   : > { %v2800_v57 = vrot.slane %v17670_v12, 4  ;;  %v2804_v51 = vrot.slane %v10335_v44, 5  ;;  %v1991_v30 = vsel %vm11768_vm2, %v1986_v38, %v1990_v35  ;;  %v10782_v7 = vcombine.low %v14068_v40, %v10413_v2  ;;  %v10497_v47 = vld [vmem:[%s11758_s13 + $0x8c] sm:$0xe] }
 0x1b9   : > { %v2803_v13 = vrot.slane %v17672_v34, 4  ;;  %v17673_v25 = vmov %v17672_v34  ;;  %v14117_v10 = vsel %vm6334_vm8, %v13636_v3, %v5063_v0  ;;  %v10703_v44 = vcombine.low %v1981_v1, %v1991_v30  ;;  %v14137_v36 = vpop.permute.xlu0 %5064 }
 0x1ba   : > { %v2802_v26 = vsel %vm12232_vm5, %v2800_v57, %v17673_v25  ;;  %v3319_v50 = vor.u32 %v3318_v62, %v3315_v61  ;;  %v3322_v37 = vshll.u32 %v10413_v2, 16  ;;  %v3328_v40 = vrot.slane %v3326_v6, 4  ;;  %5452 = vrot.lane.b32.xlu1 %v10742_v49, %s11673_s29  ;;  %v10477_v57 = vld [vmem:[%s11758_s13 + $0x9c] sm:$0x1]  ;;  %v5233_v25 = vpop.permute.xlu1 %5232 }
 0x1bb   : > { %v2805_v63 = vsel %vm12232_vm5, %v2803_v13, %v2804_v51  ;;  %v3332_v38 = vshll.u32 %v14099_v9, 16  ;;  %v3346_v42 = vshrl.u32 %v14105_v29, 16  ;;  %v14127_v3 = vsel %vm6334_vm8, %v13647_v45, %v5061_v22  ;;  %5254 = vrot.lane.b32.xlu0 %v10703_v44, %s11672_s23 }
 0x1bc   : > { %v10743_v23 = vcombine.low %v2802_v26, %v2805_v63  ;;  %v3320_v1 = vrot.slane %v3319_v50, 4  ;;  %v3324_v41 = vrot.slane %v3322_v37, 5  ;;  %v10783_v0 = vcombine.low %v14099_v9, %v14105_v29  ;;  %v17674_v50 = vld [vmem:[#allocation83_spill] sm:$0xff]  ;;  %v17675_v37 = vld [vmem:[#allocation88_spill] sm:$0xff] }
 0x1bd   : > { %v10517_v35 = vrot.slane %v10497_v47, 9  ;;  %v4159_v6 = vrot.slane %v10413_v2, 5  ;;  %v4162_v12 = vrot.slane %v14099_v9, 5  ;;  %v3334_v62 = vrot.slane %v3332_v38, 5 }
 0x1be   : > { %v3325_v49 = vsel %vm11768_vm2, %v3320_v1, %v3324_v41  ;;  %v3329_v61 = vor.u32 %v3328_v40, %v3324_v41  ;;  %v3336_v45 = vshrl.u32 %v14099_v9, 16  ;;  %v3342_v51 = vshll.u32 %v14105_v29, 16  ;;  %5672 = vrot.lane.b32.xlu1 %v10782_v7, %s11674_s11  ;;  %v10356_v1 = vld [vmem:[%s11758_s13 + $0x8c] sm:$0xe] }
 0x1bf   : > { %v4160_v34 = vsel %vm12232_vm5, %v10517_v35, %v4159_v6  ;;  %v4161_v13 = vrot.slane %v4159_v6, 4  ;;  %v3348_v30 = vrot.slane %v3346_v42, 4  ;;  %v3352_v22 = vshll.u32 %v10477_v57, 16  ;;  %5454 = vrot.lane.b32.xlu0 %v10743_v23, %s11673_s29 }
 0x1c0   : > { %v3330_v2 = vrot.slane %v3329_v61, 4  ;;  %v3338_v26 = vrot.slane %v3336_v45, 4  ;;  %v6417_v9 = vsel %vm6415_vm9, %v13933_v5, %v5233_v25  ;;  %v3344_v63 = vrot.slane %v3342_v51, 5  ;;  %v17676_v5 = vld [vmem:[#allocation84_spill] sm:$0xff]  ;;  %v5433_v45 = vpop.permute.xlu1 %5432 }
 0x1c1   : > { %v4163_v44 = vsel %vm12232_vm5, %v4161_v13, %v4162_v12  ;;  %v2005_v47 = vsel %vm11768_vm2, %v17675_v37, %v17674_v50  ;;  %v3354_v42 = vrot.slane %v3352_v22, 5  ;;  %v2009_v35 = vor.u32 %v17676_v5, %v17674_v50  ;;  %v10336_v37 = vld [vmem:[%s11758_s13 + $0x9c] sm:$0x1]  ;;  %v14184_v5 = vld [vmem:[%s11758_s13 + $0xa0] sm:$0xf] }
 0x1c2   : > { %v3335_v7 = vsel %vm11768_vm2, %v3330_v2, %v3334_v62  ;;  %v10862_v40 = vcombine.low %v4160_v34, %v4163_v44  ;;  %v3339_v38 = vor.u32 %v3338_v26, %v3334_v62  ;;  %v3349_v41 = vor.u32 %v3348_v30, %v3344_v63  ;;  %v17677_v26 = vld [vmem:[#allocation77_spill] sm:$0xff] }
 0x1c3   : > { %v10822_v23 = vcombine.low %v3325_v49, %v3335_v7  ;;  %v4164_v6 = vrot.slane %v4162_v12, 4  ;;  %v4165_v13 = vrot.slane %v14105_v29, 5  ;;  %v4168_v51 = vrot.slane %v10477_v57, 5  ;;  %5674 = vrot.lane.b32.xlu0 %v10783_v0, %s11674_s11  ;;  %v5235_v49 = vpop.permute.xlu0 %5234 }
 0x1c4   : > { %v3340_v61 = vrot.slane %v3339_v38, 4  ;;  %v3350_v62 = vrot.slane %v3349_v41, 4  ;;  %v6498_v34 = vsel %vm6496_vm10, %v6417_v9, %v5433_v45  ;;  %v2010_v30 = vrot.slane %v2009_v35, 4  ;;  %v17678_v9 = vld [vmem:[#allocation69_spill] sm:$0xff]  ;;  %v17682_v45 = vld [vmem:[#allocation59_spill] sm:$0xff] }
 0x1c5   : > { %5872 = vrot.lane.b32.xlu1 %v10822_v23, %s11675_s12  ;;  %v10376_v2 = vrot.slane %v10356_v1, 9  ;;  %v6419_v29 = vsel %vm6415_vm9, %v13916_v46, %v5235_v49  ;;  %v4166_v57 = vsel %vm12232_vm5, %v4164_v6, %v4165_v13  ;;  %v4167_v25 = vrot.slane %v4165_v13, 4  ;;  %v17681_v23 = vld [vmem:[#allocation78_spill] sm:$0xff] }
 0x1c6   : > { %v3345_v12 = vsel %vm11768_vm2, %v3340_v61, %v3344_v63  ;;  %v3355_v0 = vsel %vm11768_vm2, %v3350_v62, %v3354_v42  ;;  %v2015_v22 = vsel %vm11768_vm2, %v2010_v30, %v17677_v26  ;;  %v17679_v44 = vrot.slane %v17678_v9, 5  ;;  %v5653_v42 = vpop.permute.xlu1 %5652  ;;  %v17684_v62 = vld [vmem:[#allocation81_spill] sm:$0xff]  ;;  %v17685_v49 = vld [vmem:[#allocation82_spill] sm:$0xff] }
 0x1c7   : > { %v10823_v7 = vcombine.low %v3345_v12, %v3355_v0  ;;  %v10704_v38 = vcombine.low %v2005_v47, %v2015_v22  ;;  %v4169_v1 = vsel %vm12232_vm5, %v4167_v25, %v4168_v51  ;;  %v2019_v41 = vor.u32 %v17681_v23, %v17677_v26  ;;  %v5435_v61 = vpop.permute.xlu0 %5434  ;;  %v14195_v30 = vld [vmem:[%s11758_s13 + $0xa4] sm:$0xf]  ;;  %v11398_v26 = vld [vmem:[%s17279_s1 + $0x20] ss:$0 sps:$4 sm:$0xff]  }
 0x1c8   : > { %v2809_v63 = vsel %vm12232_vm5, %v10376_v2, %v17679_v44  ;;  %v17680_v50 = vmov %v17679_v44  ;;  %v10863_v35 = vcombine.low %v4166_v57, %v4169_v1  ;;  %v6579_v6 = vsel %vm6577_vm11, %v6498_v34, %v5653_v42  ;;  %v17687_v42 = vld [vmem:[#allocation63_spill] sm:$0xff]  ;;  %11283 = vmatprep.subr.msk.bf16.mxu0 %vm6944_vm13, %v11398_v26 }
 0x1c9   : > { %v2810_v46 = vrot.slane %v17680_v50, 4  ;;  %6072 = vrot.lane.b32.xlu1 %v10862_v40, %s11676_s14  ;;  %v17683_v13 = vrot.slane %v17682_v45, 5  ;;  %v2029_v51 = vor.u32 %v17685_v49, %v17684_v62  ;;  %5874 = vrot.lane.b32.xlu0 %v10823_v7, %s11675_s12  ;;  %v6500_v2 = vsel %vm6496_vm10, %v6419_v29, %v5435_v61  ;;  %v14216_v61 = vld [vmem:[%s11758_s13 + $0xa8] sm:$0xf] }
 0x1ca   : > { %v2020_v40 = vrot.slane %v2019_v41, 4  ;;  %v2032_v57 = vshll.u32 %v10336_v37, 16  ;;  %v3357_v25 = vshrl.u32 %v14184_v5, 16  ;;  %v3360_v0 = vshll.u32 %v14184_v5, 16  ;;  %v5853_v45 = vpop.permute.xlu1 %5852 }
 0x1cb   : > { %v2812_v47 = vsel %vm12232_vm5, %v2810_v46, %v17683_v13  ;;  %v2030_v34 = vrot.slane %v2029_v51, 4  ;;  %v3370_v9 = vshrl.u32 %v14195_v30, 16  ;;  %v10784_v44 = vcombine.low %v14184_v5, %v14195_v30 }
 0x1cc   : > { %v10744_v12 = vcombine.low %v2809_v63, %v2812_v47  ;;  %v2025_v22 = vsel %vm11768_vm2, %v2020_v40, %v17684_v62  ;;  %v2034_v29 = vrot.slane %v2032_v57, 5  ;;  %v5655_v63 = vpop.permute.xlu0 %5654  ;;  %v3359_v50 = vrot.slane %v3357_v25, 4  ;;  %v14223_v47 = vld [vmem:[%s11758_s13 + $0xac] sm:$0xf]  ;;  %v10498_v25 = vld [vmem:[%s11758_s13 + $0xa0] sm:$0xe] }
 0x1cd   : > { %5256 = vrot.lane.b32.xlu1 %v10704_v38, %s11672_s23  ;;  %v3362_v46 = vrot.slane %v3360_v0, 5  ;;  %v17686_v7 = vmov %v17683_v13  ;;  %v17688_v23 = vrot.slane %v17687_v42, 5  ;;  %6074 = vrot.lane.b32.xlu0 %v10863_v35, %s11676_s14  ;;  %v6581_v5 = vsel %vm6577_vm11, %v6500_v2, %v5655_v63 }
 0x1ce   : > { %v2813_v1 = vrot.slane %v17686_v7, 4  ;;  %v2035_v13 = vsel %vm11768_vm2, %v2030_v34, %v2034_v29  ;;  %v2817_v38 = vrot.slane %v10336_v37, 5  ;;  %v3366_v40 = vshll.u32 %v14195_v30, 16 }
 0x1cf   : > { %v2816_v41 = vrot.slane %v17688_v23, 4  ;;  %v10705_v62 = vcombine.low %v2025_v22, %v2035_v13  ;;  %v17689_v49 = vmov %v17688_v23  ;;  %v3363_v35 = vor.u32 %v3362_v46, %v3359_v50  ;;  %v10478_v23 = vld [vmem:[%s11758_s13 + $0xb0] sm:$0x1] }
 0x1d0   : > { %v2815_v51 = vsel %vm12232_vm5, %v2813_v1, %v17689_v49  ;;  %v6660_v57 = vsel %vm6658_vm12, %v6579_v6, %v5853_v45  ;;  %v3372_v2 = vrot.slane %v3370_v9, 4  ;;  %v3376_v34 = vshll.u32 %v14216_v61, 16  ;;  %v6053_v9 = vpop.permute.xlu1 %6052  ;;  %v5855_v46 = vpop.permute.xlu0 %5854 }
 0x1d1   : > { %v2818_v37 = vsel %vm12232_vm5, %v2816_v41, %v2817_v38  ;;  %5456 = vrot.lane.b32.xlu1 %v10744_v12, %s11673_s29  ;;  %v3364_v22 = vrot.slane %v3363_v35, 4  ;;  %v3368_v29 = vrot.slane %v3366_v40, 5  ;;  %v3390_v63 = vshrl.u32 %v14223_v47, 16  ;;  %5258 = vrot.lane.b32.xlu0 %v10705_v62, %s11672_s23  ;;  %v17690_v40 = vld [vmem:[#allocation91_spill] sm:$0xff] }
 0x1d2   : > { %v10745_v0 = vcombine.low %v2815_v51, %v2818_v37  ;;  %v3378_v50 = vrot.slane %v3376_v34, 5  ;;  %v10785_v6 = vcombine.low %v14216_v61, %v14223_v47  ;;  %v6946_v1 = vsel %vm6944_vm13, %v11398_v26, 0 }
 0x1d3   : > { %v3369_v7 = vsel %vm11768_vm2, %v3364_v22, %v3368_v29  ;;  %v3373_v12 = vor.u32 %v3372_v2, %v3368_v29  ;;  %v10518_v42 = vrot.slane %v10498_v25, 9  ;;  %v6662_v41 = vsel %vm6658_vm12, %v6581_v5, %v5855_v46  ;;  %11166 = vmatpush3.bf16.msra.mxu0 %v6946_v1  ;;  %v17692_v22 = vld [vmem:[#allocation92_spill] sm:$0xff] }
 0x1d4   : > { %v6741_v13 = vsel %vm6739_vm14, %v6660_v57, %v6053_v9  ;;  %v4172_v38 = vrot.slane %v14195_v30, 5  ;;  %v4175_v62 = vrot.slane %v14216_v61, 5  ;;  %v3380_v49 = vshrl.u32 %v14216_v61, 16  ;;  %v17691_v57 = vld [vmem:[#allocation4_spill] sm:$0xff]  ;;  %v5237_v61 = vpop.permute.xlu1 %5236  ;;  %v6055_v2 = vpop.permute.xlu0 %6054 }
 0x1d5   : > { %5676 = vrot.lane.b32.xlu1 %v10784_v44, %s11674_s11  ;;  %v3374_v45 = vrot.slane %v3373_v12, 4  ;;  %11167 = vmatprep.mubr.msk.bf16.mxu0 %vm6863_vm15, %v6741_v13  ;;  %v3386_v26 = vshll.u32 %v14223_v47, 16  ;;  %v3392_v51 = vrot.slane %v3390_v63, 4  ;;  %v3396_v30 = vshll.u32 %v10478_v23, 16  ;;  %v10357_v12 = vld [vmem:[%s11758_s13 + $0xa0] sm:$0xe] }
 0x1d6   : > { %5458 = vrot.lane.b32.xlu0 %v10745_v0, %s11673_s29  ;;  %v4173_v5 = vsel %vm12232_vm5, %v10518_v42, %v4172_v38  ;;  %v4174_v35 = vrot.slane %v4172_v38, 4  ;;  %v2049_v44 = vsel %vm11768_vm2, %v17691_v57, %v17690_v40  ;;  %v3382_v34 = vrot.slane %v3380_v49, 4 }
 0x1d7   : > { %v3379_v37 = vsel %vm11768_vm2, %v3374_v45, %v3378_v50  ;;  %v3388_v25 = vrot.slane %v3386_v26, 5  ;;  %v2053_v0 = vor.u32 %v17692_v22, %v17690_v40  ;;  %v6421_v63 = vsel %vm6415_vm9, %v13956_v56, %v5237_v61 }
 0x1d8   : > { %v10824_v29 = vcombine.low %v3369_v7, %v3379_v37  ;;  %v6743_v9 = vsel %vm6739_vm14, %v6662_v41, %v6055_v2  ;;  %v4176_v46 = vsel %vm12232_vm5, %v4174_v35, %v4175_v62  ;;  %v3383_v42 = vor.u32 %v3382_v34, %v3378_v50  ;;  %v5437_v35 = vpop.permute.xlu1 %5436  ;;  %v5239_v40 = vpop.permute.xlu0 %5238  ;;  %v17693_v50 = vld [vmem:[#allocation79_spill] sm:$0xff]  ;;  %v10337_v37 = vld [vmem:[%s11758_s13 + $0xb0] sm:$0x1] }
 0x1d9   : > { %v10864_v1 = vcombine.low %v4173_v5, %v4176_v46  ;;  %v3393_v13 = vor.u32 %v3392_v51, %v3388_v25  ;;  %v3398_v38 = vrot.slane %v3396_v30, 5  ;;  %11168 = vmatmul.mubr.msk.bf16.vlgmr.msra.gmra.mrb[0].mxu0 %vm6863_vm15, %v6743_v9  ;;  %v2054_v7 = vrot.slane %v2053_v0, 4 }
 0x1da   : > { %5876 = vrot.lane.b32.xlu1 %v10824_v29, %s11675_s12  ;;  %5678 = vrot.lane.b32.xlu0 %v10785_v6, %s11674_s11  ;;  %v4177_v45 = vrot.slane %v4175_v62, 4  ;;  %v4178_v56 = vrot.slane %v14223_v47, 5  ;;  %v4181_v41 = vrot.slane %v10478_v23, 5  ;;  %v3384_v49 = vrot.slane %v3383_v42, 4  ;;  %v17695_v62 = vld [vmem:[#allocation85_spill] sm:$0xff] }
 0x1db   : > { %v3394_v26 = vrot.slane %v3393_v13, 4  ;;  %v10377_v5 = vrot.slane %v10357_v12, 9  ;;  %v17694_v51 = vrot.slane %v17693_v50, 5  ;;  %v14279_v57 = vsel %vm6334_vm8, %v13675_v24, %v14137_v36  ;;  %v17697_v29 = vld [vmem:[#allocation73_spill] sm:$0xff]  ;;  %v10420_v12 = vld [vmem:[%s11758_s13 + $0xb4] sm:$0xf] }
 0x1dc   : > { %v6502_v6 = vsel %vm6496_vm10, %v6421_v63, %v5437_v35  ;;  %v2059_v47 = vsel %vm11768_vm2, %v2054_v7, %v17695_v62  ;;  %v4179_v23 = vsel %vm12232_vm5, %v4177_v45, %v4178_v56  ;;  %v3389_v61 = vsel %vm11768_vm2, %v3384_v49, %v3388_v25  ;;  %v17699_v25 = vld [vmem:[#allocation86_spill] sm:$0xff]  ;;  %v5657_v42 = vpop.permute.xlu1 %5656  ;;  %v14309_v49 = vld [vmem:[%s11758_s13 + $0xb8] sm:$0xf] }
 0x1dd   : > { %v2823_v30 = vrot.slane %v17694_v51, 4  ;;  %v3399_v2 = vsel %vm11768_vm2, %v3394_v26, %v3398_v38  ;;  %v10706_v34 = vcombine.low %v2049_v44, %v2059_v47  ;;  %v4180_v24 = vrot.slane %v4178_v56, 4  ;;  %v17700_v38 = vld [vmem:[#allocation87_spill] sm:$0xff]  ;;  %v17701_v7 = vld [vmem:[#allocation90_spill] sm:$0xff] }
 0x1de   : > { %6076 = vrot.lane.b32.xlu1 %v10864_v1, %s11676_s14  ;;  %v10825_v36 = vcombine.low %v3389_v61, %v3399_v2  ;;  %v17696_v22 = vmov %v17694_v51  ;;  %v17698_v63 = vrot.slane %v17697_v29, 5  ;;  %v2063_v46 = vor.u32 %v17699_v25, %v17695_v62  ;;  %v5439_v1 = vpop.permute.xlu0 %5438 }
 0x1df   : > { %v2822_v0 = vsel %vm12232_vm5, %v10377_v5, %v17696_v22  ;;  %v4182_v44 = vsel %vm12232_vm5, %v4180_v24, %v4181_v41  ;;  %v2073_v45 = vor.u32 %v17701_v7, %v17700_v38  ;;  %v2076_v56 = vshll.u32 %v10337_v37, 16  ;;  %v17703_v22 = vld [vmem:[#allocation76_spill] sm:$0xff] }
 0x1e0   : > { %v2825_v9 = vsel %vm12232_vm5, %v2823_v30, %v17698_v63  ;;  %5878 = vrot.lane.b32.xlu0 %v10825_v36, %s11675_s12  ;;  %v6423_v26 = vsel %vm6415_vm9, %v13950_v27, %v5239_v40  ;;  %v10865_v35 = vcombine.low %v4179_v23, %v4182_v44  ;;  %v6583_v5 = vsel %vm6577_vm11, %v6502_v6, %v5657_v42  ;;  %v14324_v23 = vld [vmem:[%s11758_s13 + $0xbc] sm:$0xf] }
 0x1e1   : > { %v10746_v13 = vcombine.low %v2822_v0, %v2825_v9  ;;  %v2064_v50 = vrot.slane %v2063_v46, 4  ;;  %v2074_v41 = vrot.slane %v2073_v45, 4  ;;  %v2078_v51 = vrot.slane %v2076_v56, 5  ;;  %v14331_v9 = vld [vmem:[%s11758_s13 + $0xc0] sm:$0xf]  ;;  %v5857_v46 = vpop.permute.xlu1 %5856 }
 0x1e2   : > { %v3401_v30 = vshrl.u32 %v10420_v12, 16  ;;  %v3404_v62 = vshll.u32 %v10420_v12, 16  ;;  %5260 = vrot.lane.b32.xlu1 %v10706_v34, %s11672_s23  ;;  %v6504_v47 = vsel %vm6496_vm10, %v6423_v26, %v5439_v1  ;;  %v3414_v27 = vshrl.u32 %v14309_v49, 16  ;;  %v5659_v24 = vpop.permute.xlu0 %5658 }
 0x1e3   : > { %v2069_v61 = vsel %vm11768_vm2, %v2064_v50, %v17700_v38  ;;  %v17702_v40 = vmov %v17698_v63  ;;  %v2079_v2 = vsel %vm11768_vm2, %v2074_v41, %v2078_v51  ;;  %v17704_v0 = vrot.slane %v17703_v22, 5  ;;  %v10499_v38 = vld [vmem:[%s11758_s13 + $0xb4] sm:$0xe]  ;;  %v14358_v22 = vld [vmem:[%s11758_s13 + $0xbc] sm:$0xf] }
 0x1e4   : > { %v2826_v6 = vrot.slane %v17702_v40, 4  ;;  %v3403_v36 = vrot.slane %v3401_v30, 4  ;;  %v3406_v34 = vrot.slane %v3404_v62, 5  ;;  %6078 = vrot.lane.b32.xlu0 %v10865_v35, %s11676_s14  ;;  %v10707_v25 = vcombine.low %v2069_v61, %v2079_v2  ;;  %v10479_v40 = vld [vmem:[%s11758_s13 + $0xc4] sm:$0x1] }
 0x1e5   : > { %v2829_v63 = vrot.slane %v17704_v0, 4  ;;  %v10786_v29 = vcombine.low %v10420_v12, %v14309_v49  ;;  %v17705_v44 = vmov %v17704_v0  ;;  %v2830_v1 = vrot.slane %v10337_v37, 5 }
 0x1e6   : > { %v2828_v42 = vsel %vm12232_vm5, %v2826_v6, %v17705_v44  ;;  %v6585_v7 = vsel %vm6577_vm11, %v6504_v47, %v5659_v24  ;;  %v3407_v45 = vor.u32 %v3406_v34, %v3403_v36  ;;  %v3410_v56 = vshll.u32 %v14309_v49, 16  ;;  %5460 = vrot.lane.b32.xlu1 %v10746_v13, %s11673_s29  ;;  %v6057_v47 = vpop.permute.xlu1 %6056  ;;  %v5859_v61 = vpop.permute.xlu0 %5858 }
 0x1e7   : > { %v3416_v26 = vrot.slane %v3414_v27, 4  ;;  %v6664_v35 = vsel %vm6658_vm12, %v6583_v5, %v5857_v46  ;;  %v2831_v12 = vsel %vm12232_vm5, %v2829_v63, %v2830_v1  ;;  %v3420_v50 = vshll.u32 %v14324_v23, 16 }
 0x1e8   : > { %v3434_v41 = vshrl.u32 %v14331_v9, 16  ;;  %v10747_v37 = vcombine.low %v2828_v42, %v2831_v12  ;;  %v3408_v51 = vrot.slane %v3407_v45, 4  ;;  %v3412_v30 = vrot.slane %v3410_v56, 5  ;;  %5262 = vrot.lane.b32.xlu0 %v10707_v25, %s11672_s23  ;;  %v14371_v56 = vld [vmem:[%s11758_s13 + $0xc0] sm:$0xf] }
 0x1e9   : > { %v10519_v62 = vrot.slane %v10499_v38, 9  ;;  %v3422_v27 = vrot.slane %v3420_v50, 5  ;;  %v4185_v13 = vrot.slane %v14309_v49, 5  ;;  %v4188_v5 = vrot.slane %v14324_v23, 5 }
 0x1ea   : > { %v3424_v6 = vshrl.u32 %v14324_v23, 16  ;;  %v6745_v2 = vsel %vm6739_vm14, %v6664_v35, %v6057_v47  ;;  %v6666_v24 = vsel %vm6658_vm12, %v6585_v7, %v5859_v61  ;;  %v3417_v36 = vor.u32 %v3416_v26, %v3412_v30  ;;  %5680 = vrot.lane.b32.xlu1 %v10786_v29, %s11674_s11  ;;  %v5241_v1 = vpop.permute.xlu1 %5240  ;;  %v6059_v29 = vpop.permute.xlu0 %6058 }
 0x1eb   : > { %v10787_v34 = vcombine.low %v14324_v23, %v14331_v9  ;;  %v3413_v49 = vsel %vm11768_vm2, %v3408_v51, %v3412_v30  ;;  %11171 = vmatprep.mubr.msk.bf16.mxu0 %vm6863_vm15, %v6745_v2  ;;  %v4187_v0 = vrot.slane %v4185_v13, 4  ;;  %v3430_v25 = vshll.u32 %v14331_v9, 16 }
 0x1ec   : > { %v3426_v63 = vrot.slane %v3424_v6, 4  ;;  %v3418_v46 = vrot.slane %v3417_v36, 4  ;;  %v4186_v44 = vsel %vm12232_vm5, %v10519_v62, %v4185_v13  ;;  %v3436_v42 = vrot.slane %v3434_v41, 4  ;;  %5462 = vrot.lane.b32.xlu0 %v10747_v37, %s11673_s29 }
 0x1ed   : > { %v3440_v23 = vshll.u32 %v10479_v40, 16  ;;  %v4189_v38 = vsel %vm12232_vm5, %v4187_v0, %v4188_v5  ;;  %v3432_v45 = vrot.slane %v3430_v25, 5  ;;  %v2100_v26 = vshll.u32 %v14358_v22, 16 }
 0x1ee   : > { %v3427_v7 = vor.u32 %v3426_v63, %v3422_v27  ;;  %v3423_v35 = vsel %vm11768_vm2, %v3418_v46, %v3422_v27  ;;  %v6425_v12 = vsel %vm6415_vm9, %v13997_v8, %v5241_v1  ;;  %v6747_v50 = vsel %vm6739_vm14, %v6666_v24, %v6059_v29  ;;  %v5441_v2 = vpop.permute.xlu1 %5440  ;;  %v5243_v24 = vpop.permute.xlu0 %5242  ;;  %v17706_v29 = vld [vmem:[#allocation93_spill] sm:$0xff] }
 0x1ef   : > { %v2104_v41 = vshrl.u32 %v14358_v22, 16  ;;  %v10826_v37 = vcombine.low %v3413_v49, %v3423_v35  ;;  %v3437_v30 = vor.u32 %v3436_v42, %v3432_v45  ;;  %v3442_v62 = vrot.slane %v3440_v23, 5  ;;  %11172 = vmatmul.mubr.msk.bf16.gmra.mrb[4].mxu0 %vm6863_vm15, %v6747_v50  ;;  %v10338_v49 = vld [vmem:[%s11758_s13 + $0xc4] sm:$0x1] }
 0x1f0   : > { %v3428_v51 = vrot.slane %v3427_v7, 4  ;;  %v10866_v47 = vcombine.low %v4186_v44, %v4189_v38  ;;  %v2114_v61 = vshrl.u32 %v14371_v56, 16  ;;  %v4190_v13 = vrot.slane %v4188_v5, 4  ;;  %5682 = vrot.lane.b32.xlu0 %v10787_v34, %s11674_s11  ;;  %v17707_v38 = vld [vmem:[#allocation96_spill] sm:$0xff] }
 0x1f1   : > { %v4191_v27 = vrot.slane %v14331_v9, 5  ;;  %5880 = vrot.lane.b32.xlu1 %v10826_v37, %s11675_s12  ;;  %v3438_v6 = vrot.slane %v3437_v30, 4  ;;  %v4194_v36 = vrot.slane %v10479_v40, 5  ;;  %v2102_v0 = vrot.slane %v2100_v26, 5 }
 0x1f2   : > { %v3433_v8 = vsel %vm11768_vm2, %v3428_v51, %v3432_v45  ;;  %v6506_v63 = vsel %vm6496_vm10, %v6425_v12, %v5441_v2  ;;  %v10669_v5 = vcombine.low %v14358_v22, %v14371_v56  ;;  %v2106_v46 = vrot.slane %v2104_v41, 4  ;;  %v5661_v26 = vpop.permute.xlu1 %5660  ;;  %v5443_v35 = vpop.permute.xlu0 %5442  ;;  %v17708_v41 = vld [vmem:[#allocation95_spill] sm:$0xff]  ;;  %v10358_v51 = vld [vmem:[%s11758_s13 + $0xb4] sm:$0xe] }
 0x1f3   : > { %v4192_v9 = vsel %vm12232_vm5, %v4190_v13, %v4191_v27  ;;  %v4193_v25 = vrot.slane %v4191_v27, 4  ;;  %v3443_v34 = vsel %vm11768_vm2, %v3438_v6, %v3442_v62  ;;  %v2110_v44 = vshll.u32 %v14371_v56, 16 }
 0x1f4   : > { %v2116_v42 = vrot.slane %v2114_v61, 4  ;;  %v10827_v40 = vcombine.low %v3433_v8, %v3443_v34  ;;  %v2120_v1 = vshll.u32 %v10338_v49, 16  ;;  %v2093_v7 = vsel %vm11768_vm2, %v17707_v38, %v17706_v29 }
 0x1f5   : > { %v4195_v23 = vsel %vm12232_vm5, %v4193_v25, %v4194_v36  ;;  %6080 = vrot.lane.b32.xlu1 %v10866_v47, %s11676_s14  ;;  %v6427_v45 = vsel %vm6415_vm9, %v13986_v17, %v5243_v24  ;;  %v2107_v12 = vor.u32 %v2106_v46, %v2102_v0  ;;  %v2112_v50 = vrot.slane %v2110_v44, 5  ;;  %v17709_v36 = vld [vmem:[#allocation89_spill] sm:$0xff]  ;;  %v14420_v44 = vld [vmem:[%s11758_s13 + $0xd0] sm:$0xf] }
 0x1f6   : > { %v2097_v37 = vor.u32 %v17708_v41, %v17706_v29  ;;  %5882 = vrot.lane.b32.xlu0 %v10827_v40, %s11675_s12  ;;  %v10867_v30 = vcombine.low %v4192_v9, %v4195_v23  ;;  %v6587_v62 = vsel %vm6577_vm11, %v6506_v63, %v5661_v26  ;;  %v2122_v61 = vrot.slane %v2120_v1, 5  ;;  %v5663_v46 = vpop.permute.xlu0 %5662  ;;  %v5861_v40 = vpop.permute.xlu1 %5860  ;;  %v10424_v29 = vld [vmem:[%s11758_s13 + $0xc8] sm:$0xf] }
 0x1f7   : > { %v2837_v47 = vrot.slane %v14358_v22, 5  ;;  %v2108_v13 = vrot.slane %v2107_v12, 4  ;;  %v2117_v27 = vor.u32 %v2116_v42, %v2112_v50  ;;  %v2840_v8 = vrot.slane %v14371_v56, 5 }
 0x1f8   : > { %v2098_v17 = vrot.slane %v2097_v37, 4  ;;  %v2843_v2 = vrot.slane %v10338_v49, 5  ;;  %v10378_v24 = vrot.slane %v10358_v51, 9  ;;  %v17710_v25 = vrot.slane %v17709_v36, 5 }
 0x1f9   : > { %v2839_v6 = vrot.slane %v2837_v47, 4  ;;  %5066 = vrot.lane.b32.xlu1 %v10669_v5, %s11671_s16  ;;  %v2113_v63 = vsel %vm11768_vm2, %v2108_v13, %v2112_v50  ;;  %v2118_v9 = vrot.slane %v2117_v27, 4  ;;  %v2842_v56 = vrot.slane %v2840_v8, 4  ;;  %v10480_v27 = vld [vmem:[%s11758_s13 + $0xd8] sm:$0x1] }
 0x1fa   : > { %v2836_v34 = vrot.slane %v17710_v25, 4  ;;  %v2103_v22 = vsel %vm11768_vm2, %v2098_v17, %v2102_v0  ;;  %6082 = vrot.lane.b32.xlu0 %v10867_v30, %s11676_s14  ;;  %v6508_v49 = vsel %vm6496_vm10, %v6427_v45, %v5443_v35  ;;  %v17711_v23 = vmov %v17710_v25  ;;  %v14431_v0 = vld [vmem:[%s11758_s13 + $0xd4] sm:$0xf]  ;;  %v14442_v35 = vld [vmem:[%s11758_s13 + $0xcc] sm:$0xf]  ;;  %v5863_v17 = vpop.permute.xlu0 %5862 }
 0x1fb   : > { %v10708_v42 = vcombine.low %v2093_v7, %v2103_v22  ;;  %v2841_v5 = vsel %vm12232_vm5, %v2839_v6, %v2840_v8  ;;  %v2835_v1 = vsel %vm12232_vm5, %v10378_v24, %v17711_v23  ;;  %v2123_v38 = vsel %vm11768_vm2, %v2118_v9, %v2122_v61 }
 0x1fc   : > { %v6589_v26 = vsel %vm6577_vm11, %v6508_v49, %v5663_v46  ;;  %v2844_v7 = vsel %vm12232_vm5, %v2842_v56, %v2843_v2  ;;  %v2838_v45 = vsel %vm12232_vm5, %v2836_v34, %v2837_v47  ;;  %v10709_v12 = vcombine.low %v2113_v63, %v2123_v38  ;;  %v6061_v47 = vpop.permute.xlu1 %6060 }
 0x1fd   : > { %v6668_v50 = vsel %vm6658_vm12, %v6587_v62, %v5861_v40  ;;  %v10749_v41 = vcombine.low %v2841_v5, %v2844_v7  ;;  %v3464_v37 = vshll.u32 %v14420_v44, 16  ;;  %v10748_v51 = vcombine.low %v2835_v1, %v2838_v45  ;;  %v10500_v45 = vld [vmem:[%s11758_s13 + $0xc8] sm:$0xe] }
 0x1fe   : > { %v3468_v30 = vshrl.u32 %v14420_v44, 16  ;;  %v3478_v61 = vshrl.u32 %v14431_v0, 16  ;;  %v3445_v13 = vshrl.u32 %v10424_v29, 16  ;;  %5266 = vrot.lane.b32.xlu1 %v10709_v12, %s11672_s23  ;;  %5264 = vrot.lane.b32.xlu0 %v10708_v42, %s11672_s23  ;;  %v10789_v8 = vcombine.low %v14420_v44, %v14431_v0  ;;  %v6063_v1 = vpop.permute.xlu0 %6062 }
 0x1ff   : > { %v3448_v62 = vshll.u32 %v10424_v29, 16  ;;  %v3458_v6 = vshrl.u32 %v14442_v35, 16  ;;  %v3466_v2 = vrot.slane %v3464_v37, 5  ;;  %v6749_v24 = vsel %vm6739_vm14, %v6668_v50, %v6061_v47 }
 0x200   : > { %v3447_v36 = vrot.slane %v3445_v13, 4  ;;  %v10788_v25 = vcombine.low %v10424_v29, %v14442_v35  ;;  %v3470_v34 = vrot.slane %v3468_v30, 4  ;;  %11175 = vmatprep.mubr.msk.bf16.mxu0 %vm6863_vm15, %v6749_v24  ;;  %v3474_v9 = vshll.u32 %v14431_v0, 16  ;;  %v5245_v23 = vpop.permute.xlu1 %5244 }
 0x201   : > { %v3450_v63 = vrot.slane %v3448_v62, 5  ;;  %v3480_v22 = vrot.slane %v3478_v61, 4  ;;  %v3484_v46 = vshll.u32 %v10480_v27, 16  ;;  %v3454_v49 = vshll.u32 %v14442_v35, 16 }
 0x202   : > { %v3471_v56 = vor.u32 %v3470_v34, %v3466_v2  ;;  %v3460_v42 = vrot.slane %v3458_v6, 4  ;;  %v4201_v40 = vrot.slane %v14420_v44, 5  ;;  %5466 = vrot.lane.b32.xlu1 %v10749_v41, %s11673_s29  ;;  %5464 = vrot.lane.b32.xlu0 %v10748_v51, %s11673_s29  ;;  %v6670_v5 = vsel %vm6658_vm12, %v6589_v26, %v5863_v17  ;;  %v14477_v34 = vld [vmem:[%s11758_s13 + $0xd0] sm:$0xf] }
 0x203   : > { %v3476_v29 = vrot.slane %v3474_v9, 5  ;;  %v3451_v38 = vor.u32 %v3450_v63, %v3447_v36  ;;  %v4204_v7 = vrot.slane %v14431_v0, 5  ;;  %v6751_v12 = vsel %vm6739_vm14, %v6670_v5, %v6063_v1  ;;  %v5247_v36 = vpop.permute.xlu0 %5246  ;;  %v14485_v9 = vld [vmem:[%s11758_s13 + $0xd4] sm:$0xf] }
 0x204   : > { %v3472_v50 = vrot.slane %v3471_v56, 4  ;;  %v3486_v37 = vrot.slane %v3484_v46, 5  ;;  %v3456_v30 = vrot.slane %v3454_v49, 5  ;;  %11176 = vmatmul.mubr.msk.bf16.gmra.mrb[8].mxu0 %vm6863_vm15, %v6751_v12  ;;  %v4203_v41 = vrot.slane %v4201_v40, 4  ;;  %v5445_v24 = vpop.permute.xlu1 %5444  ;;  %v10286_v49 = vld [vmem:[%s11758_s13 + $0xc8] sm:$0xf] }
 0x205   : > { %v3481_v61 = vor.u32 %v3480_v22, %v3476_v29  ;;  %v3452_v44 = vrot.slane %v3451_v38, 4  ;;  %v4206_v51 = vrot.slane %v4204_v7, 4  ;;  %v6429_v26 = vsel %vm6415_vm9, %v14012_v4, %v5245_v23 }
 0x206   : > { %v3461_v13 = vor.u32 %v3460_v42, %v3456_v30  ;;  %v4207_v47 = vrot.slane %v10480_v27, 5  ;;  %v10520_v0 = vrot.slane %v10500_v45, 9  ;;  %5686 = vrot.lane.b32.xlu1 %v10789_v8, %s11674_s11  ;;  %5684 = vrot.lane.b32.xlu0 %v10788_v25, %s11674_s11  ;;  %v3477_v17 = vsel %vm11768_vm2, %v3472_v50, %v3476_v29  ;;  %v14499_v29 = vld [vmem:[%s11758_s13 + $0xcc] sm:$0xf] }
 0x207   : > { %v3482_v62 = vrot.slane %v3481_v61, 4  ;;  %v3457_v6 = vsel %vm11768_vm2, %v3452_v44, %v3456_v30  ;;  %v4198_v4 = vrot.slane %v14442_v35, 5  ;;  %v6510_v8 = vsel %vm6496_vm10, %v6429_v26, %v5445_v24  ;;  %v5447_v12 = vpop.permute.xlu0 %5446  ;;  %v10339_v44 = vld [vmem:[%s11758_s13 + $0xd8] sm:$0x1] }
 0x208   : > { %v3462_v27 = vrot.slane %v3461_v13, 4  ;;  %v4205_v25 = vsel %vm12232_vm5, %v4203_v41, %v4204_v7  ;;  %v4208_v63 = vsel %vm12232_vm5, %v4206_v51, %v4207_v47  ;;  %v6431_v35 = vsel %vm6415_vm9, %v14005_v11, %v5247_v36  ;;  %v5665_v45 = vpop.permute.xlu1 %5664 }
 0x209   : > { %v3487_v22 = vsel %vm11768_vm2, %v3482_v62, %v3486_v37  ;;  %v4199_v46 = vsel %vm12232_vm5, %v10520_v0, %v4198_v4  ;;  %v4200_v56 = vrot.slane %v4198_v4, 4  ;;  %v2144_v23 = vshll.u32 %v14477_v34, 16 }
 0x20a   : > { %v10829_v42 = vcombine.low %v3477_v17, %v3487_v22  ;;  %v3467_v5 = vsel %vm11768_vm2, %v3462_v27, %v3466_v2  ;;  %v2148_v1 = vshrl.u32 %v14477_v34, 16  ;;  %v10869_v7 = vcombine.low %v4205_v25, %v4208_v63 }
 0x20b   : > { %v10828_v38 = vcombine.low %v3457_v6, %v3467_v5  ;;  %v4202_v11 = vsel %vm12232_vm5, %v4200_v56, %v4201_v40  ;;  %v2158_v50 = vshrl.u32 %v14485_v9, 16  ;;  %v6591_v2 = vsel %vm6577_vm11, %v6510_v8, %v5665_v45  ;;  %v5667_v24 = vpop.permute.xlu0 %5666 }
 0x20c   : > { %5886 = vrot.lane.b32.xlu1 %v10829_v42, %s11675_s12  ;;  %v10868_v37 = vcombine.low %v4199_v46, %v4202_v11  ;;  %v10671_v30 = vcombine.low %v14477_v34, %v14485_v9  ;;  %v2125_v61 = vshrl.u32 %v10286_v49, 16  ;;  %v6512_v41 = vsel %vm6496_vm10, %v6431_v35, %v5447_v12  ;;  %v5865_v6 = vpop.permute.xlu1 %5864  ;;  %v10359_v35 = vld [vmem:[%s11758_s13 + $0xc8] sm:$0xe] }
 0x20d   : > { %5884 = vrot.lane.b32.xlu0 %v10828_v38, %s11675_s12  ;;  %v2128_v51 = vshll.u32 %v10286_v49, 16  ;;  %v2138_v40 = vshrl.u32 %v14499_v29, 16  ;;  %v2146_v26 = vrot.slane %v2144_v23, 5  ;;  %v2150_v47 = vrot.slane %v2148_v1, 4 }
 0x20e   : > { %v2127_v13 = vrot.slane %v2125_v61, 4  ;;  %v2154_v0 = vshll.u32 %v14485_v9, 16  ;;  %v2160_v17 = vrot.slane %v2158_v50, 4  ;;  %v2164_v36 = vshll.u32 %v10339_v44, 16 }
 0x20f   : > { %v2130_v62 = vrot.slane %v2128_v51, 5  ;;  %v2134_v4 = vshll.u32 %v14499_v29, 16  ;;  %v2140_v27 = vrot.slane %v2138_v40, 4  ;;  %v10670_v8 = vcombine.low %v10286_v49, %v14499_v29  ;;  %v5867_v61 = vpop.permute.xlu0 %5866  ;;  %v14526_v40 = vld [vmem:[%s11758_s13 + $0xe4] sm:$0xf] }
 0x210   : > { %6086 = vrot.lane.b32.xlu1 %v10869_v7, %s11676_s14  ;;  %v6672_v25 = vsel %vm6658_vm12, %v6591_v2, %v5865_v6  ;;  %v2151_v63 = vor.u32 %v2150_v47, %v2146_v26  ;;  %v2156_v22 = vrot.slane %v2154_v0, 5  ;;  %v2166_v46 = vrot.slane %v2164_v36, 5  ;;  %v6065_v45 = vpop.permute.xlu1 %6064  ;;  %v10428_v6 = vld [vmem:[%s11758_s13 + $0xdc] sm:$0xf] }
 0x211   : > { %6084 = vrot.lane.b32.xlu0 %v10868_v37, %s11676_s14  ;;  %v2131_v56 = vor.u32 %v2130_v62, %v2127_v13  ;;  %v2136_v42 = vrot.slane %v2134_v4, 5  ;;  %v2850_v5 = vrot.slane %v14477_v34, 5  ;;  %v2853_v38 = vrot.slane %v14485_v9, 5  ;;  %v14542_v62 = vld [vmem:[%s11758_s13 + $0xe8] sm:$0xf] }
 0x212   : > { %v2152_v23 = vrot.slane %v2151_v63, 4  ;;  %v2161_v1 = vor.u32 %v2160_v17, %v2156_v22  ;;  %v2856_v7 = vrot.slane %v10339_v44, 5  ;;  %v10379_v50 = vrot.slane %v10359_v35, 9 }
 0x213   : > { %v2132_v11 = vrot.slane %v2131_v56, 4  ;;  %v2141_v49 = vor.u32 %v2140_v27, %v2136_v42  ;;  %v2852_v12 = vrot.slane %v2850_v5, 4  ;;  %v6753_v34 = vsel %vm6739_vm14, %v6672_v25, %v6065_v45  ;;  %v14550_v25 = vld [vmem:[%s11758_s13 + $0xe0] sm:$0xf] }
 0x214   : > { %5070 = vrot.lane.b32.xlu1 %v10671_v30, %s11671_s16  ;;  %v2157_v37 = vsel %vm11768_vm2, %v2152_v23, %v2156_v22  ;;  %v2162_v2 = vrot.slane %v2161_v1, 4  ;;  %v2855_v51 = vrot.slane %v2853_v38, 4  ;;  %v6593_v9 = vsel %vm6577_vm11, %v6512_v41, %v5667_v24  ;;  %11179 = vmatprep.mubr.msk.bf16.mxu0 %vm6863_vm15, %v6753_v34  ;;  %v5249_v4 = vpop.permute.xlu1 %5248 }
 0x215   : > { %5068 = vrot.lane.b32.xlu0 %v10670_v8, %s11671_s16  ;;  %v2137_v30 = vsel %vm11768_vm2, %v2132_v11, %v2136_v42  ;;  %v2142_v44 = vrot.slane %v2141_v49, 4  ;;  %v2854_v13 = vsel %vm12232_vm5, %v2852_v12, %v2853_v38  ;;  %v6674_v0 = vsel %vm6658_vm12, %v6593_v9, %v5867_v61  ;;  %v10481_v49 = vld [vmem:[%s11758_s13 + $0xec] sm:$0x1] }
 0x216   : > { %v2167_v47 = vsel %vm11768_vm2, %v2162_v2, %v2166_v46  ;;  %v2857_v17 = vsel %vm12232_vm5, %v2855_v51, %v2856_v7  ;;  %v2847_v41 = vrot.slane %v14499_v29, 5  ;;  %v3508_v27 = vshll.u32 %v14526_v40, 16  ;;  %v6067_v46 = vpop.permute.xlu0 %6066 }
 0x217   : > { %v10711_v24 = vcombine.low %v2157_v37, %v2167_v47  ;;  %v2147_v36 = vsel %vm11768_vm2, %v2142_v44, %v2146_v26  ;;  %v3512_v8 = vshrl.u32 %v14526_v40, 16  ;;  %v10751_v22 = vcombine.low %v2854_v13, %v2857_v17 }
 0x218   : > { %v10710_v63 = vcombine.low %v2137_v30, %v2147_v36  ;;  %v2848_v29 = vsel %vm12232_vm5, %v10379_v50, %v2847_v41  ;;  %v2849_v35 = vrot.slane %v2847_v41, 4  ;;  %v6433_v26 = vsel %vm6415_vm9, %v14035_v55, %v5249_v4  ;;  %v5449_v12 = vpop.permute.xlu1 %5448 }
 0x219   : > { %5270 = vrot.lane.b32.xlu1 %v10711_v24, %s11672_s23  ;;  %v6755_v56 = vsel %vm6739_vm14, %v6674_v0, %v6067_v46  ;;  %v3522_v42 = vshrl.u32 %v14542_v62, 16  ;;  %v3489_v23 = vshrl.u32 %v10428_v6, 16  ;;  %v10791_v38 = vcombine.low %v14526_v40, %v14542_v62  ;;  %v10501_v46 = vld [vmem:[%s11758_s13 + $0xdc] sm:$0xe] }
 0x21a   : > { %5268 = vrot.lane.b32.xlu0 %v10710_v63, %s11672_s23  ;;  %v2851_v1 = vsel %vm12232_vm5, %v2849_v35, %v2850_v5  ;;  %v3492_v7 = vshll.u32 %v10428_v6, 16  ;;  %v3502_v11 = vshrl.u32 %v14550_v25, 16  ;;  %11180 = vmatmul.mubr.msk.bf16.gmra.mrb[12].mxu0 %vm6863_vm15, %v6755_v56  ;;  %v3510_v50 = vrot.slane %v3508_v27, 5  ;;  %v5251_v61 = vpop.permute.xlu0 %5250 }
 0x21b   : > { %v10750_v55 = vcombine.low %v2848_v29, %v2851_v1  ;;  %v3491_v45 = vrot.slane %v3489_v23, 4  ;;  %v3514_v37 = vrot.slane %v3512_v8, 4  ;;  %v10790_v34 = vcombine.low %v10428_v6, %v14550_v25 }
 0x21c   : > { %v3494_v2 = vrot.slane %v3492_v7, 5  ;;  %v3518_v5 = vshll.u32 %v14542_v62, 16  ;;  %v3524_v51 = vrot.slane %v3522_v42, 4  ;;  %v6514_v9 = vsel %vm6496_vm10, %v6433_v26, %v5449_v12  ;;  %v5669_v4 = vpop.permute.xlu1 %5668  ;;  %v14583_v42 = vld [vmem:[%s11758_s13 + $0x1ac] sm:$0xf] }
 0x21d   : > { %5470 = vrot.lane.b32.xlu1 %v10751_v22, %s11673_s29  ;;  %v3515_v30 = vor.u32 %v3514_v37, %v3510_v50  ;;  %v3528_v44 = vshll.u32 %v10481_v49, 16  ;;  %v3498_v13 = vshll.u32 %v14550_v25, 16  ;;  %v3504_v17 = vrot.slane %v3502_v11, 4  ;;  %v14590_v7 = vld [vmem:[%s11758_s13 + $0x1b0] sm:$0xf] }
 0x21e   : > { %5468 = vrot.lane.b32.xlu0 %v10750_v55, %s11673_s29  ;;  %v3520_v47 = vrot.slane %v3518_v5, 5  ;;  %v3495_v0 = vor.u32 %v3494_v2, %v3491_v45  ;;  %v4214_v41 = vrot.slane %v14526_v40, 5  ;;  %v6435_v6 = vsel %vm6415_vm9, %v14023_v28, %v5251_v61  ;;  %v5451_v29 = vpop.permute.xlu0 %5450 }
 0x21f   : > { %v3516_v24 = vrot.slane %v3515_v30, 4  ;;  %v3500_v36 = vrot.slane %v3498_v13, 5  ;;  %v4217_v27 = vrot.slane %v14542_v62, 5  ;;  %v3530_v63 = vrot.slane %v3528_v44, 5 }
 0x220   : > { %v3525_v8 = vor.u32 %v3524_v51, %v3520_v47  ;;  %v3496_v22 = vrot.slane %v3495_v0, 4  ;;  %v4216_v35 = vrot.slane %v4214_v41, 4  ;;  %v6595_v28 = vsel %vm6577_vm11, %v6514_v9, %v5669_v4  ;;  %v10290_v51 = vld [vmem:[%s11758_s13 + $0x1a4] sm:$0xf]  ;;  %v14603_v9 = vld [vmem:[%s11758_s13 + $0x1a8] sm:$0xf] }
 0x221   : > { %5690 = vrot.lane.b32.xlu1 %v10791_v38, %s11674_s11  ;;  %v3521_v40 = vsel %vm11768_vm2, %v3516_v24, %v3520_v47  ;;  %v3505_v26 = vor.u32 %v3504_v17, %v3500_v36  ;;  %v4219_v56 = vrot.slane %v4217_v27, 4  ;;  %v6516_v23 = vsel %vm6496_vm10, %v6435_v6, %v5451_v29 }
 0x222   : > { %5688 = vrot.lane.b32.xlu0 %v10790_v34, %s11674_s11  ;;  %v3526_v62 = vrot.slane %v3525_v8, 4  ;;  %v4218_v1 = vsel %vm12232_vm5, %v4216_v35, %v4217_v27  ;;  %v4220_v38 = vrot.slane %v10481_v49, 5  ;;  %v3501_v11 = vsel %vm11768_vm2, %v3496_v22, %v3500_v36  ;;  %v5869_v34 = vpop.permute.xlu1 %5868  ;;  %v5671_v61 = vpop.permute.xlu0 %5670  ;;  %v10340_v22 = vld [vmem:[%s11758_s13 + $0x1b4] sm:$0x1] }
 0x223   : > { %v3506_v55 = vrot.slane %v3505_v26, 4  ;;  %v10521_v45 = vrot.slane %v10501_v46, 9  ;;  %v4211_v12 = vrot.slane %v14550_v25, 5  ;;  %v2188_v5 = vshll.u32 %v14583_v42, 16 }
 0x224   : > { %v3531_v37 = vsel %vm11768_vm2, %v3526_v62, %v3530_v63  ;;  %v4221_v2 = vsel %vm12232_vm5, %v4219_v56, %v4220_v38  ;;  %v2192_v49 = vshrl.u32 %v14583_v42, 16  ;;  %v2202_v13 = vshrl.u32 %v14590_v7, 16 }
 0x225   : > { %v10831_v30 = vcombine.low %v3521_v40, %v3531_v37  ;;  %v3511_v44 = vsel %vm11768_vm2, %v3506_v55, %v3510_v50  ;;  %v10871_v25 = vcombine.low %v4218_v1, %v4221_v2  ;;  %v4212_v0 = vsel %vm12232_vm5, %v10521_v45, %v4211_v12 }
 0x226   : > { %v10830_v47 = vcombine.low %v3501_v11, %v3511_v44  ;;  %v4213_v17 = vrot.slane %v4211_v12, 4  ;;  %v6676_v6 = vsel %vm6658_vm12, %v6595_v28, %v5869_v34  ;;  %v6597_v24 = vsel %vm6577_vm11, %v6516_v23, %v5671_v61  ;;  %v6069_v63 = vpop.permute.xlu1 %6068  ;;  %v5871_v56 = vpop.permute.xlu0 %5870 }
 0x227   : > { %5890 = vrot.lane.b32.xlu1 %v10831_v30, %s11675_s12  ;;  %v2169_v36 = vshrl.u32 %v10290_v51, 16  ;;  %v2172_v4 = vshll.u32 %v10290_v51, 16  ;;  %v2182_v27 = vshrl.u32 %v14603_v9, 16  ;;  %v10673_v8 = vcombine.low %v14583_v42, %v14590_v7 }
 0x228   : > { %5888 = vrot.lane.b32.xlu0 %v10830_v47, %s11675_s12  ;;  %v4215_v50 = vsel %vm12232_vm5, %v4213_v17, %v4214_v41  ;;  %v14620_v29 = vrot.slane %v2188_v5, 5  ;;  %v2194_v35 = vrot.slane %v2192_v49, 4  ;;  %v6757_v28 = vsel %vm6739_vm14, %v6676_v6, %v6069_v63 }
 0x229   : > { %v10870_v46 = vcombine.low %v4212_v0, %v4215_v50  ;;  %v2171_v40 = vrot.slane %v2169_v36, 4  ;;  %v2174_v26 = vrot.slane %v2172_v4, 5  ;;  %v10672_v62 = vcombine.low %v10290_v51, %v14603_v9  ;;  %11183 = vmatprep.mubr.msk.bf16.mxu0 %vm6863_vm15, %v6757_v28  ;;  %v14642_v36 = vld [vmem:[%s11758_s13 + $0x1c0] sm:$0xf] }
 0x22a   : > { %v2195_v23 = vor.u32 %v2194_v35, %v14620_v29  ;;  %v2198_v41 = vshll.u32 %v14590_v7, 16  ;;  %v2204_v1 = vrot.slane %v2202_v13, 4  ;;  %v2208_v38 = vshll.u32 %v10340_v22, 16  ;;  %v5253_v2 = vpop.permute.xlu1 %5252  ;;  %v6071_v44 = vpop.permute.xlu0 %6070 }
 0x22b   : > { %6090 = vrot.lane.b32.xlu1 %v10871_v25, %s11676_s14  ;;  %v2175_v11 = vor.u32 %v2174_v26, %v2171_v40  ;;  %v2178_v55 = vshll.u32 %v14603_v9, 16  ;;  %v2184_v45 = vrot.slane %v2182_v27, 4  ;;  %v2863_v34 = vrot.slane %v14583_v42, 5  ;;  %v10360_v25 = vld [vmem:[%s11758_s13 + $0x1a4] sm:$0xe] }
 0x22c   : > { %6088 = vrot.lane.b32.xlu0 %v10870_v46, %s11676_s14  ;;  %v2196_v12 = vrot.slane %v2195_v23, 4  ;;  %v2200_v37 = vrot.slane %v2198_v41, 5  ;;  %v2866_v61 = vrot.slane %v14590_v7, 5  ;;  %v6678_v5 = vsel %vm6658_vm12, %v6597_v24, %v5871_v56  ;;  %v14654_v26 = vld [vmem:[%s11758_s13 + $0x1c4] sm:$0xf] }
 0x22d   : > { %v2210_v49 = vrot.slane %v2208_v38, 5  ;;  %v2176_v51 = vrot.slane %v2175_v11, 4  ;;  %v2180_v30 = vrot.slane %v2178_v55, 5  ;;  %v6437_v47 = vsel %vm6415_vm9, %v14073_v21, %v5253_v2  ;;  %v10432_v23 = vld [vmem:[%s11758_s13 + $0x1b8] sm:$0xf] }
 0x22e   : > { %v2205_v13 = vor.u32 %v2204_v1, %v2200_v37  ;;  %v6759_v0 = vsel %vm6739_vm14, %v6678_v5, %v6071_v44  ;;  %v2865_v17 = vrot.slane %v2863_v34, 4  ;;  %v2201_v42 = vsel %vm11768_vm2, %v2196_v12, %v2200_v37  ;;  %v5255_v40 = vpop.permute.xlu0 %5254  ;;  %v14661_v41 = vld [vmem:[%s11758_s13 + $0x1bc] sm:$0xf]  ;;  %v10482_v44 = vld [vmem:[%s11758_s13 + $0x1c8] sm:$0x1] }
 0x22f   : > { %5074 = vrot.lane.b32.xlu1 %v10673_v8, %s11671_s16  ;;  %v2185_v7 = vor.u32 %v2184_v45, %v2180_v30  ;;  %v2868_v6 = vrot.slane %v2866_v61, 4  ;;  %v2869_v24 = vrot.slane %v10340_v22, 5  ;;  %11184 = vmatmul.mubr.msk.bf16.gmra.mrb[16].mxu0 %vm6863_vm15, %v6759_v0  ;;  %v10380_v27 = vrot.slane %v10360_v25, 9  ;;  %v5453_v8 = vpop.permute.xlu1 %5452 }
 0x230   : > { %5072 = vrot.lane.b32.xlu0 %v10672_v62, %s11671_s16  ;;  %v2206_v21 = vrot.slane %v2205_v13, 4  ;;  %v2867_v4 = vsel %vm12232_vm5, %v2865_v17, %v2866_v61  ;;  %v2860_v50 = vrot.slane %v14603_v9, 5  ;;  %v2181_v63 = vsel %vm11768_vm2, %v2176_v51, %v2180_v30 }
 0x231   : > { %v2186_v22 = vrot.slane %v2185_v7, 4  ;;  %v2870_v35 = vsel %vm12232_vm5, %v2868_v6, %v2869_v24  ;;  %v6518_v46 = vsel %vm6496_vm10, %v6437_v47, %v5453_v8  ;;  %v3552_v9 = vshll.u32 %v14642_v36, 16 }
 0x232   : > { %v2211_v28 = vsel %vm11768_vm2, %v2206_v21, %v2210_v49  ;;  %v10753_v56 = vcombine.low %v2867_v4, %v2870_v35  ;;  %v2862_v62 = vrot.slane %v2860_v50, 4  ;;  %v2861_v11 = vsel %vm12232_vm5, %v10380_v27, %v2860_v50  ;;  %v5455_v30 = vpop.permute.xlu0 %5454  ;;  %v10502_v35 = vld [vmem:[%s11758_s13 + $0x1b8] sm:$0xe] }
 0x233   : > { %v10713_v1 = vcombine.low %v2201_v42, %v2211_v28  ;;  %v2191_v38 = vsel %vm11768_vm2, %v2186_v22, %v14620_v29  ;;  %v3556_v55 = vshrl.u32 %v14642_v36, 16  ;;  %v6439_v37 = vsel %vm6415_vm9, %v14045_v52, %v5255_v40  ;;  %v5673_v61 = vpop.permute.xlu1 %5672 }
 0x234   : > { %v10712_v45 = vcombine.low %v2181_v63, %v2191_v38  ;;  %v2864_v12 = vsel %vm12232_vm5, %v2862_v62, %v2863_v34  ;;  %v3566_v2 = vshrl.u32 %v14654_v26, 16  ;;  %v10793_v29 = vcombine.low %v14642_v36, %v14654_v26 }
 0x235   : > { %5274 = vrot.lane.b32.xlu1 %v10713_v1, %s11672_s23  ;;  %v3533_v5 = vshrl.u32 %v10432_v23, 16  ;;  %v3536_v49 = vshll.u32 %v10432_v23, 16  ;;  %v3546_v51 = vshrl.u32 %v14661_v41, 16  ;;  %v10752_v34 = vcombine.low %v2861_v11, %v2864_v12 }
 0x236   : > { %5272 = vrot.lane.b32.xlu0 %v10712_v45, %s11672_s23  ;;  %v10792_v25 = vcombine.low %v10432_v23, %v14661_v41  ;;  %v6599_v52 = vsel %vm6577_vm11, %v6518_v46, %v5673_v61  ;;  %v3554_v13 = vrot.slane %v3552_v9, 5  ;;  %v3558_v17 = vrot.slane %v3556_v55, 4  ;;  %v5675_v63 = vpop.permute.xlu0 %5674 }
 0x237   : > { %v3535_v47 = vrot.slane %v3533_v5, 4  ;;  %v3538_v0 = vrot.slane %v3536_v49, 5  ;;  %v3562_v42 = vshll.u32 %v14654_v26, 16  ;;  %v3568_v7 = vrot.slane %v3566_v2, 4  ;;  %v5873_v8 = vpop.permute.xlu1 %5872  ;;  %v14697_v5 = vld [vmem:[%s11758_s13 + $0x1c0] sm:$0xf] }
 0x238   : > { %v3572_v6 = vshll.u32 %v10482_v44, 16  ;;  %v3542_v24 = vshll.u32 %v14661_v41, 16  ;;  %v3548_v21 = vrot.slane %v3546_v51, 4  ;;  %v3559_v4 = vor.u32 %v3558_v17, %v3554_v13 }
 0x239   : > { %5474 = vrot.lane.b32.xlu1 %v10753_v56, %s11673_s29  ;;  %v3564_v27 = vrot.slane %v3562_v42, 5  ;;  %v3539_v50 = vor.u32 %v3538_v0, %v3535_v47  ;;  %v4227_v22 = vrot.slane %v14642_v36, 5  ;;  %v6520_v46 = vsel %vm6496_vm10, %v6439_v37, %v5455_v30  ;;  %v10294_v47 = vld [vmem:[%s11758_s13 + $0x1b8] sm:$0xf] }
 0x23a   : > { %5472 = vrot.lane.b32.xlu0 %v10752_v34, %s11673_s29  ;;  %v3574_v40 = vrot.slane %v3572_v6, 5  ;;  %v3544_v28 = vrot.slane %v3542_v24, 5  ;;  %v6680_v62 = vsel %vm6658_vm12, %v6599_v52, %v5873_v8  ;;  %v3560_v9 = vrot.slane %v3559_v4, 4  ;;  %v14720_v6 = vld [vmem:[%s11758_s13 + $0x1bc] sm:$0xf] }
 0x23b   : > { %v3569_v23 = vor.u32 %v3568_v7, %v3564_v27  ;;  %v3540_v56 = vrot.slane %v3539_v50, 4  ;;  %v4229_v1 = vrot.slane %v4227_v22, 4  ;;  %v4230_v11 = vrot.slane %v14654_v26, 5  ;;  %v6073_v61 = vpop.permute.xlu1 %6072  ;;  %v5875_v30 = vpop.permute.xlu0 %5874 }
 0x23c   : > { %v3549_v38 = vor.u32 %v3548_v21, %v3544_v28  ;;  %v4233_v55 = vrot.slane %v10482_v44, 5  ;;  %v10522_v45 = vrot.slane %v10502_v35, 9  ;;  %v3565_v36 = vsel %vm11768_vm2, %v3560_v9, %v3564_v27 }
 0x23d   : > { %5694 = vrot.lane.b32.xlu1 %v10793_v29, %s11674_s11  ;;  %v3570_v12 = vrot.slane %v3569_v23, 4  ;;  %v6601_v37 = vsel %vm6577_vm11, %v6520_v46, %v5675_v63  ;;  %v4224_v2 = vrot.slane %v14661_v41, 5  ;;  %v3545_v26 = vsel %vm11768_vm2, %v3540_v56, %v3544_v28 }
 0x23e   : > { %5692 = vrot.lane.b32.xlu0 %v10792_v25, %s11674_s11  ;;  %v3550_v29 = vrot.slane %v3549_v38, 4  ;;  %v4232_v49 = vrot.slane %v4230_v11, 4  ;;  %v6761_v51 = vsel %vm6739_vm14, %v6680_v62, %v6073_v61  ;;  %v4231_v41 = vsel %vm12232_vm5, %v4229_v1, %v4230_v11  ;;  %v14710_v25 = vld [vmem:[%s11758_s13 + $0x1c4] sm:$0xf] }
 0x23f   : > { %v3575_v44 = vsel %vm11768_vm2, %v3570_v12, %v3574_v40  ;;  %v4225_v34 = vsel %vm12232_vm5, %v10522_v45, %v4224_v2  ;;  %v4226_v52 = vrot.slane %v4224_v2, 4  ;;  %11187 = vmatprep.mubr.msk.bf16.mxu0 %vm6863_vm15, %v6761_v51  ;;  %v2232_v7 = vshll.u32 %v14697_v5, 16  ;;  %v5257_v50 = vpop.permute.xlu1 %5256  ;;  %v6075_v46 = vpop.permute.xlu0 %6074  ;;  %v10341_v40 = vld [vmem:[%s11758_s13 + $0x1c8] sm:$0x1] }
 0x240   : > { %v10833_v0 = vcombine.low %v3565_v36, %v3575_v44  ;;  %v3555_v17 = vsel %vm11768_vm2, %v3550_v29, %v3554_v13  ;;  %v4234_v42 = vsel %vm12232_vm5, %v4232_v49, %v4233_v55  ;;  %v6682_v4 = vsel %vm6658_vm12, %v6601_v37, %v5875_v30  ;;  %v10361_v49 = vld [vmem:[%s11758_s13 + $0x1b8] sm:$0xe] }
 0x241   : > { %v10832_v24 = vcombine.low %v3545_v26, %v3555_v17  ;;  %v4228_v21 = vsel %vm12232_vm5, %v4226_v52, %v4227_v22  ;;  %v2236_v27 = vshrl.u32 %v14697_v5, 16  ;;  %v10873_v8 = vcombine.low %v4231_v41, %v4234_v42 }
 0x242   : > { %5894 = vrot.lane.b32.xlu1 %v10833_v0, %s11675_s12  ;;  %v10872_v13 = vcombine.low %v4225_v34, %v4228_v21  ;;  %v2246_v63 = vshrl.u32 %v14710_v25, 16  ;;  %v2213_v35 = vshrl.u32 %v10294_v47, 16  ;;  %v10675_v28 = vcombine.low %v14697_v5, %v14710_v25 }
 0x243   : > { %5892 = vrot.lane.b32.xlu0 %v10832_v24, %s11675_s12  ;;  %v2216_v22 = vshll.u32 %v10294_v47, 16  ;;  %v2226_v62 = vshrl.u32 %v14720_v6, 16  ;;  %v10674_v9 = vcombine.low %v10294_v47, %v14720_v6  ;;  %v6763_v56 = vsel %vm6739_vm14, %v6682_v4, %v6075_v46  ;;  %v5457_v12 = vpop.permute.xlu1 %5456  ;;  %v5259_v29 = vpop.permute.xlu0 %5258 }
 0x244   : > { %v2215_v23 = vrot.slane %v2213_v35, 4  ;;  %v2234_v1 = vrot.slane %v2232_v7, 5  ;;  %v2238_v38 = vrot.slane %v2236_v27, 4  ;;  %v2242_v55 = vshll.u32 %v14710_v25, 16  ;;  %11188 = vmatmul.mubr.msk.bf16.gmra.mrb[20].mxu0 %vm6863_vm15, %v6763_v56  ;;  %v14756_v35 = vld [vmem:[%s11758_s13 + $0x1d4] sm:$0xf] }
 0x245   : > { %v2218_v11 = vrot.slane %v2216_v22, 5  ;;  %v2248_v45 = vrot.slane %v2246_v63, 4  ;;  %v2252_v36 = vshll.u32 %v10341_v40, 16  ;;  %v6441_v37 = vsel %vm6415_vm9, %v14094_v53, %v5257_v50  ;;  %v14764_v22 = vld [vmem:[%s11758_s13 + $0x1d8] sm:$0xf] }
 0x246   : > { %6094 = vrot.lane.b32.xlu1 %v10873_v8, %s11676_s14  ;;  %v2239_v2 = vor.u32 %v2238_v38, %v2234_v1  ;;  %v2222_v61 = vshll.u32 %v14720_v6, 16  ;;  %v2228_v26 = vrot.slane %v2226_v62, 4  ;;  %v2244_v51 = vrot.slane %v2242_v55, 5  ;;  %v10436_v56 = vld [vmem:[%s11758_s13 + $0x1cc] sm:$0xf] }
 0x247   : > { %6092 = vrot.lane.b32.xlu0 %v10872_v13, %s11676_s14  ;;  %v2254_v30 = vrot.slane %v2252_v36, 5  ;;  %v2219_v44 = vor.u32 %v2218_v11, %v2215_v23  ;;  %v6522_v41 = vsel %vm6496_vm10, %v6441_v37, %v5457_v12  ;;  %v2876_v47 = vrot.slane %v14697_v5, 5  ;;  %v5677_v24 = vpop.permute.xlu1 %5676  ;;  %v14773_v38 = vld [vmem:[%s11758_s13 + $0x1d0] sm:$0xf] }
 0x248   : > { %v2240_v34 = vrot.slane %v2239_v2, 4  ;;  %v2224_v52 = vrot.slane %v2222_v61, 5  ;;  %v2879_v0 = vrot.slane %v14710_v25, 5  ;;  %v2249_v53 = vor.u32 %v2248_v45, %v2244_v51  ;;  %v5459_v8 = vpop.permute.xlu0 %5458 }
 0x249   : > { %v2220_v17 = vrot.slane %v2219_v44, 4  ;;  %v2882_v42 = vrot.slane %v10341_v40, 5  ;;  %v10381_v7 = vrot.slane %v10361_v49, 9  ;;  %v6443_v4 = vsel %vm6415_vm9, %v14085_v18, %v5259_v29  ;;  %v10483_v44 = vld [vmem:[%s11758_s13 + $0x1dc] sm:$0x1] }
 0x24a   : > { %5078 = vrot.lane.b32.xlu1 %v10675_v28, %s11671_s16  ;;  %v2229_v21 = vor.u32 %v2228_v26, %v2224_v52  ;;  %v2878_v27 = vrot.slane %v2876_v47, 4  ;;  %v2881_v50 = vrot.slane %v2879_v0, 4  ;;  %v2245_v5 = vsel %vm11768_vm2, %v2240_v34, %v2244_v51 }
 0x24b   : > { %5076 = vrot.lane.b32.xlu0 %v10674_v9, %s11671_s16  ;;  %v2250_v25 = vrot.slane %v2249_v53, 4  ;;  %v2225_v13 = vsel %vm11768_vm2, %v2220_v17, %v2224_v52  ;;  %v2873_v63 = vrot.slane %v14720_v6, 5  ;;  %v6603_v28 = vsel %vm6577_vm11, %v6522_v41, %v5677_v24 }
 0x24c   : > { %v2230_v46 = vrot.slane %v2229_v21, 4  ;;  %v2880_v18 = vsel %vm12232_vm5, %v2878_v27, %v2879_v0  ;;  %v2883_v40 = vsel %vm12232_vm5, %v2881_v50, %v2882_v42  ;;  %v6524_v23 = vsel %vm6496_vm10, %v6443_v4, %v5459_v8  ;;  %v5877_v12 = vpop.permute.xlu1 %5876  ;;  %v5679_v37 = vpop.permute.xlu0 %5678 }
 0x24d   : > { %v2255_v62 = vsel %vm11768_vm2, %v2250_v25, %v2254_v30  ;;  %v2874_v9 = vsel %vm12232_vm5, %v10381_v7, %v2873_v63  ;;  %v2875_v6 = vrot.slane %v2873_v63, 4  ;;  %v3596_v45 = vshll.u32 %v14756_v35, 16  ;;  %v10503_v63 = vld [vmem:[%s11758_s13 + $0x1cc] sm:$0xe] }
 0x24e   : > { %v10715_v11 = vcombine.low %v2245_v5, %v2255_v62  ;;  %v2235_v55 = vsel %vm11768_vm2, %v2230_v46, %v2234_v1  ;;  %v3600_v36 = vshrl.u32 %v14756_v35, 16  ;;  %v10755_v61 = vcombine.low %v2880_v18, %v2883_v40 }
 0x24f   : > { %v10714_v2 = vcombine.low %v2225_v13, %v2235_v55  ;;  %v2877_v26 = vsel %vm12232_vm5, %v2875_v6, %v2876_v47  ;;  %v3610_v29 = vshrl.u32 %v14764_v22, 16  ;;  %v10795_v49 = vcombine.low %v14756_v35, %v14764_v22 }
 0x250   : > { %5278 = vrot.lane.b32.xlu1 %v10715_v11, %s11672_s23  ;;  %v3577_v51 = vshrl.u32 %v10436_v56, 16  ;;  %v3580_v1 = vshll.u32 %v10436_v56, 16  ;;  %v3590_v30 = vshrl.u32 %v14773_v38, 16  ;;  %v10754_v41 = vcombine.low %v2874_v9, %v2877_v26  ;;  %v6077_v7 = vpop.permute.xlu1 %6076  ;;  %v14805_v26 = vld [vmem:[%s11758_s13 + $0x1d4] sm:$0xf] }
 0x251   : > { %5276 = vrot.lane.b32.xlu0 %v10714_v2, %s11672_s23  ;;  %v10794_v34 = vcombine.low %v10436_v56, %v14773_v38  ;;  %v6684_v52 = vsel %vm6658_vm12, %v6603_v28, %v5877_v12  ;;  %v3598_v47 = vrot.slane %v3596_v45, 5  ;;  %v3602_v17 = vrot.slane %v3600_v36, 4 }
 0x252   : > { %v3579_v0 = vrot.slane %v3577_v51, 4  ;;  %v3582_v53 = vrot.slane %v3580_v1, 5  ;;  %v3606_v42 = vshll.u32 %v14764_v22, 16  ;;  %v3612_v24 = vrot.slane %v3610_v29, 4  ;;  %v5879_v13 = vpop.permute.xlu0 %5878  ;;  %v14814_v1 = vld [vmem:[%s11758_s13 + $0x1d8] sm:$0xf] }
 0x253   : > { %v3616_v21 = vshll.u32 %v10483_v44, 16  ;;  %v3586_v4 = vshll.u32 %v14773_v38, 16  ;;  %v3592_v27 = vrot.slane %v3590_v30, 4  ;;  %v3603_v50 = vor.u32 %v3602_v17, %v3598_v47 }
 0x254   : > { %5478 = vrot.lane.b32.xlu1 %v10755_v61, %s11673_s29  ;;  %v3608_v8 = vrot.slane %v3606_v42, 5  ;;  %v3583_v5 = vor.u32 %v3582_v53, %v3579_v0  ;;  %v6765_v25 = vsel %vm6739_vm14, %v6684_v52, %v6077_v7  ;;  %v6605_v46 = vsel %vm6577_vm11, %v6524_v23, %v5679_v37  ;;  %v5261_v11 = vpop.permute.xlu1 %5260  ;;  %v10298_v52 = vld [vmem:[%s11758_s13 + $0x1cc] sm:$0xf]  ;;  %v14825_v0 = vld [vmem:[%s11758_s13 + $0x1d0] sm:$0xf] }
 0x255   : > { %5476 = vrot.lane.b32.xlu0 %v10754_v41, %s11673_s29  ;;  %v3618_v18 = vrot.slane %v3616_v21, 5  ;;  %v3588_v40 = vrot.slane %v3586_v4, 5  ;;  %v4240_v28 = vrot.slane %v14756_v35, 5  ;;  %11191 = vmatprep.mubr.msk.bf16.mxu0 %vm6863_vm15, %v6765_v25  ;;  %v3604_v62 = vrot.slane %v3603_v50, 4  ;;  %v10342_v25 = vld [vmem:[%s11758_s13 + $0x1dc] sm:$0x1] }
 0x256   : > { %v3613_v9 = vor.u32 %v3612_v24, %v3608_v8  ;;  %v3584_v6 = vrot.slane %v3583_v5, 4  ;;  %v4243_v56 = vrot.slane %v14764_v22, 5  ;;  %v4246_v36 = vrot.slane %v10483_v44, 5  ;;  %v6079_v61 = vpop.permute.xlu0 %6078 }
 0x257   : > { %v3593_v55 = vor.u32 %v3592_v27, %v3588_v40  ;;  %v4242_v45 = vrot.slane %v4240_v28, 4  ;;  %v10523_v12 = vrot.slane %v10503_v63, 9  ;;  %v3609_v23 = vsel %vm11768_vm2, %v3604_v62, %v3608_v8 }
 0x258   : > { %5698 = vrot.lane.b32.xlu1 %v10795_v49, %s11674_s11  ;;  %v3614_v35 = vrot.slane %v3613_v9, 4  ;;  %v6686_v37 = vsel %vm6658_vm12, %v6605_v46, %v5879_v13  ;;  %v4245_v2 = vrot.slane %v4243_v56, 4  ;;  %v3589_v22 = vsel %vm11768_vm2, %v3584_v6, %v3588_v40  ;;  %v5461_v53 = vpop.permute.xlu1 %5460 }
 0x259   : > { %5696 = vrot.lane.b32.xlu0 %v10794_v34, %s11674_s11  ;;  %v3594_v29 = vrot.slane %v3593_v55, 4  ;;  %v4244_v49 = vsel %vm12232_vm5, %v4242_v45, %v4243_v56  ;;  %v4237_v51 = vrot.slane %v14773_v38, 5  ;;  %v6445_v41 = vsel %vm6415_vm9, %v14127_v3, %v5261_v11 }
 0x25a   : > { %v3619_v30 = vsel %vm11768_vm2, %v3614_v35, %v3618_v18  ;;  %v4247_v44 = vsel %vm12232_vm5, %v4245_v2, %v4246_v36  ;;  %v6767_v34 = vsel %vm6739_vm14, %v6686_v37, %v6079_v61  ;;  %v2276_v7 = vshll.u32 %v14805_v26, 16  ;;  %v5263_v27 = vpop.permute.xlu0 %5262  ;;  %v10362_v2 = vld [vmem:[%s11758_s13 + $0x1cc] sm:$0xe] }
 0x25b   : > { %v10835_v17 = vcombine.low %v3609_v23, %v3619_v30  ;;  %v3599_v38 = vsel %vm11768_vm2, %v3594_v29, %v3598_v47  ;;  %v4238_v42 = vsel %vm12232_vm5, %v10523_v12, %v4237_v51  ;;  %11192 = vmatmul.mubr.msk.bf16.gmra.mrb[24].mxu0 %vm6863_vm15, %v6767_v34  ;;  %v4239_v3 = vrot.slane %v4237_v51, 4 }
 0x25c   : > { %v10834_v24 = vcombine.low %v3589_v22, %v3599_v38  ;;  %v2280_v21 = vshrl.u32 %v14805_v26, 16  ;;  %v2290_v4 = vshrl.u32 %v14814_v1, 16  ;;  %v10875_v50 = vcombine.low %v4244_v49, %v4247_v44  ;;  %v5681_v40 = vpop.permute.xlu1 %5680 }
 0x25d   : > { %5898 = vrot.lane.b32.xlu1 %v10835_v17, %s11675_s12  ;;  %v2257_v8 = vshrl.u32 %v10298_v52, 16  ;;  %v2260_v5 = vshll.u32 %v10298_v52, 16  ;;  %v2270_v47 = vshrl.u32 %v14825_v0, 16  ;;  %v4241_v13 = vsel %vm12232_vm5, %v4239_v3, %v4240_v28 }
 0x25e   : > { %5896 = vrot.lane.b32.xlu0 %v10834_v24, %s11675_s12  ;;  %v10677_v63 = vcombine.low %v14805_v26, %v14814_v1  ;;  %v10676_v46 = vcombine.low %v10298_v52, %v14825_v0  ;;  %v6526_v18 = vsel %vm6496_vm10, %v6445_v41, %v5461_v53  ;;  %v10874_v62 = vcombine.low %v4238_v42, %v4241_v13  ;;  %v5463_v12 = vpop.permute.xlu0 %5462 }
 0x25f   : > { %v2259_v9 = vrot.slane %v2257_v8, 4  ;;  %v2262_v6 = vrot.slane %v2260_v5, 5  ;;  %v2278_v56 = vrot.slane %v2276_v7, 5  ;;  %v2282_v11 = vrot.slane %v2280_v21, 4 }
 0x260   : > { %v2286_v55 = vshll.u32 %v14814_v1, 16  ;;  %v2292_v45 = vrot.slane %v2290_v4, 4  ;;  %v2296_v36 = vshll.u32 %v10342_v25, 16  ;;  %v6447_v28 = vsel %vm6415_vm9, %v14117_v10, %v5263_v27  ;;  %v14864_v27 = vld [vmem:[%s11758_s13 + $0x1e8] sm:$0xf] }
 0x261   : > { %6098 = vrot.lane.b32.xlu1 %v10875_v50, %s11676_s14  ;;  %v2263_v23 = vor.u32 %v2262_v6, %v2259_v9  ;;  %v2266_v35 = vshll.u32 %v14825_v0, 16  ;;  %v2272_v37 = vrot.slane %v2270_v47, 4  ;;  %v2283_v61 = vor.u32 %v2282_v11, %v2278_v56 }
 0x262   : > { %6096 = vrot.lane.b32.xlu0 %v10874_v62, %s11676_s14  ;;  %v2288_v22 = vrot.slane %v2286_v55, 5  ;;  %v2298_v29 = vrot.slane %v2296_v36, 5  ;;  %v6607_v49 = vsel %vm6577_vm11, %v6526_v18, %v5681_v40  ;;  %v2889_v44 = vrot.slane %v14805_v26, 5  ;;  %v5683_v38 = vpop.permute.xlu0 %5682  ;;  %v10440_v18 = vld [vmem:[%s11758_s13 + $0x1e0] sm:$0xf] }
 0x263   : > { %v2264_v51 = vrot.slane %v2263_v23, 4  ;;  %v2268_v30 = vrot.slane %v2266_v35, 5  ;;  %v2892_v41 = vrot.slane %v14814_v1, 5  ;;  %v2284_v34 = vrot.slane %v2283_v61, 4  ;;  %v5881_v17 = vpop.permute.xlu1 %5880  ;;  %v14881_v40 = vld [vmem:[%s11758_s13 + $0x1e4] sm:$0xf] }
 0x264   : > { %v2293_v10 = vor.u32 %v2292_v45, %v2288_v22  ;;  %v2895_v52 = vrot.slane %v10342_v25, 5  ;;  %v10382_v53 = vrot.slane %v10362_v2, 9  ;;  %v6528_v7 = vsel %vm6496_vm10, %v6447_v28, %v5463_v12  ;;  %v14872_v25 = vld [vmem:[%s11758_s13 + $0x1ec] sm:$0xf]  ;;  %v10484_v61 = vld [vmem:[%s11758_s13 + $0x1f0] sm:$0x1] }
 0x265   : > { %5082 = vrot.lane.b32.xlu1 %v10677_v63, %s11671_s16  ;;  %v2273_v42 = vor.u32 %v2272_v37, %v2268_v30  ;;  %v2891_v24 = vrot.slane %v2889_v44, 4  ;;  %v2894_v3 = vrot.slane %v2892_v41, 4  ;;  %v2289_v26 = vsel %vm11768_vm2, %v2284_v34, %v2288_v22 }
 0x266   : > { %5080 = vrot.lane.b32.xlu0 %v10676_v46, %s11671_s16  ;;  %v2294_v1 = vrot.slane %v2293_v10, 4  ;;  %v2269_v21 = vsel %vm11768_vm2, %v2264_v51, %v2268_v30  ;;  %v2886_v4 = vrot.slane %v14825_v0, 5  ;;  %v6688_v47 = vsel %vm6658_vm12, %v6607_v49, %v5881_v17 }
 0x267   : > { %v2274_v50 = vrot.slane %v2273_v42, 4  ;;  %v2893_v8 = vsel %vm12232_vm5, %v2891_v24, %v2892_v41  ;;  %v2896_v5 = vsel %vm12232_vm5, %v2894_v3, %v2895_v52  ;;  %v6609_v46 = vsel %vm6577_vm11, %v6528_v7, %v5683_v38  ;;  %v6081_v62 = vpop.permute.xlu1 %6080 }
 0x268   : > { %v2299_v13 = vsel %vm11768_vm2, %v2294_v1, %v2298_v29  ;;  %v2887_v63 = vsel %vm12232_vm5, %v10382_v53, %v2886_v4  ;;  %v2888_v0 = vrot.slane %v2886_v4, 4  ;;  %v3640_v11 = vshll.u32 %v14864_v27, 16  ;;  %v5883_v45 = vpop.permute.xlu0 %5882  ;;  %v10504_v1 = vld [vmem:[%s11758_s13 + $0x1e0] sm:$0xe] }
 0x269   : > { %v10717_v9 = vcombine.low %v2289_v26, %v2299_v13  ;;  %v2279_v6 = vsel %vm11768_vm2, %v2274_v50, %v2278_v56  ;;  %v3644_v55 = vshrl.u32 %v14864_v27, 16  ;;  %v10757_v12 = vcombine.low %v2893_v8, %v2896_v5 }
 0x26a   : > { %v10716_v36 = vcombine.low %v2269_v21, %v2279_v6  ;;  %v2890_v28 = vsel %vm12232_vm5, %v2888_v0, %v2889_v44  ;;  %v3654_v23 = vshrl.u32 %v14872_v25, 16  ;;  %v10797_v35 = vcombine.low %v14864_v27, %v14872_v25 }
 0x26b   : > { %5282 = vrot.lane.b32.xlu1 %v10717_v9, %s11672_s23  ;;  %v3621_v37 = vshrl.u32 %v10440_v18, 16  ;;  %v3624_v2 = vshll.u32 %v10440_v18, 16  ;;  %v3634_v56 = vshrl.u32 %v14881_v40, 16  ;;  %v10756_v22 = vcombine.low %v2887_v63, %v2890_v28  ;;  %v5067_v30 = vpop.permute.xlu1 %5066 }
 0x26c   : > { %5280 = vrot.lane.b32.xlu0 %v10716_v36, %s11672_s23  ;;  %v10796_v29 = vcombine.low %v10440_v18, %v14881_v40  ;;  %v6769_v49 = vsel %vm6739_vm14, %v6688_v47, %v6081_v62  ;;  %v3642_v51 = vrot.slane %v3640_v11, 5  ;;  %v3646_v34 = vrot.slane %v3644_v55, 4  ;;  %v6083_v52 = vpop.permute.xlu0 %6082 }
 0x26d   : > { %v3623_v44 = vrot.slane %v3621_v37, 4  ;;  %v3626_v41 = vrot.slane %v3624_v2, 5  ;;  %v3650_v10 = vshll.u32 %v14872_v25, 16  ;;  %11195 = vmatprep.mubr.msk.bf16.mxu0 %vm6863_vm15, %v6769_v49  ;;  %v3656_v53 = vrot.slane %v3654_v23, 4 }
 0x26e   : > { %v3660_v17 = vshll.u32 %v10484_v61, 16  ;;  %v3630_v38 = vshll.u32 %v14881_v40, 16  ;;  %v3636_v42 = vrot.slane %v3634_v56, 4  ;;  %v6690_v7 = vsel %vm6658_vm12, %v6609_v46, %v5883_v45  ;;  %v14915_v45 = vld [vmem:[%s11758_s13 + $0x1e8] sm:$0xf] }
 0x26f   : > { %5482 = vrot.lane.b32.xlu1 %v10757_v12, %s11673_s29  ;;  %v3647_v24 = vor.u32 %v3646_v34, %v3642_v51  ;;  %v3652_v3 = vrot.slane %v3650_v10, 5  ;;  %v3627_v26 = vor.u32 %v3626_v41, %v3623_v44  ;;  %v6771_v50 = vsel %vm6739_vm14, %v6690_v7, %v6083_v52  ;;  %v10343_v7 = vld [vmem:[%s11758_s13 + $0x1f0] sm:$0x1] }
 0x270   : > { %5480 = vrot.lane.b32.xlu0 %v10756_v22, %s11673_s29  ;;  %v3662_v21 = vrot.slane %v3660_v17, 5  ;;  %v3632_v4 = vrot.slane %v3630_v38, 5  ;;  %v4253_v8 = vrot.slane %v14864_v27, 5  ;;  %v4256_v63 = vrot.slane %v14872_v25, 5  ;;  %11196 = vmatmul.mubr.msk.bf16.gmra.mrb[28].mxu0 %vm6863_vm15, %v6771_v50  ;;  %v5267_v0 = vpop.permute.xlu1 %5266  ;;  %v5265_v46 = vpop.permute.xlu0 %5264  ;;  %v14935_v22 = vld [vmem:[%s11758_s13 + $0x1e4] sm:$0xf] }
 0x271   : > { %v3648_v5 = vrot.slane %v3647_v24, 4  ;;  %v3657_v47 = vor.u32 %v3656_v53, %v3652_v3  ;;  %v3628_v13 = vrot.slane %v3627_v26, 4  ;;  %v4259_v9 = vrot.slane %v10484_v61, 5  ;;  %v10302_v61 = vld [vmem:[%s11758_s13 + $0x1e0] sm:$0xf] }
 0x272   : > { %v3637_v18 = vor.u32 %v3636_v42, %v3632_v4  ;;  %v4255_v62 = vrot.slane %v4253_v8, 4  ;;  %v10524_v6 = vrot.slane %v10504_v1, 9  ;;  %v6370_v25 = vsel %vm6334_vm8, %v13657_v15, %v5067_v30 }
 0x273   : > { %5702 = vrot.lane.b32.xlu1 %v10797_v35, %s11674_s11  ;;  %v3653_v27 = vsel %vm11768_vm2, %v3648_v5, %v3652_v3  ;;  %v3658_v11 = vrot.slane %v3657_v47, 4  ;;  %v4258_v55 = vrot.slane %v4256_v63, 4  ;;  %v3633_v36 = vsel %vm11768_vm2, %v3628_v13, %v3632_v4  ;;  %v14924_v35 = vld [vmem:[%s11758_s13 + $0x1ec] sm:$0xf] }
 0x274   : > { %5700 = vrot.lane.b32.xlu0 %v10796_v29, %s11674_s11  ;;  %v3638_v12 = vrot.slane %v3637_v18, 4  ;;  %v4257_v28 = vsel %vm12232_vm5, %v4255_v62, %v4256_v63  ;;  %v4250_v23 = vrot.slane %v14881_v40, 5  ;;  %v6451_v2 = vsel %vm6415_vm9, %v6370_v25, %v5267_v0  ;;  %v5467_v29 = vpop.permute.xlu1 %5466  ;;  %v5465_v49 = vpop.permute.xlu0 %5464 }
 0x275   : > { %v3663_v37 = vsel %vm11768_vm2, %v3658_v11, %v3662_v21  ;;  %v4260_v15 = vsel %vm12232_vm5, %v4258_v55, %v4259_v9  ;;  %v6449_v56 = vsel %vm6415_vm9, %v14279_v57, %v5265_v46  ;;  %v2320_v41 = vshll.u32 %v14915_v45, 16 }
 0x276   : > { %v10837_v40 = vcombine.low %v3653_v27, %v3663_v37  ;;  %v3643_v30 = vsel %vm11768_vm2, %v3638_v12, %v3642_v51  ;;  %v4251_v44 = vsel %vm12232_vm5, %v10524_v6, %v4250_v23  ;;  %v4252_v10 = vrot.slane %v4250_v23, 4  ;;  %v10363_v6 = vld [vmem:[%s11758_s13 + $0x1e0] sm:$0xe] }
 0x277   : > { %v10836_v34 = vcombine.low %v3633_v36, %v3643_v30  ;;  %v2324_v52 = vshrl.u32 %v14915_v45, 16  ;;  %v2334_v57 = vshrl.u32 %v14924_v35, 16  ;;  %v10877_v53 = vcombine.low %v4257_v28, %v4260_v15 }
 0x278   : > { %5902 = vrot.lane.b32.xlu1 %v10837_v40, %s11675_s12  ;;  %v2301_v17 = vshrl.u32 %v10302_v61, 16  ;;  %v2304_v38 = vshll.u32 %v10302_v61, 16  ;;  %v2314_v42 = vshrl.u32 %v14935_v22, 16  ;;  %v4254_v51 = vsel %vm12232_vm5, %v4252_v10, %v4253_v8  ;;  %v5687_v1 = vpop.permute.xlu1 %5686  ;;  %v5685_v21 = vpop.permute.xlu0 %5684  ;;  %v14972_v10 = vld [vmem:[%s11758_s13 + $0x1fc] sm:$0xf] }
 0x279   : > { %5900 = vrot.lane.b32.xlu0 %v10836_v34, %s11675_s12  ;;  %v10679_v24 = vcombine.low %v14915_v45, %v14924_v35  ;;  %v10678_v3 = vcombine.low %v10302_v61, %v14935_v22  ;;  %v6532_v26 = vsel %vm6496_vm10, %v6451_v2, %v5467_v29  ;;  %v10876_v4 = vcombine.low %v4251_v44, %v4254_v51 }
 0x27a   : > { %v2303_v50 = vrot.slane %v2301_v17, 4  ;;  %v2306_v5 = vrot.slane %v2304_v38, 5  ;;  %v2322_v47 = vrot.slane %v2320_v41, 5  ;;  %v2326_v13 = vrot.slane %v2324_v52, 4  ;;  %v14980_v38 = vld [vmem:[%s11758_s13 + $0x200] sm:$0xf] }
 0x27b   : > { %v2330_v63 = vshll.u32 %v14924_v35, 16  ;;  %v2336_v0 = vrot.slane %v2334_v57, 4  ;;  %v2340_v46 = vshll.u32 %v10343_v7, 16  ;;  %v6530_v8 = vsel %vm6496_vm10, %v6449_v56, %v5465_v49 }
 0x27c   : > { %6102 = vrot.lane.b32.xlu1 %v10877_v53, %s11676_s14  ;;  %v2307_v18 = vor.u32 %v2306_v5, %v2303_v50  ;;  %v2310_v62 = vshll.u32 %v14935_v22, 16  ;;  %v2316_v9 = vrot.slane %v2314_v42, 4  ;;  %v2327_v27 = vor.u32 %v2326_v13, %v2322_v47 }
 0x27d   : > { %6100 = vrot.lane.b32.xlu0 %v10876_v4, %s11676_s14  ;;  %v2332_v11 = vrot.slane %v2330_v63, 5  ;;  %v2342_v25 = vrot.slane %v2340_v46, 5  ;;  %v6613_v55 = vsel %vm6577_vm11, %v6532_v26, %v5687_v1  ;;  %v2902_v28 = vrot.slane %v14915_v45, 5  ;;  %v14989_v26 = vld [vmem:[%s11758_s13 + $0x1f8] sm:$0xf] }
 0x27e   : > { %v2308_v36 = vrot.slane %v2307_v18, 4  ;;  %v2312_v12 = vrot.slane %v2310_v62, 5  ;;  %v2905_v23 = vrot.slane %v14924_v35, 5  ;;  %v5887_v37 = vpop.permute.xlu1 %5886  ;;  %v2328_v15 = vrot.slane %v2327_v27, 4 }
 0x27f   : > { %v2337_v2 = vor.u32 %v2336_v0, %v2332_v11  ;;  %v2908_v56 = vrot.slane %v10343_v7, 5  ;;  %v10383_v61 = vrot.slane %v10363_v6, 9  ;;  %v5885_v29 = vpop.permute.xlu0 %5884  ;;  %v6611_v40 = vsel %vm6577_vm11, %v6530_v8, %v5685_v21 }
 0x280   : > { %5086 = vrot.lane.b32.xlu1 %v10679_v24, %s11671_s16  ;;  %v2317_v49 = vor.u32 %v2316_v9, %v2312_v12  ;;  %v2904_v30 = vrot.slane %v2902_v28, 4  ;;  %v2907_v44 = vrot.slane %v2905_v23, 4  ;;  %v2333_v45 = vsel %vm11768_vm2, %v2328_v15, %v2332_v11  ;;  %v10485_v9 = vld [vmem:[%s11758_s13 + $0x204] sm:$0x1] }
 0x281   : > { %5084 = vrot.lane.b32.xlu0 %v10678_v3, %s11671_s16  ;;  %v2338_v35 = vrot.slane %v2337_v2, 4  ;;  %v2313_v41 = vsel %vm11768_vm2, %v2308_v36, %v2312_v12  ;;  %v2899_v34 = vrot.slane %v14935_v22, 5  ;;  %v6694_v17 = vsel %vm6658_vm12, %v6613_v55, %v5887_v37  ;;  %v10444_v3 = vld [vmem:[%s11758_s13 + $0x1f4] sm:$0xf] }
 0x282   : > { %v2318_v52 = vrot.slane %v2317_v49, 4  ;;  %v2906_v57 = vsel %vm12232_vm5, %v2904_v30, %v2905_v23  ;;  %v2909_v53 = vsel %vm12232_vm5, %v2907_v44, %v2908_v56  ;;  %v6087_v42 = vpop.permute.xlu1 %6086  ;;  %v6692_v24 = vsel %vm6658_vm12, %v6611_v40, %v5885_v29  ;;  %v10505_v44 = vld [vmem:[%s11758_s13 + $0x1f4] sm:$0xe] }
 0x283   : > { %v2343_v7 = vsel %vm11768_vm2, %v2338_v35, %v2342_v25  ;;  %v2900_v22 = vsel %vm12232_vm5, %v10383_v61, %v2899_v34  ;;  %v2901_v51 = vrot.slane %v2899_v34, 4  ;;  %v6085_v1 = vpop.permute.xlu0 %6084  ;;  %v3684_v50 = vshll.u32 %v14972_v10, 16 }
 0x284   : > { %v10719_v21 = vcombine.low %v2333_v45, %v2343_v7  ;;  %v2323_v4 = vsel %vm11768_vm2, %v2318_v52, %v2322_v47  ;;  %v3688_v5 = vshrl.u32 %v14972_v10, 16  ;;  %v10759_v63 = vcombine.low %v2906_v57, %v2909_v53 }
 0x285   : > { %v10718_v13 = vcombine.low %v2313_v41, %v2323_v4  ;;  %v2903_v0 = vsel %vm12232_vm5, %v2901_v51, %v2902_v28  ;;  %v3698_v46 = vshrl.u32 %v14980_v38, 16  ;;  %v10799_v8 = vcombine.low %v14972_v10, %v14980_v38  ;;  %v15024_v4 = vld [vmem:[%s11758_s13 + $0x1fc] sm:$0xf] }
 0x286   : > { %5286 = vrot.lane.b32.xlu1 %v10719_v21, %s11672_s23  ;;  %v3665_v18 = vshrl.u32 %v10444_v3, 16  ;;  %v3668_v62 = vshll.u32 %v10444_v3, 16  ;;  %v3678_v47 = vshrl.u32 %v14989_v26, 16  ;;  %v5071_v6 = vpop.permute.xlu1 %5070  ;;  %v10758_v27 = vcombine.low %v2900_v22, %v2903_v0 }
 0x287   : > { %5284 = vrot.lane.b32.xlu0 %v10718_v13, %s11672_s23  ;;  %v6775_v11 = vsel %vm6739_vm14, %v6694_v17, %v6087_v42  ;;  %v6773_v25 = vsel %vm6739_vm14, %v6692_v24, %v6085_v1  ;;  %v3686_v55 = vrot.slane %v3684_v50, 5  ;;  %v5069_v36 = vpop.permute.xlu0 %5068  ;;  %v3690_v23 = vrot.slane %v3688_v5, 4 }
 0x288   : > { %v3667_v12 = vrot.slane %v3665_v18, 4  ;;  %v3670_v28 = vrot.slane %v3668_v62, 5  ;;  %v3694_v37 = vshll.u32 %v14980_v38, 16  ;;  %11199 = vmatprep.mubr.msk.bf16.mxu0 %vm6863_vm15, %v6773_v25  ;;  %v3700_v15 = vrot.slane %v3698_v46, 4  ;;  %v10306_v62 = vld [vmem:[%s11758_s13 + $0x1f4] sm:$0xf] }
 0x289   : > { %v3704_v2 = vshll.u32 %v10485_v9, 16  ;;  %v3674_v56 = vshll.u32 %v14989_v26, 16  ;;  %v3680_v61 = vrot.slane %v3678_v47, 4  ;;  %11200 = vmatmul.mubr.msk.bf16.gmra.mrb[32].mxu0 %vm6863_vm15, %v6775_v11  ;;  %v10798_v29 = vcombine.low %v10444_v3, %v14989_v26  ;;  %v15043_v47 = vld [vmem:[%s11758_s13 + $0x1f8] sm:$0xf] }
 0x28a   : > { %5486 = vrot.lane.b32.xlu1 %v10759_v63, %s11673_s29  ;;  %v3691_v49 = vor.u32 %v3690_v23, %v3686_v55  ;;  %v3696_v40 = vrot.slane %v3694_v37, 5  ;;  %v3671_v30 = vor.u32 %v3670_v28, %v3667_v12  ;;  %v6374_v41 = vsel %vm6334_vm8, %v13689_v39, %v5071_v6  ;;  %v15033_v63 = vld [vmem:[%s11758_s13 + $0x200] sm:$0xf] }
 0x28b   : > { %5484 = vrot.lane.b32.xlu0 %v10758_v27, %s11673_s29  ;;  %v3706_v45 = vrot.slane %v3704_v2, 5  ;;  %v3676_v35 = vrot.slane %v3674_v56, 5  ;;  %v4266_v34 = vrot.slane %v14972_v10, 5  ;;  %v5271_v52 = vpop.permute.xlu1 %5270  ;;  %v4269_v42 = vrot.slane %v14980_v38, 5  ;;  %v10344_v56 = vld [vmem:[%s11758_s13 + $0x204] sm:$0x1] }
 0x28c   : > { %v3692_v57 = vrot.slane %v3691_v49, 4  ;;  %v3701_v53 = vor.u32 %v3700_v15, %v3696_v40  ;;  %v3672_v17 = vrot.slane %v3671_v30, 4  ;;  %v5269_v7 = vpop.permute.xlu0 %5268  ;;  %v4272_v24 = vrot.slane %v10485_v9, 5 }
 0x28d   : > { %v3681_v22 = vor.u32 %v3680_v61, %v3676_v35  ;;  %v4268_v51 = vrot.slane %v4266_v34, 4  ;;  %v10525_v3 = vrot.slane %v10505_v44, 9  ;;  %v6372_v1 = vsel %vm6334_vm8, %v13694_v60, %v5069_v36 }
 0x28e   : > { %5706 = vrot.lane.b32.xlu1 %v10799_v8, %s11674_s11  ;;  %v3697_v39 = vsel %vm11768_vm2, %v3692_v57, %v3696_v40  ;;  %v3702_v10 = vrot.slane %v3701_v53, 4  ;;  %v4271_v21 = vrot.slane %v4269_v42, 4  ;;  %v3677_v38 = vsel %vm11768_vm2, %v3672_v17, %v3676_v35 }
 0x28f   : > { %5704 = vrot.lane.b32.xlu0 %v10798_v29, %s11674_s11  ;;  %v3682_v50 = vrot.slane %v3681_v22, 4  ;;  %v4270_v5 = vsel %vm12232_vm5, %v4268_v51, %v4269_v42  ;;  %v4263_v13 = vrot.slane %v14989_v26, 5  ;;  %v5471_v0 = vpop.permute.xlu1 %5470  ;;  %v6455_v8 = vsel %vm6415_vm9, %v6374_v41, %v5271_v52  ;;  %v10364_v51 = vld [vmem:[%s11758_s13 + $0x1f4] sm:$0xe] }
 0x290   : > { %v3707_v60 = vsel %vm11768_vm2, %v3702_v10, %v3706_v45  ;;  %v4273_v46 = vsel %vm12232_vm5, %v4271_v21, %v4272_v24  ;;  %v6453_v18 = vsel %vm6415_vm9, %v6372_v1, %v5269_v7  ;;  %v5469_v9 = vpop.permute.xlu0 %5468  ;;  %v2364_v11 = vshll.u32 %v15024_v4, 16 }
 0x291   : > { %v10839_v6 = vcombine.low %v3697_v39, %v3707_v60  ;;  %v3687_v26 = vsel %vm11768_vm2, %v3682_v50, %v3686_v55  ;;  %v4264_v27 = vsel %vm12232_vm5, %v10525_v3, %v4263_v13  ;;  %v4265_v36 = vrot.slane %v4263_v13, 4 }
 0x292   : > { %v10838_v25 = vcombine.low %v3677_v38, %v3687_v26  ;;  %v2368_v12 = vshrl.u32 %v15024_v4, 16  ;;  %v2378_v28 = vshrl.u32 %v15033_v63, 16  ;;  %v10879_v23 = vcombine.low %v4270_v5, %v4273_v46 }
 0x293   : > { %5906 = vrot.lane.b32.xlu1 %v10839_v6, %s11675_s12  ;;  %v2345_v37 = vshrl.u32 %v10306_v62, 16  ;;  %v2348_v15 = vshll.u32 %v10306_v62, 16  ;;  %v2358_v2 = vshrl.u32 %v15043_v47, 16  ;;  %v5691_v55 = vpop.permute.xlu1 %5690  ;;  %v4267_v61 = vsel %vm12232_vm5, %v4265_v36, %v4266_v34 }
 0x294   : > { %5904 = vrot.lane.b32.xlu0 %v10838_v25, %s11675_s12  ;;  %v10681_v29 = vcombine.low %v15024_v4, %v15033_v63  ;;  %v10680_v49 = vcombine.low %v10306_v62, %v15043_v47  ;;  %v6536_v40 = vsel %vm6496_vm10, %v6455_v8, %v5471_v0  ;;  %v5689_v30 = vpop.permute.xlu0 %5688  ;;  %v10878_v44 = vcombine.low %v4264_v27, %v4267_v61  ;;  %v15097_v61 = vld [vmem:[%s11758_s13 + $0x20c] sm:$0xf] }
 0x295   : > { %v2347_v45 = vrot.slane %v2345_v37, 4  ;;  %v2350_v35 = vrot.slane %v2348_v15, 5  ;;  %v2366_v41 = vrot.slane %v2364_v11, 5  ;;  %v2370_v52 = vrot.slane %v2368_v12, 4  ;;  %v15080_v11 = vld [vmem:[%s11758_s13 + $0x210] sm:$0xf] }
 0x296   : > { %v2374_v57 = vshll.u32 %v15033_v63, 16  ;;  %v2380_v53 = vrot.slane %v2378_v28, 4  ;;  %v2384_v17 = vshll.u32 %v10344_v56, 16  ;;  %v6534_v34 = vsel %vm6496_vm10, %v6453_v18, %v5469_v9 }
 0x297   : > { %6106 = vrot.lane.b32.xlu1 %v10879_v23, %s11676_s14  ;;  %v2351_v42 = vor.u32 %v2350_v35, %v2347_v45  ;;  %v2354_v7 = vshll.u32 %v15043_v47, 16  ;;  %v2360_v22 = vrot.slane %v2358_v2, 4  ;;  %v2371_v24 = vor.u32 %v2370_v52, %v2366_v41  ;;  %v15088_v23 = vld [vmem:[%s11758_s13 + $0x214] sm:$0xf] }
 0x298   : > { %6104 = vrot.lane.b32.xlu0 %v10878_v44, %s11676_s14  ;;  %v2376_v3 = vrot.slane %v2374_v57, 5  ;;  %v2386_v39 = vrot.slane %v2384_v17, 5  ;;  %v6617_v10 = vsel %vm6577_vm11, %v6536_v40, %v5691_v55  ;;  %v2915_v38 = vrot.slane %v15024_v4, 5  ;;  %v10448_v55 = vld [vmem:[%s11758_s13 + $0x208] sm:$0xf] }
 0x299   : > { %v2352_v1 = vrot.slane %v2351_v42, 4  ;;  %v2356_v21 = vrot.slane %v2354_v7, 5  ;;  %v2918_v50 = vrot.slane %v15033_v63, 5  ;;  %v5891_v5 = vpop.permute.xlu1 %5890  ;;  %v2372_v13 = vrot.slane %v2371_v24, 4  ;;  %v10486_v42 = vld [vmem:[%s11758_s13 + $0x218] sm:$0x1] }
 0x29a   : > { %v2381_v0 = vor.u32 %v2380_v53, %v2376_v3  ;;  %v2921_v60 = vrot.slane %v10344_v56, 5  ;;  %v10384_v46 = vrot.slane %v10364_v51, 9  ;;  %v5889_v8 = vpop.permute.xlu0 %5888  ;;  %v6615_v62 = vsel %vm6577_vm11, %v6534_v34, %v5689_v30 }
 0x29b   : > { %5090 = vrot.lane.b32.xlu1 %v10681_v29, %s11671_s16  ;;  %v2361_v18 = vor.u32 %v2360_v22, %v2356_v21  ;;  %v2917_v9 = vrot.slane %v2915_v38, 4  ;;  %v2920_v6 = vrot.slane %v2918_v50, 4  ;;  %v2377_v4 = vsel %vm11768_vm2, %v2372_v13, %v2376_v3 }
 0x29c   : > { %5088 = vrot.lane.b32.xlu0 %v10680_v49, %s11671_s16  ;;  %v2382_v63 = vrot.slane %v2381_v0, 4  ;;  %v2357_v26 = vsel %vm11768_vm2, %v2352_v1, %v2356_v21  ;;  %v2912_v27 = vrot.slane %v15043_v47, 5  ;;  %v6698_v28 = vsel %vm6658_vm12, %v6617_v10, %v5891_v5 }
 0x29d   : > { %v2362_v25 = vrot.slane %v2361_v18, 4  ;;  %v2919_v36 = vsel %vm12232_vm5, %v2917_v9, %v2918_v50  ;;  %v2922_v12 = vsel %vm12232_vm5, %v2920_v6, %v2921_v60  ;;  %v6091_v37 = vpop.permute.xlu1 %6090  ;;  %v6696_v56 = vsel %vm6658_vm12, %v6615_v62, %v5889_v8  ;;  %v10506_v62 = vld [vmem:[%s11758_s13 + $0x208] sm:$0xe] }
 0x29e   : > { %v2387_v15 = vsel %vm11768_vm2, %v2382_v63, %v2386_v39  ;;  %v2913_v47 = vsel %vm12232_vm5, %v10384_v46, %v2912_v27  ;;  %v2914_v2 = vrot.slane %v2912_v27, 4  ;;  %v6089_v29 = vpop.permute.xlu0 %6088  ;;  %v3728_v30 = vshll.u32 %v15080_v11, 16 }
 0x29f   : > { %v10721_v49 = vcombine.low %v2377_v4, %v2387_v15  ;;  %v2367_v40 = vsel %vm11768_vm2, %v2362_v25, %v2366_v41  ;;  %v3732_v44 = vshrl.u32 %v15080_v11, 16  ;;  %v10761_v35 = vcombine.low %v2919_v36, %v2922_v12 }
 0x2a0   : > { %v10720_v45 = vcombine.low %v2357_v26, %v2367_v40  ;;  %v2916_v52 = vsel %vm12232_vm5, %v2914_v2, %v2915_v38  ;;  %v3742_v57 = vshrl.u32 %v15088_v23, 16  ;;  %v10801_v53 = vcombine.low %v15080_v11, %v15088_v23 }
 0x2a1   : > { %5290 = vrot.lane.b32.xlu1 %v10721_v49, %s11672_s23  ;;  %v3709_v17 = vshrl.u32 %v10448_v55, 16  ;;  %v3712_v34 = vshll.u32 %v10448_v55, 16  ;;  %v3722_v41 = vshrl.u32 %v15097_v61, 16  ;;  %v5075_v7 = vpop.permute.xlu1 %5074  ;;  %v10760_v22 = vcombine.low %v2913_v47, %v2916_v52 }
 0x2a2   : > { %5288 = vrot.lane.b32.xlu0 %v10720_v45, %s11672_s23  ;;  %v6779_v51 = vsel %vm6739_vm14, %v6698_v28, %v6091_v37  ;;  %v6777_v24 = vsel %vm6739_vm14, %v6696_v56, %v6089_v29  ;;  %v3730_v3 = vrot.slane %v3728_v30, 5  ;;  %v5073_v39 = vpop.permute.xlu0 %5072  ;;  %v3734_v21 = vrot.slane %v3732_v44, 4  ;;  %v15141_v44 = vld [vmem:[%s11758_s13 + $0x214] sm:$0xf] }
 0x2a3   : > { %v3711_v10 = vrot.slane %v3709_v17, 4  ;;  %v3714_v1 = vrot.slane %v3712_v34, 5  ;;  %v3738_v38 = vshll.u32 %v15088_v23, 16  ;;  %11203 = vmatprep.mubr.msk.bf16.mxu0 %vm6863_vm15, %v6777_v24  ;;  %v3744_v50 = vrot.slane %v3742_v57, 4  ;;  %v15150_v57 = vld [vmem:[%s11758_s13 + $0x208] sm:$0xf] }
 0x2a4   : > { %v3748_v5 = vshll.u32 %v10486_v42, 16  ;;  %v3718_v13 = vshll.u32 %v15097_v61, 16  ;;  %v3724_v0 = vrot.slane %v3722_v41, 4  ;;  %11204 = vmatmul.mubr.msk.bf16.gmra.mrb[36].mxu0 %vm6863_vm15, %v6779_v51  ;;  %v10800_v60 = vcombine.low %v10448_v55, %v15097_v61 }
 0x2a5   : > { %5490 = vrot.lane.b32.xlu1 %v10761_v35, %s11673_s29  ;;  %v3735_v46 = vor.u32 %v3734_v21, %v3730_v3  ;;  %v3740_v8 = vrot.slane %v3738_v38, 5  ;;  %v3715_v18 = vor.u32 %v3714_v1, %v3711_v10  ;;  %v6378_v4 = vsel %vm6334_vm8, %v13710_v59, %v5075_v7  ;;  %v10345_v38 = vld [vmem:[%s11758_s13 + $0x218] sm:$0x1] }
 0x2a6   : > { %5488 = vrot.lane.b32.xlu0 %v10760_v22, %s11673_s29  ;;  %v3750_v9 = vrot.slane %v3748_v5, 5  ;;  %v3720_v6 = vrot.slane %v3718_v13, 5  ;;  %v4279_v63 = vrot.slane %v15080_v11, 5  ;;  %v4282_v36 = vrot.slane %v15088_v23, 5  ;;  %v15132_v23 = vld [vmem:[%s11758_s13 + $0x210] sm:$0xf] }
 0x2a7   : > { %v3736_v26 = vrot.slane %v3735_v46, 4  ;;  %v3745_v27 = vor.u32 %v3744_v50, %v3740_v8  ;;  %v3716_v25 = vrot.slane %v3715_v18, 4  ;;  %v5275_v12 = vpop.permute.xlu1 %5274  ;;  %v4285_v15 = vrot.slane %v10486_v42, 5 }
 0x2a8   : > { %v3725_v28 = vor.u32 %v3724_v0, %v3720_v6  ;;  %v4281_v37 = vrot.slane %v4279_v63, 4  ;;  %v10526_v47 = vrot.slane %v10506_v62, 9  ;;  %v5273_v2 = vpop.permute.xlu0 %5272  ;;  %v6376_v56 = vsel %vm6334_vm8, %v13718_v32, %v5073_v39 }
 0x2a9   : > { %5710 = vrot.lane.b32.xlu1 %v10801_v53, %s11674_s11  ;;  %v3741_v59 = vsel %vm11768_vm2, %v3736_v26, %v3740_v8  ;;  %v3746_v11 = vrot.slane %v3745_v27, 4  ;;  %v4284_v55 = vrot.slane %v4282_v36, 4  ;;  %v3721_v29 = vsel %vm11768_vm2, %v3716_v25, %v3720_v6  ;;  %v15153_v53 = vld [vmem:[%s11758_s13 + $0x20c] sm:$0xf] }
 0x2aa   : > { %5708 = vrot.lane.b32.xlu0 %v10800_v60, %s11674_s11  ;;  %v3726_v49 = vrot.slane %v3725_v28, 4  ;;  %v4283_v40 = vsel %vm12232_vm5, %v4281_v37, %v4282_v36  ;;  %v4276_v30 = vrot.slane %v15097_v61, 5  ;;  %v6459_v35 = vsel %vm6415_vm9, %v6378_v4, %v5275_v12 }
 0x2ab   : > { %v3751_v45 = vsel %vm11768_vm2, %v3746_v11, %v3750_v9  ;;  %v4286_v32 = vsel %vm12232_vm5, %v4284_v55, %v4285_v15  ;;  %v6457_v52 = vsel %vm6415_vm9, %v6376_v56, %v5273_v2  ;;  %v5475_v17 = vpop.permute.xlu1 %5474  ;;  %v2408_v42 = vshll.u32 %v15132_v23, 16  ;;  %v10365_v2 = vld [vmem:[%s11758_s13 + $0x208] sm:$0xe] }
 0x2ac   : > { %v10841_v34 = vcombine.low %v3741_v59, %v3751_v45  ;;  %v3731_v61 = vsel %vm11768_vm2, %v3726_v49, %v3730_v3  ;;  %v4277_v41 = vsel %vm12232_vm5, %v10526_v47, %v4276_v30  ;;  %v5473_v7 = vpop.permute.xlu0 %5472  ;;  %v4278_v51 = vrot.slane %v4276_v30, 4  ;;  %v15167_v50 = vpop.f32.mrb[0].mxu0 }
 0x2ad   : > { %v10840_v22 = vcombine.low %v3721_v29, %v3731_v61  ;;  %v2412_v24 = vshrl.u32 %v15132_v23, 16  ;;  %v2422_v39 = vshrl.u32 %v15141_v44, 16  ;;  %v10881_v10 = vcombine.low %v4283_v40, %v4286_v32  ;;  %v15177_v8 = vpop.f32.mrb[1].mxu0 }
 0x2ae   : > { %5910 = vrot.lane.b32.xlu1 %v10841_v34, %s11675_s12  ;;  %v2389_v1 = vshrl.u32 %v15150_v57, 16  ;;  %v2392_v21 = vshll.u32 %v15150_v57, 16  ;;  %v2402_v3 = vshrl.u32 %v15153_v53, 16  ;;  %v4280_v5 = vsel %vm12232_vm5, %v4278_v51, %v4279_v63  ;;  %v15179_v26 = vpop.f32.mrb[2].mxu0  ;;  %v15201_v51 = vld [vmem:[%s11758_s13 + $0x224] sm:$0xf] }
 0x2af   : > { %5908 = vrot.lane.b32.xlu0 %v10840_v22, %s11675_s12  ;;  %v10683_v13 = vcombine.low %v15132_v23, %v15141_v44  ;;  %v10682_v0 = vcombine.low %v15150_v57, %v15153_v53  ;;  %v6540_v60 = vsel %vm6496_vm10, %v6459_v35, %v5475_v17  ;;  %v5695_v46 = vpop.permute.xlu1 %5694  ;;  %v10880_v18 = vcombine.low %v4277_v41, %v4280_v5  ;;  %v15182_v12 = vpop.f32.mrb[3].mxu0 }
 0x2b0   : > { %v2391_v62 = vrot.slane %v2389_v1, 4  ;;  %v2394_v9 = vrot.slane %v2392_v21, 5  ;;  %v2410_v6 = vrot.slane %v2408_v42, 5  ;;  %v5693_v4 = vpop.permute.xlu0 %5692  ;;  %v2414_v63 = vrot.slane %v2412_v24, 4  ;;  %v15209_v21 = vld [vmem:[%s11758_s13 + $0x228] sm:$0xf] }
 0x2b1   : > { %v2418_v27 = vshll.u32 %v15141_v44, 16  ;;  %v2424_v25 = vrot.slane %v2422_v39, 4  ;;  %v2428_v36 = vshll.u32 %v10345_v38, 16  ;;  %v6538_v28 = vsel %vm6496_vm10, %v6457_v52, %v5473_v7 }
 0x2b2   : > { %6110 = vrot.lane.b32.xlu1 %v10881_v10, %s11676_s14  ;;  %v2395_v37 = vor.u32 %v2394_v9, %v2391_v62  ;;  %v2398_v15 = vshll.u32 %v15153_v53, 16  ;;  %v2404_v47 = vrot.slane %v2402_v3, 4  ;;  %v2415_v59 = vor.u32 %v2414_v63, %v2410_v6 }
 0x2b3   : > { %6108 = vrot.lane.b32.xlu0 %v10880_v18, %s11676_s14  ;;  %v2420_v11 = vrot.slane %v2418_v27, 5  ;;  %v2430_v56 = vrot.slane %v2428_v36, 5  ;;  %v6621_v55 = vsel %vm6577_vm11, %v6540_v60, %v5695_v46  ;;  %v2928_v40 = vrot.slane %v15132_v23, 5  ;;  %v15220_v60 = vld [vmem:[%s11758_s13 + $0x220] sm:$0xf] }
 0x2b4   : > { %v2396_v29 = vrot.slane %v2395_v37, 4  ;;  %v2400_v49 = vrot.slane %v2398_v15, 5  ;;  %v2931_v30 = vrot.slane %v15141_v44, 5  ;;  %v5895_v45 = vpop.permute.xlu1 %5894  ;;  %v2416_v32 = vrot.slane %v2415_v59, 4 }
 0x2b5   : > { %v2425_v35 = vor.u32 %v2424_v25, %v2420_v11  ;;  %v2934_v52 = vrot.slane %v10345_v38, 5  ;;  %v10385_v57 = vrot.slane %v10365_v2, 9  ;;  %v5893_v17 = vpop.permute.xlu0 %5892  ;;  %v6619_v61 = vsel %vm6577_vm11, %v6538_v28, %v5693_v4 }
 0x2b6   : > { %5094 = vrot.lane.b32.xlu1 %v10683_v13, %s11671_s16  ;;  %v2405_v34 = vor.u32 %v2404_v47, %v2400_v49  ;;  %v2930_v41 = vrot.slane %v2928_v40, 4  ;;  %v2933_v42 = vrot.slane %v2931_v30, 4  ;;  %v2421_v23 = vsel %vm11768_vm2, %v2416_v32, %v2420_v11  ;;  %v15236_v47 = vld [vmem:[%s11758_s13 + $0x22c] sm:$0x1]  ;;  %v15246_v32 = vld [vmem:[%s17280_s2] ss:$0 sm:$0xff] }
 0x2b7   : > { %5092 = vrot.lane.b32.xlu0 %v10682_v0, %s11671_s16  ;;  %v2426_v44 = vrot.slane %v2425_v35, 4  ;;  %v2401_v7 = vsel %vm11768_vm2, %v2396_v29, %v2400_v49  ;;  %v2925_v22 = vrot.slane %v15153_v53, 5  ;;  %v6702_v1 = vsel %vm6658_vm12, %v6621_v55, %v5895_v45  ;;  %v15217_v0 = vld [vmem:[%s11758_s13 + $0x21c] sm:$0xf] }
 0x2b8   : > { %v2406_v24 = vrot.slane %v2405_v34, 4  ;;  %v2932_v39 = vsel %vm12232_vm5, %v2930_v41, %v2931_v30  ;;  %v2935_v10 = vsel %vm12232_vm5, %v2933_v42, %v2934_v52  ;;  %v6095_v3 = vpop.permute.xlu1 %6094  ;;  %v6700_v13 = vsel %vm6658_vm12, %v6619_v61, %v5893_v17 }
 0x2b9   : > { %v2431_v38 = vsel %vm11768_vm2, %v2426_v44, %v2430_v56  ;;  %v2926_v53 = vsel %vm12232_vm5, %v10385_v57, %v2925_v22  ;;  %v2927_v5 = vrot.slane %v2925_v22, 4  ;;  %v6093_v46 = vpop.permute.xlu0 %6092  ;;  %v3772_v9 = vshll.u32 %v15201_v51, 16 }
 0x2ba   : > { %v10723_v18 = vcombine.low %v2421_v23, %v2431_v38  ;;  %v2411_v62 = vsel %vm11768_vm2, %v2406_v24, %v2410_v6  ;;  %v3776_v4 = vshrl.u32 %v15201_v51, 16  ;;  %v10763_v27 = vcombine.low %v2932_v39, %v2935_v10 }
 0x2bb   : > { %v10722_v63 = vcombine.low %v2401_v7, %v2411_v62  ;;  %v2929_v25 = vsel %vm12232_vm5, %v2927_v5, %v2928_v40  ;;  %v3786_v36 = vshrl.u32 %v15209_v21, 16  ;;  %v10803_v28 = vcombine.low %v15201_v51, %v15209_v21 }
 0x2bc   : > { %5294 = vrot.lane.b32.xlu1 %v10723_v18, %s11672_s23  ;;  %v3753_v37 = vshrl.u32 %v15217_v0, 16  ;;  %v3756_v6 = vshll.u32 %v15217_v0, 16  ;;  %v3766_v15 = vshrl.u32 %v15220_v60, 16  ;;  %v5079_v2 = vpop.permute.xlu1 %5078  ;;  %v10762_v59 = vcombine.low %v2926_v53, %v2929_v25 }
 0x2bd   : > { %5292 = vrot.lane.b32.xlu0 %v10722_v63, %s11672_s23  ;;  %v6783_v11 = vsel %vm6739_vm14, %v6702_v1, %v6095_v3  ;;  %v6781_v56 = vsel %vm6739_vm14, %v6700_v13, %v6093_v46  ;;  %v3774_v55 = vrot.slane %v3772_v9, 5  ;;  %v5077_v29 = vpop.permute.xlu0 %5076  ;;  %v3778_v30 = vrot.slane %v3776_v4, 4  ;;  %v10507_v13 = vld [vmem:[%s11758_s13 + $0x21c] sm:$0xe] }
 0x2be   : > { %v3755_v49 = vrot.slane %v3753_v37, 4  ;;  %v3758_v40 = vrot.slane %v3756_v6, 5  ;;  %v3782_v45 = vshll.u32 %v15209_v21, 16  ;;  %11207 = vmatprep.mubr.msk.bf16.mxu0 %vm6863_vm15, %v6781_v56  ;;  %v3788_v35 = vrot.slane %v3786_v36, 4 }
 0x2bf   : > { %v3792_v52 = vshll.u32 %v15236_v47, 16  ;;  %v3762_v57 = vshll.u32 %v15220_v60, 16  ;;  %v3768_v17 = vrot.slane %v3766_v15, 4  ;;  %11208 = vmatmul.mubr.msk.bf16.gmra.mrb[40].mxu0 %vm6863_vm15, %v6783_v11  ;;  %v10802_v34 = vcombine.low %v15217_v0, %v15220_v60 }
 0x2c0   : > { %5494 = vrot.lane.b32.xlu1 %v10763_v27, %s11673_s29  ;;  %v3779_v61 = vor.u32 %v3778_v30, %v3774_v55  ;;  %v3784_v41 = vrot.slane %v3782_v45, 5  ;;  %v3759_v42 = vor.u32 %v3758_v40, %v3755_v49  ;;  %v6382_v7 = vsel %vm6334_vm8, %v13745_v48, %v5079_v2  ;;  %v15297_v45 = vld [vmem:[%s11758_s13 + $0x224] sm:$0xf] }
 0x2c1   : > { %5492 = vrot.lane.b32.xlu0 %v10762_v59, %s11673_s29  ;;  %v3794_v23 = vrot.slane %v3792_v52, 5  ;;  %v3764_v44 = vrot.slane %v3762_v57, 5  ;;  %v6991_v22 = vadd.f32 %v15167_v50, %v15246_v32  ;;  %v4292_v1 = vrot.slane %v15201_v51, 5  ;;  %v15304_v57 = vld [vmem:[%s11758_s13 + $0x228] sm:$0xf] }
 0x2c2   : > { %v3780_v24 = vrot.slane %v3779_v61, 4  ;;  %v3789_v39 = vor.u32 %v3788_v35, %v3784_v41  ;;  %v3760_v10 = vrot.slane %v3759_v42, 4  ;;  %v5279_v3 = vpop.permute.xlu1 %5278  ;;  %v6380_v53 = vsel %vm6334_vm8, %v13775_v19, %v5077_v29  ;;  %v15264_v46 = vpop.f32.mrb[4].mxu0 }
 0x2c3   : > { %v3769_v38 = vor.u32 %v3768_v17, %v3764_v44  ;;  %vm7303_vm0 = vcmp.ge.f32.partialorder %v6991_v22, 0.0  ;;  %v4295_v5 = vrot.slane %v15209_v21, 5  ;;  %v5277_v0 = vpop.permute.xlu0 %5276  ;;  %v7383_v18 = vmul.f32 0.2, %v6991_v22  ;;  %v15269_v62 = vpop.f32.mrb[5].mxu0 }
 0x2c4   : > { %5714 = vrot.lane.b32.xlu1 %v10803_v28, %s11674_s11  ;;  %v3785_v48 = vsel %vm11768_vm2, %v3780_v24, %v3784_v41  ;;  %v3790_v50 = vrot.slane %v3789_v39, 4  ;;  %v4294_v51 = vrot.slane %v4292_v1, 4  ;;  %v3765_v19 = vsel %vm11768_vm2, %v3760_v10, %v3764_v44  ;;  %v15275_v63 = vpop.f32.mrb[6].mxu0  ;;  %v10314_v17 = vld [vmem:[%s11758_s13 + $0x21c] sm:$0xf] }
 0x2c5   : > { %5712 = vrot.lane.b32.xlu0 %v10802_v34, %s11674_s11  ;;  %v3770_v21 = vrot.slane %v3769_v38, 4  ;;  %v4297_v9 = vrot.slane %v4295_v5, 4  ;;  %v4298_v4 = vrot.slane %v15236_v47, 5  ;;  %v6983_v36 = vadd.f32 %v15246_v32, %v15177_v8  ;;  %v15283_v6 = vpop.f32.mrb[7].mxu0 }
 0x2c6   : > { %v3795_v27 = vsel %vm11768_vm2, %v3790_v50, %v3794_v23  ;;  %v4296_v25 = vsel %vm12232_vm5, %v4294_v51, %v4295_v5  ;;  %v10527_v28 = vrot.slane %v10507_v13, 9  ;;  %v5479_v37 = vpop.permute.xlu1 %5478  ;;  %v4289_v59 = vrot.slane %v15220_v60, 5 }
 0x2c7   : > { %v10843_v15 = vcombine.low %v3785_v48, %v3795_v27  ;;  %v3775_v47 = vsel %vm11768_vm2, %v3770_v21, %v3774_v55  ;;  %v4299_v2 = vsel %vm12232_vm5, %v4297_v9, %v4298_v4  ;;  %v5477_v11 = vpop.permute.xlu0 %5476  ;;  %v7463_v29 = vsel %vm7303_vm0, %v6991_v22, %v7383_v18  ;;  %v10346_v48 = vld [vmem:[%s11758_s13 + $0x22c] sm:$0x1] }
 0x2c8   : > { %v10842_v56 = vcombine.low %v3765_v19, %v3775_v47  ;;  %vm7301_vm1 = vcmp.ge.f32.partialorder %v6983_v36, 0.0  ;;  %v7381_v8 = vmul.f32 0.2, %v6983_v36  ;;  %v10883_v49 = vcombine.low %v4296_v25, %v4299_v2 }
 0x2c9   : > { %5914 = vrot.lane.b32.xlu1 %v10843_v15, %s11675_s12  ;;  %v4290_v40 = vsel %vm12232_vm5, %v10527_v28, %v4289_v59  ;;  %v4291_v55 = vrot.slane %v4289_v59, 4  ;;  %v6994_v30 = vadd.f32 %v15179_v26, %v15246_v32  ;;  %v6463_v35 = vsel %vm6415_vm9, %v6382_v7, %v5279_v3  ;;  %v15311_v7 = vld [vmem:[%s11758_s13 + $0x220] sm:$0xf] }
 0x2ca   : > { %5912 = vrot.lane.b32.xlu0 %v10842_v56, %s11675_s12  ;;  %v7461_v60 = vsel %vm7301_vm1, %v6983_v36, %v7381_v8  ;;  %v6986_v52 = vadd.f32 %v15246_v32, %v15182_v12  ;;  %v5699_v34 = vpop.permute.xlu1 %5698  ;;  %vm7622_vm0 = vsmask.f32 256  ;;  %v6461_v44 = vsel %vm6415_vm9, %v6380_v53, %v5277_v0 }
 0x2cb   : > { %v4293_v26 = vsel %vm12232_vm5, %v4291_v55, %v4292_v1  ;;  %vm7304_vm13 = vcmp.ge.f32.partialorder %v6994_v30, 0.0  ;;  %v7384_v61 = vmul.f32 0.2, %v6994_v30  ;;  %v5697_v41 = vpop.permute.xlu0 %5696  ;;  %v2452_v22 = vshll.u32 %v15297_v45, 16 }
 0x2cc   : > { %v10882_v42 = vcombine.low %v4290_v40, %v4293_v26  ;;  %vm7302_vm1 = vcmp.ge.f32.partialorder %v6986_v52, 0.0  ;;  %v7382_v23 = vmul.f32 0.2, %v6986_v52  ;;  %v2456_v24 = vshrl.u32 %v15297_v45, 16 }
 0x2cd   : > { %6114 = vrot.lane.b32.xlu1 %v10883_v49, %s11676_s14  ;;  %v7464_v12 = vsel %vm7304_vm13, %v6994_v30, %v7384_v61  ;;  %v2466_v39 = vshrl.u32 %v15304_v57, 16  ;;  %v10685_v3 = vcombine.low %v15297_v45, %v15304_v57  ;;  %v2433_v38 = vshrl.u32 %v10314_v17, 16  ;;  %vm15347_vm13 = vmand %vm7621_vm3, %vm7684_vm4 }
 0x2ce   : > { %6112 = vrot.lane.b32.xlu0 %v10882_v42, %s11676_s14  ;;  %v7542_v10 = vpack.c.bf16 %v7464_v12, %v7463_v29  ;;  %v7462_v1 = vsel %vm7302_vm1, %v6986_v52, %v7382_v23  ;;  %v2436_v5 = vshll.u32 %v10314_v17, 16  ;;  %v2446_v13 = vshrl.u32 %v15311_v7, 16  ;;  %v10366_v29 = vld [vmem:[%s11758_s13 + $0x21c] sm:$0xe]  ;;  %vm15353_vm1 = vmand %vm7621_vm3, %vm7622_vm0 }
 0x2cf   : > { %v7541_v53 = vpack.c.bf16 %v7462_v1, %v7461_v60  ;;  %v10684_v0 = vcombine.low %v10314_v17, %v15311_v7  ;;  %v15323_v50 = vpop.permute.xlu1 %5898  ;;  %v2435_v18 = vrot.slane %v2433_v38, 4  ;;  %v6544_v51 = vsel %vm6496_vm10, %v6463_v35, %v5479_v37 }
 0x2d0   : > { %7582 = vst.msk [vmem:[#allocation2 + $0x8] sm:$0xff] %vm6577_vm11, %v7542_v10  ;;  %v6542_v19 = vsel %vm6496_vm10, %v6461_v44, %v5477_v11  ;;  %v15328_v21 = vrot.slane %v2452_v22, 5  ;;  %v15330_v9 = vpop.permute.xlu0 %5896  ;;  %v2438_v4 = vrot.slane %v2436_v5, 5  ;;  %v2458_v27 = vrot.slane %v2456_v24, 4 }
 0x2d1   : > { %7581 = vst.msk [vmem:[#allocation2] sm:$0xff] %vm6577_vm11, %v7541_v53  ;;  %5098 = vrot.lane.b32.xlu1 %v10685_v3, %s11671_s16  ;;  %v2462_v25 = vshll.u32 %v15304_v57, 16  ;;  %v2468_v36 = vrot.slane %v2466_v39, 4  ;;  %v2472_v28 = vshll.u32 %v10346_v48, 16  ;;  %v2442_v37 = vshll.u32 %v15311_v7, 16 }
 0x2d2   : > { %5096 = vrot.lane.b32.xlu0 %v10684_v0, %s11671_s16  ;;  %v2448_v15 = vrot.slane %v2446_v13, 4  ;;  %v6625_v47 = vsel %vm6577_vm11, %v6544_v51, %v5699_v34  ;;  %v2459_v2 = vor.u32 %v2458_v27, %v15328_v21  ;;  %v2439_v11 = vor.u32 %v2438_v4, %v2435_v18  ;;  %v15363_v39 = vld [vmem:[%s11758_s13 + $0x238] sm:$0xf]  ;;  %v15387_v4 = vld [vmem:[%s11758_s13 + $0x230] sm:$0xf] }
 0x2d3   : > { %v2464_v59 = vrot.slane %v2462_v25, 5  ;;  %v6623_v56 = vsel %vm6577_vm11, %v6542_v19, %v5697_v41  ;;  %v15341_v8 = vpop.permute.xlu1 %6098  ;;  %v2474_v49 = vrot.slane %v2472_v28, 5  ;;  %v2444_v40 = vrot.slane %v2442_v37, 5  ;;  %v15384_v19 = vld [vmem:[%s11758_s13 + $0x23c] sm:$0xf] }
 0x2d4   : > { %v2941_v55 = vrot.slane %v15297_v45, 5  ;;  %v2944_v30 = vrot.slane %v15304_v57, 5  ;;  %v6097_v60 = vpop.permute.xlu0 %6096  ;;  %v2460_v52 = vrot.slane %v2459_v2, 4  ;;  %v2440_v34 = vrot.slane %v2439_v11, 4 }
 0x2d5   : > { %v2469_v17 = vor.u32 %v2468_v36, %v2464_v59  ;;  %v2947_v26 = vrot.slane %v10346_v48, 5  ;;  %v2449_v45 = vor.u32 %v2448_v15, %v2444_v40  ;;  %v10386_v42 = vrot.slane %v10366_v29, 9  ;;  %v15397_v15 = vld [vmem:[%s11758_s13 + $0x234] sm:$0xf] }
 0x2d6   : > { %v2943_v57 = vrot.slane %v2941_v55, 4  ;;  %v2946_v41 = vrot.slane %v2944_v30, 4  ;;  %v2465_v44 = vsel %vm11768_vm2, %v2460_v52, %v2464_v59  ;;  %v2445_v22 = vsel %vm11768_vm2, %v2440_v34, %v2444_v40  ;;  %v15420_v34 = vld [vmem:[%s11758_s13 + $0x240] sm:$0x1] }
 0x2d7   : > { %v7686_v23 = vld [vmem:[#allocation2 + $0x8] sm:$0x1]  ;;  %v2470_v12 = vrot.slane %v2469_v17, 4  ;;  %v2938_v24 = vrot.slane %v15311_v7, 5  ;;  %v15365_v10 = vpop.permute.xlu1 %5082  ;;  %v2450_v38 = vrot.slane %v2449_v45, 4  ;;  %v15375_v7 = vpop.f32.mrb[8].mxu0  ;;  %v6706_v37 = vsel %vm6658_vm12, %v6625_v47, %v15323_v50 }
 0x2d8   : > { %v7687_v1 = vsel %vm15347_vm13, 0, %v7686_v23  ;;  %v7624_v3 = vld [vmem:[#allocation2] sm:$0x1]  ;;  %v2945_v53 = vsel %vm12232_vm5, %v2943_v57, %v2944_v30  ;;  %v2948_v5 = vsel %vm12232_vm5, %v2946_v41, %v2947_v26  ;;  %v15373_v13 = vpop.permute.xlu0 %5080  ;;  %v15389_v27 = vpop.f32.mrb[9].mxu0  ;;  %v6704_v11 = vsel %vm6658_vm12, %v6623_v56, %v15330_v9 }
 0x2d9   : > { %7688 = vst [vmem:[#allocation2 + $0x8] sm:$0x1] %v7687_v1  ;;  %v7625_v0 = vsel %vm15353_vm1, 0, %v7624_v3  ;;  %v2475_v48 = vsel %vm11768_vm2, %v2470_v12, %v2474_v49  ;;  %v10765_v18 = vcombine.low %v2945_v53, %v2948_v5  ;;  %v2939_v51 = vsel %vm12232_vm5, %v10386_v42, %v2938_v24  ;;  %v15399_v2 = vpop.f32.mrb[10].mxu0 }
 0x2da   : > { %7626 = vst [vmem:[#allocation2] sm:$0x1] %v7625_v0  ;;  %v10725_v25 = vcombine.low %v2465_v44, %v2475_v48  ;;  %v2455_v36 = vsel %vm11768_vm2, %v2450_v38, %v15328_v21  ;;  %v2940_v28 = vrot.slane %v2938_v24, 4  ;;  %v3816_v29 = vshll.u32 %v15363_v39, 16  ;;  %v15405_v40 = vpop.f32.mrb[11].mxu0 }
 0x2db   : > { %v10724_v59 = vcombine.low %v2445_v22, %v2455_v36  ;;  %v3820_v49 = vshrl.u32 %v15363_v39, 16  ;;  %v3830_v21 = vshrl.u32 %v15384_v19, 16  ;;  %v10805_v47 = vcombine.low %v15363_v39, %v15384_v19 }
 0x2dc   : > { %5298 = vrot.lane.b32.xlu1 %v10725_v25, %s11672_s23  ;;  %v2942_v50 = vsel %vm12232_vm5, %v2940_v28, %v2941_v55  ;;  %v3797_v30 = vshrl.u32 %v15387_v4, 16  ;;  %v3800_v56 = vshll.u32 %v15387_v4, 16  ;;  %v3810_v52 = vshrl.u32 %v15397_v15, 16 }
 0x2dd   : > { %5296 = vrot.lane.b32.xlu0 %v10724_v59, %s11672_s23  ;;  %v10764_v9 = vcombine.low %v2939_v51, %v2942_v50  ;;  %v10804_v17 = vcombine.low %v15387_v4, %v15397_v15  ;;  %v15422_v55 = vpop.permute.xlu1 %5282  ;;  %v6787_v45 = vsel %vm6739_vm14, %v6706_v37, %v15341_v8  ;;  %v6785_v57 = vsel %vm6739_vm14, %v6704_v11, %v6097_v60 }
 0x2de   : > { %v3799_v26 = vrot.slane %v3797_v30, 4  ;;  %v7007_v41 = vadd.f32 %v15264_v46, %v15246_v32  ;;  %v15429_v42 = vpop.permute.xlu0 %5280  ;;  %v3802_v23 = vrot.slane %v3800_v56, 5  ;;  %v15431_v44 = vrot.slane %v3816_v29, 5  ;;  %11211 = vmatprep.mubr.msk.bf16.mxu0 %vm6863_vm15, %v6785_v57  ;;  %v10508_v56 = vld [vmem:[%s11758_s13 + $0x230] sm:$0xe] }
 0x2df   : > { %v3822_v12 = vrot.slane %v3820_v49, 4  ;;  %v3826_v22 = vshll.u32 %v15384_v19, 16  ;;  %v3832_v8 = vrot.slane %v3830_v21, 4  ;;  %v3836_v60 = vshll.u32 %v15420_v34, 16  ;;  %11212 = vmatmul.mubr.msk.bf16.gmra.mrb[44].mxu0 %vm6863_vm15, %v6787_v45 }
 0x2e0   : > { %5498 = vrot.lane.b32.xlu1 %v10765_v18, %s11673_s29  ;;  %vm7307_vm3 = vcmp.ge.f32.partialorder %v7007_v41, 0.0  ;;  %v7387_v24 = vmul.f32 0.2, %v7007_v41  ;;  %v6999_v3 = vadd.f32 %v15246_v32, %v15269_v62  ;;  %v3803_v38 = vor.u32 %v3802_v23, %v3799_v26 }
 0x2e1   : > { %5496 = vrot.lane.b32.xlu0 %v10764_v9, %s11673_s29  ;;  %v3823_v46 = vor.u32 %v3822_v12, %v15431_v44  ;;  %v3828_v1 = vrot.slane %v3826_v22, 5  ;;  %v15442_v53 = vpop.permute.xlu1 %5482  ;;  %v3838_v0 = vrot.slane %v3836_v60, 5  ;;  %v3806_v48 = vshll.u32 %v15397_v15, 16  ;;  %v15474_v22 = vld [vmem:[%s11758_s13 + $0x238] sm:$0xf] }
 0x2e2   : > { %v7467_v5 = vsel %vm7307_vm3, %v7007_v41, %v7387_v24  ;;  %v3812_v18 = vrot.slane %v3810_v52, 4  ;;  %v15445_v51 = vpop.permute.xlu0 %5480  ;;  %vm7305_vm4 = vcmp.ge.f32.partialorder %v6999_v3, 0.0  ;;  %v7385_v36 = vmul.f32 0.2, %v6999_v3 }
 0x2e3   : > { %v3824_v4 = vrot.slane %v3823_v46, 4  ;;  %v3833_v25 = vor.u32 %v3832_v8, %v3828_v1  ;;  %v3804_v28 = vrot.slane %v3803_v38, 4  ;;  %v3808_v37 = vrot.slane %v3806_v48, 5 }
 0x2e4   : > { %5718 = vrot.lane.b32.xlu1 %v10805_v47, %s11674_s11  ;;  %v7010_v62 = vadd.f32 %v15275_v63, %v15246_v32  ;;  %v6386_v59 = vsel %vm6334_vm8, %v13795_v43, %v15365_v10  ;;  %v7465_v49 = vsel %vm7305_vm4, %v6999_v3, %v7385_v36  ;;  %v7002_v50 = vadd.f32 %v15246_v32, %v15283_v6  ;;  %v10318_v3 = vld [vmem:[%s11758_s13 + $0x230] sm:$0xf] }
 0x2e5   : > { %5716 = vrot.lane.b32.xlu0 %v10804_v17, %s11674_s11  ;;  %v3829_v11 = vsel %vm11768_vm2, %v3824_v4, %v3828_v1  ;;  %v3834_v29 = vrot.slane %v3833_v25, 4  ;;  %v15458_v21 = vpop.permute.xlu1 %5702  ;;  %v3809_v63 = vsel %vm11768_vm2, %v3804_v28, %v3808_v37  ;;  %v3813_v47 = vor.u32 %v3812_v18, %v3808_v37  ;;  %v15500_v18 = vld [vmem:[%s11758_s13 + $0x234] sm:$0xf] }
 0x2e6   : > { %vm7308_vm0 = vcmp.ge.f32.partialorder %v7010_v62, 0.0  ;;  %v7388_v43 = vmul.f32 0.2, %v7010_v62  ;;  %v15462_v10 = vpop.permute.xlu0 %5700  ;;  %vm7306_vm3 = vcmp.ge.f32.partialorder %v7002_v50, 0.0  ;;  %v7386_v9 = vmul.f32 0.2, %v7002_v50 }
 0x2e7   : > { %v3839_v30 = vsel %vm11768_vm2, %v3834_v29, %v3838_v0  ;;  %v6384_v6 = vsel %vm6334_vm8, %v13804_v16, %v15373_v13  ;;  %v3814_v17 = vrot.slane %v3813_v47, 4  ;;  %v4305_v45 = vrot.slane %v15363_v39, 5  ;;  %v15481_v39 = vld [vmem:[%s11758_s13 + $0x23c] sm:$0xf]  ;;  %v15523_v47 = vld [vmem:[%s11758_s13 + $0x240] sm:$0x1] }
 0x2e8   : > { %v10845_v52 = vcombine.low %v3829_v11, %v3839_v30  ;;  %v7468_v26 = vsel %vm7308_vm0, %v7010_v62, %v7388_v43  ;;  %v7466_v41 = vsel %vm7306_vm3, %v7002_v50, %v7386_v9  ;;  %v4308_v23 = vrot.slane %v15384_v19, 5 }
 0x2e9   : > { %v7544_v57 = vpack.c.bf16 %v7468_v26, %v7467_v5  ;;  %v4311_v12 = vrot.slane %v15420_v34, 5  ;;  %v3819_v16 = vsel %vm11768_vm2, %v3814_v17, %v15431_v44  ;;  %v7543_v13 = vpack.c.bf16 %v7466_v41, %v7465_v49 }
 0x2ea   : > { %5918 = vrot.lane.b32.xlu1 %v10845_v52, %s11675_s12  ;;  %v4307_v24 = vrot.slane %v4305_v45, 4  ;;  %v10528_v8 = vrot.slane %v10508_v56, 9  ;;  %v15483_v60 = vpop.permute.xlu1 %5902  ;;  %v10844_v46 = vcombine.low %v3809_v63, %v3819_v16  ;;  %v4310_v19 = vrot.slane %v4308_v23, 4 }
 0x2eb   : > { %7584 = vst.msk [vmem:[#allocation2 + $0x18] sm:$0xff] %vm6577_vm11, %v7544_v57  ;;  %v4302_v34 = vrot.slane %v15397_v15, 5  ;;  %v6467_v1 = vsel %vm6415_vm9, %v6386_v59, %v15422_v55  ;;  %v15490_v38 = vpop.permute.xlu0 %5900  ;;  %7583 = vst.msk [vmem:[#allocation2 + $0x10] sm:$0xff] %vm6577_vm11, %v7543_v13  ;;  %v6465_v5 = vsel %vm6415_vm9, %v6384_v6, %v15429_v42  ;;  %v2496_v0 = vshll.u32 %v15474_v22, 16 }
 0x2ec   : > { %v4309_v44 = vsel %vm12232_vm5, %v4307_v24, %v4308_v23  ;;  %v2500_v48 = vshrl.u32 %v15474_v22, 16  ;;  %5916 = vrot.lane.b32.xlu0 %v10844_v46, %s11675_s12  ;;  %v4312_v15 = vsel %vm12232_vm5, %v4310_v19, %v4311_v12  ;;  %v2510_v25 = vshrl.u32 %v15481_v39, 16 }
 0x2ed   : > { %v4303_v55 = vsel %vm12232_vm5, %v10528_v8, %v4302_v34  ;;  %v4304_v4 = vrot.slane %v4302_v34, 4  ;;  %v15508_v36 = vpop.f32.mrb[12].mxu0  ;;  %v10885_v42 = vcombine.low %v4309_v44, %v4312_v15  ;;  %v10687_v28 = vcombine.low %v15474_v22, %v15481_v39 }
 0x2ee   : > { %v2477_v37 = vshrl.u32 %v10318_v3, 16  ;;  %v2480_v62 = vshll.u32 %v10318_v3, 16  ;;  %v15512_v59 = vpop.permute.xlu1 %6102  ;;  %v15514_v11 = vpop.f32.mrb[13].mxu0  ;;  %v2490_v49 = vshrl.u32 %v15500_v18, 16  ;;  %v10686_v50 = vcombine.low %v10318_v3, %v15500_v18 }
 0x2ef   : > { %v4306_v29 = vsel %vm12232_vm5, %v4304_v4, %v4305_v45  ;;  %v6548_v63 = vsel %vm6496_vm10, %v6467_v1, %v15442_v53  ;;  %v15525_v43 = vpop.permute.xlu0 %6100  ;;  %v15527_v30 = vpop.f32.mrb[14].mxu0  ;;  %6118 = vrot.lane.b32.xlu1 %v10885_v42, %s11676_s14  ;;  %v6546_v52 = vsel %vm6496_vm10, %v6465_v5, %v15445_v51  ;;  %v2498_v26 = vrot.slane %v2496_v0, 5 }
 0x2f0   : > { %v10884_v9 = vcombine.low %v4303_v55, %v4306_v29  ;;  %v2479_v6 = vrot.slane %v2477_v37, 4  ;;  %v2482_v56 = vrot.slane %v2480_v62, 5  ;;  %v15532_v17 = vpop.f32.mrb[15].mxu0  ;;  %v2502_v45 = vrot.slane %v2500_v48, 4  ;;  %v10367_v48 = vld [vmem:[%s11758_s13 + $0x230] sm:$0xe] }
 0x2f1   : > { %v2506_v53 = vshll.u32 %v15481_v39, 16  ;;  %v2512_v57 = vrot.slane %v2510_v25, 4  ;;  %v2516_v23 = vshll.u32 %v15523_v47, 16  ;;  %v2486_v16 = vshll.u32 %v15500_v18, 16 }
 0x2f2   : > { %v7689_v41 = vld [vmem:[#allocation2 + $0x18] sm:$0x1]  ;;  %6116 = vrot.lane.b32.xlu0 %v10884_v9, %s11676_s14  ;;  %v2483_v12 = vor.u32 %v2482_v56, %v2479_v6  ;;  %v2492_v13 = vrot.slane %v2490_v49, 4  ;;  %v15538_v24 = vpop.permute.xlu1 %5086  ;;  %v7627_v8 = vld [vmem:[#allocation2 + $0x10] sm:$0x1]  ;;  %v2503_v46 = vor.u32 %v2502_v45, %v2498_v26  ;;  %v6629_v34 = vsel %vm6577_vm11, %v6548_v63, %v15458_v21 }
 0x2f3   : > { %v7690_v51 = vsel %vm15347_vm13, 0, %v7689_v41  ;;  %v2508_v19 = vrot.slane %v2506_v53, 5  ;;  %v15544_v1 = vpop.permute.xlu0 %5084  ;;  %v7628_v3 = vsel %vm15353_vm1, 0, %v7627_v8  ;;  %5102 = vrot.lane.b32.xlu1 %v10687_v28, %s11671_s16  ;;  %v2518_v44 = vrot.slane %v2516_v23, 5  ;;  %v15574_v45 = vld [vmem:[%s11758_s13 + $0x24c] sm:$0xf] }
 0x2f4   : > { %7691 = vst [vmem:[#allocation2 + $0x18] sm:$0x1] %v7690_v51  ;;  %v2484_v5 = vrot.slane %v2483_v12, 4  ;;  %v2488_v0 = vrot.slane %v2486_v16, 5  ;;  %7629 = vst [vmem:[#allocation2 + $0x10] sm:$0x1] %v7628_v3  ;;  %v6627_v4 = vsel %vm6577_vm11, %v6546_v52, %v15462_v10  ;;  %v6710_v9 = vsel %vm6658_vm12, %v6629_v34, %v15483_v60 }
 0x2f5   : > { %v2504_v15 = vrot.slane %v2503_v46, 4  ;;  %v2513_v55 = vor.u32 %v2512_v57, %v2508_v19  ;;  %v2954_v21 = vrot.slane %v15474_v22, 5  ;;  %v2957_v28 = vrot.slane %v15481_v39, 5 }
 0x2f6   : > { %5100 = vrot.lane.b32.xlu0 %v10686_v50, %s11671_s16  ;;  %v2489_v25 = vsel %vm11768_vm2, %v2484_v5, %v2488_v0  ;;  %v2493_v42 = vor.u32 %v2492_v13, %v2488_v0  ;;  %v2960_v37 = vrot.slane %v15523_v47, 5  ;;  %v10387_v10 = vrot.slane %v10367_v48, 9  ;;  %v15589_v13 = vld [vmem:[%s11758_s13 + $0x248] sm:$0xf] }
 0x2f7   : > { %v2509_v62 = vsel %vm11768_vm2, %v2504_v15, %v2508_v19  ;;  %v2514_v29 = vrot.slane %v2513_v55, 4  ;;  %v2956_v49 = vrot.slane %v2954_v21, 4  ;;  %v2959_v22 = vrot.slane %v2957_v28, 4 }
 0x2f8   : > { %v2494_v63 = vrot.slane %v2493_v42, 4  ;;  %v2951_v50 = vrot.slane %v15500_v18, 5  ;;  %v15563_v6 = vpop.permute.xlu1 %5286  ;;  %v6708_v56 = vsel %vm6658_vm12, %v6627_v4, %v15490_v38  ;;  %v7023_v52 = vadd.f32 %v15375_v7, %v15246_v32  ;;  %v15577_v18 = vld [vmem:[%s11758_s13 + $0x250] sm:$0xf]  ;;  %v10460_v38 = vld [vmem:[%s11758_s13 + $0x244] sm:$0xf] }
 0x2f9   : > { %v2519_v39 = vsel %vm11768_vm2, %v2514_v29, %v2518_v44  ;;  %v2958_v47 = vsel %vm12232_vm5, %v2956_v49, %v2957_v28  ;;  %v15579_v60 = vpop.permute.xlu0 %5284  ;;  %v2961_v41 = vsel %vm12232_vm5, %v2959_v22, %v2960_v37  ;;  %v3860_v8 = vshll.u32 %v15574_v45, 16  ;;  %v15616_v29 = vld [vmem:[%s11758_s13 + $0x254] sm:$0x1] }
 0x2fa   : > { %v10727_v53 = vcombine.low %v2509_v62, %v2519_v39  ;;  %v2499_v57 = vsel %vm11768_vm2, %v2494_v63, %v2498_v26  ;;  %v2952_v23 = vsel %vm12232_vm5, %v10387_v10, %v2951_v50  ;;  %v10767_v16 = vcombine.low %v2958_v47, %v2961_v41 }
 0x2fb   : > { %v10726_v12 = vcombine.low %v2489_v25, %v2499_v57  ;;  %v2953_v7 = vrot.slane %v2951_v50, 4  ;;  %vm7311_vm4 = vcmp.ge.f32.partialorder %v7023_v52, 0.0  ;;  %v7391_v51 = vmul.f32 0.2, %v7023_v52 }
 0x2fc   : > { %5302 = vrot.lane.b32.xlu1 %v10727_v53, %s11672_s23  ;;  %v3864_v26 = vshrl.u32 %v15574_v45, 16  ;;  %v3874_v46 = vshrl.u32 %v15577_v18, 16  ;;  %v15595_v19 = vpop.permute.xlu1 %5486  ;;  %v10807_v3 = vcombine.low %v15574_v45, %v15577_v18  ;;  %v7015_v44 = vadd.f32 %v15246_v32, %v15389_v27 }
 0x2fd   : > { %5300 = vrot.lane.b32.xlu0 %v10726_v12, %s11672_s23  ;;  %v2955_v34 = vsel %vm12232_vm5, %v2953_v7, %v2954_v21  ;;  %v3841_v5 = vshrl.u32 %v10460_v38, 16  ;;  %v15604_v0 = vpop.permute.xlu0 %5484  ;;  %v7471_v15 = vsel %vm7311_vm4, %v7023_v52, %v7391_v51  ;;  %v3844_v55 = vshll.u32 %v10460_v38, 16  ;;  %v10509_v51 = vld [vmem:[%s11758_s13 + $0x244] sm:$0xe] }
 0x2fe   : > { %v10766_v48 = vcombine.low %v2952_v23, %v2955_v34  ;;  %v3854_v4 = vshrl.u32 %v15589_v13, 16  ;;  %vm7309_vm0 = vcmp.ge.f32.partialorder %v7015_v44, 0.0  ;;  %v7389_v25 = vmul.f32 0.2, %v7015_v44 }
 0x2ff   : > { %v3843_v42 = vrot.slane %v3841_v5, 4  ;;  %v10806_v21 = vcombine.low %v10460_v38, %v15589_v13  ;;  %v3846_v28 = vrot.slane %v3844_v55, 5  ;;  %v7026_v27 = vadd.f32 %v15399_v2, %v15246_v32 }
 0x300   : > { %5502 = vrot.lane.b32.xlu1 %v10767_v16, %s11673_s29  ;;  %v6791_v37 = vsel %vm6739_vm14, %v6710_v9, %v15512_v59  ;;  %v7018_v62 = vadd.f32 %v15246_v32, %v15405_v40  ;;  %v15618_v49 = vpop.permute.xlu1 %5706  ;;  %v7469_v10 = vsel %vm7309_vm0, %v7015_v44, %v7389_v25  ;;  %v6789_v63 = vsel %vm6739_vm14, %v6708_v56, %v15525_v43 }
 0x301   : > { %5500 = vrot.lane.b32.xlu0 %v10766_v48, %s11673_s29  ;;  %v15623_v22 = vrot.slane %v3860_v8, 5  ;;  %v3866_v50 = vrot.slane %v3864_v26, 4  ;;  %v15625_v2 = vpop.permute.xlu0 %5704  ;;  %vm7312_vm3 = vcmp.ge.f32.partialorder %v7026_v27, 0.0  ;;  %v7392_v59 = vmul.f32 0.2, %v7026_v27  ;;  %11215 = vmatprep.mubr.msk.bf16.mxu0 %vm6863_vm15, %v6789_v63 }
 0x302   : > { %vm7310_vm4 = vcmp.ge.f32.partialorder %v7018_v62, 0.0  ;;  %v7390_v9 = vmul.f32 0.2, %v7018_v62  ;;  %v3870_v39 = vshll.u32 %v15577_v18, 16  ;;  %v3876_v47 = vrot.slane %v3874_v46, 4  ;;  %11216 = vmatmul.mubr.msk.bf16.gmra.mrb[48].mxu0 %vm6863_vm15, %v6791_v37  ;;  %v15632_v43 = vpop.f32.mrb[16].mxu0 }
 0x303   : > { %v3867_v40 = vor.u32 %v3866_v50, %v15623_v22  ;;  %v3880_v52 = vshll.u32 %v15616_v29, 16  ;;  %v7472_v56 = vsel %vm7312_vm3, %v7026_v27, %v7392_v59  ;;  %v3847_v57 = vor.u32 %v3846_v28, %v3843_v42  ;;  %v15636_v23 = vpop.f32.mrb[17].mxu0  ;;  %v15669_v59 = vld [vmem:[%s11758_s13 + $0x24c] sm:$0xf] }
 0x304   : > { %5722 = vrot.lane.b32.xlu1 %v10807_v3, %s11674_s11  ;;  %v7470_v53 = vsel %vm7310_vm4, %v7018_v62, %v7390_v9  ;;  %v3850_v41 = vshll.u32 %v15589_v13, 16  ;;  %v7546_v38 = vpack.c.bf16 %v7472_v56, %v7471_v15  ;;  %v3872_v7 = vrot.slane %v3870_v39, 5  ;;  %v15642_v26 = vpop.f32.mrb[18].mxu0  ;;  %v10322_v56 = vld [vmem:[%s11758_s13 + $0x244] sm:$0xf] }
 0x305   : > { %5720 = vrot.lane.b32.xlu0 %v10806_v21, %s11674_s11  ;;  %v7545_v12 = vpack.c.bf16 %v7470_v53, %v7469_v10  ;;  %v3868_v16 = vrot.slane %v3867_v40, 4  ;;  %v15640_v8 = vpop.permute.xlu1 %5906  ;;  %v3882_v46 = vrot.slane %v3880_v52, 5  ;;  %v3848_v34 = vrot.slane %v3847_v57, 4  ;;  %v15646_v48 = vpop.f32.mrb[19].mxu0  ;;  %v15680_v40 = vld [vmem:[%s11758_s13 + $0x250] sm:$0xf] }
 0x306   : > { %v3852_v3 = vrot.slane %v3850_v41, 5  ;;  %v3856_v44 = vrot.slane %v3854_v4, 4  ;;  %v15644_v5 = vpop.permute.xlu0 %5904  ;;  %7586 = vst.msk [vmem:[#allocation2 + $0x28] sm:$0xff] %vm6577_vm11, %v7546_v38  ;;  %v3877_v55 = vor.u32 %v3876_v47, %v3872_v7  ;;  %v6390_v25 = vsel %vm6334_vm8, %v13823_v33, %v15538_v24  ;;  %v15694_v38 = vld [vmem:[%s11758_s13 + $0x248] sm:$0xf] }
 0x307   : > { %7585 = vst.msk [vmem:[#allocation2 + $0x20] sm:$0xff] %vm6577_vm11, %v7545_v12  ;;  %v3873_v15 = vsel %vm11768_vm2, %v3868_v16, %v3872_v7  ;;  %v6388_v4 = vsel %vm6334_vm8, %v13828_v14, %v15544_v1  ;;  %v4318_v28 = vrot.slane %v15574_v45, 5  ;;  %v4321_v27 = vrot.slane %v15577_v18, 5 }
 0x308   : > { %v3853_v42 = vsel %vm11768_vm2, %v3848_v34, %v3852_v3  ;;  %v3857_v21 = vor.u32 %v3856_v44, %v3852_v3  ;;  %v3878_v37 = vrot.slane %v3877_v55, 4  ;;  %v4324_v62 = vrot.slane %v15616_v29, 5 }
 0x309   : > { %v10529_v10 = vrot.slane %v10509_v51, 9  ;;  %v4315_v63 = vrot.slane %v15589_v13, 5  ;;  %v15664_v33 = vpop.permute.xlu1 %6106  ;;  %v4320_v14 = vrot.slane %v4318_v28, 4  ;;  %v4323_v1 = vrot.slane %v4321_v27, 4 }
 0x30a   : > { %v3858_v24 = vrot.slane %v3857_v21, 4  ;;  %v6471_v50 = vsel %vm6415_vm9, %v6390_v25, %v15563_v6  ;;  %v15671_v45 = vpop.permute.xlu0 %6104  ;;  %v3883_v18 = vsel %vm11768_vm2, %v3878_v37, %v3882_v46  ;;  %v6469_v9 = vsel %vm6415_vm9, %v6388_v4, %v15579_v60  ;;  %v10348_v4 = vld [vmem:[%s11758_s13 + $0x254] sm:$0x1] }
 0x30b   : > { %v4316_v13 = vsel %vm12232_vm5, %v10529_v10, %v4315_v63  ;;  %v4317_v29 = vrot.slane %v4315_v63, 4  ;;  %v10847_v39 = vcombine.low %v3873_v15, %v3883_v18  ;;  %v4322_v47 = vsel %vm12232_vm5, %v4320_v14, %v4321_v27 }
 0x30c   : > { %v3863_v6 = vsel %vm11768_vm2, %v3858_v24, %v15623_v22  ;;  %v4325_v52 = vsel %vm12232_vm5, %v4323_v1, %v4324_v62  ;;  %v2540_v60 = vshll.u32 %v15669_v59, 16  ;;  %v2544_v51 = vshrl.u32 %v15669_v59, 16 }
 0x30d   : > { %v10846_v53 = vcombine.low %v3853_v42, %v3863_v6  ;;  %v10887_v57 = vcombine.low %v4322_v47, %v4325_v52  ;;  %v4319_v41 = vsel %vm12232_vm5, %v4317_v29, %v4318_v28  ;;  %v15696_v12 = vpop.permute.xlu1 %5090  ;;  %v7692_v22 = vld [vmem:[#allocation2 + $0x28] sm:$0x1]  ;;  %5922 = vrot.lane.b32.xlu1 %v10847_v39, %s11675_s12  ;;  %v2554_v46 = vshrl.u32 %v15680_v40, 16 }
 0x30e   : > { %v7630_v16 = vld [vmem:[#allocation2 + $0x20] sm:$0x1]  ;;  %v10886_v7 = vcombine.low %v4316_v13, %v4319_v41  ;;  %v10689_v34 = vcombine.low %v15669_v59, %v15680_v40  ;;  %v15703_v3 = vpop.permute.xlu0 %5088  ;;  %v7693_v44 = vsel %vm15347_vm13, 0, %v7692_v22  ;;  %v2521_v55 = vshrl.u32 %v10322_v56, 16 }
 0x30f   : > { %v7631_v15 = vsel %vm15353_vm1, 0, %v7630_v16  ;;  %5920 = vrot.lane.b32.xlu0 %v10846_v53, %s11675_s12  ;;  %v2524_v25 = vshll.u32 %v10322_v56, 16  ;;  %7694 = vst [vmem:[#allocation2 + $0x28] sm:$0x1] %v7693_v44  ;;  %v2534_v42 = vshrl.u32 %v15694_v38, 16  ;;  %v10688_v21 = vcombine.low %v10322_v56, %v15694_v38 }
 0x310   : > { %7632 = vst [vmem:[#allocation2 + $0x20] sm:$0x1] %v7631_v15  ;;  %v6552_v28 = vsel %vm6496_vm10, %v6471_v50, %v15595_v19  ;;  %v6550_v27 = vsel %vm6496_vm10, %v6469_v9, %v15604_v0  ;;  %v2523_v37 = vrot.slane %v2521_v55, 4  ;;  %v2542_v10 = vrot.slane %v2540_v60, 5 }
 0x311   : > { %v2526_v62 = vrot.slane %v2524_v25, 5  ;;  %v2546_v63 = vrot.slane %v2544_v51, 4  ;;  %6122 = vrot.lane.b32.xlu1 %v10887_v57, %s11676_s14  ;;  %v2550_v24 = vshll.u32 %v15680_v40, 16  ;;  %v2556_v14 = vrot.slane %v2554_v46, 4 }
 0x312   : > { %v2560_v1 = vshll.u32 %v10348_v4, 16  ;;  %v2530_v18 = vshll.u32 %v15694_v38, 16  ;;  %v2536_v19 = vrot.slane %v2534_v42, 4  ;;  %v6633_v0 = vsel %vm6577_vm11, %v6552_v28, %v15618_v49 }
 0x313   : > { %6120 = vrot.lane.b32.xlu0 %v10886_v7, %s11676_s14  ;;  %v2547_v13 = vor.u32 %v2546_v63, %v2542_v10  ;;  %v2527_v29 = vor.u32 %v2526_v62, %v2523_v37  ;;  %v15723_v50 = vpop.permute.xlu1 %5290  ;;  %v2552_v9 = vrot.slane %v2550_v24, 5  ;;  %v6631_v47 = vsel %vm6577_vm11, %v6550_v27, %v15625_v2  ;;  %v10368_v7 = vld [vmem:[%s11758_s13 + $0x244] sm:$0xe]  ;;  %v15760_v24 = vld [vmem:[%s11758_s13 + $0x260] sm:$0xf] }
 0x314   : > { %v2562_v39 = vrot.slane %v2560_v1, 5  ;;  %v2532_v6 = vrot.slane %v2530_v18, 5  ;;  %v15727_v52 = vpop.permute.xlu0 %5288  ;;  %v7039_v57 = vadd.f32 %v15508_v36, %v15246_v32  ;;  %v2967_v41 = vrot.slane %v15669_v59, 5 }
 0x315   : > { %v2548_v56 = vrot.slane %v2547_v13, 4  ;;  %v2528_v53 = vrot.slane %v2527_v29, 4  ;;  %5106 = vrot.lane.b32.xlu1 %v10689_v34, %s11671_s16  ;;  %v2557_v49 = vor.u32 %v2556_v14, %v2552_v9  ;;  %v2970_v22 = vrot.slane %v15680_v40, 5 }
 0x316   : > { %v2537_v60 = vor.u32 %v2536_v19, %v2532_v6  ;;  %v2973_v16 = vrot.slane %v10348_v4, 5  ;;  %vm7315_vm0 = vcmp.ge.f32.partialorder %v7039_v57, 0.0  ;;  %v7395_v36 = vmul.f32 0.2, %v7039_v57  ;;  %v15773_v19 = vld [vmem:[%s17280_s2] ss:$0 sm:$0xff] }
 0x317   : > { %5104 = vrot.lane.b32.xlu0 %v10688_v21, %s11671_s16  ;;  %v2553_v2 = vsel %vm11768_vm2, %v2548_v56, %v2552_v9  ;;  %v2533_v51 = vsel %vm11768_vm2, %v2528_v53, %v2532_v6  ;;  %v15740_v46 = vpop.permute.xlu1 %5490  ;;  %v2558_v59 = vrot.slane %v2557_v49, 4  ;;  %v2969_v44 = vrot.slane %v2967_v41, 4  ;;  %v15744_v55 = vpop.f32.mrb[20].mxu0 }
 0x318   : > { %v2538_v34 = vrot.slane %v2537_v60, 4  ;;  %v2972_v15 = vrot.slane %v2970_v22, 4  ;;  %v15742_v40 = vpop.permute.xlu0 %5488  ;;  %v7475_v25 = vsel %vm7315_vm0, %v7039_v57, %v7395_v36  ;;  %v7031_v4 = vadd.f32 %v15246_v32, %v15514_v11  ;;  %v15749_v28 = vpop.f32.mrb[21].mxu0  ;;  %v15788_v57 = vld [vmem:[%s11758_s13 + $0x264] sm:$0xf] }
 0x319   : > { %v10388_v42 = vrot.slane %v10368_v7, 9  ;;  %v2964_v21 = vrot.slane %v15694_v38, 5  ;;  %v2563_v27 = vsel %vm11768_vm2, %v2558_v59, %v2562_v39  ;;  %v2971_v62 = vsel %vm12232_vm5, %v2969_v44, %v2970_v22  ;;  %v15762_v32 = vpop.f32.mrb[22].mxu0  ;;  %v15796_v7 = vld [vmem:[%s11758_s13 + $0x25c] sm:$0xf] }
 0x31a   : > { %v2543_v37 = vsel %vm11768_vm2, %v2538_v34, %v2542_v10  ;;  %v2974_v63 = vsel %vm12232_vm5, %v2972_v15, %v2973_v16  ;;  %v10729_v11 = vcombine.low %v2553_v2, %v2563_v27  ;;  %vm7313_vm3 = vcmp.ge.f32.partialorder %v7031_v4, 0.0  ;;  %v15766_v18 = vpop.f32.mrb[23].mxu0  ;;  %v10490_v15 = vld [vmem:[%s11758_s13 + $0x268] sm:$0x1] }
 0x31b   : > { %v10728_v38 = vcombine.low %v2533_v51, %v2543_v37  ;;  %v10769_v14 = vcombine.low %v2971_v62, %v2974_v63  ;;  %v15764_v1 = vpop.permute.xlu1 %5710  ;;  %v7393_v10 = vmul.f32 0.2, %v7031_v4  ;;  %v2965_v13 = vsel %vm12232_vm5, %v10388_v42, %v2964_v21 }
 0x31c   : > { %v2966_v29 = vrot.slane %v2964_v21, 4  ;;  %v7042_v9 = vadd.f32 %v15773_v19, %v15527_v30  ;;  %v15777_v39 = vpop.permute.xlu0 %5708  ;;  %5306 = vrot.lane.b32.xlu1 %v10729_v11, %s11672_s23  ;;  %v6714_v6 = vsel %vm6658_vm12, %v6633_v0, %v15640_v8  ;;  %v7034_v56 = vadd.f32 %v15773_v19, %v15532_v17  ;;  %v10464_v30 = vld [vmem:[%s11758_s13 + $0x258] sm:$0xf] }
 0x31d   : > { %5304 = vrot.lane.b32.xlu0 %v10728_v38, %s11672_s23  ;;  %v6712_v53 = vsel %vm6658_vm12, %v6631_v47, %v15644_v5  ;;  %v3904_v49 = vshll.u32 %v15760_v24, 16  ;;  %v7473_v60 = vsel %vm7313_vm3, %v7031_v4, %v7393_v10  ;;  %v3908_v5 = vshrl.u32 %v15760_v24, 16 }
 0x31e   : > { %v2968_v22 = vsel %vm12232_vm5, %v2966_v29, %v2967_v41  ;;  %vm7316_vm4 = vcmp.ge.f32.partialorder %v7042_v9, 0.0  ;;  %v7396_v16 = vmul.f32 0.2, %v7042_v9  ;;  %vm7314_vm0 = vcmp.ge.f32.partialorder %v7034_v56, 0.0 }
 0x31f   : > { %v10768_v8 = vcombine.low %v2965_v13, %v2968_v22  ;;  %v7394_v17 = vmul.f32 0.2, %v7034_v56  ;;  %v3918_v47 = vshrl.u32 %v15788_v57, 16  ;;  %v10809_v2 = vcombine.low %v15760_v24, %v15788_v57  ;;  %v17716_v22 = vld [vmem:[#allocation10_spill] sm:$0xff] }
 0x320   : > { %v7476_v0 = vsel %vm7316_vm4, %v7042_v9, %v7396_v16  ;;  %v3885_v51 = vshrl.u32 %v10464_v30, 16  ;;  %v15802_v36 = vpop.permute.xlu1 %5910  ;;  %5506 = vrot.lane.b32.xlu1 %v10769_v14, %s11673_s29  ;;  %v3888_v34 = vshll.u32 %v10464_v30, 16  ;;  %v3898_v44 = vshrl.u32 %v15796_v7, 16 }
 0x321   : > { %5504 = vrot.lane.b32.xlu0 %v10768_v8, %s11673_s29  ;;  %v7548_v41 = vpack.c.bf16 %v7476_v0, %v7475_v25  ;;  %v7474_v59 = vsel %vm7314_vm0, %v7034_v56, %v7394_v17  ;;  %v15808_v4 = vpop.permute.xlu0 %5908  ;;  %v10808_v27 = vcombine.low %v10464_v30, %v15796_v7  ;;  %v6795_v37 = vsel %vm6739_vm14, %v6714_v6, %v15664_v33  ;;  %v10510_v56 = vld [vmem:[%s11758_s13 + $0x258] sm:$0xe] }
 0x322   : > { %v7547_v42 = vpack.c.bf16 %v7474_v59, %v7473_v60  ;;  %v3887_v21 = vrot.slane %v3885_v51, 4  ;;  %v3890_v62 = vrot.slane %v3888_v34, 5  ;;  %v6793_v25 = vsel %vm6739_vm14, %v6712_v53, %v15671_v45 }
 0x323   : > { %7588 = vst.msk [vmem:[#allocation2 + $0x38] sm:$0xff] %vm6577_vm11, %v7548_v41  ;;  %v3906_v63 = vrot.slane %v3904_v49, 5  ;;  %v3910_v11 = vrot.slane %v3908_v5, 4  ;;  %v3914_v38 = vshll.u32 %v15788_v57, 16  ;;  %v3920_v14 = vrot.slane %v3918_v47, 4  ;;  %11219 = vmatprep.mubr.msk.bf16.mxu0 %vm6863_vm15, %v6793_v25 }
 0x324   : > { %7587 = vst.msk [vmem:[#allocation2 + $0x30] sm:$0xff] %vm6577_vm11, %v7547_v42  ;;  %v3924_v10 = vshll.u32 %v10490_v15, 16  ;;  %v3894_v13 = vshll.u32 %v15796_v7, 16  ;;  %v15820_v33 = vpop.permute.xlu1 %6110  ;;  %5726 = vrot.lane.b32.xlu1 %v10809_v2, %s11674_s11  ;;  %v3891_v29 = vor.u32 %v3890_v62, %v3887_v21  ;;  %v3900_v9 = vrot.slane %v3898_v44, 4  ;;  %11220 = vmatmul.mubr.msk.bf16.gmra.mrb[52].mxu0 %vm6863_vm15, %v6795_v37  ;;  %v15843_v44 = vld [vmem:[%s11758_s13 + $0x260] sm:$0xf] }
 0x325   : > { %5724 = vrot.lane.b32.xlu0 %v10808_v27, %s11674_s11  ;;  %v3911_v45 = vor.u32 %v3910_v11, %v3906_v63  ;;  %v6394_v6 = vsel %vm6334_vm8, %v13849_v20, %v15696_v12  ;;  %v15828_v53 = vpop.permute.xlu0 %6108  ;;  %v3916_v49 = vrot.slane %v3914_v38, 5  ;;  %v6392_v16 = vsel %vm6334_vm8, %v17716_v22, %v15703_v3 }
 0x326   : > { %v3926_v30 = vrot.slane %v3924_v10, 5  ;;  %v3896_v60 = vrot.slane %v3894_v13, 5  ;;  %v3892_v17 = vrot.slane %v3891_v29, 4  ;;  %v4331_v5 = vrot.slane %v15760_v24, 5  ;;  %v15869_v29 = vld [vmem:[%s11758_s13 + $0x25c] sm:$0xf] }
 0x327   : > { %v3912_v8 = vrot.slane %v3911_v45, 4  ;;  %v4334_v0 = vrot.slane %v15788_v57, 5  ;;  %v3921_v20 = vor.u32 %v3920_v14, %v3916_v49  ;;  %v4337_v47 = vrot.slane %v10490_v15, 5  ;;  %v15859_v14 = vld [vmem:[%s11758_s13 + $0x264] sm:$0xf] }
 0x328   : > { %v3901_v12 = vor.u32 %v3900_v9, %v3896_v60  ;;  %v10530_v2 = vrot.slane %v10510_v56, 9  ;;  %v15836_v51 = vpop.permute.xlu1 %5094  ;;  %v3897_v59 = vsel %vm11768_vm2, %v3892_v17, %v3896_v60  ;;  %v4333_v3 = vrot.slane %v4331_v5, 4  ;;  %v10326_v45 = vld [vmem:[%s11758_s13 + $0x258] sm:$0xf] }
 0x329   : > { %v3917_v41 = vsel %vm11768_vm2, %v3912_v8, %v3916_v49  ;;  %v4336_v34 = vrot.slane %v4334_v0, 4  ;;  %v15845_v24 = vpop.permute.xlu0 %5092  ;;  %v3922_v42 = vrot.slane %v3921_v20, 4  ;;  %v4328_v21 = vrot.slane %v15796_v7, 5 }
 0x32a   : > { %v7695_v57 = vld [vmem:[#allocation2 + $0x38] sm:$0x1]  ;;  %v3902_v15 = vrot.slane %v3901_v12, 4  ;;  %v6475_v27 = vsel %vm6415_vm9, %v6394_v6, %v15723_v50  ;;  %v4335_v25 = vsel %vm12232_vm5, %v4333_v3, %v4334_v0  ;;  %v6473_v38 = vsel %vm6415_vm9, %v6392_v16, %v15727_v52  ;;  %v15888_v12 = vld [vmem:[%s11758_s13 + $0x268] sm:$0x1] }
 0x32b   : > { %v7696_v37 = vsel %vm15347_vm13, 0, %v7695_v57  ;;  %v7633_v62 = vld [vmem:[#allocation2 + $0x30] sm:$0x1]  ;;  %v4338_v11 = vsel %vm12232_vm5, %v4336_v34, %v4337_v47  ;;  %v3927_v50 = vsel %vm11768_vm2, %v3922_v42, %v3926_v30  ;;  %v4329_v6 = vsel %vm12232_vm5, %v10530_v2, %v4328_v21 }
 0x32c   : > { %7697 = vst [vmem:[#allocation2 + $0x38] sm:$0x1] %v7696_v37  ;;  %v7634_v7 = vsel %vm15353_vm1, 0, %v7633_v62  ;;  %v3907_v10 = vsel %vm11768_vm2, %v3902_v15, %v3906_v63  ;;  %v10889_v13 = vcombine.low %v4335_v25, %v4338_v11  ;;  %v10849_v9 = vcombine.low %v3917_v41, %v3927_v50 }
 0x32d   : > { %7635 = vst [vmem:[#allocation2 + $0x30] sm:$0x1] %v7634_v7  ;;  %v10848_v52 = vcombine.low %v3897_v59, %v3907_v10  ;;  %v4330_v56 = vrot.slane %v4328_v21, 4  ;;  %v2584_v49 = vshll.u32 %v15843_v44, 16  ;;  %v2588_v60 = vshrl.u32 %v15843_v44, 16 }
 0x32e   : > { %v2598_v30 = vshrl.u32 %v15859_v14, 16  ;;  %v10691_v63 = vcombine.low %v15843_v44, %v15859_v14  ;;  %v15878_v22 = vpop.permute.xlu1 %5294  ;;  %v15880_v16 = vpop.f32.mrb[24].mxu0  ;;  %5926 = vrot.lane.b32.xlu1 %v10849_v9, %s11675_s12  ;;  %v2565_v17 = vshrl.u32 %v10326_v45, 16  ;;  %v2568_v0 = vshll.u32 %v10326_v45, 16 }
 0x32f   : > { %5924 = vrot.lane.b32.xlu0 %v10848_v52, %s11675_s12  ;;  %v4332_v8 = vsel %vm12232_vm5, %v4330_v56, %v4331_v5  ;;  %v2578_v20 = vshrl.u32 %v15869_v29, 16  ;;  %v15890_v47 = vpop.permute.xlu0 %5292  ;;  %v15892_v2 = vpop.f32.mrb[25].mxu0  ;;  %v10690_v59 = vcombine.low %v10326_v45, %v15869_v29  ;;  %v6556_v3 = vsel %vm6496_vm10, %v6475_v27, %v15740_v46 }
 0x330   : > { %v10888_v41 = vcombine.low %v4329_v6, %v4332_v8  ;;  %v6554_v34 = vsel %vm6496_vm10, %v6473_v38, %v15742_v40  ;;  %v15899_v5 = vpop.f32.mrb[26].mxu0  ;;  %v2567_v57 = vrot.slane %v2565_v17, 4  ;;  %v2570_v42 = vrot.slane %v2568_v0, 5 }
 0x331   : > { %v7055_v15 = vadd.f32 %v15773_v19, %v15632_v43  ;;  %v2586_v21 = vrot.slane %v2584_v49, 5  ;;  %v15903_v37 = vpop.f32.mrb[27].mxu0  ;;  %v2590_v62 = vrot.slane %v2588_v60, 4  ;;  %v2594_v25 = vshll.u32 %v15859_v14, 16 }
 0x332   : > { %v2600_v11 = vrot.slane %v2598_v30, 4  ;;  %v2604_v7 = vshll.u32 %v15888_v12, 16  ;;  %v15907_v46 = vpop.permute.xlu1 %5494  ;;  %6126 = vrot.lane.b32.xlu1 %v10889_v13, %s11676_s14  ;;  %v7047_v43 = vadd.f32 %v15773_v19, %v15636_v23  ;;  %v2571_v27 = vor.u32 %v2570_v42, %v2567_v57 }
 0x333   : > { %6124 = vrot.lane.b32.xlu0 %v10888_v41, %s11676_s14  ;;  %vm7319_vm3 = vcmp.ge.f32.partialorder %v7055_v15, 0.0  ;;  %v7399_v40 = vmul.f32 0.2, %v7055_v15  ;;  %v15913_v38 = vpop.permute.xlu0 %5492  ;;  %v2591_v50 = vor.u32 %v2590_v62, %v2586_v21  ;;  %v2596_v10 = vrot.slane %v2594_v25, 5 }
 0x334   : > { %v2606_v45 = vrot.slane %v2604_v7, 5  ;;  %v2574_v9 = vshll.u32 %v15869_v29, 16  ;;  %vm7317_vm4 = vcmp.ge.f32.partialorder %v7047_v43, 0.0  ;;  %v7397_v6 = vmul.f32 0.2, %v7047_v43 }
 0x335   : > { %v7479_v52 = vsel %vm7319_vm3, %v7055_v15, %v7399_v40  ;;  %v2572_v56 = vrot.slane %v2571_v27, 4  ;;  %v2592_v13 = vrot.slane %v2591_v50, 4  ;;  %v2601_v49 = vor.u32 %v2600_v11, %v2596_v10  ;;  %v10369_v11 = vld [vmem:[%s11758_s13 + $0x258] sm:$0xe] }
 0x336   : > { %v2576_v60 = vrot.slane %v2574_v9, 5  ;;  %v2580_v30 = vrot.slane %v2578_v20, 4  ;;  %v15916_v8 = vpop.permute.xlu1 %5714  ;;  %5110 = vrot.lane.b32.xlu1 %v10691_v63, %s11671_s16  ;;  %v7477_v23 = vsel %vm7317_vm4, %v7047_v43, %v7397_v6  ;;  %v7058_v17 = vadd.f32 %v15773_v19, %v15642_v26 }
 0x337   : > { %5108 = vrot.lane.b32.xlu0 %v10690_v59, %s11671_s16  ;;  %v6637_v0 = vsel %vm6577_vm11, %v6556_v3, %v15764_v1  ;;  %v2980_v41 = vrot.slane %v15843_v44, 5  ;;  %v15925_v57 = vpop.permute.xlu0 %5712  ;;  %v2597_v20 = vsel %vm11768_vm2, %v2592_v13, %v2596_v10  ;;  %v2602_v42 = vrot.slane %v2601_v49, 4  ;;  %v15947_v10 = vld [vmem:[%s11758_s13 + $0x278] sm:$0xf] }
 0x338   : > { %v2577_v63 = vsel %vm11768_vm2, %v2572_v56, %v2576_v60  ;;  %v2581_v59 = vor.u32 %v2580_v30, %v2576_v60  ;;  %vm7320_vm0 = vcmp.ge.f32.partialorder %v7058_v17, 0.0  ;;  %v7400_v15 = vmul.f32 0.2, %v7058_v17  ;;  %v10468_v30 = vld [vmem:[%s11758_s13 + $0x26c] sm:$0xf] }
 0x339   : > { %v7050_v26 = vadd.f32 %v15773_v19, %v15646_v48  ;;  %v6635_v1 = vsel %vm6577_vm11, %v6554_v34, %v15777_v39  ;;  %v2607_v44 = vsel %vm11768_vm2, %v2602_v42, %v2606_v45  ;;  %v2982_v62 = vrot.slane %v2980_v41, 4  ;;  %v15944_v34 = vld [vmem:[%s11758_s13 + $0x274] sm:$0xf] }
 0x33a   : > { %v2582_v3 = vrot.slane %v2581_v59, 4  ;;  %v2983_v25 = vrot.slane %v15859_v14, 5  ;;  %v10731_v7 = vcombine.low %v2597_v20, %v2607_v44  ;;  %v7480_v40 = vsel %vm7320_vm0, %v7058_v17, %v7400_v15  ;;  %v15963_v17 = vld [vmem:[%s11758_s13 + $0x270] sm:$0xf] }
 0x33b   : > { %vm7318_vm3 = vcmp.ge.f32.partialorder %v7050_v26, 0.0  ;;  %v7398_v43 = vmul.f32 0.2, %v7050_v26  ;;  %v7550_v48 = vpack.c.bf16 %v7480_v40, %v7479_v52  ;;  %v15949_v14 = vpop.permute.xlu1 %5914  ;;  %v2986_v6 = vrot.slane %v15888_v12, 5 }
 0x33c   : > { %v2587_v27 = vsel %vm11768_vm2, %v2582_v3, %v2586_v21  ;;  %v2984_v50 = vsel %vm12232_vm5, %v2982_v62, %v2983_v25  ;;  %v2985_v39 = vrot.slane %v2983_v25, 4  ;;  %5310 = vrot.lane.b32.xlu1 %v10731_v7, %s11672_s23  ;;  %v10389_v21 = vrot.slane %v10369_v11, 9  ;;  %v15953_v52 = vpop.permute.xlu0 %5912 }
 0x33d   : > { %v10730_v45 = vcombine.low %v2577_v63, %v2587_v27  ;;  %v7478_v9 = vsel %vm7318_vm3, %v7050_v26, %v7398_v43  ;;  %7590 = vst.msk [vmem:[#allocation2 + $0x48] sm:$0xff] %vm6577_vm11, %v7550_v48  ;;  %v2977_v13 = vrot.slane %v15869_v29, 5  ;;  %v6718_v49 = vsel %vm6658_vm12, %v6637_v0, %v15802_v36 }
 0x33e   : > { %v7549_v56 = vpack.c.bf16 %v7478_v9, %v7477_v23  ;;  %v6716_v60 = vsel %vm6658_vm12, %v6635_v1, %v15808_v4  ;;  %v2987_v12 = vsel %vm12232_vm5, %v2985_v39, %v2986_v6  ;;  %v3948_v20 = vshll.u32 %v15944_v34, 16  ;;  %v15979_v1 = vld [vmem:[%s11758_s13 + $0x27c] sm:$0x1] }
 0x33f   : > { %5308 = vrot.lane.b32.xlu0 %v10730_v45, %s11672_s23  ;;  %v3952_v23 = vshrl.u32 %v15944_v34, 16  ;;  %v3962_v29 = vshrl.u32 %v15947_v10, 16  ;;  %v10771_v36 = vcombine.low %v2984_v50, %v2987_v12  ;;  %v2978_v4 = vsel %vm12232_vm5, %v10389_v21, %v2977_v13  ;;  %v15988_v11 = vpop.permute.xlu1 %6114 }
 0x340   : > { %7589 = vst.msk [vmem:[#allocation2 + $0x40] sm:$0xff] %vm6577_vm11, %v7549_v56  ;;  %v2979_v0 = vrot.slane %v2977_v13, 4  ;;  %v10811_v42 = vcombine.low %v15944_v34, %v15947_v10  ;;  %v3929_v63 = vshrl.u32 %v10468_v30, 16  ;;  %v3932_v59 = vshll.u32 %v10468_v30, 16  ;;  %v15991_v48 = vpop.permute.xlu0 %6112  ;;  %v17717_v56 = vld [vmem:[#allocation27_spill] sm:$0xff] }
 0x341   : > { %v3942_v15 = vshrl.u32 %v15963_v17, 16  ;;  %v10810_v26 = vcombine.low %v10468_v30, %v15963_v17  ;;  %5510 = vrot.lane.b32.xlu1 %v10771_v36, %s11673_s29  ;;  %v6799_v3 = vsel %vm6739_vm14, %v6718_v49, %v15820_v33  ;;  %v6797_v62 = vsel %vm6739_vm14, %v6716_v60, %v15828_v53  ;;  %v10511_v49 = vld [vmem:[%s11758_s13 + $0x26c] sm:$0xe] }
 0x342   : > { %v2981_v44 = vsel %vm12232_vm5, %v2979_v0, %v2980_v41  ;;  %v3950_v25 = vrot.slane %v3948_v20, 5  ;;  %v3931_v40 = vrot.slane %v3929_v63, 4  ;;  %v3934_v43 = vrot.slane %v3932_v59, 5  ;;  %11223 = vmatprep.mubr.msk.bf16.mxu0 %vm6863_vm15, %v6797_v62 }
 0x343   : > { %v10770_v7 = vcombine.low %v2978_v4, %v2981_v44  ;;  %v3954_v27 = vrot.slane %v3952_v23, 4  ;;  %v3958_v41 = vshll.u32 %v15947_v10, 16  ;;  %v3964_v50 = vrot.slane %v3962_v29, 4  ;;  %11224 = vmatmul.mubr.msk.bf16.gmra.mrb[56].mxu0 %vm6863_vm15, %v6799_v3  ;;  %v15997_v53 = vpop.f32.mrb[28].mxu0  ;;  %v16020_v62 = vpop.permute.xlu1 %5098 }
 0x344   : > { %v3968_v33 = vshll.u32 %v15979_v1, 16  ;;  %v3938_v39 = vshll.u32 %v15963_v17, 16  ;;  %v7698_v45 = vld [vmem:[#allocation2 + $0x48] sm:$0x1]  ;;  %v3935_v6 = vor.u32 %v3934_v43, %v3931_v40  ;;  %v3944_v21 = vrot.slane %v3942_v15, 4  ;;  %v16004_v60 = vpop.f32.mrb[29].mxu0  ;;  %v16028_v40 = vpop.permute.xlu0 %5096 }
 0x345   : > { %5508 = vrot.lane.b32.xlu0 %v10770_v7, %s11673_s29  ;;  %v3955_v9 = vor.u32 %v3954_v27, %v3950_v25  ;;  %v6398_v13 = vsel %vm6334_vm8, %v17717_v56, %v15836_v51  ;;  %v7699_v30 = vsel %vm15347_vm13, 0, %v7698_v45  ;;  %5730 = vrot.lane.b32.xlu1 %v10811_v42, %s11674_s11  ;;  %v3960_v12 = vrot.slane %v3958_v41, 5  ;;  %v16009_v29 = vpop.f32.mrb[30].mxu0 }
 0x346   : > { %v3970_v20 = vrot.slane %v3968_v33, 5  ;;  %v3940_v23 = vrot.slane %v3938_v39, 5  ;;  %7700 = vst [vmem:[#allocation2 + $0x48] sm:$0x1] %v7699_v30  ;;  %v3936_v0 = vrot.slane %v3935_v6, 4  ;;  %v6396_v51 = vsel %vm6334_vm8, %v13901_v31, %v15845_v24  ;;  %v16015_v59 = vpop.f32.mrb[31].mxu0 }
 0x347   : > { %v7636_v36 = vld [vmem:[#allocation2 + $0x40] sm:$0x1]  ;;  %v3956_v4 = vrot.slane %v3955_v9, 4  ;;  %v4344_v63 = vrot.slane %v15944_v34, 5  ;;  %v3965_v15 = vor.u32 %v3964_v50, %v3960_v12  ;;  %v4347_v3 = vrot.slane %v15947_v10, 5 }
 0x348   : > { %v7637_v42 = vsel %vm15353_vm1, 0, %v7636_v36  ;;  %v3945_v44 = vor.u32 %v3944_v21, %v3940_v23  ;;  %v3941_v31 = vsel %vm11768_vm2, %v3936_v0, %v3940_v23  ;;  %v4350_v34 = vrot.slane %v15979_v1, 5 }
 0x349   : > { %7638 = vst [vmem:[#allocation2 + $0x40] sm:$0x1] %v7637_v42  ;;  %5728 = vrot.lane.b32.xlu0 %v10810_v26, %s11674_s11  ;;  %v3961_v7 = vsel %vm11768_vm2, %v3956_v4, %v3960_v12  ;;  %v4346_v24 = vrot.slane %v4344_v63, 4  ;;  %v3966_v43 = vrot.slane %v3965_v15, 4  ;;  %v4349_v41 = vrot.slane %v4347_v3, 4 }
 0x34a   : > { %v3946_v27 = vrot.slane %v3945_v44, 4  ;;  %v10531_v10 = vrot.slane %v10511_v49, 9  ;;  %v4341_v26 = vrot.slane %v15963_v17, 5  ;;  %v6479_v33 = vsel %vm6415_vm9, %v6398_v13, %v15878_v22 }
 0x34b   : > { %v4348_v50 = vsel %vm12232_vm5, %v4346_v24, %v4347_v3  ;;  %v6477_v39 = vsel %vm6415_vm9, %v6396_v51, %v15890_v47  ;;  %v3971_v1 = vsel %vm11768_vm2, %v3966_v43, %v3970_v20  ;;  %v4351_v9 = vsel %vm12232_vm5, %v4349_v41, %v4350_v34  ;;  %v17720_v34 = vld [vmem:[#allocation42_spill] sm:$0xff]  ;;  %v17721_v43 = vld [vmem:[#allocation65_spill] sm:$0xff] }
 0x34c   : > { %v3951_v45 = vsel %vm11768_vm2, %v3946_v27, %v3950_v25  ;;  %v7071_v6 = vadd.f32 %v15773_v19, %v15744_v55  ;;  %v10851_v21 = vcombine.low %v3961_v7, %v3971_v1  ;;  %v10891_v56 = vcombine.low %v4348_v50, %v4351_v9  ;;  %v17718_v7 = vld [vmem:[#allocation31_spill] sm:$0xff] }
 0x34d   : > { %v10850_v17 = vcombine.low %v3941_v31, %v3951_v45  ;;  %v4342_v22 = vsel %vm12232_vm5, %v10531_v10, %v4341_v26  ;;  %v4343_v13 = vrot.slane %v4341_v26, 4  ;;  %v7063_v49 = vadd.f32 %v15773_v19, %v15749_v28  ;;  %v17719_v31 = vld [vmem:[#allocation64_spill] sm:$0xff] }
 0x34e   : > { %vm7323_vm4 = vcmp.ge.f32.partialorder %v7071_v6, 0.0  ;;  %v7403_v47 = vmul.f32 0.2, %v7071_v6  ;;  %v5299_v58 = vpop.permute.xlu1 %5298  ;;  %5930 = vrot.lane.b32.xlu1 %v10851_v21, %s11675_s12  ;;  %v7074_v55 = vadd.f32 %v15773_v19, %v15762_v32  ;;  %v6560_v25 = vsel %vm6496_vm10, %v6479_v33, %v15907_v46 }
 0x34f   : > { %5928 = vrot.lane.b32.xlu0 %v10850_v17, %s11675_s12  ;;  %v7066_v30 = vadd.f32 %v15773_v19, %v15766_v18  ;;  %v5297_v12 = vpop.permute.xlu0 %5296  ;;  %v4345_v20 = vsel %vm12232_vm5, %v4343_v13, %v4344_v63  ;;  %vm7321_vm2 = vcmp.ge.f32.partialorder %v7063_v49, 0.0  ;;  %v7401_v28 = vmul.f32 0.2, %v7063_v49 }
 0x350   : > { %v7483_v23 = vsel %vm7323_vm4, %v7071_v6, %v7403_v47  ;;  %v10890_v36 = vcombine.low %v4342_v22, %v4345_v20  ;;  %vm7324_vm0 = vcmp.ge.f32.partialorder %v7074_v55, 0.0  ;;  %v7404_v4 = vmul.f32 0.2, %v7074_v55 }
 0x351   : > { %vm7322_vm3 = vcmp.ge.f32.partialorder %v7066_v30, 0.0  ;;  %v7481_v0 = vsel %vm7321_vm2, %v7063_v49, %v7401_v28  ;;  %v7402_v51 = vmul.f32 0.2, %v7066_v30  ;;  %v6558_v32 = vsel %vm6496_vm10, %v6477_v39, %v15913_v38 }
 0x352   : > { %v6641_v46 = vsel %vm6577_vm11, %v6560_v25, %v15916_v8  ;;  %v5499_v18 = vpop.permute.xlu1 %5498  ;;  %6130 = vrot.lane.b32.xlu1 %v10891_v56, %s11676_s14  ;;  %v7484_v54 = vsel %vm7324_vm0, %v7074_v55, %v7404_v4  ;;  %v6639_v63 = vsel %vm6577_vm11, %v6558_v32, %v15925_v57  ;;  %v6321_v24 = vsel %vm6253_vm7, %v17719_v31, %v17718_v7 }
 0x353   : > { %6128 = vrot.lane.b32.xlu0 %v10890_v36, %s11676_s14  ;;  %v6722_v42 = vsel %vm6658_vm12, %v6641_v46, %v15949_v14  ;;  %v5497_v15 = vpop.permute.xlu0 %5496  ;;  %v7552_v44 = vpack.c.bf16 %v7484_v54, %v7483_v23  ;;  %v7482_v3 = vsel %vm7322_vm3, %v7066_v30, %v7402_v51  ;;  %v6720_v38 = vsel %vm6658_vm12, %v6639_v63, %v15953_v52 }
 0x354   : > { %v6803_v8 = vsel %vm6739_vm14, %v6722_v42, %v15988_v11  ;;  %v6319_v57 = vsel %vm6253_vm7, %v17721_v43, %v17720_v34  ;;  %v7551_v27 = vpack.c.bf16 %v7482_v3, %v7481_v0  ;;  %v6801_v14 = vsel %vm6739_vm14, %v6720_v38, %v15991_v48 }
 0x355   : > { %7592 = vst.msk [vmem:[#allocation2 + $0x58] sm:$0xff] %vm6577_vm11, %v7552_v44  ;;  %11227 = vmatprep.mubr.msk.bf16.mxu0 %vm6863_vm15, %v6801_v14  ;;  %v6402_v52 = vsel %vm6334_vm8, %v6321_v24, %v16020_v62  ;;  %v7087_v11 = vadd.f32 %v15773_v19, %v15880_v16  ;;  %v7079_v41 = vadd.f32 %v15773_v19, %v15892_v2 }
 0x356   : > { %v7090_v10 = vadd.f32 %v15773_v19, %v15899_v5  ;;  %v5719_v50 = vpop.permute.xlu1 %5718  ;;  %7591 = vst.msk [vmem:[#allocation2 + $0x50] sm:$0xff] %vm6577_vm11, %v7551_v27  ;;  %11228 = vmatmul.mubr.msk.bf16.gmra.mrb[60].mxu0 %vm6863_vm15, %v6803_v8  ;;  %v6400_v48 = vsel %vm6334_vm8, %v6319_v57, %v16028_v40  ;;  %v6483_v26 = vsel %vm6415_vm9, %v6402_v52, %v5299_v58 }
 0x357   : > { %v7082_v62 = vadd.f32 %v15773_v19, %v15903_v37  ;;  %v7103_v16 = vadd.f32 %v15773_v19, %v15997_v53  ;;  %vm7327_vm5 = vcmp.ge.f32.partialorder %v7087_v11, 0.0  ;;  %v7407_v2 = vmul.f32 0.2, %v7087_v11  ;;  %v5717_v1 = vpop.permute.xlu0 %5716 }
 0x358   : > { %vm7325_vm4 = vcmp.ge.f32.partialorder %v7079_v41, 0.0  ;;  %v7405_v5 = vmul.f32 0.2, %v7079_v41  ;;  %vm7328_vm2 = vcmp.ge.f32.partialorder %v7090_v10, 0.0  ;;  %v7408_v33 = vmul.f32 0.2, %v7090_v10 }
 0x359   : > { %vm7326_vm0 = vcmp.ge.f32.partialorder %v7082_v62, 0.0  ;;  %v7406_v39 = vmul.f32 0.2, %v7082_v62  ;;  %v7487_v45 = vsel %vm7327_vm5, %v7087_v11, %v7407_v2  ;;  %v6481_v40 = vsel %vm6415_vm9, %v6400_v48, %v5297_v12 }
 0x35a   : > { %v7485_v9 = vsel %vm7325_vm4, %v7079_v41, %v7405_v5  ;;  %v6564_v6 = vsel %vm6496_vm10, %v6483_v26, %v5499_v18  ;;  %v7488_v21 = vsel %vm7328_vm2, %v7090_v10, %v7408_v33  ;;  %v6562_v17 = vsel %vm6496_vm10, %v6481_v40, %v5497_v15 }
 0x35b   : > { %v7486_v37 = vsel %vm7326_vm0, %v7082_v62, %v7406_v39  ;;  %v6645_v53 = vsel %vm6577_vm11, %v6564_v6, %v5719_v50  ;;  %v7554_v56 = vpack.c.bf16 %v7488_v21, %v7487_v45  ;;  %v7411_v47 = vmul.f32 0.2, %v7103_v16 }
 0x35c   : > { %v7553_v22 = vpack.c.bf16 %v7486_v37, %v7485_v9  ;;  %v5919_v13 = vpop.permute.xlu1 %5918  ;;  %v7095_v49 = vadd.f32 %v15773_v19, %v16004_v60  ;;  %v11201_v58 = vpop.f32.mrb[32].mxu0  ;;  %v7701_v55 = vld [vmem:[#allocation2 + $0x58] sm:$0x1]  ;;  %v6643_v25 = vsel %vm6577_vm11, %v6562_v17, %v5717_v1  ;;  %vm7331_vm3 = vcmp.ge.f32.partialorder %v7103_v16, 0.0 }
 0x35d   : > { %v7106_v30 = vadd.f32 %v15773_v19, %v16009_v29  ;;  %v7098_v12 = vadd.f32 %v15773_v19, %v16015_v59  ;;  %v7110_v20 = vpop.f32.mrb[33].mxu0  ;;  %v7702_v23 = vsel %vm15347_vm13, 0, %v7701_v55  ;;  %v7639_v28 = vld [vmem:[#allocation2 + $0x50] sm:$0x1]  ;;  %7594 = vst.msk [vmem:[#allocation2 + $0x68] sm:$0xff] %vm6577_vm11, %v7554_v56  ;;  %v7119_v36 = vadd.f32 %v15773_v19, %v11201_v58 }
 0x35e   : > { %7593 = vst.msk [vmem:[#allocation2 + $0x60] sm:$0xff] %vm6577_vm11, %v7553_v22  ;;  %vm7329_vm5 = vcmp.ge.f32.partialorder %v7095_v49, 0.0  ;;  %v7409_v60 = vmul.f32 0.2, %v7095_v49  ;;  %7703 = vst [vmem:[#allocation2 + $0x58] sm:$0x1] %v7702_v23  ;;  %v5917_v4 = vpop.permute.xlu0 %5916  ;;  %v6726_v51 = vsel %vm6658_vm12, %v6645_v53, %v5919_v13  ;;  %v7491_v46 = vsel %vm7331_vm3, %v7103_v16, %v7411_v47 }
 0x35f   : > { %v7640_v29 = vsel %vm15353_vm1, 0, %v7639_v28  ;;  %vm7332_vm4 = vcmp.ge.f32.partialorder %v7106_v30, 0.0  ;;  %v7412_v59 = vmul.f32 0.2, %v7106_v30  ;;  %vm7330_vm2 = vcmp.ge.f32.partialorder %v7098_v12, 0.0  ;;  %v11202_v0 = vpop.f32.mrb[34].mxu0 }
 0x360   : > { %7641 = vst [vmem:[#allocation2 + $0x50] sm:$0x1] %v7640_v29  ;;  %v6724_v32 = vsel %vm6658_vm12, %v6643_v25, %v5917_v4  ;;  %v7410_v18 = vmul.f32 0.2, %v7098_v12  ;;  %v7113_v54 = vpop.f32.mrb[35].mxu0  ;;  %v7489_v63 = vsel %vm7329_vm5, %v7095_v49, %v7409_v60  ;;  %v7111_v15 = vadd.f32 %v15773_v19, %v7110_v20 }
 0x361   : > { %v7492_v42 = vsel %vm7332_vm4, %v7106_v30, %v7412_v59  ;;  %v7122_v44 = vadd.f32 %v15773_v19, %v11202_v0  ;;  %v6119_v3 = vpop.permute.xlu1 %6118  ;;  %v7415_v7 = vmul.f32 0.2, %v7119_v36  ;;  %v7114_v31 = vadd.f32 %v15773_v19, %v7113_v54  ;;  %v11532_v30 = vld [vmem:[%s11758_s13 + $0x224] sm:$0xf]  ;;  %v11534_v23 = vld [vmem:[%s11758_s13 + $0x21c] sm:$0xf] }
 0x362   : > { %v7556_v38 = vpack.c.bf16 %v7492_v42, %v7491_v46  ;;  %v7490_v8 = vsel %vm7330_vm2, %v7098_v12, %v7410_v18  ;;  %v6807_v24 = vsel %vm6739_vm14, %v6726_v51, %v6119_v3  ;;  %vm7335_vm0 = vcmp.ge.f32.partialorder %v7119_v36, 0.0  ;;  %v11533_v12 = vld [vmem:[%s11758_s13 + $0x228] sm:$0xf]  ;;  %v11535_v28 = vld [vmem:[%s11758_s13 + $0x220] sm:$0xf]  ;;  %v17722_v54 = vld [vmem:[#allocation28_spill] sm:$0xff] }
 0x363   : > { %v7555_v34 = vpack.c.bf16 %v7490_v8, %v7489_v63  ;;  %vm7333_vm3 = vcmp.ge.f32.partialorder %v7111_v15, 0.0  ;;  %v7413_v57 = vmul.f32 0.2, %v7111_v15  ;;  %vm7336_vm5 = vcmp.ge.f32.partialorder %v7122_v44, 0.0  ;;  %v17723_v42 = vld [vmem:[#allocation44_spill] sm:$0xff] }
 0x364   : > { %v6117_v43 = vpop.permute.xlu0 %6116  ;;  %7596 = vst.msk [vmem:[#allocation2 + $0x78] sm:$0xff] %vm6577_vm11, %v7556_v38  ;;  %v7416_v27 = vmul.f32 0.2, %v7122_v44  ;;  %vm7334_vm4 = vcmp.ge.f32.partialorder %v7114_v31, 0.0  ;;  %v7704_v14 = vld [vmem:[#allocation2 + $0x68] sm:$0x1]  ;;  %v7495_v48 = vsel %vm7335_vm0, %v7119_v36, %v7415_v7  ;;  %v10567_v20 = vcombine.low %v11532_v30, %v11533_v12 }
 0x365   : > { %v7642_v52 = vld [vmem:[#allocation2 + $0x60] sm:$0x1]  ;;  %v6805_v11 = vsel %vm6739_vm14, %v6724_v32, %v6117_v43  ;;  %7595 = vst.msk [vmem:[#allocation2 + $0x70] sm:$0xff] %vm6577_vm11, %v7555_v34  ;;  %v7414_v41 = vmul.f32 0.2, %v7114_v31  ;;  %v7705_v10 = vsel %vm15347_vm13, 0, %v7704_v14  ;;  %v7493_v62 = vsel %vm7333_vm3, %v7111_v15, %v7413_v57  ;;  %v5103_v5 = vpop.permute.xlu1 %5102 }
 0x366   : > { %v7643_v50 = vsel %vm15353_vm1, 0, %v7642_v52  ;;  %11231 = vmatprep.mubr.msk.bf16.mxu0 %vm6863_vm15, %v6805_v11  ;;  %v7496_v26 = vsel %vm7336_vm5, %v7122_v44, %v7416_v27  ;;  %7706 = vst [vmem:[#allocation2 + $0x68] sm:$0x1] %v7705_v10  ;;  %v10566_v60 = vcombine.low %v11534_v23, %v11535_v28  ;;  %v6240_v63 = vsel %vm6132_vm6, %v10567_v20, %v17722_v54  ;;  %v17724_v38 = vld [vmem:[#allocation34_spill] sm:$0xff] }
 0x367   : > { %7644 = vst [vmem:[#allocation2 + $0x60] sm:$0x1] %v7643_v50  ;;  %11232 = vmatmul.mubr.msk.bf16.gmra.mrb[64].mxu0 %vm6863_vm15, %v6807_v24  ;;  %v7558_v16 = vpack.c.bf16 %v7496_v26, %v7495_v48  ;;  %v7494_v2 = vsel %vm7334_vm4, %v7114_v31, %v7414_v41  ;;  %v6325_v8 = vsel %vm6253_vm7, %v6240_v63, %v17724_v38  ;;  %v17725_v34 = vld [vmem:[#allocation94_spill] sm:$0xff] }
 0x368   : > { %v7557_v33 = vpack.c.bf16 %v7494_v2, %v7493_v62  ;;  %v5101_v39 = vpop.permute.xlu0 %5100  ;;  %v6237_v15 = vsel %vm6132_vm6, %v10566_v60, %v17723_v42  ;;  %v6406_v57 = vsel %vm6334_vm8, %v6325_v8, %v5103_v5  ;;  %v17727_v38 = vld [vmem:[#allocation54_spill] sm:$0xff] }
 0x369   : > { %7598 = vst.msk [vmem:[#allocation2 + $0x88] sm:$0xff] %vm6577_vm11, %v7558_v16  ;;  %v6323_v43 = vsel %vm6253_vm7, %v6237_v15, %v17725_v34 }
 0x36a   : > { %7597 = vst.msk [vmem:[#allocation2 + $0x80] sm:$0xff] %vm6577_vm11, %v7557_v33  ;;  %v6404_v52 = vsel %vm6334_vm8, %v6323_v43, %v5101_v39 }
 0x36b   : > { %v7707_v1 = vld [vmem:[#allocation2 + $0x78] sm:$0x1] }
 0x36c   : > { %v7708_v45 = vsel %vm15347_vm13, 0, %v7707_v1  ;;  %v7645_v9 = vld [vmem:[#allocation2 + $0x70] sm:$0x1] }
 0x36d   : > { %7709 = vst [vmem:[#allocation2 + $0x78] sm:$0x1] %v7708_v45  ;;  %v7646_v40 = vsel %vm15353_vm1, 0, %v7645_v9 }
 0x36e   : > { %7647 = vst [vmem:[#allocation2 + $0x70] sm:$0x1] %v7646_v40  ;;  %v5303_v6 = vpop.permute.xlu1 %5302 }
 0x36f   : > { %v5301_v21 = vpop.permute.xlu0 %5300  ;;  %v6487_v11 = vsel %vm6415_vm9, %v6406_v57, %v5303_v6 }
 0x370   : > { %v7710_v37 = vld [vmem:[#allocation2 + $0x88] sm:$0x1]  ;;  %v6485_v10 = vsel %vm6415_vm9, %v6404_v52, %v5301_v21 }
 0x371   : > { %v7711_v17 = vsel %vm15347_vm13, 0, %v7710_v37  ;;  %v7648_v53 = vld [vmem:[#allocation2 + $0x80] sm:$0x1] }
 0x372   : > { %7712 = vst [vmem:[#allocation2 + $0x88] sm:$0x1] %v7711_v17  ;;  %v7649_v56 = vsel %vm15353_vm1, 0, %v7648_v53  ;;  %v5503_v22 = vpop.permute.xlu1 %5502 }
 0x373   : > { %7650 = vst [vmem:[#allocation2 + $0x80] sm:$0x1] %v7649_v56  ;;  %v5501_v13 = vpop.permute.xlu0 %5500  ;;  %v6568_v50 = vsel %vm6496_vm10, %v6487_v11, %v5503_v22 }
 0x374   : > { %v6566_v48 = vsel %vm6496_vm10, %v6485_v10, %v5501_v13 }
 0x376   : > { %v5723_v36 = vpop.permute.xlu1 %5722 }
 0x377   : > { %v11205_v47 = vpop.f32.mrb[36].mxu0  ;;  %v5721_v0 = vpop.permute.xlu0 %5720  ;;  %v6649_v26 = vsel %vm6577_vm11, %v6568_v50, %v5723_v36  ;;  %v11536_v36 = vld [vmem:[%s11758_s13 + $0x238] sm:$0xf] }
 0x378   : > { %v7135_v49 = vadd.f32 %v15773_v19, %v11205_v47  ;;  %v7126_v58 = vpop.f32.mrb[37].mxu0  ;;  %v6647_v62 = vsel %vm6577_vm11, %v6566_v48, %v5721_v0 }
 0x379   : > { %v7127_v55 = vadd.f32 %v15773_v19, %v7126_v58  ;;  %v11206_v25 = vpop.f32.mrb[38].mxu0 }
 0x37a   : > { %v7419_v29 = vmul.f32 0.2, %v7135_v49  ;;  %v7138_v4 = vadd.f32 %v15773_v19, %v11206_v25  ;;  %v7129_v59 = vpop.f32.mrb[39].mxu0  ;;  %vm7339_vm2 = vcmp.ge.f32.partialorder %v7135_v49, 0.0 }
 0x37b   : > { %v7417_v51 = vmul.f32 0.2, %v7127_v55  ;;  %v7130_v32 = vadd.f32 %v15773_v19, %v7129_v59  ;;  %vm7337_vm0 = vcmp.ge.f32.partialorder %v7127_v55, 0.0 }
 0x37c   : > { %vm7340_vm3 = vcmp.ge.f32.partialorder %v7138_v4, 0.0  ;;  %v7420_v46 = vmul.f32 0.2, %v7138_v4  ;;  %v7499_v44 = vsel %vm7339_vm2, %v7135_v49, %v7419_v29  ;;  %v11537_v29 = vld [vmem:[%s11758_s13 + $0x23c] sm:$0xf] }
 0x37d   : > { %vm7338_vm5 = vcmp.ge.f32.partialorder %v7130_v32, 0.0  ;;  %v7418_v18 = vmul.f32 0.2, %v7130_v32  ;;  %v7497_v7 = vsel %vm7337_vm0, %v7127_v55, %v7417_v51  ;;  %v11538_v51 = vld [vmem:[%s11758_s13 + $0x230] sm:$0xf] }
 0x37e   : > { %v7500_v3 = vsel %vm7340_vm3, %v7138_v4, %v7420_v46  ;;  %v10569_v4 = vcombine.low %v11536_v36, %v11537_v29  ;;  %v11542_v36 = vld [vmem:[%s11758_s13 + $0x250] sm:$0xf] }
 0x37f   : > { %v7560_v31 = vpack.c.bf16 %v7500_v3, %v7499_v44  ;;  %v7498_v24 = vsel %vm7338_vm5, %v7130_v32, %v7418_v18  ;;  %v5923_v27 = vpop.permute.xlu1 %5922  ;;  %v11539_v32 = vld [vmem:[%s11758_s13 + $0x234] sm:$0xf] }
 0x380   : > { %v7559_v14 = vpack.c.bf16 %v7498_v24, %v7497_v7  ;;  %v6730_v16 = vsel %vm6658_vm12, %v6649_v26, %v5923_v27  ;;  %v10568_v46 = vcombine.low %v11538_v51, %v11539_v32  ;;  %v17728_v7 = vld [vmem:[#allocation5_spill] sm:$0xff]  ;;  %v11544_v51 = vld [vmem:[%s11758_s13 + $0x248] sm:$0xf] }
 0x381   : > { %v5921_v41 = vpop.permute.xlu0 %5920  ;;  %7600 = vst.msk [vmem:[#allocation2 + $0x98] sm:$0xff] %vm6577_vm11, %v7560_v31  ;;  %v17729_v24 = vld [vmem:[#allocation33_spill] sm:$0xff] }
 0x382   : > { %7599 = vst.msk [vmem:[#allocation2 + $0x90] sm:$0xff] %vm6577_vm11, %v7559_v14  ;;  %v6728_v5 = vsel %vm6658_vm12, %v6647_v62, %v5921_v41  ;;  %v6243_v8 = vsel %vm6132_vm6, %v10568_v46, %v17727_v38 }
 0x383   : > { %v6123_v2 = vpop.permute.xlu1 %6122  ;;  %v6327_v34 = vsel %vm6253_vm7, %v6243_v8, %v17729_v24  ;;  %v17732_v8 = vld [vmem:[#allocation25_spill] sm:$0xff] }
 0x384   : > { %v6811_v33 = vsel %vm6739_vm14, %v6730_v16, %v6123_v2 }
 0x385   : > { %v6121_v39 = vpop.permute.xlu0 %6120 }
 0x386   : > { %v6809_v1 = vsel %vm6739_vm14, %v6728_v5, %v6121_v39 }
 0x387   : > { %11235 = vmatprep.mubr.msk.bf16.mxu0 %vm6863_vm15, %v6809_v1  ;;  %v5107_v9 = vpop.permute.xlu1 %5106 }
 0x388   : > { %11236 = vmatmul.mubr.msk.bf16.gmra.mrb[68].mxu0 %vm6863_vm15, %v6811_v33  ;;  %v7713_v45 = vld [vmem:[#allocation2 + $0x98] sm:$0x1] }
 0x389   : > { %v5105_v40 = vpop.permute.xlu0 %5104  ;;  %v7714_v6 = vsel %vm15347_vm13, 0, %v7713_v45  ;;  %v7651_v21 = vld [vmem:[#allocation2 + $0x90] sm:$0x1] }
 0x38a   : > { %7715 = vst [vmem:[#allocation2 + $0x98] sm:$0x1] %v7714_v6  ;;  %v7652_v37 = vsel %vm15353_vm1, 0, %v7651_v21  ;;  %v6408_v57 = vsel %vm6334_vm8, %v6327_v34, %v5105_v40 }
 0x38b   : > { %7653 = vst [vmem:[#allocation2 + $0x90] sm:$0x1] %v7652_v37 }
 0x38e   : > { %v5307_v17 = vpop.permute.xlu1 %5306 }
 0x38f   : > { %v5305_v53 = vpop.permute.xlu0 %5304 }
 0x390   : > { %v6489_v11 = vsel %vm6415_vm9, %v6408_v57, %v5305_v53  ;;  %v16223_v53 = vld [vmem:[%s17280_s2] ss:$0 sm:$0xff] }
 0x392   : > { %v11209_v56 = vpop.f32.mrb[40].mxu0  ;;  %v5507_v13 = vpop.permute.xlu1 %5506 }
 0x393   : > { %v7151_v22 = vadd.f32 %v15773_v19, %v11209_v56  ;;  %v7142_v47 = vpop.f32.mrb[41].mxu0  ;;  %v5505_v49 = vpop.permute.xlu0 %5504 }
 0x394   : > { %v7143_v58 = vadd.f32 %v15773_v19, %v7142_v47  ;;  %v11210_v55 = vpop.f32.mrb[42].mxu0  ;;  %v6570_v10 = vsel %vm6496_vm10, %v6489_v11, %v5505_v49 }
 0x395   : > { %v7423_v25 = vmul.f32 0.2, %v7151_v22  ;;  %v7154_v30 = vadd.f32 %v15773_v19, %v11210_v55  ;;  %v7145_v12 = vpop.f32.mrb[43].mxu0  ;;  %vm7343_vm4 = vcmp.ge.f32.partialorder %v7151_v22, 0.0 }
 0x396   : > { %v7421_v20 = vmul.f32 0.2, %v7143_v58  ;;  %v7146_v23 = vadd.f32 %v15773_v19, %v7145_v12  ;;  %vm7341_vm2 = vcmp.ge.f32.partialorder %v7143_v58, 0.0  ;;  %v5727_v18 = vpop.permute.xlu1 %5726  ;;  %v17726_v19 = vld [vmem:[#allocation46_spill] sm:$0xff] }
 0x397   : > { %vm7344_vm0 = vcmp.ge.f32.partialorder %v7154_v30, 0.0  ;;  %v7424_v28 = vmul.f32 0.2, %v7154_v30  ;;  %v7503_v59 = vsel %vm7343_vm4, %v7151_v22, %v7423_v25  ;;  %v5725_v54 = vpop.permute.xlu0 %5724  ;;  %v6246_v3 = vsel %vm6132_vm6, %v10569_v4, %v17726_v19 }
 0x398   : > { %vm7342_vm3 = vcmp.ge.f32.partialorder %v7146_v23, 0.0  ;;  %v7422_v60 = vmul.f32 0.2, %v7146_v23  ;;  %v7501_v63 = vsel %vm7341_vm2, %v7143_v58, %v7421_v20  ;;  %v6329_v31 = vsel %vm6253_vm7, %v6246_v3, %v17728_v7  ;;  %v17731_v3 = vld [vmem:[#allocation66_spill] sm:$0xff] }
 0x399   : > { %v7504_v0 = vsel %vm7344_vm0, %v7154_v30, %v7424_v28  ;;  %v6410_v43 = vsel %vm6334_vm8, %v6329_v31, %v5107_v9  ;;  %v6651_v48 = vsel %vm6577_vm11, %v6570_v10, %v5725_v54  ;;  %v17733_v31 = vld [vmem:[#allocation24_spill] sm:$0xff] }
 0x39a   : > { %v7562_v42 = vpack.c.bf16 %v7504_v0, %v7503_v59  ;;  %v7502_v15 = vsel %vm7342_vm3, %v7146_v23, %v7422_v60  ;;  %v6491_v52 = vsel %vm6415_vm9, %v6410_v43, %v5307_v17  ;;  %v11541_v60 = vld [vmem:[%s11758_s13 + $0x24c] sm:$0xf]  ;;  %v11543_v0 = vld [vmem:[%s11758_s13 + $0x244] sm:$0xf]  ;;  %s16342_s13 = scalar_lea.vmem [#allocation3], %s13264_s20 }
 0x39b   : > { %v7561_v44 = vpack.c.bf16 %v7502_v15, %v7501_v63  ;;  %v6572_v41 = vsel %vm6496_vm10, %v6491_v52, %v5507_v13  ;;  %v10571_v29 = vcombine.low %v11541_v60, %v11542_v36  ;;  %v10570_v32 = vcombine.low %v11543_v0, %v11544_v51 }
 0x39c   : > { %7602 = vst.msk [vmem:[#allocation2 + $0xa8] sm:$0xff] %vm6577_vm11, %v7562_v42  ;;  %v6653_v50 = vsel %vm6577_vm11, %v6572_v41, %v5727_v18 }
 0x39d   : > { %7601 = vst.msk [vmem:[#allocation2 + $0xa0] sm:$0xff] %vm6577_vm11, %v7561_v44  ;;  %v17730_v44 = vld [vmem:[#allocation56_spill] sm:$0xff]  ;;  %v6249_v38 = vsel %vm6132_vm6, %v10570_v32, %v17731_v3 }
 0x39e   : > { %v6252_v19 = vsel %vm6132_vm6, %v10571_v29, %v17730_v44  ;;  %v6331_v24 = vsel %vm6253_vm7, %v6249_v38, %v17733_v31 }
 0x39f   : > { %v6333_v7 = vsel %vm6253_vm7, %v6252_v19, %v17732_v8 }
 0x3a0   : > { %v5927_v27 = vpop.permute.xlu1 %5926 }
 0x3a1   : > { %v5925_v14 = vpop.permute.xlu0 %5924  ;;  %v6734_v62 = vsel %vm6658_vm12, %v6653_v50, %v5927_v27 }
 0x3a2   : > { %v6732_v16 = vsel %vm6658_vm12, %v6651_v48, %v5925_v14 }
 0x3a3   : > { %v7716_v26 = vld [vmem:[#allocation2 + $0xa8] sm:$0x1] }
 0x3a4   : > { %v6127_v2 = vpop.permute.xlu1 %6126  ;;  %v7717_v33 = vsel %vm15347_vm13, 0, %v7716_v26  ;;  %v7654_v39 = vld [vmem:[#allocation2 + $0xa0] sm:$0x1] }
 0x3a5   : > { %v6125_v5 = vpop.permute.xlu0 %6124  ;;  %v6815_v1 = vsel %vm6739_vm14, %v6734_v62, %v6127_v2  ;;  %7718 = vst [vmem:[#allocation2 + $0xa8] sm:$0x1] %v7717_v33  ;;  %v7655_v9 = vsel %vm15353_vm1, 0, %v7654_v39 }
 0x3a6   : > { %v6813_v45 = vsel %vm6739_vm14, %v6732_v16, %v6125_v5  ;;  %7656 = vst [vmem:[#allocation2 + $0xa0] sm:$0x1] %v7655_v9 }
 0x3a7   : > { %11239 = vmatprep.mubr.msk.bf16.mxu0 %vm6863_vm15, %v6813_v45 }
 0x3a8   : > { %11240 = vmatmul.mubr.msk.bf16.gmra.mrb[72].mxu0 %vm6863_vm15, %v6815_v1  ;;  %v5111_v40 = vpop.permute.xlu1 %5110 }
 0x3a9   : > { %v5109_v6 = vpop.permute.xlu0 %5108  ;;  %v6414_v34 = vsel %vm6334_vm8, %v6333_v7, %v5111_v40 }
 0x3aa   : > { %v6412_v43 = vsel %vm6334_vm8, %v6331_v24, %v5109_v6 }
 0x3ae   : > { %v5311_v21 = vpop.permute.xlu1 %5310 }
 0x3af   : > { %v6495_v14 = vsel %vm6415_vm9, %v6414_v34, %v5311_v21 }
 0x3b1   : > { %v5309_v37 = vpop.permute.xlu0 %5308 }
 0x3b2   : > { %v11213_v17 = vpop.f32.mrb[44].mxu0  ;;  %v6493_v52 = vsel %vm6415_vm9, %v6412_v43, %v5309_v37 }
 0x3b3   : > { %v7167_v56 = vadd.f32 %v16223_v53, %v11213_v17  ;;  %v7158_v22 = vpop.f32.mrb[45].mxu0  ;;  %v5511_v13 = vpop.permute.xlu1 %5510 }
 0x3b4   : > { %v7159_v47 = vadd.f32 %v16223_v53, %v7158_v22  ;;  %v11214_v49 = vpop.f32.mrb[46].mxu0  ;;  %v6576_v11 = vsel %vm6496_vm10, %v6495_v14, %v5511_v13 }
 0x3b5   : > { %v7427_v58 = vmul.f32 0.2, %v7167_v56  ;;  %v7170_v55 = vadd.f32 %v16223_v53, %v11214_v49  ;;  %v7161_v25 = vpop.f32.mrb[47].mxu0  ;;  %vm7347_vm5 = vcmp.ge.f32.partialorder %v7167_v56, 0.0 }
 0x3b6   : > { %v7425_v12 = vmul.f32 0.2, %v7159_v47  ;;  %v7162_v20 = vadd.f32 %v16223_v53, %v7161_v25  ;;  %vm7345_vm4 = vcmp.ge.f32.partialorder %v7159_v47, 0.0 }
 0x3b7   : > { %v5509_v30 = vpop.permute.xlu0 %5508  ;;  %vm7348_vm2 = vcmp.ge.f32.partialorder %v7170_v55, 0.0  ;;  %v7428_v23 = vmul.f32 0.2, %v7170_v55  ;;  %v7507_v4 = vsel %vm7347_vm5, %v7167_v56, %v7427_v58  ;;  %v5731_v46 = vpop.permute.xlu1 %5730 }
 0x3b8   : > { %vm7346_vm0 = vcmp.ge.f32.partialorder %v7162_v20, 0.0  ;;  %v7426_v28 = vmul.f32 0.2, %v7162_v20  ;;  %v7505_v54 = vsel %vm7345_vm4, %v7159_v47, %v7425_v12  ;;  %v6574_v41 = vsel %vm6496_vm10, %v6493_v52, %v5509_v30 }
 0x3b9   : > { %v7508_v59 = vsel %vm7348_vm2, %v7170_v55, %v7428_v23  ;;  %v6657_v10 = vsel %vm6577_vm11, %v6576_v11, %v5731_v46 }
 0x3ba   : > { %v7564_v63 = vpack.c.bf16 %v7508_v59, %v7507_v4  ;;  %v7506_v42 = vsel %vm7346_vm0, %v7162_v20, %v7426_v28 }
 0x3bb   : > { %v5729_v18 = vpop.permute.xlu0 %5728  ;;  %v7563_v15 = vpack.c.bf16 %v7506_v42, %v7505_v54 }
 0x3bc   : > { %7604 = vst.msk [vmem:[#allocation2 + $0xb8] sm:$0xff] %vm6577_vm11, %v7564_v63  ;;  %v6655_v50 = vsel %vm6577_vm11, %v6574_v41, %v5729_v18 }
 0x3bd   : > { %7603 = vst.msk [vmem:[#allocation2 + $0xb0] sm:$0xff] %vm6577_vm11, %v7563_v15 }
 0x3c0   : > { %v5931_v57 = vpop.permute.xlu1 %5930 }
 0x3c1   : > { %v5929_v27 = vpop.permute.xlu0 %5928  ;;  %v6738_v26 = vsel %vm6658_vm12, %v6657_v10, %v5931_v57 }
 0x3c2   : > { %v6736_v62 = vsel %vm6658_vm12, %v6655_v50, %v5929_v27 }
 0x3c3   : > { %v7719_v48 = vld [vmem:[#allocation2 + $0xb8] sm:$0x1] }
 0x3c4   : > { %v6131_v16 = vpop.permute.xlu1 %6130  ;;  %v7720_v5 = vsel %vm15347_vm13, 0, %v7719_v48  ;;  %v7657_v33 = vld [vmem:[#allocation2 + $0xb0] sm:$0x1] }
 0x3c5   : > { %v6129_v2 = vpop.permute.xlu0 %6128  ;;  %v6819_v39 = vsel %vm6739_vm14, %v6738_v26, %v6131_v16  ;;  %7721 = vst [vmem:[#allocation2 + $0xb8] sm:$0x1] %v7720_v5  ;;  %v7658_v45 = vsel %vm15353_vm1, 0, %v7657_v33 }
 0x3c6   : > { %v6817_v1 = vsel %vm6739_vm14, %v6736_v62, %v6129_v2  ;;  %7659 = vst [vmem:[#allocation2 + $0xb0] sm:$0x1] %v7658_v45 }
 0x3c7   : > { %11243 = vmatprep.mubr.msk.bf16.mxu0 %vm6863_vm15, %v6817_v1 }
 0x3c8   : > { %11244 = vmatmul.mubr.msk.bf16.gmra.mrb[76].mxu0 %vm6863_vm15, %v6819_v39 }
 0x3d5   : > { %v11217_v9 = vpop.f32.mrb[48].mxu0 }
 0x3d6   : > { %v7183_v40 = vadd.f32 %v16223_v53, %v11217_v9  ;;  %v7174_v6 = vpop.f32.mrb[49].mxu0 }
 0x3d7   : > { %v7175_v21 = vadd.f32 %v16223_v53, %v7174_v6  ;;  %v11218_v37 = vpop.f32.mrb[50].mxu0 }
 0x3d8   : > { %v7431_v17 = vmul.f32 0.2, %v7183_v40  ;;  %v7186_v56 = vadd.f32 %v16223_v53, %v11218_v37  ;;  %v7177_v22 = vpop.f32.mrb[51].mxu0  ;;  %vm7351_vm6 = vcmp.ge.f32.partialorder %v7183_v40, 0.0 }
 0x3d9   : > { %v7429_v13 = vmul.f32 0.2, %v7175_v21  ;;  %v7178_v47 = vadd.f32 %v16223_v53, %v7177_v22  ;;  %vm7349_vm8 = vcmp.ge.f32.partialorder %v7175_v21, 0.0 }
 0x3da   : > { %vm7352_vm10 = vcmp.ge.f32.partialorder %v7186_v56, 0.0  ;;  %v7432_v49 = vmul.f32 0.2, %v7186_v56  ;;  %v7511_v55 = vsel %vm7351_vm6, %v7183_v40, %v7431_v17 }
 0x3db   : > { %vm7350_vm12 = vcmp.ge.f32.partialorder %v7178_v47, 0.0  ;;  %v7430_v58 = vmul.f32 0.2, %v7178_v47  ;;  %v7509_v30 = vsel %vm7349_vm8, %v7175_v21, %v7429_v13 }
 0x3dc   : > { %v7512_v25 = vsel %vm7352_vm10, %v7186_v56, %v7432_v49 }
 0x3dd   : > { %v7566_v12 = vpack.c.bf16 %v7512_v25, %v7511_v55  ;;  %v7510_v20 = vsel %vm7350_vm12, %v7178_v47, %v7430_v58 }
 0x3de   : > { %v7565_v23 = vpack.c.bf16 %v7510_v20, %v7509_v30 }
 0x3df   : > { %7606 = vst.msk [vmem:[#allocation2 + $0xc8] sm:$0xff] %vm6577_vm11, %v7566_v12 }
 0x3e0   : > { %7605 = vst.msk [vmem:[#allocation2 + $0xc0] sm:$0xff] %vm6577_vm11, %v7565_v23 }
 0x3e6   : > { %v7722_v28 = vld [vmem:[#allocation2 + $0xc8] sm:$0x1] }
 0x3e7   : > { %v7723_v60 = vsel %vm15347_vm13, 0, %v7722_v28  ;;  %v7660_v36 = vld [vmem:[#allocation2 + $0xc0] sm:$0x1] }
 0x3e8   : > { %7724 = vst [vmem:[#allocation2 + $0xc8] sm:$0x1] %v7723_v60  ;;  %v7661_v29 = vsel %vm15353_vm1, 0, %v7660_v36 }
 0x3e9   : > { %7662 = vst [vmem:[#allocation2 + $0xc0] sm:$0x1] %v7661_v29 }
 0x3f7   : > { %v11221_v4 = vpop.f32.mrb[52].mxu0 }
 0x3f8   : > { %v7199_v59 = vadd.f32 %v16223_v53, %v11221_v4  ;;  %v7190_v0 = vpop.f32.mrb[53].mxu0 }
 0x3f9   : > { %v7191_v51 = vadd.f32 %v16223_v53, %v7190_v0  ;;  %v11222_v32 = vpop.f32.mrb[54].mxu0 }
 0x3fa   : > { %v7435_v46 = vmul.f32 0.2, %v7199_v59  ;;  %v7202_v18 = vadd.f32 %v16223_v53, %v11222_v32  ;;  %v7193_v54 = vpop.f32.mrb[55].mxu0  ;;  %vm7355_vm15 = vcmp.ge.f32.partialorder %v7199_v59, 0.0 }
 0x3fb   : > { %v7433_v63 = vmul.f32 0.2, %v7191_v51  ;;  %v7194_v42 = vadd.f32 %v16223_v53, %v7193_v54  ;;  %vm7353_vm3 = vcmp.ge.f32.partialorder %v7191_v51, 0.0 }
 0x3fc   : > { %vm7356_vm5 = vcmp.ge.f32.partialorder %v7202_v18, 0.0  ;;  %v7436_v15 = vmul.f32 0.2, %v7202_v18  ;;  %v7515_v19 = vsel %vm7355_vm15, %v7199_v59, %v7435_v46 }
 0x3fd   : > { %vm7354_vm4 = vcmp.ge.f32.partialorder %v7194_v42, 0.0  ;;  %v7434_v44 = vmul.f32 0.2, %v7194_v42  ;;  %v7513_v38 = vsel %vm7353_vm3, %v7191_v51, %v7433_v63 }
 0x3fe   : > { %v7516_v3 = vsel %vm7356_vm5, %v7202_v18, %v7436_v15 }
 0x3ff   : > { %v7568_v8 = vpack.c.bf16 %v7516_v3, %v7515_v19  ;;  %v7514_v7 = vsel %vm7354_vm4, %v7194_v42, %v7434_v44 }
 0x400   : > { %v7567_v31 = vpack.c.bf16 %v7514_v7, %v7513_v38 }
 0x401   : > { %7608 = vst.msk [vmem:[#allocation2 + $0xd8] sm:$0xff] %vm6577_vm11, %v7568_v8 }
 0x402   : > { %7607 = vst.msk [vmem:[#allocation2 + $0xd0] sm:$0xff] %vm6577_vm11, %v7567_v31 }
 0x408   : > { %v7725_v24 = vld [vmem:[#allocation2 + $0xd8] sm:$0x1] }
 0x409   : > { %v7726_v34 = vsel %vm15347_vm13, 0, %v7725_v24  ;;  %v7663_v43 = vld [vmem:[#allocation2 + $0xd0] sm:$0x1] }
 0x40a   : > { %7727 = vst [vmem:[#allocation2 + $0xd8] sm:$0x1] %v7726_v34  ;;  %v7664_v57 = vsel %vm15353_vm1, 0, %v7663_v43 }
 0x40b   : > { %7665 = vst [vmem:[#allocation2 + $0xd0] sm:$0x1] %v7664_v57 }
 0x416   : > { %v11225_v27 = vpop.f32.mrb[56].mxu0 }
 0x417   : > { %v7215_v14 = vadd.f32 %v16223_v53, %v11225_v27  ;;  %v7206_v52 = vpop.f32.mrb[57].mxu0 }
 0x418   : > { %v7207_v11 = vadd.f32 %v16223_v53, %v7206_v52  ;;  %v11226_v41 = vpop.f32.mrb[58].mxu0 }
 0x419   : > { %v7439_v10 = vmul.f32 0.2, %v7215_v14  ;;  %v7218_v50 = vadd.f32 %v16223_v53, %v11226_v41  ;;  %v7209_v48 = vpop.f32.mrb[59].mxu0  ;;  %vm7359_vm2 = vcmp.ge.f32.partialorder %v7215_v14, 0.0 }
 0x41a   : > { %v7437_v26 = vmul.f32 0.2, %v7207_v11  ;;  %v7210_v62 = vadd.f32 %v16223_v53, %v7209_v48  ;;  %vm7357_vm0 = vcmp.ge.f32.partialorder %v7207_v11, 0.0 }
 0x41b   : > { %vm7360_vm6 = vcmp.ge.f32.partialorder %v7218_v50, 0.0  ;;  %v7440_v16 = vmul.f32 0.2, %v7218_v50  ;;  %v7519_v5 = vsel %vm7359_vm2, %v7215_v14, %v7439_v10 }
 0x41c   : > { %vm7358_vm8 = vcmp.ge.f32.partialorder %v7210_v62, 0.0  ;;  %v7438_v2 = vmul.f32 0.2, %v7210_v62  ;;  %v7517_v39 = vsel %vm7357_vm0, %v7207_v11, %v7437_v26 }
 0x41d   : > { %v7520_v33 = vsel %vm7360_vm6, %v7218_v50, %v7440_v16 }
 0x41e   : > { %v7570_v1 = vpack.c.bf16 %v7520_v33, %v7519_v5  ;;  %v7518_v45 = vsel %vm7358_vm8, %v7210_v62, %v7438_v2 }
 0x41f   : > { %v7569_v9 = vpack.c.bf16 %v7518_v45, %v7517_v39 }
 0x420   : > { %7610 = vst.msk [vmem:[#allocation2 + $0xe8] sm:$0xff] %vm6577_vm11, %v7570_v1 }
 0x421   : > { %7609 = vst.msk [vmem:[#allocation2 + $0xe0] sm:$0xff] %vm6577_vm11, %v7569_v9 }
 0x427   : > { %v7728_v40 = vld [vmem:[#allocation2 + $0xe8] sm:$0x1] }
 0x428   : > { %v7729_v6 = vsel %vm15347_vm13, 0, %v7728_v40  ;;  %v7666_v21 = vld [vmem:[#allocation2 + $0xe0] sm:$0x1] }
 0x429   : > { %7730 = vst [vmem:[#allocation2 + $0xe8] sm:$0x1] %v7729_v6  ;;  %v7667_v37 = vsel %vm15353_vm1, 0, %v7666_v21  ;;  %v11229_v17 = vpop.f32.mrb[60].mxu0 }
 0x42a   : > { %7668 = vst [vmem:[#allocation2 + $0xe0] sm:$0x1] %v7667_v37  ;;  %v7231_v56 = vadd.f32 %v16223_v53, %v11229_v17  ;;  %v7222_v22 = vpop.f32.mrb[61].mxu0 }
 0x42b   : > { %v7223_v13 = vadd.f32 %v16223_v53, %v7222_v22  ;;  %v11230_v47 = vpop.f32.mrb[62].mxu0 }
 0x42c   : > { %v7443_v49 = vmul.f32 0.2, %v7231_v56  ;;  %v7234_v58 = vadd.f32 %v16223_v53, %v11230_v47  ;;  %v7225_v55 = vpop.f32.mrb[63].mxu0  ;;  %vm7363_vm10 = vcmp.ge.f32.partialorder %v7231_v56, 0.0 }
 0x42d   : > { %v7441_v25 = vmul.f32 0.2, %v7223_v13  ;;  %v7226_v30 = vadd.f32 %v16223_v53, %v7225_v55  ;;  %vm7361_vm12 = vcmp.ge.f32.partialorder %v7223_v13, 0.0 }
 0x42e   : > { %vm7364_vm15 = vcmp.ge.f32.partialorder %v7234_v58, 0.0  ;;  %v7444_v12 = vmul.f32 0.2, %v7234_v58  ;;  %v7523_v23 = vsel %vm7363_vm10, %v7231_v56, %v7443_v49 }
 0x42f   : > { %vm7362_vm3 = vcmp.ge.f32.partialorder %v7226_v30, 0.0  ;;  %v7442_v20 = vmul.f32 0.2, %v7226_v30  ;;  %v7521_v60 = vsel %vm7361_vm12, %v7223_v13, %v7441_v25 }
 0x430   : > { %v7524_v28 = vsel %vm7364_vm15, %v7234_v58, %v7444_v12 }
 0x431   : > { %v7572_v36 = vpack.c.bf16 %v7524_v28, %v7523_v23  ;;  %v7522_v29 = vsel %vm7362_vm3, %v7226_v30, %v7442_v20 }
 0x432   : > { %v7571_v4 = vpack.c.bf16 %v7522_v29, %v7521_v60 }
 0x433   : > { %7612 = vst.msk [vmem:[#allocation2 + $0xf8] sm:$0xff] %vm6577_vm11, %v7572_v36 }
 0x434   : > { %7611 = vst.msk [vmem:[#allocation2 + $0xf0] sm:$0xff] %vm6577_vm11, %v7571_v4 }
 0x43a   : > { %v11233_v59 = vpop.f32.mrb[64].mxu0  ;;  %v7731_v0 = vld [vmem:[#allocation2 + $0xf8] sm:$0x1] }
 0x43b   : > { %v7247_v51 = vadd.f32 %v16223_v53, %v11233_v59  ;;  %v7238_v32 = vpop.f32.mrb[65].mxu0  ;;  %v7732_v46 = vsel %vm15347_vm13, 0, %v7731_v0  ;;  %v7669_v18 = vld [vmem:[#allocation2 + $0xf0] sm:$0x1] }
 0x43c   : > { %v7239_v54 = vadd.f32 %v16223_v53, %v7238_v32  ;;  %v11234_v63 = vpop.f32.mrb[66].mxu0  ;;  %7733 = vst [vmem:[#allocation2 + $0xf8] sm:$0x1] %v7732_v46  ;;  %v7670_v42 = vsel %vm15353_vm1, 0, %v7669_v18 }
 0x43d   : > { %v7447_v15 = vmul.f32 0.2, %v7247_v51  ;;  %v7250_v44 = vadd.f32 %v16223_v53, %v11234_v63  ;;  %v7241_v19 = vpop.f32.mrb[67].mxu0  ;;  %7671 = vst [vmem:[#allocation2 + $0xf0] sm:$0x1] %v7670_v42  ;;  %vm7367_vm5 = vcmp.ge.f32.partialorder %v7247_v51, 0.0 }
 0x43e   : > { %v7445_v3 = vmul.f32 0.2, %v7239_v54  ;;  %v7242_v38 = vadd.f32 %v16223_v53, %v7241_v19  ;;  %vm7365_vm4 = vcmp.ge.f32.partialorder %v7239_v54, 0.0 }
 0x43f   : > { %vm7368_vm2 = vcmp.ge.f32.partialorder %v7250_v44, 0.0  ;;  %v7448_v8 = vmul.f32 0.2, %v7250_v44  ;;  %v7527_v31 = vsel %vm7367_vm5, %v7247_v51, %v7447_v15 }
 0x440   : > { %vm7366_vm0 = vcmp.ge.f32.partialorder %v7242_v38, 0.0  ;;  %v7446_v7 = vmul.f32 0.2, %v7242_v38  ;;  %v7525_v34 = vsel %vm7365_vm4, %v7239_v54, %v7445_v3 }
 0x441   : > { %v7528_v24 = vsel %vm7368_vm2, %v7250_v44, %v7448_v8 }
 0x442   : > { %v7574_v43 = vpack.c.bf16 %v7528_v24, %v7527_v31  ;;  %v7526_v57 = vsel %vm7366_vm0, %v7242_v38, %v7446_v7 }
 0x443   : > { %v7573_v27 = vpack.c.bf16 %v7526_v57, %v7525_v34 }
 0x444   : > { %7614 = vst.msk [vmem:[#allocation2 + $0x108] sm:$0xff] %vm6577_vm11, %v7574_v43 }
 0x445   : > { %7613 = vst.msk [vmem:[#allocation2 + $0x100] sm:$0xff] %vm6577_vm11, %v7573_v27 }
 0x44b   : > { %v7734_v14 = vld [vmem:[#allocation2 + $0x108] sm:$0x1] }
 0x44c   : > { %v7735_v52 = vsel %vm15347_vm13, 0, %v7734_v14  ;;  %v7672_v11 = vld [vmem:[#allocation2 + $0x100] sm:$0x1] }
 0x44d   : > { %7736 = vst [vmem:[#allocation2 + $0x108] sm:$0x1] %v7735_v52  ;;  %v7673_v41 = vsel %vm15353_vm1, 0, %v7672_v11 }
 0x44e   : > { %7674 = vst [vmem:[#allocation2 + $0x100] sm:$0x1] %v7673_v41 }
 0x45b   : > { %v11237_v10 = vpop.f32.mrb[68].mxu0 }
 0x45c   : > { %v7263_v50 = vadd.f32 %v16223_v53, %v11237_v10  ;;  %v7254_v48 = vpop.f32.mrb[69].mxu0 }
 0x45d   : > { %v7255_v26 = vadd.f32 %v16223_v53, %v7254_v48  ;;  %v11238_v62 = vpop.f32.mrb[70].mxu0 }
 0x45e   : > { %v7451_v16 = vmul.f32 0.2, %v7263_v50  ;;  %v7266_v2 = vadd.f32 %v16223_v53, %v11238_v62  ;;  %v7257_v5 = vpop.f32.mrb[71].mxu0  ;;  %vm7371_vm6 = vcmp.ge.f32.partialorder %v7263_v50, 0.0  ;;  %v11677_v62 = vmov (!%p10938_p7), 0  }
 0x45f   : > { %v7449_v33 = vmul.f32 0.2, %v7255_v26  ;;  %v7258_v39 = vadd.f32 %v16223_v53, %v7257_v5  ;;  %vm7369_vm8 = vcmp.ge.f32.partialorder %v7255_v26, 0.0  ;;  %7750 = vst.msk [vmem:[#allocation2] sm:$0xff] (!%p10938_p7), %vm6577_vm11, %v11677_v62  ;;  %7751 = vst.msk [vmem:[#allocation2 + $0x8] sm:$0xff] (!%p10938_p7), %vm6577_vm11, %v11677_v62 }
 0x460   : > { %vm7372_vm10 = vcmp.ge.f32.partialorder %v7266_v2, 0.0  ;;  %v7452_v1 = vmul.f32 0.2, %v7266_v2  ;;  %v7531_v9 = vsel %vm7371_vm6, %v7263_v50, %v7451_v16  ;;  %7752 = vst.msk [vmem:[#allocation2 + $0xa0] sm:$0xff] (!%p10938_p7), %vm6577_vm11, %v11677_v62  ;;  %7753 = vst.msk [vmem:[#allocation2 + $0xa8] sm:$0xff] (!%p10938_p7), %vm6577_vm11, %v11677_v62 }
 0x461   : > { %vm7370_vm12 = vcmp.ge.f32.partialorder %v7258_v39, 0.0  ;;  %v7450_v45 = vmul.f32 0.2, %v7258_v39  ;;  %v7529_v6 = vsel %vm7369_vm8, %v7255_v26, %v7449_v33 }
 0x462   : > { %v7532_v40 = vsel %vm7372_vm10, %v7266_v2, %v7452_v1 }
 0x463   : > { %v7576_v21 = vpack.c.bf16 %v7532_v40, %v7531_v9  ;;  %v7530_v37 = vsel %vm7370_vm12, %v7258_v39, %v7450_v45 }
 0x464   : > { %v7575_v17 = vpack.c.bf16 %v7530_v37, %v7529_v6 }
 0x465   : > { %7616 = vst.msk [vmem:[#allocation2 + $0x118] sm:$0xff] %vm6577_vm11, %v7576_v21 }
 0x466   : > { %7615 = vst.msk [vmem:[#allocation2 + $0x110] sm:$0xff] %vm6577_vm11, %v7575_v17 }
 0x46c   : > { %v7737_v56 = vld [vmem:[#allocation2 + $0x118] sm:$0x1] }
 0x46d   : > { %v7738_v22 = vsel %vm15347_vm13, 0, %v7737_v56  ;;  %v7675_v13 = vld [vmem:[#allocation2 + $0x110] sm:$0x1] }
 0x46e   : > { %7739 = vst [vmem:[#allocation2 + $0x118] sm:$0x1] %v7738_v22  ;;  %v7676_v47 = vsel %vm15353_vm1, 0, %v7675_v13 }
 0x46f   : > { %7677 = vst [vmem:[#allocation2 + $0x110] sm:$0x1] %v7676_v47 }
 0x47b   : > { %v11241_v49 = vpop.f32.mrb[72].mxu0 }
 0x47c   : > { %v7279_v58 = vadd.f32 %v16223_v53, %v11241_v49  ;;  %v7270_v55 = vpop.f32.mrb[73].mxu0 }
 0x47d   : > { %v7271_v25 = vadd.f32 %v16223_v53, %v7270_v55  ;;  %v11242_v30 = vpop.f32.mrb[74].mxu0 }
 0x47e   : > { %v7455_v12 = vmul.f32 0.2, %v7279_v58  ;;  %v7282_v20 = vadd.f32 %v16223_v53, %v11242_v30  ;;  %v7273_v23 = vpop.f32.mrb[75].mxu0  ;;  %vm7375_vm15 = vcmp.ge.f32.partialorder %v7279_v58, 0.0 }
 0x47f   : > { %v7453_v28 = vmul.f32 0.2, %v7271_v25  ;;  %v7274_v60 = vadd.f32 %v16223_v53, %v7273_v23  ;;  %vm7373_vm3 = vcmp.ge.f32.partialorder %v7271_v25, 0.0 }
 0x480   : > { %vm7376_vm5 = vcmp.ge.f32.partialorder %v7282_v20, 0.0  ;;  %v7456_v36 = vmul.f32 0.2, %v7282_v20  ;;  %v7535_v4 = vsel %vm7375_vm15, %v7279_v58, %v7455_v12 }
 0x481   : > { %vm7374_vm4 = vcmp.ge.f32.partialorder %v7274_v60, 0.0  ;;  %v7454_v29 = vmul.f32 0.2, %v7274_v60  ;;  %v7533_v0 = vsel %vm7373_vm3, %v7271_v25, %v7453_v28 }
 0x482   : > { %v7536_v59 = vsel %vm7376_vm5, %v7282_v20, %v7456_v36 }
 0x483   : > { %v7578_v51 = vpack.c.bf16 %v7536_v59, %v7535_v4  ;;  %v7534_v32 = vsel %vm7374_vm4, %v7274_v60, %v7454_v29 }
 0x484   : > { %v7577_v46 = vpack.c.bf16 %v7534_v32, %v7533_v0 }
 0x485   : > { %7618 = vst.msk [vmem:[#allocation2 + $0x128] sm:$0xff] %vm6577_vm11, %v7578_v51 }
 0x486   : > { %7617 = vst.msk [vmem:[#allocation2 + $0x120] sm:$0xff] %vm6577_vm11, %v7577_v46 }
 0x48c   : > { %v7740_v18 = vld [vmem:[#allocation2 + $0x128] sm:$0x1] }
 0x48d   : > { %v7741_v54 = vsel %vm15347_vm13, 0, %v7740_v18  ;;  %v7678_v63 = vld [vmem:[#allocation2 + $0x120] sm:$0x1] }
 0x48e   : > { %7742 = vst [vmem:[#allocation2 + $0x128] sm:$0x1] %v7741_v54  ;;  %v7679_v42 = vsel %vm15353_vm1, 0, %v7678_v63 }
 0x48f   : > { %7680 = vst [vmem:[#allocation2 + $0x120] sm:$0x1] %v7679_v42 }
 0x49b   : > { %v11245_v15 = vpop.f32.mrb[76].mxu0 }
 0x49c   : > { %v7295_v44 = vadd.f32 %v16223_v53, %v11245_v15  ;;  %v7286_v19 = vpop.f32.mrb[77].mxu0 }
 0x49d   : > { %v7287_v3 = vadd.f32 %v16223_v53, %v7286_v19  ;;  %v11246_v38 = vpop.f32.mrb[78].mxu0 }
 0x49e   : > { %v7459_v8 = vmul.f32 0.2, %v7295_v44  ;;  %v7298_v7 = vadd.f32 %v16223_v53, %v11246_v38  ;;  %v7289_v31 = vpop.f32.mrb[79].mxu0  ;;  %vm7379_vm2 = vcmp.ge.f32.partialorder %v7295_v44, 0.0 }
 0x49f   : > { %v7457_v24 = vmul.f32 0.2, %v7287_v3  ;;  %v7290_v34 = vadd.f32 %v16223_v53, %v7289_v31  ;;  %vm7377_vm0 = vcmp.ge.f32.partialorder %v7287_v3, 0.0 }
 0x4a0   : > { %vm7380_vm6 = vcmp.ge.f32.partialorder %v7298_v7, 0.0  ;;  %v7460_v43 = vmul.f32 0.2, %v7298_v7  ;;  %v7539_v27 = vsel %vm7379_vm2, %v7295_v44, %v7459_v8 }
 0x4a1   : > { %vm7378_vm8 = vcmp.ge.f32.partialorder %v7290_v34, 0.0  ;;  %v7458_v57 = vmul.f32 0.2, %v7290_v34  ;;  %v7537_v52 = vsel %vm7377_vm0, %v7287_v3, %v7457_v24 }
 0x4a2   : > { %v7540_v14 = vsel %vm7380_vm6, %v7298_v7, %v7460_v43 }
 0x4a3   : > { %v7580_v11 = vpack.c.bf16 %v7540_v14, %v7539_v27  ;;  %v7538_v41 = vsel %vm7378_vm8, %v7290_v34, %v7458_v57 }
 0x4a4   : > { %v7579_v10 = vpack.c.bf16 %v7538_v41, %v7537_v52 }
 0x4a5   : > { %7620 = vst.msk [vmem:[#allocation2 + $0x138] sm:$0xff] %vm6577_vm11, %v7580_v11 }
 0x4a6   : > { %7619 = vst.msk [vmem:[#allocation2 + $0x130] sm:$0xff] %vm6577_vm11, %v7579_v10 }
 0x4a9   : > { %7749 = sbr.rel (%p10938_p7) target bundleno = 1200 (0x4b0), region = 52 }
 0x4ac   : > { %v7743_v50 = vld [vmem:[#allocation2 + $0x138] sm:$0x1] }
 0x4ad   : > { %v7744_v53 = vsel %vm15347_vm13, 0, %v7743_v50  ;;  %v7681_v48 = vld [vmem:[#allocation2 + $0x130] sm:$0x1] }
 0x4ae   : > { %7745 = vst [vmem:[#allocation2 + $0x138] sm:$0x1] %v7744_v53  ;;  %v7682_v26 = vsel %vm15353_vm1, 0, %v7681_v48 }
 0x4af   : > { %7683 = vst [vmem:[#allocation2 + $0x130] sm:$0x1] %v7682_v26 }
 0x4b0 PF: > { %p10939_p8 = scmp.ne.s32.totalorder %s11738_s27, 1 }
 0x4b1   : > { %v11678_v35 = vmov (!%p10939_p8), 0  }
 0x4b2   : > { %7757 = sbr.rel (%p10939_p8) target bundleno = 1209 (0x4b9), region = 56  ;;  %7759 = vst.msk [vmem:[#allocation2 + $0x90] sm:$0xff] (!%p10939_p8), %vm6577_vm11, %v11678_v35  ;;  %7760 = vst.msk [vmem:[#allocation2 + $0x98] sm:$0xff] (!%p10939_p8), %vm6577_vm11, %v11678_v35 }
 0x4b3   : > { %7761 = vst.msk [vmem:[#allocation2 + $0x130] sm:$0xff] (!%p10939_p8), %vm6577_vm11, %v11678_v35  ;;  %7762 = vst.msk [vmem:[#allocation2 + $0x138] sm:$0xff] (!%p10939_p8), %vm6577_vm11, %v11678_v35 }
 0x4b9 PF: > { %v16354_v61 = vld [vmem:[#allocation2 + $0x60] sm:$0xff]  ;;  %v7785_v16 = vld [vmem:[#allocation2 + $0x68] sm:$0x1]  ;;  %vm8036_vm13 = vcmask 1046528   ;;  %v7784_v45 = vld [vmem:[#allocation2 + $0x58] sm:$0x1] }
 0x4ba   : > { %v7994_v2 = vld [vmem:[#allocation2 + $0x60] sm:$0xfe]  ;;  %8817 = vrot.lane.b32.xlu0 %v16354_v61, %s11670_s15  ;;  %v8179_v5 = vshrl.u32 %v16354_v61, 16  ;;  %v8181_v33 = vshll.u32 %v16354_v61, 16  ;;  %v8056_v1 = vrot.slane %v7785_v16, 1  ;;  %v8053_v37 = vrot.slane %v7784_v45, 1 }
 0x4bb   : > { %v8055_v39 = vrot.slane %v7994_v2, 1  ;;  %v7993_v9 = vld [vmem:[#allocation2 + $0x50] sm:$0xfe]  ;;  %vm7795_vm1 = vsmask.f32 7424  ;;  %s11679_s20 = smov 96  }
 0x4bc   : > { %v8183_v40 = vrot.slane %v8181_v33, 1  ;;  %v8052_v21 = vrot.slane %v7993_v9, 1  ;;  %v8107_v17 = vld [vmem:[#allocation2 + $0x68] sm:$0x1]  ;;  %v16361_v56 = vld [vmem:[#allocation2 + $0x50] sm:$0xff]  ;;  %v7864_v12 = vshll.u32 %v7784_v45, 16 }
 0x4bd   : > { %v8057_v6 = vsel %vm8036_vm13, %v8055_v39, %v8056_v1  ;;  %v8186_v22 = vshll.u32 %v8107_v17, 16  ;;  %v8315_v13 = vld [vmem:[#allocation2 + $0x60] sm:$0xfe]  ;;  %v8374_v47 = vrot.slane %v8107_v17, 1  ;;  %v7857_v49 = vshrl.u32 %v16361_v56, 16  ;;  %v16369_v20 = vld [vmem:[#allocation2 + $0x70] sm:$0xff] }
 0x4be   : > { %8771 = vrot.lane.b32.xlu1 %v8057_v6, %s11679_s20  ;;  %v7859_v58 = vshll.u32 %v16361_v56, 16  ;;  %v8054_v55 = vsel %vm8036_vm13, %v8052_v21, %v8053_v37  ;;  %v16367_v25 = vor.u32 %v8183_v40, %v8179_v5  ;;  %v8373_v30 = vrot.slane %v8315_v13, 1  ;;  %v8108_v23 = vld [vmem:[#allocation2 + $0x78] sm:$0x1]  ;;  %v16379_v54 = vld [vmem:[#allocation2 + $0x80] sm:$0xff]  ;;  %s11680_s29 = smov 112  }
 0x4bf   : > { %8769 = vrot.lane.b32.xlu0 %v8054_v55, %s11679_s20  ;;  %v8188_v28 = vrot.slane %v8186_v22, 1  ;;  %v8191_v36 = vshrl.u32 %v16369_v20, 16  ;;  %v8193_v29 = vshll.u32 %v16369_v20, 16  ;;  %v7866_v59 = vrot.slane %v7864_v12, 1  ;;  %v8316_v44 = vld [vmem:[#allocation2 + $0x70] sm:$0xfe] }
 0x4c0   : > { %v7861_v60 = vrot.slane %v7859_v58, 1  ;;  %v8375_v4 = vsel %vm8036_vm13, %v8373_v30, %v8374_v47  ;;  %v8198_v0 = vshll.u32 %v8108_v23, 16  ;;  %v7876_v51 = vshll.u32 %v7785_v16, 16  ;;  %v7786_v3 = vld [vmem:[#allocation2 + $0x78] sm:$0x1]  ;;  %v8094_v26 = vld [vmem:[#allocation2 + $0xb0] sm:$0xff] }
 0x4c1   : > { %v8189_v32 = vsel %vm7795_vm1, %v16367_v25, %v8188_v28  ;;  %v8195_v18 = vrot.slane %v8193_v29, 1  ;;  %v7995_v38 = vld [vmem:[#allocation2 + $0x70] sm:$0xfe]  ;;  %v8205_v8 = vshll.u32 %v16379_v54, 16  ;;  %v8109_v7 = vld [vmem:[#allocation2 + $0x88] sm:$0x1] }
 0x4c2   : > { %v16377_v46 = vor.u32 %v7861_v60, %v7857_v49  ;;  %8849 = vrot.lane.b32.xlu1 %v8189_v32, %s11676_s14  ;;  %v8200_v15 = vrot.slane %v8198_v0, 1  ;;  %v7878_v19 = vrot.slane %v7876_v51, 1  ;;  %v8376_v31 = vrot.slane %v8316_v44, 1  ;;  %v8317_v62 = vld [vmem:[#allocation2 + $0x80] sm:$0xfe]  ;;  %v11611_v37 = vld [vmem:[%s17281_s3 + $0x48] sm:$0xff]  }
 0x4c3   : > { %8881 = vrot.lane.b32.xlu0 %v8375_v4, %s11680_s29  ;;  %v16385_v42 = vor.u32 %v8195_v18, %v8191_v36  ;;  %v8377_v34 = vrot.slane %v8108_v23, 1  ;;  %v8058_v43 = vrot.slane %v7995_v38, 1  ;;  %v8059_v57 = vrot.slane %v7786_v3, 1  ;;  %v16402_v35 = vld [vmem:[#allocation2 + $0xa0] sm:$0xff]  ;;  %v7787_v16 = vld [vmem:[#allocation2 + $0xa8] sm:$0x1] }
 0x4c4   : > { %v7867_v63 = vsel %vm7795_vm1, %v16377_v46, %v7866_v59  ;;  %v7879_v27 = vsel %vm7795_vm1, %v16367_v25, %v7878_v19  ;;  %v8203_v14 = vshrl.u32 %v16379_v54, 16  ;;  %v8207_v52 = vrot.slane %v8205_v8, 1  ;;  %v11609_v2 = vld [vmem:[%s17281_s3 + $0x40] sm:$0xff]   ;;  %v16414_v6 = vld [vmem:[#allocation2 + $0xb8] sm:$0x1]  ;;  %v11612_v17 = vld [vmem:[%s17281_s3 + $0x8] sm:$0xff]  }
 0x4c5   : > { %v8201_v24 = vsel %vm7795_vm1, %v16385_v42, %v8200_v15  ;;  %v8210_v11 = vshll.u32 %v8109_v7, 16  ;;  %v8378_v41 = vsel %vm8036_vm13, %v8376_v31, %v8377_v34  ;;  %v7888_v10 = vshll.u32 %v7786_v3, 16  ;;  %v7996_v33 = vld [vmem:[#allocation2 + $0xa0] sm:$0xfe]  ;;  %11267 = vmatprep.subr.bf16.mxu1 %v11609_v2  ;;  %11037 = vmatprep.subr.bf16.mxu0 %v11609_v2  ;;  %v11613_v36 = vld [vmem:[%s17281_s3 + $0x50] sm:$0xff]   ;;  %v11615_v18 = vld [vmem:[%s17281_s3 + $0x58] sm:$0xff]  }
 0x4c6   : > { %8737 = vrot.lane.b32.xlu1 %v7867_v63, %s11674_s11  ;;  %v8060_v50 = vsel %vm8036_vm13, %v8058_v43, %v8059_v57  ;;  %v16400_v53 = vor.u32 %v8207_v52, %v8203_v14  ;;  %v8217_v39 = vshll.u32 %v8094_v26, 16  ;;  %v11610_v1 = vld [vmem:[%s17281_s3] sm:$0xff]   ;;  %v8379_v9 = vrot.slane %v8317_v62, 1  ;;  %v11614_v29 = vld [vmem:[%s17281_s3 + $0x10] sm:$0xff]   ;;  %v7788_v32 = vld [vmem:[#allocation2 + $0xb8] sm:$0x1] }
 0x4c7   : > { %8819 = vrot.lane.b32.xlu0 %v16369_v20, %s11670_s15  ;;  %v8212_v48 = vrot.slane %v8210_v11, 1  ;;  %v7890_v5 = vrot.slane %v7888_v10, 1  ;;  %v8380_v40 = vrot.slane %v8109_v7, 1  ;;  %v7895_v21 = vshll.u32 %v16402_v35, 16  ;;  %11275 = vmatpush3.bf16.msra.mxu1 %v11610_v1  ;;  %v16431_v60 = vld [vmem:[#allocation2 + $0xc0] sm:$0xff]  ;;  %v11616_v38 = vld [vmem:[%s17281_s3 + $0x18] sm:$0xff]  }
 0x4c8   : > { %11038 = vmatpush3.bf16.msra.mxu0 %v11610_v1  ;;  %v8061_v22 = vrot.slane %v7996_v33, 1  ;;  %v8062_v13 = vrot.slane %v7787_v16, 1  ;;  %11268 = vmatprep.subr.bf16.mxu1 %v11611_v37  ;;  %v8215_v49 = vshrl.u32 %v8094_v26, 16  ;;  %v8219_v58 = vrot.slane %v8217_v39, 1  ;;  %v8318_v51 = vld [vmem:[#allocation2 + $0xb0] sm:$0xfe] }
 0x4c9   : > { %v8213_v45 = vsel %vm7795_vm1, %v16400_v53, %v8212_v48  ;;  %v7891_v47 = vsel %vm7795_vm1, %v16385_v42, %v7890_v5  ;;  %v8222_v55 = vshll.u32 %v16414_v6, 16  ;;  %11039 = vmatprep.subr.bf16.mxu0 %v11611_v37  ;;  %v8381_v30 = vsel %vm8036_vm13, %v8379_v9, %v8380_v40  ;;  %v7997_v44 = vld [vmem:[#allocation2 + $0xb0] sm:$0xfe]  ;;  %v16448_v3 = vld [vmem:[#allocation2 + $0xc8] sm:$0x1]  ;;  %v11617_v7 = vld [vmem:[%s17281_s3 + $0x60] sm:$0xff]  }
 0x4ca   : > { %8851 = vrot.lane.b32.xlu1 %v8201_v24, %s11676_s14  ;;  %v7893_v12 = vshrl.u32 %v16402_v35, 16  ;;  %v7897_v23 = vrot.slane %v7895_v21, 1  ;;  %v7900_v28 = vshll.u32 %v7787_v16, 16  ;;  %v8063_v4 = vsel %vm8036_vm13, %v8061_v22, %v8062_v13  ;;  %v11618_v11 = vld [vmem:[%s17281_s3 + $0x20] sm:$0xff]   ;;  %v16476_v16 = vld [vmem:[#allocation2 + $0xd0] sm:$0xff]  ;;  %v11620_v5 = vld [vmem:[%s17281_s3 + $0x28] sm:$0xff]  }
 0x4cb   : > { %8739 = vrot.lane.b32.xlu0 %v7879_v27, %s11674_s11  ;;  %11276 = vmatpush3.bf16.msra.mxu1 %v11612_v17  ;;  %v16442_v59 = vor.u32 %v8219_v58, %v8215_v49  ;;  %v8224_v0 = vrot.slane %v8222_v55, 1  ;;  %v8229_v19 = vshll.u32 %v16431_v60, 16  ;;  %v8382_v8 = vrot.slane %v8318_v51, 1  ;;  %v8319_v2 = vld [vmem:[#allocation2 + $0xc0] sm:$0xfe]  ;;  %v11621_v39 = vld [vmem:[%s17281_s3 + $0x70] sm:$0xff]  }
 0x4cc   : > { %11040 = vmatpush3.bf16.msra.mxu0 %v11612_v17  ;;  %11269 = vmatprep.subr.bf16.mxu1 %v11613_v36  ;;  %v7898_v63 = vor.u32 %v7897_v23, %v7893_v12  ;;  %v7902_v15 = vrot.slane %v7900_v28, 1  ;;  %v8383_v24 = vrot.slane %v16414_v6, 1  ;;  %v8064_v34 = vrot.slane %v7997_v44, 1  ;;  %v7789_v33 = vld [vmem:[#allocation2 + $0xc8] sm:$0x1]  ;;  %v11622_v17 = vld [vmem:[%s17281_s3 + $0x30] sm:$0xff]  }
 0x4cd   : > { %11041 = vmatprep.subr.bf16.mxu0 %v11613_v36  ;;  %v8225_v31 = vsel %vm7795_vm1, %v16442_v59, %v8224_v0  ;;  %v8065_v43 = vrot.slane %v7788_v32, 1  ;;  %v8227_v27 = vshrl.u32 %v16431_v60, 16  ;;  %v8231_v14 = vrot.slane %v8229_v19, 1  ;;  %v8112_v37 = vld [vmem:[#allocation2 + $0xd8] sm:$0x1]  ;;  %v8097_v28 = vld [vmem:[#allocation2 + $0xe0] sm:$0xff] }
 0x4ce   : > { %8883 = vrot.lane.b32.xlu1 %v8378_v41, %s11680_s29  ;;  %v7903_v57 = vsel %vm7795_vm1, %v7898_v63, %v7902_v15  ;;  %v8234_v52 = vshll.u32 %v16448_v3, 16  ;;  %v8384_v41 = vsel %vm8036_vm13, %v8382_v8, %v8383_v24  ;;  %v7912_v10 = vshll.u32 %v7788_v32, 16  ;;  %v11623_v49 = vld [vmem:[%s17281_s3 + $0x78] sm:$0xff]   ;;  %v8320_v36 = vld [vmem:[#allocation2 + $0xd0] sm:$0xfe]  ;;  %s11682_s26 = smov 80  }
 0x4cf   : > { %8773 = vrot.lane.b32.xlu0 %v8060_v50, %s11679_s20  ;;  %11277 = vmatpush3.bf16.msra.mxu1 %v11614_v29  ;;  %v11619_v50 = vld [vmem:[%s17281_s3 + $0x68] sm:$0xff]   ;;  %v8066_v48 = vsel %vm8036_vm13, %v8064_v34, %v8065_v43  ;;  %v8241_v9 = vshll.u32 %v16476_v16, 16  ;;  %v8385_v6 = vrot.slane %v8319_v2, 1  ;;  %v8386_v21 = vrot.slane %v16448_v3, 1  ;;  %v7790_v51 = vld [vmem:[#allocation2 + $0xd8] sm:$0x1] }
 0x4d0   : > { %11042 = vmatpush3.bf16.msra.mxu0 %v11614_v29  ;;  %11270 = vmatprep.subr.bf16.mxu1 %v11615_v18  ;;  %v8236_v62 = vrot.slane %v8234_v52, 1  ;;  %v7914_v1 = vrot.slane %v7912_v10, 1  ;;  %v8068_v13 = vrot.slane %v7789_v33, 1  ;;  %v7924_v23 = vshll.u32 %v7789_v33, 16  ;;  %v7999_v32 = vld [vmem:[#allocation2 + $0xd0] sm:$0xfe] }
 0x4d1   : > { %11043 = vmatprep.subr.bf16.mxu0 %v11615_v18  ;;  %v8243_v55 = vrot.slane %v8241_v9, 1  ;;  %v8387_v12 = vsel %vm8036_vm13, %v8385_v6, %v8386_v21  ;;  %v8253_v18 = vshll.u32 %v8097_v28, 16  ;;  %v8113_v63 = vld [vmem:[#allocation2 + $0xe8] sm:$0x1]  ;;  %v8388_v15 = vrot.slane %v8320_v36, 1  ;;  %v11624_v34 = vld [vmem:[%s17281_s3 + $0x38] sm:$0xff]  }
 0x4d2   : > { %8821 = vrot.lane.b32.xlu1 %v16379_v54, %s11670_s15  ;;  %v7915_v58 = vsel %vm7795_vm1, %v16442_v59, %v7914_v1  ;;  %v7926_v0 = vrot.slane %v7924_v23, 1  ;;  %v8389_v44 = vrot.slane %v8112_v37, 1  ;;  %v8070_v3 = vrot.slane %v7999_v32, 1  ;;  %s10988_s18 = sshll.u32 (%p11750_p4), %s11738_s27, 2 }
 0x4d3   : > { %8853 = vrot.lane.b32.xlu0 %v8213_v45, %s11676_s14  ;;  %11278 = vmatpush3.bf16.msra.mxu1 %v11616_v38  ;;  %v7998_v45 = vld [vmem:[#allocation2 + $0xc0] sm:$0xfe]  ;;  %v8258_v24 = vshll.u32 %v8113_v63, 16  ;;  %v8392_v33 = vrot.slane %v8113_v63, 1  ;;  %v11681_v36 = vmov 0   ;;  %vm9128_vm10 = vcmask 916480   ;;  %s10128_s22 = scalar_lea.vmem (%p11750_p4), %s17285_s7, %s10988_s18 }
 0x4d4   : > { %11044 = vmatpush3.bf16.msra.mxu0 %v11616_v38  ;;  %11271 = vmatprep.subr.bf16.mxu1 %v11617_v7  ;;  %v8067_v22 = vrot.slane %v7998_v45, 1  ;;  %v8071_v38 = vrot.slane %v7790_v51, 1  ;;  %v8390_v43 = vsel %vm8036_vm13, %v8388_v15, %v8389_v44  ;;  %vm9015_vm12 = vcmask 785408  }
 0x4d5   : > { %11045 = vmatprep.subr.bf16.mxu0 %v11617_v7  ;;  %v8251_v7 = vshrl.u32 %v8097_v28, 16  ;;  %v8260_v52 = vrot.slane %v8258_v24, 1  ;;  %11607 = vset.pattern.permute.xlu1 %v11681_v36  ;;  %v8323_v24 = vld [vmem:[#allocation2 + $0x100] sm:$0xfe]  ;;  %vm9209_vm15 = vcmask 654336  }
 0x4d6   : > { %8741 = vrot.lane.b32.xlu1 %v7891_v47, %s11674_s11  ;;  %v8239_v47 = vshrl.u32 %v16476_v16, 16  ;;  %v8069_v29 = vsel %vm8036_vm13, %v8067_v22, %v8068_v13  ;;  %v8099_v22 = vld [vmem:[#allocation2 + $0x100] sm:$0xff]  ;;  %v8322_v13 = vld [vmem:[#allocation2 + $0xf0] sm:$0xfe] }
 0x4d7   : > { %8885 = vrot.lane.b32.xlu0 %v8381_v30, %s11680_s29  ;;  %11279 = vmatpush3.bf16.msra.mxu1 %v11618_v11  ;;  %v8246_v30 = vshll.u32 %v8112_v37, 16  ;;  %v8277_v23 = vshll.u32 %v8099_v22, 16  ;;  %v8275_v63 = vshrl.u32 %v8099_v22, 16 }
 0x4d8   : > { %11046 = vmatpush3.bf16.msra.mxu0 %v11618_v11  ;;  %11272 = vmatprep.subr.bf16.mxu1 %v11619_v50  ;;  %v16522_v11 = vld [vmem:[#allocation2 + $0xf0] sm:$0xff] }
 0x4d9   : > { %11047 = vmatprep.subr.bf16.mxu0 %v11619_v50  ;;  %v8248_v59 = vrot.slane %v8246_v30, 1  ;;  %v7791_v50 = vld [vmem:[#allocation2 + $0xe8] sm:$0x1]  ;;  %v8001_v30 = vld [vmem:[#allocation2 + $0xf0] sm:$0xfe]  ;;  %v8279_v15 = vrot.slane %v8277_v23, 1 }
 0x4da   : > { %8775 = vrot.lane.b32.xlu1 %v8063_v4, %s11679_s20  ;;  %v16506_v4 = vor.u32 %v8243_v55, %v8239_v47  ;;  %v8074_v45 = vrot.slane %v7791_v50, 1  ;;  %v7792_v47 = vld [vmem:[#allocation2 + $0xf8] sm:$0x1] }
 0x4db   : > { %8823 = vrot.lane.b32.xlu0 %v8094_v26, %s11670_s15  ;;  %v16474_v26 = vor.u32 %v8231_v14, %v8227_v27  ;;  %11280 = vmatpush3.bf16.msra.mxu1 %v11620_v5  ;;  %v8072_v27 = vsel %vm8036_vm13, %v8070_v3, %v8071_v38  ;;  %v8077_v32 = vrot.slane %v7792_v47, 1  ;;  %v7960_v3 = vshll.u32 %v7792_v47, 16  ;;  %v8117_v47 = vld [vmem:[#allocation2 + $0x128] sm:$0x1] }
 0x4dc   : > { %11048 = vmatpush3.bf16.msra.mxu0 %v11620_v5  ;;  %11273 = vmatprep.subr.bf16.mxu1 %v11621_v39  ;;  %v8249_v19 = vsel %vm7795_vm1, %v16506_v4, %v8248_v59 }
 0x4dd   : > { %v8237_v40 = vsel %vm7795_vm1, %v16474_v26, %v8236_v62  ;;  %11049 = vmatprep.subr.bf16.mxu0 %v11621_v39  ;;  %v7927_v8 = vsel %vm7795_vm1, %v16474_v26, %v7926_v0  ;;  %v8265_v62 = vshll.u32 %v16522_v11, 16  ;;  %v8114_v39 = vld [vmem:[#allocation2 + $0xf8] sm:$0x1] }
 0x4de   : > { %8855 = vrot.lane.b32.xlu1 %v8225_v31, %s11676_s14  ;;  %v8255_v31 = vrot.slane %v8253_v18, 1  ;;  %v8270_v21 = vshll.u32 %v8114_v39, 16  ;;  %v8395_v0 = vrot.slane %v8114_v39, 1 }
 0x4df   : > { %8743 = vrot.lane.b32.xlu0 %v7903_v57, %s11674_s11  ;;  %11281 = vmatpush3.bf16.msra.mxu1 %v11622_v17  ;;  %v7936_v57 = vshll.u32 %v7790_v51, 16  ;;  %v8267_v6 = vrot.slane %v8265_v62, 1  ;;  %v8076_v51 = vrot.slane %v8001_v30, 1 }
 0x4e0   : > { %11050 = vmatpush3.bf16.msra.mxu0 %v11622_v17  ;;  %11274 = vmatprep.subr.bf16.mxu1 %v11623_v49  ;;  %v8256_v14 = vor.u32 %v8255_v31, %v8251_v7  ;;  %v7948_v17 = vshll.u32 %v7791_v50, 16  ;;  %v8272_v55 = vrot.slane %v8270_v21, 1  ;;  %v16548_v31 = vld [vmem:[#allocation2 + $0x110] sm:$0xff] }
 0x4e1   : > { %11051 = vmatprep.subr.bf16.mxu0 %v11623_v49  ;;  %v7938_v10 = vrot.slane %v7936_v57, 1  ;;  %v8078_v38 = vsel %vm8036_vm13, %v8076_v51, %v8077_v32  ;;  %v8002_v57 = vld [vmem:[#allocation2 + $0x100] sm:$0xfe] }
 0x4e2   : > { %8887 = vrot.lane.b32.xlu1 %v8384_v41, %s11680_s29  ;;  %v8321_v41 = vld [vmem:[#allocation2 + $0xe0] sm:$0xfe]  ;;  %v8261_v2 = vsel %vm7795_vm1, %v8256_v14, %v8260_v52  ;;  %v8397_v52 = vrot.slane %v8323_v24, 1  ;;  %v8079_v50 = vrot.slane %v8002_v57, 1  ;;  %v8404_v24 = vrot.slane %v8117_v47, 1  ;;  %v16581_v57 = vld [vmem:[#allocation2 + $0x30] sm:$0xff] }
 0x4e3   : > { %8777 = vrot.lane.b32.xlu0 %v8066_v48, %s11679_s20  ;;  %11282 = vmatpush3.bf16.msra.mxu1 %v11624_v34  ;;  %v8000_v48 = vld [vmem:[#allocation2 + $0xe0] sm:$0xfe]  ;;  %v8391_v5 = vrot.slane %v8321_v41, 1  ;;  %v7939_v9 = vsel %vm7795_vm1, %v16506_v4, %v7938_v10  ;;  %v8116_v10 = vld [vmem:[#allocation2 + $0x118] sm:$0x1] }
 0x4e4   : > { %11052 = vmatpush3.bf16.msra.mxu0 %v11624_v34  ;;  %v8073_v1 = vrot.slane %v8000_v48, 1  ;;  %9690 = vmatprep.subr.bf16.mxu1 %v11681_v36  ;;  %v7962_v34 = vrot.slane %v7960_v3, 1  ;;  %v8310_v3 = vld [vmem:[#allocation2 + $0x10] sm:$0xfe] }
 0x4e5   : > { %v8393_v37 = vsel %vm8036_vm13, %v8391_v5, %v8392_v33  ;;  %v8294_v33 = vshll.u32 %v8116_v10, 16 }
 0x4e6   : > { %8825 = vrot.lane.b32.xlu1 %v16431_v60, %s11670_s15  ;;  %v8075_v49 = vsel %vm8036_vm13, %v8073_v1, %v8074_v45  ;;  %v8101_v45 = vld [vmem:[#allocation2 + $0x120] sm:$0xff] }
 0x4e7   : > { %8857 = vrot.lane.b32.xlu0 %v8237_v40, %s11676_s14  ;;  %v8263_v40 = vshrl.u32 %v16522_v11, 16  ;;  %v8296_v21 = vrot.slane %v8294_v33, 1  ;;  %v16593_v33 = vld [vmem:[#allocation2 + $0x38] sm:$0x1] }
 0x4ea   : > { %8745 = vrot.lane.b32.xlu1 %v7915_v58, %s11674_s11  ;;  %v8268_v58 = vor.u32 %v8267_v6, %v8263_v40 }
 0x4eb   : > { %8889 = vrot.lane.b32.xlu0 %v8387_v12, %s11680_s29  ;;  %v7950_v12 = vrot.slane %v7948_v17, 1  ;;  %v8003_v17 = vld [vmem:[#allocation2 + $0x110] sm:$0xfe] }
 0x4ec   : > { %v8273_v59 = vsel %vm7795_vm1, %v8268_v58, %v8272_v55  ;;  %v7963_v62 = vsel %vm7795_vm1, %v8268_v58, %v7962_v34  ;;  %v8401_v55 = vrot.slane %v8116_v10, 1  ;;  %v8082_v30 = vrot.slane %v8003_v17, 1  ;;  %v16577_v34 = vld [vmem:[#allocation2 + $0x18] sm:$0x1]  ;;  %v16603_v17 = vld [vmem:[#allocation2 + $0x40] sm:$0xff] }
 0x4ed   : > { %v7951_v18 = vsel %vm7795_vm1, %v8256_v14, %v7950_v12 }
 0x4ee   : > { %8779 = vrot.lane.b32.xlu1 %v8069_v29, %s11679_s20  ;;  %v8394_v29 = vrot.slane %v8322_v13, 1  ;;  %v8301_v13 = vshll.u32 %v8101_v45, 16 }
 0x4ef   : > { %8827 = vrot.lane.b32.xlu0 %v16476_v16, %s11670_s15 }
 0x4f2   : > { %8859 = vrot.lane.b32.xlu1 %v8249_v19, %s11676_s14  ;;  %v8396_v19 = vsel %vm8036_vm13, %v8394_v29, %v8395_v0  ;;  %v8303_v29 = vrot.slane %v8301_v13, 1  ;;  %v8312_v13 = vld [vmem:[#allocation2 + $0x30] sm:$0xfe] }
 0x4f3   : > { %8747 = vrot.lane.b32.xlu0 %v7927_v8, %s11674_s11  ;;  %v8280_v8 = vor.u32 %v8279_v15, %v8275_v63  ;;  %v16571_v15 = vld [vmem:[#allocation2 + $0x20] sm:$0xff] }
 0x4f6   : > { %8891 = vrot.lane.b32.xlu1 %v8390_v43, %s11680_s29  ;;  %v7793_v43 = vld [vmem:[#allocation2 + $0x108] sm:$0x1] }
 0x4f7   : > { %8781 = vrot.lane.b32.xlu0 %v8072_v27, %s11679_s20  ;;  %v8289_v27 = vshll.u32 %v16548_v31, 16  ;;  %v8080_v48 = vrot.slane %v7793_v43, 1  ;;  %v7972_v1 = vshll.u32 %v7793_v43, 16  ;;  %v16579_v43 = vld [vmem:[#allocation2 + $0x28] sm:$0x1] }
 0x4f9   : > { %v8291_v5 = vrot.slane %v8289_v27, 1  ;;  %v8081_v40 = vsel %vm8036_vm13, %v8079_v50, %v8080_v48  ;;  %v8358_v27 = vrot.slane %v8310_v3, 1  ;;  %v8447_v50 = vshll.u32 %v16579_v43, 16  ;;  %v16629_v3 = vld [vmem:[#allocation2 + $0x58] sm:$0x1] }
 0x4fa   : > { %8829 = vrot.lane.b32.xlu1 %v8097_v28, %s11670_s15  ;;  %v8115_v28 = vld [vmem:[#allocation2 + $0x108] sm:$0x1] }
 0x4fb   : > { %8861 = vrot.lane.b32.xlu0 %v8261_v2, %s11676_s14  ;;  %v8282_v44 = vshll.u32 %v8115_v28, 16  ;;  %v8398_v41 = vrot.slane %v8115_v28, 1  ;;  %v8287_v2 = vshrl.u32 %v16548_v31, 16  ;;  %v8299_v28 = vshrl.u32 %v8101_v45, 16 }
 0x4fd   : > { %v8284_v7 = vrot.slane %v8282_v44, 1  ;;  %v8399_v39 = vsel %vm8036_vm13, %v8397_v52, %v8398_v41  ;;  %v8292_v6 = vor.u32 %v8291_v5, %v8287_v2  ;;  %v8325_v44 = vld [vmem:[#allocation2 + $0x120] sm:$0xfe]  ;;  %v8359_v41 = vrot.slane %v16577_v34, 1  ;;  %v16591_v2 = vld [vmem:[#allocation2 + $0x28] sm:$0x1] }
 0x4fe   : > { %8749 = vrot.lane.b32.xlu1 %v7939_v9, %s11674_s11  ;;  %v8324_v9 = vld [vmem:[#allocation2 + $0x110] sm:$0xfe]  ;;  %v8311_v5 = vld [vmem:[#allocation2 + $0x20] sm:$0xfe] }
 0x4ff   : > { %8893 = vrot.lane.b32.xlu0 %v8393_v37, %s11680_s29  ;;  %v8285_v14 = vsel %vm7795_vm1, %v8280_v8, %v8284_v7  ;;  %v7794_v37 = vld [vmem:[#allocation2 + $0x118] sm:$0x1]  ;;  %v8297_v58 = vsel %vm7795_vm1, %v8292_v6, %v8296_v21  ;;  %v8403_v7 = vrot.slane %v8325_v44, 1  ;;  %v16627_v44 = vld [vmem:[#allocation2 + $0x48] sm:$0x1] }
 0x500   : > { %v8083_v12 = vrot.slane %v7794_v37, 1  ;;  %v7984_v51 = vshll.u32 %v7794_v37, 16  ;;  %v8459_v37 = vshll.u32 %v16593_v33, 16 }
 0x501   : > { %v8405_v48 = vsel %vm8036_vm13, %v8403_v7, %v8404_v24 }
 0x502   : > { %8783 = vrot.lane.b32.xlu1 %v8075_v49, %s11679_s20  ;;  %v8400_v49 = vrot.slane %v8324_v9, 1  ;;  %v8084_v32 = vsel %vm8036_vm13, %v8082_v30, %v8083_v12  ;;  %v8452_v9 = vshrl.u32 %v16581_v57, 16  ;;  %v8461_v30 = vrot.slane %v8459_v37, 1  ;;  %v16614_v12 = vld [vmem:[#allocation2 + $0x38] sm:$0x1] }
 0x503   : > { %8831 = vrot.lane.b32.xlu0 %v16522_v11, %s11670_s15 }
 0x504   : > { %v8402_v0 = vsel %vm8036_vm13, %v8400_v49, %v8401_v55 }
 0x506   : > { %8863 = vrot.lane.b32.xlu1 %v8273_v59, %s11676_s14  ;;  %v8306_v59 = vshll.u32 %v8117_v47, 16  ;;  %v8466_v47 = vshll.u32 %v16603_v17, 16 }
 0x507   : > { %8751 = vrot.lane.b32.xlu0 %v7951_v18, %s11674_s11  ;;  %v8304_v18 = vor.u32 %v8303_v29, %v8299_v28  ;;  %v8364_v28 = vrot.slane %v8312_v13, 1 }
 0x508   : > { %v8308_v63 = vrot.slane %v8306_v59, 1  ;;  %v8365_v59 = vrot.slane %v16614_v12, 1 }
 0x50a   : > { %8895 = vrot.lane.b32.xlu1 %v8396_v19, %s11680_s29  ;;  %v7986_v19 = vrot.slane %v7984_v51, 1  ;;  %v8468_v51 = vrot.slane %v8466_v47, 1 }
 0x50b   : > { %8785 = vrot.lane.b32.xlu0 %v8078_v38, %s11679_s20  ;;  %v8442_v38 = vshll.u32 %v16571_v15, 16 }
 0x50c   : > { %v7987_v52 = vsel %vm7795_vm1, %v8292_v6, %v7986_v19  ;;  %v8362_v6 = vrot.slane %v16591_v2, 1  ;;  %v8313_v19 = vld [vmem:[#allocation2 + $0x40] sm:$0xfe] }
 0x50d   : > { %v8444_v10 = vrot.slane %v8442_v38, 1  ;;  %v8366_v38 = vsel %vm8036_vm13, %v8364_v28, %v8365_v59 }
 0x50e   : > { %8833 = vrot.lane.b32.xlu1 %v8099_v22, %s11670_s15  ;;  %v7974_v22 = vrot.slane %v7972_v1, 1 }
 0x50f   : > { %8865 = vrot.lane.b32.xlu0 %v8285_v14, %s11676_s14  ;;  %v8440_v14 = vshrl.u32 %v16571_v15, 16 }
 0x510   : > { %v7975_v23 = vsel %vm7795_vm1, %v8280_v8, %v7974_v22  ;;  %v8309_v8 = vsel %vm7795_vm1, %v8304_v18, %v8308_v63 }
 0x511   : > { %v16598_v1 = vor.u32 %v8444_v10, %v8440_v14  ;;  %v8367_v14 = vrot.slane %v8313_v19, 1 }
 0x512   : > { %8753 = vrot.lane.b32.xlu1 %v7963_v62, %s11674_s11  ;;  %v8454_v62 = vshll.u32 %v16581_v57, 16 }
 0x513   : > { %8897 = vrot.lane.b32.xlu0 %v8399_v39, %s11680_s29  ;;  %v8360_v39 = vsel %vm8036_vm13, %v8358_v27, %v8359_v41  ;;  %v8483_v41 = vshll.u32 %v16629_v3, 16 }
 0x514   : > { %v8456_v21 = vrot.slane %v8454_v62, 1 }
 0x516   : > { %8787 = vrot.lane.b32.xlu1 %v8081_v40, %s11679_s20  ;;  %v8361_v40 = vrot.slane %v8311_v5, 1  ;;  %v16612_v55 = vor.u32 %v8456_v21, %v8452_v9  ;;  %v16650_v5 = vld [vmem:[#allocation2 + $0x58] sm:$0x1]  ;;  %v8485_v9 = vrot.slane %v8483_v41, 1  ;;  %v11625_v21 = vld [vmem:[%s17281_s3 + $0x80] sm:$0xff]  }
 0x517   : > { %8835 = vrot.lane.b32.xlu0 %v16548_v31, %s11670_s15 }
 0x518   : > { %v8462_v18 = vsel %vm7795_vm1, %v16612_v55, %v8461_v30  ;;  %v16665_v30 = vld [vmem:[#allocation2 + $0x78] sm:$0x1]  ;;  %v8486_v59 = vsel %vm7795_vm1, %v16377_v46, %v8485_v9 }
 0x51a   : > { %8867 = vrot.lane.b32.xlu1 %v8297_v58, %s11676_s14  ;;  %v8363_v58 = vsel %vm8036_vm13, %v8361_v40, %v8362_v6  ;;  %v8314_v40 = vld [vmem:[#allocation2 + $0x50] sm:$0xfe]  ;;  %v16653_v6 = vld [vmem:[#allocation2 + $0x68] sm:$0x1] }
 0x51b   : > { %8755 = vrot.lane.b32.xlu0 %v7975_v23, %s11674_s11  ;;  %v16616_v23 = vld [vmem:[#allocation2 + $0x48] sm:$0x1]  ;;  %v8370_v47 = vrot.slane %v8314_v40, 1  ;;  %v16703_v40 = vld [vmem:[#allocation2 + $0x10] sm:$0xff] }
 0x51e   : > { %8899 = vrot.lane.b32.xlu1 %v8402_v0, %s11680_s29  ;;  %v8464_v0 = vshrl.u32 %v16603_v17, 16 }
 0x51f   : > { %8789 = vrot.lane.b32.xlu0 %v8084_v32, %s11679_s20  ;;  %v8471_v32 = vshll.u32 %v16616_v23, 16 }
 0x521   : > { %v8473_v7 = vrot.slane %v8471_v32, 1  ;;  %v8507_v32 = vshll.u32 %v16665_v30, 16 }
 0x522   : > { %8837 = vrot.lane.b32.xlu1 %v8101_v45, %s11670_s15  ;;  %v8449_v45 = vrot.slane %v8447_v50, 1 }
 0x523   : > { %8869 = vrot.lane.b32.xlu0 %v8309_v8, %s11676_s14  ;;  %v16635_v8 = vor.u32 %v8468_v51, %v8464_v0  ;;  %v11626_v0 = vld [vmem:[%s17281_s3 + $0x88] sm:$0xff]  }
 0x524   : > { %v8450_v22 = vsel %vm7795_vm1, %v16598_v1, %v8449_v45 }
 0x525   : > { %v8474_v62 = vsel %vm7795_vm1, %v16635_v8, %v8473_v7 }
 0x526   : > { %8757 = vrot.lane.b32.xlu1 %v7987_v52, %s11674_s11  ;;  %v8368_v52 = vrot.slane %v16627_v44, 1 }
 0x527   : > { %8901 = vrot.lane.b32.xlu0 %v8405_v48, %s11680_s29 }
 0x528   : > { %v8369_v45 = vsel %vm8036_vm13, %v8367_v14, %v8368_v52  ;;  %v11636_v52 = vld [vmem:[#allocation2 + $0x60] sm:$0xff] }
 0x52a   : > { %8871 = vrot.lane.b32.xlu1 %v8360_v39, %s11680_s29 }
 0x52b   : > { %8919 = vrot.lane.b32.xlu0 %v16571_v15, %s11672_s23 }
 0x52c   : > { %v8818_v49 = vpop.permute.xlu0 %8817 }
 0x52e   : > { %8951 = vrot.lane.b32.xlu1 %v8450_v22, %s11682_s26 }
 0x52f   : > { %8873 = vrot.lane.b32.xlu0 %v8363_v58, %s11680_s29  ;;  %v8495_v58 = vshll.u32 %v16653_v6, 16 }
 0x530   : > { %v16620_v29 = vpop.permute.xlu1 %8771 }
 0x531   : > { %v8770_v63 = vpop.permute.xlu0 %8769  ;;  %v8497_v19 = vrot.slane %v8495_v58, 1  ;;  %v8121_v58 = vshll.u32 %v16703_v40, 16 }
 0x532   : > { %8921 = vrot.lane.b32.xlu1 %v16581_v57, %s11672_s23  ;;  %v9075_v27 = vsel %vm6253_vm7, %v8770_v63, %v8818_v49  ;;  %v8371_v49 = vrot.slane %v16650_v5, 1 }
 0x533   : > { %8953 = vrot.lane.b32.xlu0 %v8462_v18, %s11682_s26  ;;  %v8498_v41 = vsel %vm7795_vm1, %v16367_v25, %v8497_v19 }
 0x534   : > { %v8850_v24 = vpop.permute.xlu1 %8849  ;;  %v8372_v46 = vsel %vm8036_vm13, %v8370_v47, %v8371_v49  ;;  %v7779_v47 = vld [vmem:[#allocation2 + $0x8] sm:$0x1]  ;;  %v7988_v49 = vld [vmem:[#allocation2] sm:$0xfe] }
 0x535   : > { %v9107_v10 = vsel %vm6739_vm14, %v9075_v27, %v8850_v24  ;;  %v16641_v50 = vpop.permute.xlu0 %8881  ;;  %v16685_v24 = vld [vmem:[#allocation2 + $0x88] sm:$0x1] }
 0x536   : > { %8875 = vrot.lane.b32.xlu1 %v8366_v38, %s11680_s29  ;;  %v9145_v48 = vsel %vm9128_vm10, %v9107_v10, %v16641_v50  ;;  %v8509_v10 = vrot.slane %v8507_v32, 1 }
 0x537   : > { %9601 = vmatprep.mubr.bf16.mxu1 %v9145_v48  ;;  %8923 = vrot.lane.b32.xlu0 %v16603_v17, %s11672_s23  ;;  %v8519_v48 = vshll.u32 %v16685_v24, 16 }
 0x538   : > { %v8738_v39 = vpop.permute.xlu1 %8737 }
 0x539   : > { %v8994_v37 = vsel %vm6577_vm11, %v16361_v56, %v8738_v39  ;;  %v8820_v22 = vpop.permute.xlu0 %8819 }
 0x53a   : > { %8955 = vrot.lane.b32.xlu1 %v8474_v62, %s11682_s26  ;;  %v9032_v13 = vsel %vm9015_vm12, %v8994_v37, %v8770_v63  ;;  %v9077_v18 = vsel %vm6253_vm7, %v16620_v29, %v8820_v22  ;;  %v8414_v62 = vld [vmem:[#allocation2 + $0x90] sm:$0xff]  ;;  %v8521_v37 = vrot.slane %v8519_v48, 1  ;;  %v16712_v22 = vld [vmem:[#allocation2 + $0x98] sm:$0x1] }
 0x53b   : > { %8877 = vrot.lane.b32.xlu0 %v8369_v45, %s11680_s29  ;;  %9602 = vmatmul.mubr.bf16.vlgmr.msra.gmra.mrb[0].mxu1 %v9032_v13  ;;  %v11628_v45 = vld [vmem:[%s17281_s3 + $0x98] sm:$0xff]   ;;  %v8526_v25 = vshll.u32 %v8414_v62, 16  ;;  %v8524_v32 = vshrl.u32 %v8414_v62, 16  ;;  %v8531_v19 = vshll.u32 %v16712_v22, 16 }
 0x53c   : > { %v8852_v28 = vpop.permute.xlu1 %8851  ;;  %9691 = vmatpush1.bf16.msra.mxu1 %v11625_v21  ;;  %v8510_v21 = vsel %vm7795_vm1, %v16385_v42, %v8509_v10  ;;  %v11629_v42 = vld [vmem:[%s17281_s3 + $0xa0] sm:$0xff]  }
 0x53d   : > { %v8740_v51 = vpop.permute.xlu0 %8739  ;;  %9692 = vmatprep.subr.bf16.mxu1 %v11681_v36  ;;  %v9109_v38 = vsel %vm6739_vm14, %v9077_v18, %v8852_v28  ;;  %v16715_v28 = vld [vmem:[#allocation2] sm:$0xff]  ;;  %v8533_v48 = vrot.slane %v8531_v19, 1 }
 0x53e   : > { %8925 = vrot.lane.b32.xlu1 %v16361_v56, %s11672_s23  ;;  %v8996_v63 = vsel %vm6577_vm11, %v16354_v61, %v8740_v51  ;;  %v11627_v56 = vld [vmem:[%s17281_s3 + $0x90] sm:$0xff]  }
 0x53f   : > { %8957 = vrot.lane.b32.xlu0 %v8486_v59, %s11682_s26  ;;  %v9035_v14 = vsel %vm9015_vm12, %v8996_v63, %v16620_v29 }
 0x540   : > { %v16683_v7 = vpop.permute.xlu1 %8883  ;;  %9693 = vmatpush1.bf16.msra.mxu1 %v11626_v0 }
 0x541   : > { %v8774_v27 = vpop.permute.xlu0 %8773  ;;  %v9148_v61 = vsel %vm9128_vm10, %v9109_v38, %v16683_v7  ;;  %9694 = vmatprep.subr.bf16.mxu1 %v11681_v36  ;;  %v8037_v38 = vrot.slane %v7988_v49, 1 }
 0x542   : > { %8879 = vrot.lane.b32.xlu1 %v8372_v46, %s11680_s29  ;;  %9609 = vmatprep.mubr.bf16.mxu1 %v9148_v61  ;;  %v8528_v46 = vrot.slane %v8526_v25, 1  ;;  %v7799_v61 = vshll.u32 %v16715_v28, 16 }
 0x543   : > { %8927 = vrot.lane.b32.xlu0 %v11636_v52, %s11672_s23  ;;  %9610 = vmatmul.mubr.bf16.gmra.mrb[4].mxu1 %v9035_v14  ;;  %v8119_v52 = vshrl.u32 %v16703_v40, 16 }
 0x544   : > { %v8822_v39 = vpop.permute.xlu1 %8821  ;;  %9695 = vmatpush1.bf16.msra.mxu1 %v11627_v56  ;;  %v8038_v56 = vrot.slane %v7779_v47, 1 }
 0x545   : > { %v8854_v9 = vpop.permute.xlu0 %8853  ;;  %9696 = vmatprep.subr.bf16.mxu1 %v11681_v36  ;;  %v9079_v29 = vsel %vm6253_vm7, %v8774_v27, %v8822_v39 }
 0x546   : > { %8959 = vrot.lane.b32.xlu1 %v8498_v41, %s11682_s26  ;;  %v9111_v59 = vsel %vm6739_vm14, %v9079_v29, %v8854_v9  ;;  %v8123_v41 = vrot.slane %v8121_v58, 1  ;;  %v8039_v39 = vsel %vm8036_vm13, %v8037_v38, %v8038_v56  ;;  %v7801_v9 = vrot.slane %v7799_v61, 1 }
 0x547   : > { %8929 = vrot.lane.b32.xlu0 %v16369_v20, %s11672_s23 }
 0x548   : > { %v8742_v13 = vpop.permute.xlu1 %8741  ;;  %9697 = vmatpush1.bf16.msra.mxu1 %v11628_v45  ;;  %v7797_v45 = vshrl.u32 %v16715_v28, 16  ;;  %v16746_v25 = vor.u32 %v8123_v41, %v8119_v52 }
 0x549   : > { %v8998_v0 = vsel %vm6577_vm11, %v16369_v20, %v8742_v13  ;;  %v16720_v51 = vpop.permute.xlu0 %8885  ;;  %9698 = vmatprep.subr.bf16.mxu1 %v11681_v36  ;;  %v8522_v20 = vsel %vm7795_vm1, %v16400_v53, %v8521_v37  ;;  %v8529_v53 = vor.u32 %v8528_v46, %v8524_v32  ;;  %v11631_v13 = vld [vmem:[%s17281_s3 + $0xb0] sm:$0xff]   ;;  %v16764_v46 = vld [vmem:[#allocation2 + $0xc8] sm:$0x1] }
 0x54a   : > { %8961 = vrot.lane.b32.xlu1 %v8510_v21, %s11682_s26  ;;  %v9151_v18 = vsel %vm9128_vm10, %v9111_v59, %v16720_v51  ;;  %v9038_v63 = vsel %vm9015_vm12, %v8998_v0, %v8774_v27  ;;  %v8126_v27 = vshll.u32 %v16577_v34, 16  ;;  %v7804_v34 = vshll.u32 %v7779_v47, 16 }
 0x54b   : > { %8931 = vrot.lane.b32.xlu0 %v16379_v54, %s11672_s23  ;;  %9617 = vmatprep.mubr.bf16.mxu1 %v9151_v18  ;;  %v11630_v54 = vld [vmem:[%s17281_s3 + $0xa8] sm:$0xff]   ;;  %v7802_v58 = vor.u32 %v7801_v9, %v7797_v45  ;;  %v7780_v18 = vld [vmem:[#allocation2 + $0x18] sm:$0x1]  ;;  %v8543_v41 = vshll.u32 %v16764_v46, 16 }
 0x54c   : > { %9618 = vmatmul.mubr.bf16.gmra.mrb[8].mxu1 %v9038_v63  ;;  %v8776_v14 = vpop.permute.xlu1 %8775  ;;  %v8128_v21 = vrot.slane %v8126_v27, 1  ;;  %v7806_v59 = vrot.slane %v7804_v34, 1  ;;  %v7989_v63 = vld [vmem:[#allocation2 + $0x10] sm:$0xfe]  ;;  %v8041_v52 = vrot.slane %v7780_v18, 1 }
 0x54d   : > { %v8824_v10 = vpop.permute.xlu0 %8823  ;;  %9699 = vmatpush1.bf16.msra.mxu1 %v11629_v42  ;;  %v8040_v61 = vrot.slane %v7989_v63, 1 }
 0x54e   : > { %8963 = vrot.lane.b32.xlu1 %v8522_v20, %s11682_s26  ;;  %9700 = vmatprep.subr.bf16.mxu1 %v11681_v36  ;;  %v9081_v49 = vsel %vm6253_vm7, %v8776_v14, %v8824_v10  ;;  %v8129_v42 = vsel %vm7795_vm1, %v16746_v25, %v8128_v21  ;;  %v11632_v20 = vld [vmem:[%s17281_s3 + $0xb8] sm:$0xff]   ;;  %v7807_v56 = vsel %vm7795_vm1, %v7802_v58, %v7806_v59  ;;  %v8138_v10 = vshll.u32 %v16591_v2, 16 }
 0x54f   : > { %8933 = vrot.lane.b32.xlu0 %v8414_v62, %s11672_s23  ;;  %v8534_v62 = vsel %vm7795_vm1, %v8529_v53, %v8533_v48  ;;  %v8042_v48 = vsel %vm8036_vm13, %v8040_v61, %v8041_v52  ;;  %v8545_v2 = vrot.slane %v8543_v41, 1 }
 0x550   : > { %v8856_v29 = vpop.permute.xlu1 %8855  ;;  %v8140_v9 = vrot.slane %v8138_v10, 1 }
 0x551   : > { %v8744_v37 = vpop.permute.xlu0 %8743  ;;  %9701 = vmatpush1.bf16.msra.mxu1 %v11630_v54  ;;  %v9113_v0 = vsel %vm6739_vm14, %v9081_v49, %v8856_v29  ;;  %v11637_v29 = vld [vmem:[#allocation2 + $0xb0] sm:$0xff]  ;;  %v8546_v49 = vsel %vm7795_vm1, %v16474_v26, %v8545_v2 }
 0x552   : > { %8759 = vrot.lane.b32.xlu1 %v8039_v39, %s11679_s20  ;;  %9702 = vmatprep.subr.bf16.mxu1 %v11681_v36  ;;  %v9000_v47 = vsel %vm6577_vm11, %v16402_v35, %v8744_v37  ;;  %v7816_v39 = vshll.u32 %v7780_v18, 16  ;;  %v8141_v59 = vsel %vm7795_vm1, %v16598_v1, %v8140_v9  ;;  %v16805_v18 = vld [vmem:[#allocation2 + $0xd8] sm:$0x1] }
 0x553   : > { %8807 = vrot.lane.b32.xlu0 %v16703_v40, %s11670_s15  ;;  %v9041_v38 = vsel %vm9015_vm12, %v9000_v47, %v8776_v14  ;;  %v11633_v14 = vld [vmem:[%s17281_s3 + $0xc0] sm:$0xff]  }
 0x554   : > { %v16760_v32 = vpop.permute.xlu1 %8887  ;;  %v7818_v47 = vrot.slane %v7816_v39, 1 }
 0x555   : > { %v8778_v19 = vpop.permute.xlu0 %8777  ;;  %v9154_v35 = vsel %vm9128_vm10, %v9113_v0, %v16760_v32  ;;  %9703 = vmatpush1.bf16.msra.mxu1 %v11631_v13  ;;  %v11634_v13 = vld [vmem:[%s17281_s3 + $0xc8] sm:$0xff]  }
 0x556   : > { %8965 = vrot.lane.b32.xlu1 %v8534_v62, %s11682_s26  ;;  %9625 = vmatprep.mubr.bf16.mxu1 %v9154_v35  ;;  %v7781_v0 = vld [vmem:[#allocation2 + $0x28] sm:$0x1]  ;;  %v7819_v26 = vsel %vm7795_vm1, %v16746_v25, %v7818_v47 }
 0x557   : > { %8839 = vrot.lane.b32.xlu0 %v8129_v42, %s11676_s14  ;;  %9626 = vmatmul.mubr.bf16.gmra.mrb[12].mxu1 %v9041_v38  ;;  %v7990_v42 = vld [vmem:[#allocation2 + $0x20] sm:$0xfe]  ;;  %v8044_v35 = vrot.slane %v7781_v0, 1  ;;  %v7828_v52 = vshll.u32 %v7781_v0, 16 }
 0x558   : > { %v8826_v27 = vpop.permute.xlu1 %8825  ;;  %9704 = vmatprep.subr.bf16.mxu1 %v11681_v36 }
 0x559   : > { %v8858_v54 = vpop.permute.xlu0 %8857  ;;  %9705 = vmatpush1.bf16.msra.mxu1 %v11632_v20  ;;  %v9083_v53 = vsel %vm6253_vm7, %v8778_v19, %v8826_v27  ;;  %v8555_v20 = vshll.u32 %v16805_v18, 16  ;;  %v11638_v27 = vld [vmem:[#allocation2 + $0xc0] sm:$0xff]  ;;  %v7830_v9 = vrot.slane %v7828_v52, 1 }
 0x55a   : > { %8727 = vrot.lane.b32.xlu1 %v7807_v56, %s11674_s11  ;;  %9706 = vmatprep.subr.bf16.mxu1 %v11681_v36  ;;  %v9115_v34 = vsel %vm6739_vm14, %v9083_v53, %v8858_v54  ;;  %v8150_v56 = vshll.u32 %v16614_v12, 16 }
 0x55b   : > { %8935 = vrot.lane.b32.xlu0 %v16431_v60, %s11672_s23  ;;  %v8557_v54 = vrot.slane %v8555_v20, 1 }
 0x55c   : > { %v8746_v45 = vpop.permute.xlu1 %8745  ;;  %v8152_v12 = vrot.slane %v8150_v56, 1 }
 0x55d   : > { %v9002_v21 = vsel %vm6577_vm11, %v11637_v29, %v8746_v45  ;;  %v16789_v37 = vpop.permute.xlu0 %8889  ;;  %9707 = vmatpush1.bf16.msra.mxu1 %v11633_v14  ;;  %v7991_v29 = vld [vmem:[#allocation2 + $0x30] sm:$0xfe] }
 0x55e   : > { %8761 = vrot.lane.b32.xlu1 %v8042_v48, %s11679_s20  ;;  %v9157_v60 = vsel %vm9128_vm10, %v9115_v34, %v16789_v37  ;;  %v9044_v62 = vsel %vm9015_vm12, %v9002_v21, %v8778_v19  ;;  %9708 = vmatprep.subr.bf16.mxu1 %v11681_v36  ;;  %v8043_v19 = vrot.slane %v7990_v42, 1  ;;  %v8417_v48 = vld [vmem:[#allocation2 + $0xe0] sm:$0xff] }
 0x55f   : > { %8809 = vrot.lane.b32.xlu0 %v16571_v15, %s11670_s15  ;;  %9633 = vmatprep.mubr.bf16.mxu1 %v9157_v60  ;;  %v11635_v15 = vld [vmem:[%s17281_s3 + $0xd0] sm:$0xff]   ;;  %v8562_v34 = vshll.u32 %v8417_v48, 16  ;;  %v7782_v60 = vld [vmem:[#allocation2 + $0x38] sm:$0x1] }
 0x560   : > { %9634 = vmatmul.mubr.bf16.gmra.mrb[16].mxu1 %v9044_v62  ;;  %v8780_v58 = vpop.permute.xlu1 %8779  ;;  %v8045_v25 = vsel %vm8036_vm13, %v8043_v19, %v8044_v35  ;;  %v16836_v62 = vld [vmem:[#allocation2 + $0xe8] sm:$0x1]  ;;  %v8047_v0 = vrot.slane %v7782_v60, 1  ;;  %v11639_v19 = vld [vmem:[#allocation2 + $0xd0] sm:$0xff]  ;;  %v7840_v52 = vshll.u32 %v7782_v60, 16 }
 0x561   : > { %v8828_v63 = vpop.permute.xlu0 %8827  ;;  %9709 = vmatpush1.bf16.msra.mxu1 %v11634_v13  ;;  %v8153_v13 = vsel %vm7795_vm1, %v16612_v55, %v8152_v12  ;;  %v8567_v42 = vshll.u32 %v16836_v62, 16 }
 0x562   : > { %8967 = vrot.lane.b32.xlu1 %v8546_v49, %s11682_s26  ;;  %9710 = vmatprep.subr.bf16.mxu1 %v11681_v36  ;;  %v9085_v41 = vsel %vm6253_vm7, %v8780_v58, %v8828_v63 }
 0x563   : > { %8841 = vrot.lane.b32.xlu0 %v8141_v59, %s11676_s14  ;;  %v8564_v59 = vrot.slane %v8562_v34, 1  ;;  %v16861_v34 = vld [vmem:[#allocation2 + $0xf8] sm:$0x1] }
 0x564   : > { %v8860_v38 = vpop.permute.xlu1 %8859 }
 0x565   : > { %v8748_v61 = vpop.permute.xlu0 %8747  ;;  %9711 = vmatpush1.bf16.msra.mxu1 %v11635_v15  ;;  %v9117_v14 = vsel %vm6739_vm14, %v9085_v41, %v8860_v38  ;;  %v8162_v15 = vshll.u32 %v16627_v44, 16  ;;  %v8418_v41 = vld [vmem:[#allocation2 + $0xf0] sm:$0xff] }
 0x566   : > { %8729 = vrot.lane.b32.xlu1 %v7819_v26, %s11674_s11  ;;  %v9004_v10 = vsel %vm6577_vm11, %v11638_v27, %v8748_v61  ;;  %v8569_v61 = vrot.slane %v8567_v42, 1 }
 0x567   : > { %8937 = vrot.lane.b32.xlu0 %v16476_v16, %s11672_s23  ;;  %v9047_v45 = vsel %vm9015_vm12, %v9004_v10, %v8780_v58  ;;  %v8558_v16 = vsel %vm7795_vm1, %v16506_v4, %v8557_v54  ;;  %v8046_v58 = vrot.slane %v7991_v29, 1  ;;  %v7831_v4 = vsel %vm7795_vm1, %v16598_v1, %v7830_v9  ;;  %v8090_v54 = vld [vmem:[#allocation2 + $0x50] sm:$0xff] }
 0x568   : > { %v16824_v53 = vpop.permute.xlu1 %8891  ;;  %v8164_v10 = vrot.slane %v8162_v15, 1  ;;  %v8169_v9 = vshll.u32 %v8090_v54, 16  ;;  %v8167_v42 = vshrl.u32 %v8090_v54, 16  ;;  %v8174_v15 = vshll.u32 %v16650_v5, 16  ;;  %v16880_v5 = vld [vmem:[#allocation2 + $0x108] sm:$0x1] }
 0x569   : > { %v8782_v2 = vpop.permute.xlu0 %8781  ;;  %v9160_v39 = vsel %vm9128_vm10, %v9117_v14, %v16824_v53  ;;  %v8048_v44 = vsel %vm8036_vm13, %v8046_v58, %v8047_v0  ;;  %v8574_v14 = vshll.u32 %v8418_v41, 16 }
 0x56a   : > { %9641 = vmatprep.mubr.bf16.mxu1 %v9160_v39  ;;  %8763 = vrot.lane.b32.xlu1 %v8045_v25, %s11679_s20  ;;  %v7992_v39 = vld [vmem:[#allocation2 + $0x40] sm:$0xfe] }
 0x56b   : > { %8811 = vrot.lane.b32.xlu0 %v16581_v57, %s11670_s15  ;;  %9642 = vmatmul.mubr.bf16.gmra.mrb[20].mxu1 %v9047_v45  ;;  %v8560_v57 = vshrl.u32 %v8417_v48, 16  ;;  %v8049_v60 = vrot.slane %v7992_v39, 1  ;;  %v8591_v39 = vshll.u32 %v16880_v5, 16 }
 0x56c   : > { %v8830_v21 = vpop.permute.xlu1 %8829 }
 0x56d   : > { %v8862_v49 = vpop.permute.xlu0 %8861  ;;  %v9087_v47 = vsel %vm6253_vm7, %v8782_v2, %v8830_v21  ;;  %v8565_v56 = vor.u32 %v8564_v59, %v8560_v57  ;;  %v8572_v21 = vshrl.u32 %v8418_v41, 16 }
 0x56e   : > { %8969 = vrot.lane.b32.xlu1 %v8558_v16, %s11682_s26  ;;  %v9119_v26 = vsel %vm6739_vm14, %v9087_v47, %v8862_v49  ;;  %v8165_v16 = vsel %vm7795_vm1, %v16635_v8, %v8164_v10  ;;  %v11640_v47 = vld [vmem:[#allocation2 + $0xe0] sm:$0xff] }
 0x56f   : > { %8843 = vrot.lane.b32.xlu0 %v8153_v13, %s11676_s14  ;;  %v8570_v12 = vsel %vm7795_vm1, %v8565_v56, %v8569_v61  ;;  %v8576_v13 = vrot.slane %v8574_v14, 1  ;;  %v8420_v14 = vld [vmem:[#allocation2 + $0x110] sm:$0xff] }
 0x570   : > { %v8750_v63 = vpop.permute.xlu1 %8749 }
 0x571   : > { %v9006_v35 = vsel %vm6577_vm11, %v11639_v19, %v8750_v63  ;;  %v16847_v20 = vpop.permute.xlu0 %8893  ;;  %v8171_v63 = vrot.slane %v8169_v9, 1  ;;  %v8421_v9 = vld [vmem:[#allocation2 + $0x120] sm:$0xff] }
 0x572   : > { %8731 = vrot.lane.b32.xlu1 %v7831_v4, %s11674_s11  ;;  %v9163_v38 = vsel %vm9128_vm10, %v9119_v26, %v16847_v20  ;;  %v9050_v1 = vsel %vm9015_vm12, %v9006_v35, %v8782_v2  ;;  %v7783_v2 = vld [vmem:[#allocation2 + $0x48] sm:$0x1]  ;;  %v8579_v4 = vshll.u32 %v16861_v34, 16  ;;  %v8419_v26 = vld [vmem:[#allocation2 + $0x100] sm:$0xff] }
 0x573   : > { %8939 = vrot.lane.b32.xlu0 %v8417_v48, %s11672_s23  ;;  %9649 = vmatprep.mubr.bf16.mxu1 %v9163_v38  ;;  %v7842_v48 = vrot.slane %v7840_v52, 1  ;;  %v8050_v49 = vrot.slane %v7783_v2, 1  ;;  %v8586_v61 = vshll.u32 %v8419_v26, 16  ;;  %v8172_v10 = vor.u32 %v8171_v63, %v8167_v42 }
 0x574   : > { %9650 = vmatmul.mubr.bf16.gmra.mrb[24].mxu1 %v9050_v1  ;;  %v8784_v27 = vpop.permute.xlu1 %8783  ;;  %v8577_v1 = vor.u32 %v8576_v13, %v8572_v21  ;;  %v8581_v56 = vrot.slane %v8579_v4, 1  ;;  %v16888_v13 = vld [vmem:[#allocation2 + $0x118] sm:$0x1]  ;;  %v8610_v4 = vshll.u32 %v8421_v9, 16 }
 0x575   : > { %v8832_v25 = vpop.permute.xlu0 %8831  ;;  %v7843_v58 = vsel %vm7795_vm1, %v16612_v55, %v7842_v48  ;;  %v8051_v38 = vsel %vm8036_vm13, %v8049_v60, %v8050_v49  ;;  %v8603_v63 = vshll.u32 %v16888_v13, 16 }
 0x576   : > { %8765 = vrot.lane.b32.xlu1 %v8048_v44, %s11679_s20  ;;  %v7852_v44 = vshll.u32 %v7783_v2, 16 }
 0x577   : > { %8813 = vrot.lane.b32.xlu0 %v16603_v17, %s11670_s15  ;;  %v9089_v17 = vsel %vm6253_vm7, %v8784_v27, %v8832_v25  ;;  %v8176_v25 = vrot.slane %v8174_v15, 1  ;;  %v16903_v15 = vld [vmem:[#allocation2 + $0x128] sm:$0x1] }
 0x578   : > { %v8864_v45 = vpop.permute.xlu1 %8863  ;;  %v7854_v2 = vrot.slane %v7852_v44, 1 }
 0x579   : > { %v8752_v29 = vpop.permute.xlu0 %8751  ;;  %v9121_v59 = vsel %vm6739_vm14, %v9089_v17, %v8864_v45  ;;  %v8588_v45 = vrot.slane %v8586_v61, 1  ;;  %v8177_v21 = vsel %vm7795_vm1, %v8172_v10, %v8176_v25  ;;  %v16909_v25 = vld [vmem:[#allocation2 + $0x138] sm:$0x1] }
 0x57a   : > { %8971 = vrot.lane.b32.xlu1 %v8570_v12, %s11682_s26  ;;  %v9008_v57 = vsel %vm6577_vm11, %v11640_v47, %v8752_v29  ;;  %v8596_v47 = vshrl.u32 %v8420_v14, 16 }
 0x57b   : > { %8845 = vrot.lane.b32.xlu0 %v8165_v16, %s11676_s14  ;;  %v9053_v55 = vsel %vm9015_vm12, %v9008_v57, %v8784_v27  ;;  %v8584_v27 = vshrl.u32 %v8419_v26, 16  ;;  %v8598_v16 = vshll.u32 %v8420_v14, 16 }
 0x57c   : > { %v16871_v0 = vpop.permute.xlu1 %8895 }
 0x57d   : > { %v8786_v19 = vpop.permute.xlu0 %8785  ;;  %v9166_v35 = vsel %vm9128_vm10, %v9121_v59, %v16871_v0  ;;  %v7855_v59 = vsel %vm7795_vm1, %v16635_v8, %v7854_v2  ;;  %v8589_v42 = vor.u32 %v8588_v45, %v8584_v27  ;;  %v11641_v45 = vld [vmem:[#allocation2 + $0x100] sm:$0xff] }
 0x57e   : > { %9657 = vmatprep.mubr.bf16.mxu1 %v9166_v35  ;;  %8733 = vrot.lane.b32.xlu1 %v7843_v58, %s11674_s11  ;;  %v8593_v58 = vrot.slane %v8591_v39, 1  ;;  %v8422_v35 = vld [vmem:[#allocation2 + $0x130] sm:$0xff] }
 0x57f   : > { %8941 = vrot.lane.b32.xlu0 %v8418_v41, %s11672_s23  ;;  %9658 = vmatmul.mubr.bf16.gmra.mrb[28].mxu1 %v9053_v55  ;;  %v8582_v41 = vsel %vm7795_vm1, %v8577_v1, %v8581_v56  ;;  %v8612_v1 = vrot.slane %v8610_v4, 1  ;;  %v8615_v56 = vshll.u32 %v16903_v15, 16  ;;  %v8622_v44 = vshll.u32 %v8422_v35, 16  ;;  %v8631_v4 = vld [vmem:[#allocation2 + $0x20] sm:$0xfe] }
 0x580   : > { %v8834_v52 = vpop.permute.xlu1 %8833  ;;  %v8594_v8 = vsel %vm7795_vm1, %v8589_v42, %v8593_v58  ;;  %v8620_v39 = vshrl.u32 %v8422_v35, 16 }
 0x581   : > { %v8866_v12 = vpop.permute.xlu0 %8865  ;;  %v9091_v48 = vsel %vm6253_vm7, %v8786_v19, %v8834_v52  ;;  %v8605_v52 = vrot.slane %v8603_v63, 1  ;;  %v8617_v27 = vrot.slane %v8615_v56, 1  ;;  %v8679_v63 = vrot.slane %v8631_v4, 1 }
 0x582   : > { %8767 = vrot.lane.b32.xlu1 %v8051_v38, %s11679_s20  ;;  %v9123_v60 = vsel %vm6739_vm14, %v9091_v48, %v8866_v12 }
 0x583   : > { %8815 = vrot.lane.b32.xlu0 %v8090_v54, %s11670_s15 }
 0x584   : > { %v8754_v29 = vpop.permute.xlu1 %8753 }
 0x585   : > { %v9010_v49 = vsel %vm6577_vm11, %v16522_v11, %v8754_v29  ;;  %v16893_v17 = vpop.permute.xlu0 %8897  ;;  %v8600_v11 = vrot.slane %v8598_v16, 1  ;;  %v8627_v29 = vshll.u32 %v16909_v25, 16 }
 0x586   : > { %8973 = vrot.lane.b32.xlu1 %v8582_v41, %s11682_s26  ;;  %v9169_v54 = vsel %vm9128_vm10, %v9123_v60, %v16893_v17  ;;  %v9056_v57 = vsel %vm9015_vm12, %v9010_v49, %v8786_v19  ;;  %v8608_v19 = vshrl.u32 %v8421_v9, 16  ;;  %v8624_v41 = vrot.slane %v8622_v44, 1 }
 0x587   : > { %8847 = vrot.lane.b32.xlu0 %v8177_v21, %s11676_s14  ;;  %9665 = vmatprep.mubr.bf16.mxu1 %v9169_v54  ;;  %v8601_v61 = vor.u32 %v8600_v11, %v8596_v47  ;;  %v8629_v58 = vrot.slane %v8627_v29, 1 }
 0x588   : > { %9666 = vmatmul.mubr.bf16.gmra.mrb[32].mxu1 %v9056_v57  ;;  %v8788_v55 = vpop.permute.xlu1 %8787  ;;  %v8613_v48 = vor.u32 %v8612_v1, %v8608_v19  ;;  %v8625_v57 = vor.u32 %v8624_v41, %v8620_v39 }
 0x589   : > { %v8836_v38 = vpop.permute.xlu0 %8835 }
 0x58a   : > { %8735 = vrot.lane.b32.xlu1 %v7855_v59, %s11674_s11  ;;  %v9093_v2 = vsel %vm6253_vm7, %v8788_v55, %v8836_v38  ;;  %v8680_v38 = vrot.slane %v16579_v43, 1 }
 0x58b   : > { %8943 = vrot.lane.b32.xlu0 %v8419_v26, %s11672_s23  ;;  %v8606_v26 = vsel %vm7795_vm1, %v8601_v61, %v8605_v52 }
 0x58c   : > { %v8868_v10 = vpop.permute.xlu1 %8867  ;;  %v8681_v43 = vsel %vm8036_vm13, %v8679_v63, %v8680_v38 }
 0x58d   : > { %v8756_v12 = vpop.permute.xlu0 %8755  ;;  %v9125_v21 = vsel %vm6739_vm14, %v9093_v2, %v8868_v10  ;;  %v8683_v10 = vrot.slane %v16593_v33, 1  ;;  %v8633_v2 = vld [vmem:[#allocation2 + $0x40] sm:$0xfe]  ;;  %v8686_v33 = vrot.slane %v16616_v23, 1  ;;  %v8689_v23 = vrot.slane %v16629_v3, 1 }
 0x58e   : > { %8975 = vrot.lane.b32.xlu1 %v8594_v8, %s11682_s26  ;;  %v9012_v16 = vsel %vm6577_vm11, %v11641_v45, %v8756_v12 }
 0x58f   : > { %8945 = vrot.lane.b32.xlu0 %v8420_v14, %s11672_s23  ;;  %v9059_v54 = vsel %vm9015_vm12, %v9012_v16, %v8788_v55  ;;  %v8618_v14 = vsel %vm7795_vm1, %v8613_v48, %v8617_v27  ;;  %v8630_v55 = vsel %vm7795_vm1, %v8625_v57, %v8629_v58 }
 0x590   : > { %v16918_v60 = vpop.permute.xlu1 %8899 }
 0x591   : > { %v8790_v49 = vpop.permute.xlu0 %8789  ;;  %v9172_v47 = vsel %vm9128_vm10, %v9125_v21, %v16918_v60 }
 0x592   : > { %9673 = vmatprep.mubr.bf16.mxu1 %v9172_v47  ;;  %8977 = vrot.lane.b32.xlu1 %v8606_v26, %s11682_s26  ;;  %v8685_v26 = vrot.slane %v8633_v2, 1 }
 0x593   : > { %8947 = vrot.lane.b32.xlu0 %v8421_v9, %s11672_s23  ;;  %9674 = vmatmul.mubr.bf16.gmra.mrb[36].mxu1 %v9059_v54 }
 0x594   : > { %v8838_v59 = vpop.permute.xlu1 %8837  ;;  %v8687_v47 = vsel %vm8036_vm13, %v8685_v26, %v8686_v33  ;;  %v8637_v26 = vld [vmem:[#allocation2 + $0x80] sm:$0xfe] }
 0x595   : > { %v8870_v42 = vpop.permute.xlu0 %8869  ;;  %v9095_v11 = vsel %vm6253_vm7, %v8790_v49, %v8838_v59 }
 0x596   : > { %8979 = vrot.lane.b32.xlu1 %v8618_v14, %s11682_s26  ;;  %v9127_v19 = vsel %vm6739_vm14, %v9095_v11, %v8870_v42  ;;  %v8634_v14 = vld [vmem:[#allocation2 + $0x50] sm:$0xfe] }
 0x597   : > { %8949 = vrot.lane.b32.xlu0 %v8422_v35, %s11672_s23  ;;  %v8632_v35 = vld [vmem:[#allocation2 + $0x30] sm:$0xfe]  ;;  %v8688_v4 = vrot.slane %v8634_v14, 1 }
 0x598   : > { %v8758_v9 = vpop.permute.xlu1 %8757 }
 0x599   : > { %v9014_v1 = vsel %vm6577_vm11, %v16548_v31, %v8758_v9  ;;  %v16934_v56 = vpop.permute.xlu0 %8901  ;;  %v8682_v31 = vrot.slane %v8632_v35, 1  ;;  %v8690_v63 = vsel %vm8036_vm13, %v8688_v4, %v8689_v23 }
 0x59a   : > { %8981 = vrot.lane.b32.xlu1 %v8630_v55, %s11682_s26  ;;  %v9175_v44 = vsel %vm9128_vm10, %v9127_v19, %v16934_v56  ;;  %v9062_v8 = vsel %vm9015_vm12, %v9014_v1, %v8790_v49  ;;  %v8635_v55 = vld [vmem:[#allocation2 + $0x60] sm:$0xfe] }
 0x59b   : > { %9681 = vmatprep.mubr.bf16.mxu1 %v9175_v44  ;;  %v8684_v39 = vsel %vm8036_vm13, %v8682_v31, %v8683_v10  ;;  %v8691_v1 = vrot.slane %v8635_v55, 1  ;;  %v8692_v44 = vrot.slane %v16653_v6, 1  ;;  %v8636_v31 = vld [vmem:[#allocation2 + $0x70] sm:$0xfe] }
 0x59c   : > { %9682 = vmatmul.mubr.bf16.gmra.mrb[40].mxu1 %v9062_v8  ;;  %v16941_v61 = vpop.permute.xlu1 %8871 }
 0x59d   : > { %v8920_v52 = vpop.permute.xlu0 %8919  ;;  %10968 = vmatprep.mubr.msk.bf16.mxu1 %vm6577_vm11, %v8681_v43  ;;  %v8693_v35 = vsel %vm8036_vm13, %v8691_v1, %v8692_v44 }
 0x59e   : > { %v9178_v27 = vsel %vm6415_vm9, %v16941_v61, %v8920_v52 }
 0x5a0   : > { %v8952_v12 = vpop.permute.xlu1 %8951 }
 0x5a1   : > { %v16945_v48 = vpop.permute.xlu0 %8873  ;;  %v9211_v41 = vsel %vm9209_vm15, %v9178_v27, %v8952_v12  ;;  %v8694_v27 = vrot.slane %v8636_v31, 1 }
 0x5a4   : > { %9723 = vmatmul.mubr.bf16.vlgmr.msra.gmra.mrb[44].mxu1 %v9211_v41  ;;  %v8922_v45 = vpop.permute.xlu1 %8921 }
 0x5a5   : > { %v8954_v16 = vpop.permute.xlu0 %8953  ;;  %10969 = vmatprep.mubr.msk.bf16.mxu1 %vm6577_vm11, %v8684_v39  ;;  %v9180_v29 = vsel %vm6415_vm9, %v16945_v48, %v8922_v45  ;;  %v8695_v39 = vrot.slane %v16665_v30, 1 }
 0x5a6   : > { %v9214_v54 = vsel %vm9209_vm15, %v9180_v29, %v8954_v16 }
 0x5a7   : > { %v8696_v45 = vsel %vm8036_vm13, %v8694_v27, %v8695_v39 }
 0x5a8   : > { %v16955_v21 = vpop.permute.xlu1 %8875 }
 0x5a9   : > { %v8924_v49 = vpop.permute.xlu0 %8923 }
 0x5aa   : > { %v9182_v11 = vsel %vm6415_vm9, %v16955_v21, %v8924_v49  ;;  %v8697_v49 = vrot.slane %v8637_v26, 1 }
 0x5ac   : > { %9731 = vmatmul.mubr.bf16.gmra.mrb[48].mxu1 %v9214_v54  ;;  %v8956_v57 = vpop.permute.xlu1 %8955 }
 0x5ad   : > { %v16959_v58 = vpop.permute.xlu0 %8877  ;;  %10970 = vmatprep.mubr.msk.bf16.mxu1 %vm6577_vm11, %v8687_v47  ;;  %v9217_v38 = vsel %vm9209_vm15, %v9182_v11, %v8956_v57  ;;  %v8698_v47 = vrot.slane %v16685_v24, 1  ;;  %v8638_v11 = vld [vmem:[#allocation2 + $0x90] sm:$0xfe] }
 0x5ae   : > { %v8700_v55 = vrot.slane %v8638_v11, 1  ;;  %v8710_v11 = vrot.slane %v16836_v62, 1 }
 0x5af   : > { %v8699_v23 = vsel %vm8036_vm13, %v8697_v49, %v8698_v47 }
 0x5b0   : > { %v8926_v59 = vpop.permute.xlu1 %8925 }
 0x5b1   : > { %v8958_v42 = vpop.permute.xlu0 %8957  ;;  %v9184_v3 = vsel %vm6415_vm9, %v16959_v58, %v8926_v59 }
 0x5b2   : > { %v9220_v52 = vsel %vm9209_vm15, %v9184_v3, %v8958_v42 }
 0x5b4   : > { %9739 = vmatmul.mubr.bf16.gmra.mrb[52].mxu1 %v9217_v38  ;;  %v16967_v9 = vpop.permute.xlu1 %8879 }
 0x5b5   : > { %v8928_v19 = vpop.permute.xlu0 %8927  ;;  %10971 = vmatprep.mubr.msk.bf16.mxu1 %vm6577_vm11, %v8690_v63 }
 0x5b6   : > { %v9186_v2 = vsel %vm6415_vm9, %v16967_v9, %v8928_v19  ;;  %v8701_v19 = vrot.slane %v16712_v22, 1 }
 0x5b8   : > { %v8960_v8 = vpop.permute.xlu1 %8959  ;;  %v8702_v3 = vsel %vm8036_vm13, %v8700_v55, %v8701_v19  ;;  %v8642_v55 = vld [vmem:[#allocation2 + $0xf0] sm:$0xfe] }
 0x5b9   : > { %v8930_v43 = vpop.permute.xlu0 %8929  ;;  %v9223_v16 = vsel %vm9209_vm15, %v9186_v2, %v8960_v8 }
 0x5ba   : > { %v9188_v57 = vsel %vm6415_vm9, %v16641_v50, %v8930_v43  ;;  %v8639_v43 = vld [vmem:[#allocation2 + $0xc0] sm:$0xfe] }
 0x5bb   : > { %v8703_v31 = vrot.slane %v8639_v43, 1  ;;  %v11643_v43 = vld [vmem:[#allocation2 + $0x30] sm:$0xff] }
 0x5bc   : > { %9747 = vmatmul.mubr.bf16.gmra.mrb[56].mxu1 %v9220_v52  ;;  %v8962_v10 = vpop.permute.xlu1 %8961 }
 0x5bd   : > { %v8932_v12 = vpop.permute.xlu0 %8931  ;;  %10972 = vmatprep.mubr.msk.bf16.mxu1 %vm6577_vm11, %v8693_v35  ;;  %v9226_v42 = vsel %vm9209_vm15, %v9188_v57, %v8962_v10  ;;  %v8704_v10 = vrot.slane %v16764_v46, 1  ;;  %v8640_v46 = vld [vmem:[#allocation2 + $0xd0] sm:$0xfe]  ;;  %v8641_v57 = vld [vmem:[#allocation2 + $0xe0] sm:$0xfe] }
 0x5be   : > { %v9190_v44 = vsel %vm6415_vm9, %v16683_v7, %v8932_v12 }
 0x5c0   : > { %v8964_v41 = vpop.permute.xlu1 %8963 }
 0x5c1   : > { %v8934_v6 = vpop.permute.xlu0 %8933  ;;  %v9229_v8 = vsel %vm9209_vm15, %v9190_v44, %v8964_v41  ;;  %v8712_v44 = vrot.slane %v8642_v55, 1 }
 0x5c2   : > { %v9192_v41 = vsel %vm6415_vm9, %v16720_v51, %v8934_v6 }
 0x5c4   : > { %9755 = vmatmul.mubr.bf16.gmra.mrb[60].mxu1 %v9223_v16  ;;  %v8760_v33 = vpop.permute.xlu1 %8759 }
 0x5c5   : > { %v8808_v29 = vpop.permute.xlu0 %8807  ;;  %10973 = vmatprep.mubr.msk.bf16.mxu1 %vm6577_vm11, %v8696_v45  ;;  %v8705_v45 = vsel %vm8036_vm13, %v8703_v31, %v8704_v10 }
 0x5c6   : > { %v9065_v30 = vsel %vm6253_vm7, %v8760_v33, %v8808_v29 }
 0x5c8   : > { %v8966_v54 = vpop.permute.xlu1 %8965 }
 0x5c9   : > { %v8840_v14 = vpop.permute.xlu0 %8839  ;;  %v9232_v16 = vsel %vm9209_vm15, %v9192_v41, %v8966_v54 }
 0x5ca   : > { %v9097_v4 = vsel %vm6739_vm14, %v9065_v30, %v8840_v14 }
 0x5cb   : > { %v9130_v59 = vsel %vm9128_vm10, %v9097_v4, %v16941_v61  ;;  %v11642_v4 = vld [vmem:[#allocation2 + $0x20] sm:$0xff] }
 0x5cc   : > { %9561 = vmatprep.mubr.bf16.mxu0 %v9130_v59  ;;  %9763 = vmatmul.mubr.bf16.gmra.mrb[64].mxu1 %v9226_v42  ;;  %v8728_v24 = vpop.permute.xlu1 %8727  ;;  %v8709_v42 = vrot.slane %v8641_v57, 1  ;;  %v8722_v57 = vrot.slane %v16903_v15, 1 }
 0x5cd   : > { %v8984_v63 = vsel %vm6577_vm11, %v16715_v28, %v8728_v24  ;;  %v8936_v38 = vpop.permute.xlu0 %8935  ;;  %10974 = vmatprep.mubr.msk.bf16.mxu1 %vm6577_vm11, %v8699_v23 }
 0x5ce   : > { %v9017_v50 = vsel %vm9015_vm12, %v8984_v63, %v8760_v33  ;;  %v8706_v33 = vrot.slane %v8640_v46, 1  ;;  %v9194_v6 = vsel %vm6415_vm9, %v16760_v32, %v8936_v38  ;;  %v8711_v38 = vsel %vm8036_vm13, %v8709_v42, %v8710_v11 }
 0x5cf   : > { %9562 = vmatmul.mubr.bf16.vlgmr.msra.gmra.mrb[80].mxu0 %v9017_v50  ;;  %v8725_v11 = vrot.slane %v16909_v25, 1 }
 0x5d0   : > { %v8762_v1 = vpop.permute.xlu1 %8761 }
 0x5d1   : > { %v8810_v61 = vpop.permute.xlu0 %8809 }
 0x5d2   : > { %v9067_v35 = vsel %vm6253_vm7, %v8762_v1, %v8810_v61 }
 0x5d4   : > { %9771 = vmatmul.mubr.bf16.gmra.mrb[68].mxu1 %v9229_v8  ;;  %v8968_v28 = vpop.permute.xlu1 %8967 }
 0x5d5   : > { %v8842_v52 = vpop.permute.xlu0 %8841  ;;  %10975 = vmatprep.mubr.msk.bf16.mxu1 %vm6577_vm11, %v8702_v3  ;;  %v9235_v14 = vsel %vm9209_vm15, %v9194_v6, %v8968_v28  ;;  %v8713_v3 = vrot.slane %v16861_v34, 1  ;;  %v8643_v34 = vld [vmem:[#allocation2 + $0x100] sm:$0xfe] }
 0x5d6   : > { %v9099_v22 = vsel %vm6739_vm14, %v9067_v35, %v8842_v52 }
 0x5d7   : > { %v9133_v7 = vsel %vm9128_vm10, %v9099_v22, %v16945_v48  ;;  %v8714_v31 = vsel %vm8036_vm13, %v8712_v44, %v8713_v3 }
 0x5d8   : > { %9569 = vmatprep.mubr.bf16.mxu0 %v9133_v7  ;;  %v8730_v12 = vpop.permute.xlu1 %8729 }
 0x5d9   : > { %v8986_v27 = vsel %vm6577_vm11, %v16703_v40, %v8730_v12  ;;  %v8938_v39 = vpop.permute.xlu0 %8937  ;;  %v8707_v40 = vrot.slane %v16805_v18, 1  ;;  %v8715_v12 = vrot.slane %v8643_v34, 1 }
 0x5da   : > { %v9020_v2 = vsel %vm9015_vm12, %v8986_v27, %v8762_v1  ;;  %v9196_v63 = vsel %vm6415_vm9, %v16789_v37, %v8938_v39  ;;  %v8716_v27 = vrot.slane %v16880_v5, 1 }
 0x5db   : > { %9570 = vmatmul.mubr.bf16.gmra.mrb[84].mxu0 %v9020_v2  ;;  %v8708_v54 = vsel %vm8036_vm13, %v8706_v33, %v8707_v40  ;;  %v11644_v33 = vld [vmem:[#allocation2 + $0x40] sm:$0xff] }
 0x5dc   : > { %9779 = vmatmul.mubr.bf16.gmra.mrb[72].mxu1 %v9232_v16  ;;  %v8764_v26 = vpop.permute.xlu1 %8763  ;;  %v8717_v16 = vsel %vm8036_vm13, %v8715_v12, %v8716_v27 }
 0x5dd   : > { %v8812_v48 = vpop.permute.xlu0 %8811  ;;  %10976 = vmatprep.mubr.msk.bf16.mxu1 %vm6577_vm11, %v8705_v45 }
 0x5de   : > { %v9069_v49 = vsel %vm6253_vm7, %v8764_v26, %v8812_v48  ;;  %v8644_v48 = vld [vmem:[#allocation2 + $0x110] sm:$0xfe] }
 0x5e0   : > { %v8970_v29 = vpop.permute.xlu1 %8969 }
 0x5e1   : > { %v8844_v51 = vpop.permute.xlu0 %8843  ;;  %v9238_v50 = vsel %vm9209_vm15, %v9196_v63, %v8970_v29  ;;  %v8718_v29 = vrot.slane %v8644_v48, 1 }
 0x5e2   : > { %v9101_v47 = vsel %vm6739_vm14, %v9069_v49, %v8844_v51  ;;  %v8719_v49 = vrot.slane %v16888_v13, 1 }
 0x5e3   : > { %v9136_v30 = vsel %vm9128_vm10, %v9101_v47, %v16955_v21 }
 0x5e4   : > { %9577 = vmatprep.mubr.bf16.mxu0 %v9136_v30  ;;  %9787 = vmatmul.mubr.bf16.gmra.mrb[76].mxu1 %v9235_v14  ;;  %v8732_v18 = vpop.permute.xlu1 %8731  ;;  %v8720_v47 = vsel %vm8036_vm13, %v8718_v29, %v8719_v49  ;;  %v8645_v30 = vld [vmem:[#allocation2 + $0x120] sm:$0xfe] }
 0x5e5   : > { %v8988_v23 = vsel %vm6577_vm11, %v11642_v4, %v8732_v18  ;;  %v8940_v59 = vpop.permute.xlu0 %8939  ;;  %10977 = vmatprep.mubr.msk.bf16.mxu1 %vm6577_vm11, %v8708_v54  ;;  %v8721_v14 = vrot.slane %v8645_v30, 1 }
 0x5e6   : > { %v9023_v32 = vsel %vm9015_vm12, %v8988_v23, %v8764_v26  ;;  %v9198_v52 = vsel %vm6415_vm9, %v16824_v53, %v8940_v59  ;;  %v8646_v59 = vld [vmem:[#allocation2 + $0x130] sm:$0xfe] }
 0x5e7   : > { %9578 = vmatmul.mubr.bf16.gmra.mrb[88].mxu0 %v9023_v32  ;;  %v8723_v23 = vsel %vm8036_vm13, %v8721_v14, %v8722_v57  ;;  %v8724_v42 = vrot.slane %v8646_v59, 1 }
 0x5e8   : > { %v8766_v24 = vpop.permute.xlu1 %8765 }
 0x5e9   : > { %v8814_v21 = vpop.permute.xlu0 %8813 }
 0x5ea   : > { %v9071_v1 = vsel %vm6253_vm7, %v8766_v24, %v8814_v21 }
 0x5ec   : > { %9795 = vmatmul.mubr.bf16.gmra.mrb[80].mxu1 %v9238_v50  ;;  %v8972_v19 = vpop.permute.xlu1 %8971 }
 0x5ed   : > { %v8846_v61 = vpop.permute.xlu0 %8845  ;;  %10978 = vmatprep.mubr.msk.bf16.mxu1 %vm6577_vm11, %v8711_v38  ;;  %v9241_v10 = vsel %vm9209_vm15, %v9198_v52, %v8972_v19  ;;  %v8726_v19 = vsel %vm8036_vm13, %v8724_v42, %v8725_v11 }
 0x5ee   : > { %v9103_v62 = vsel %vm6739_vm14, %v9071_v1, %v8846_v61 }
 0x5ef   : > { %v9139_v37 = vsel %vm9128_vm10, %v9103_v62, %v16959_v58 }
 0x5f0   : > { %9585 = vmatprep.mubr.bf16.mxu0 %v9139_v37  ;;  %v8734_v8 = vpop.permute.xlu1 %8733 }
 0x5f1   : > { %v8990_v28 = vsel %vm6577_vm11, %v11643_v43, %v8734_v8  ;;  %v8942_v35 = vpop.permute.xlu0 %8941 }
 0x5f2   : > { %v9026_v22 = vsel %vm9015_vm12, %v8990_v28, %v8766_v24  ;;  %v9200_v2 = vsel %vm6415_vm9, %v16847_v20, %v8942_v35 }
 0x5f3   : > { %9586 = vmatmul.mubr.bf16.gmra.mrb[92].mxu0 %v9026_v22 }
 0x5f4   : > { %9803 = vmatmul.mubr.bf16.gmra.mrb[84].mxu1 %v9241_v10  ;;  %v8768_v7 = vpop.permute.xlu1 %8767 }
 0x5f5   : > { %v8816_v58 = vpop.permute.xlu0 %8815  ;;  %10979 = vmatprep.mubr.msk.bf16.mxu1 %vm6577_vm11, %v8714_v31 }
 0x5f6   : > { %v9073_v41 = vsel %vm6253_vm7, %v8768_v7, %v8816_v58 }
 0x5f8   : > { %v8974_v39 = vpop.permute.xlu1 %8973 }
 0x5f9   : > { %v8848_v53 = vpop.permute.xlu0 %8847  ;;  %v9244_v26 = vsel %vm9209_vm15, %v9200_v2, %v8974_v39 }
 0x5fa   : > { %v9105_v45 = vsel %vm6739_vm14, %v9073_v41, %v8848_v53 }
 0x5fb   : > { %v9142_v46 = vsel %vm9128_vm10, %v9105_v45, %v16967_v9 }
 0x5fc   : > { %9593 = vmatprep.mubr.bf16.mxu0 %v9142_v46  ;;  %9811 = vmatmul.mubr.bf16.gmra.mrb[88].mxu1 %v9244_v26  ;;  %v8736_v5 = vpop.permute.xlu1 %8735 }
 0x5fd   : > { %v8992_v40 = vsel %vm6577_vm11, %v11644_v33, %v8736_v5  ;;  %10980 = vmatprep.mubr.msk.bf16.mxu1 %vm6577_vm11, %v8717_v16  ;;  %v8944_v51 = vpop.permute.xlu0 %8943 }
 0x5fe   : > { %v9029_v20 = vsel %vm9015_vm12, %v8992_v40, %v8768_v7  ;;  %v9202_v9 = vsel %vm6415_vm9, %v16871_v0, %v8944_v51 }
 0x5ff   : > { %9594 = vmatmul.mubr.bf16.gmra.mrb[96].mxu0 %v9029_v20 }
 0x600   : > { %v8976_v6 = vpop.permute.xlu1 %8975 }
 0x601   : > { %v9247_v54 = vsel %vm9209_vm15, %v9202_v9, %v8976_v6  ;;  %v8946_v18 = vpop.permute.xlu0 %8945 }
 0x602   : > { %v9204_v13 = vsel %vm6415_vm9, %v16893_v17, %v8946_v18 }
 0x604   : > { %9819 = vmatmul.mubr.bf16.gmra.mrb[92].mxu1 %v9247_v54  ;;  %v8978_v4 = vpop.permute.xlu1 %8977 }
 0x605   : > { %10981 = vmatprep.mubr.msk.bf16.mxu1 %vm6577_vm11, %v8720_v47  ;;  %v9250_v0 = vsel %vm9209_vm15, %v9204_v13, %v8978_v4  ;;  %v8948_v24 = vpop.permute.xlu0 %8947 }
 0x606   : > { %v9206_v17 = vsel %vm6415_vm9, %v16918_v60, %v8948_v24 }
 0x608   : > { %v8980_v15 = vpop.permute.xlu1 %8979 }
 0x609   : > { %v9253_v1 = vsel %vm9209_vm15, %v9206_v17, %v8980_v15  ;;  %v8950_v61 = vpop.permute.xlu0 %8949 }
 0x60a   : > { %v9208_v60 = vsel %vm6415_vm9, %v16934_v56, %v8950_v61 }
 0x60c   : > { %9827 = vmatmul.mubr.bf16.gmra.mrb[96].mxu1 %v9250_v0  ;;  %v8982_v44 = vpop.permute.xlu1 %8981 }
 0x60d   : > { %10982 = vmatprep.mubr.msk.bf16.mxu1 %vm6577_vm11, %v8723_v23  ;;  %v9256_v28 = vsel %vm9209_vm15, %v9208_v60, %v8982_v44 }
 0x60e   : > { %v11083_v32 = vpop.f32.mrb[0].mxu1 }
 0x60f   : > { %v11084_v21 = vpop.f32.mrb[1].mxu1 }
 0x610   : > { %v17069_v63 = vadd.f32 %v11084_v21, %v11083_v32  ;;  %v11086_v38 = vpop.f32.mrb[2].mxu1 }
 0x611   : > { %v11087_v50 = vpop.f32.mrb[3].mxu1 }
 0x612   : > { %v17073_v55 = vadd.f32 %v11087_v50, %v11086_v38 }
 0x614   : > { %9835 = vmatmul.mubr.bf16.gmra.mrb[100].mxu1 %v9253_v1 }
 0x615   : > { %10983 = vmatprep.mubr.msk.bf16.mxu1 %vm6577_vm11, %v8726_v19 }
 0x616   : > { %v11089_v25 = vpop.f32.mrb[4].mxu1 }
 0x617   : > { %v11090_v62 = vpop.f32.mrb[5].mxu1 }
 0x618   : > { %v17078_v3 = vadd.f32 %v11090_v62, %v11089_v25  ;;  %v11092_v37 = vpop.f32.mrb[6].mxu1 }
 0x619   : > { %v11093_v8 = vpop.f32.mrb[7].mxu1 }
 0x61a   : > { %v17082_v43 = vadd.f32 %v11093_v8, %v11092_v37 }
 0x61c   : > { %9843 = vmatmul.mubr.bf16.gmra.mrb[104].mxu1 %v9256_v28 }
 0x61f   : > { %v11095_v35 = vpop.f32.mrb[8].mxu1 }
 0x620   : > { %v11096_v52 = vpop.f32.mrb[9].mxu1 }
 0x621   : > { %v17085_v22 = vadd.f32 %v11096_v52, %v11095_v35  ;;  %v11098_v31 = vpop.f32.mrb[10].mxu1 }
 0x622   : > { %v11099_v10 = vpop.f32.mrb[11].mxu1 }
 0x623   : > { %v17087_v34 = vadd.f32 %v11099_v10, %v11098_v31 }
 0x62a   : > { %v11101_v7 = vpop.f32.mrb[12].mxu1 }
 0x62b   : > { %v11102_v58 = vpop.f32.mrb[13].mxu1 }
 0x62c   : > { %v17089_v12 = vadd.f32 %v11102_v58, %v11101_v7  ;;  %v11104_v27 = vpop.f32.mrb[14].mxu1 }
 0x62d   : > { %v11105_v39 = vpop.f32.mrb[15].mxu1 }
 0x62e   : > { %v17091_v56 = vadd.f32 %v11105_v39, %v11104_v27 }
 0x633   : > { %v11107_v41 = vpop.f32.mrb[16].mxu1 }
 0x634   : > { %v11108_v53 = vpop.f32.mrb[17].mxu1 }
 0x635   : > { %v17093_v2 = vadd.f32 %v11108_v53, %v11107_v41  ;;  %v11110_v45 = vpop.f32.mrb[18].mxu1 }
 0x636   : > { %v11111_v16 = vpop.f32.mrb[19].mxu1 }
 0x637   : > { %v17095_v46 = vadd.f32 %v11111_v16, %v11110_v45 }
 0x63e   : > { %v11113_v26 = vpop.f32.mrb[20].mxu1 }
 0x63f   : > { %v11114_v48 = vpop.f32.mrb[21].mxu1 }
 0x640   : > { %v17097_v5 = vadd.f32 %v11114_v48, %v11113_v26  ;;  %v11116_v33 = vpop.f32.mrb[22].mxu1 }
 0x641   : > { %v11117_v40 = vpop.f32.mrb[23].mxu1 }
 0x642   : > { %v17099_v20 = vadd.f32 %v11117_v40, %v11116_v33  ;;  %v17136_v40 = vld [vmem:[%s17282_s4] ss:$0 sm:$0xff] }
 0x647   : > { %v11119_v29 = vpop.f32.mrb[24].mxu1 }
 0x648   : > { %v11120_v49 = vpop.f32.mrb[25].mxu1 }
 0x649   : > { %v17101_v51 = vadd.f32 %v11120_v49, %v11119_v29  ;;  %v11122_v6 = vpop.f32.mrb[26].mxu1  ;;  %v9604_v29 = vadd.f32 %v17069_v63, %v17136_v40  ;;  %v9612_v63 = vadd.f32 %v17078_v3, %v17136_v40 }
 0x64a   : > { %v11123_v9 = vpop.f32.mrb[27].mxu1 }
 0x64b   : > { %v17103_v47 = vadd.f32 %v11123_v9, %v11122_v6 }
 0x652   : > { %v11125_v54 = vpop.f32.mrb[28].mxu1 }
 0x653   : > { %v11126_v30 = vpop.f32.mrb[29].mxu1 }
 0x654   : > { %v17105_v14 = vadd.f32 %v11126_v30, %v11125_v54  ;;  %v11128_v57 = vpop.f32.mrb[30].mxu1  ;;  %v9607_v54 = vadd.f32 %v17073_v55, %v17136_v40 }
 0x655   : > { %v11129_v18 = vpop.f32.mrb[31].mxu1 }
 0x656   : > { %v17107_v4 = vadd.f32 %v11129_v18, %v11128_v57 }
 0x65b   : > { %v11131_v13 = vpop.f32.mrb[32].mxu1 }
 0x65c   : > { %v11132_v23 = vpop.f32.mrb[33].mxu1 }
 0x65d   : > { %v17109_v0 = vadd.f32 %v11132_v23, %v11131_v13  ;;  %v11134_v59 = vpop.f32.mrb[34].mxu1 }
 0x65e   : > { %v11135_v32 = vpop.f32.mrb[35].mxu1 }
 0x65f   : > { %v17111_v42 = vadd.f32 %v11135_v32, %v11134_v59 }
 0x666   : > { %v11137_v11 = vpop.f32.mrb[36].mxu1 }
 0x667   : > { %v11138_v24 = vpop.f32.mrb[37].mxu1 }
 0x668   : > { %v17113_v21 = vadd.f32 %v11138_v24, %v11137_v11  ;;  %v11140_v15 = vpop.f32.mrb[38].mxu1 }
 0x669   : > { %v11141_v38 = vpop.f32.mrb[39].mxu1 }
 0x66a   : > { %v17115_v50 = vadd.f32 %v11141_v38, %v11140_v15 }
 0x66f   : > { %v11143_v17 = vpop.f32.mrb[40].mxu1 }
 0x670   : > { %v11144_v19 = vpop.f32.mrb[41].mxu1 }
 0x671   : > { %v17117_v1 = vadd.f32 %v11144_v19, %v11143_v17  ;;  %v11146_v25 = vpop.f32.mrb[42].mxu1 }
 0x672   : > { %v11147_v61 = vpop.f32.mrb[43].mxu1 }
 0x673   : > { %v17119_v62 = vadd.f32 %v11147_v61, %v11146_v25  ;;  %v9615_v61 = vadd.f32 %v17082_v43, %v17136_v40  ;;  %v9623_v43 = vadd.f32 %v17087_v34, %v17136_v40  ;;  %v9631_v34 = vadd.f32 %v17091_v56, %v17136_v40 }
 0x674   : > { %v9636_v56 = vadd.f32 %v17093_v2, %v17136_v40 }
 0x677   : > { %v9724_v44 = vpop.f32.mrb[44].mxu1 }
 0x678   : > { %v9726_v37 = vpop.f32.mrb[45].mxu1 }
 0x679   : > { %v9727_v8 = vpop.f32.mrb[46].mxu1 }
 0x67a   : > { %v9729_v60 = vpop.f32.mrb[47].mxu1 }
 0x67f   : > { %v9732_v28 = vpop.f32.mrb[48].mxu1 }
 0x680   : > { %v9734_v35 = vpop.f32.mrb[49].mxu1 }
 0x681   : > { %v9735_v52 = vpop.f32.mrb[50].mxu1 }
 0x682   : > { %v9737_v31 = vpop.f32.mrb[51].mxu1 }
 0x687   : > { %v17121_v10 = vpop.f32.mrb[52].mxu1 }
 0x688   : > { %v9742_v7 = vpop.f32.mrb[53].mxu1 }
 0x689   : > { %v17123_v58 = vpop.f32.mrb[54].mxu1 }
 0x68a   : > { %v9745_v27 = vpop.f32.mrb[55].mxu1 }
 0x68b   : > { %v9620_v27 = vadd.f32 %v17085_v22, %v17136_v40 }
 0x68f   : > { %v17125_v39 = vpop.f32.mrb[56].mxu1 }
 0x690   : > { %v9750_v41 = vpop.f32.mrb[57].mxu1 }
 0x691   : > { %v17127_v53 = vpop.f32.mrb[58].mxu1 }
 0x692   : > { %v9753_v45 = vpop.f32.mrb[59].mxu1 }
 0x697   : > { %v17129_v16 = vpop.f32.mrb[60].mxu1 }
 0x698   : > { %v9758_v26 = vpop.f32.mrb[61].mxu1 }
 0x699   : > { %v17131_v48 = vpop.f32.mrb[62].mxu1 }
 0x69a   : > { %v9761_v33 = vpop.f32.mrb[63].mxu1 }
 0x69f   : > { %v9764_v49 = vpop.f32.mrb[64].mxu1 }
 0x6a0   : > { %v17140_v6 = vadd.f32 %v9764_v49, %v9604_v29  ;;  %v9766_v9 = vpop.f32.mrb[65].mxu1 }
 0x6a1   : > { %v9767_v30 = vpop.f32.mrb[66].mxu1 }
 0x6a2   : > { %v17144_v57 = vadd.f32 %v9767_v30, %v9607_v54  ;;  %v11053_v18 = vpop.f32.mrb[80].mxu0  ;;  %v9769_v13 = vpop.f32.mrb[67].mxu1 }
 0x6a3   : > { %v11054_v23 = vpop.f32.mrb[81].mxu0 }
 0x6a4   : > { %v11055_v59 = vadd.f32 %v11054_v23, %v11053_v18  ;;  %v11056_v32 = vpop.f32.mrb[82].mxu0  ;;  %v9628_v23 = vadd.f32 %v17089_v12, %v17136_v40 }
 0x6a5   : > { %v11057_v11 = vpop.f32.mrb[83].mxu0 }
 0x6a6   : > { %v9564_v24 = vadd.f32 %v11055_v59, %v17136_v40  ;;  %v11058_v15 = vadd.f32 %v11057_v11, %v11056_v32 }
 0x6a7   : > { %v9772_v38 = vpop.f32.mrb[68].mxu1 }
 0x6a8   : > { %v9725_v17 = vadd.f32 %v9724_v44, %v9564_v24  ;;  %v9567_v19 = vadd.f32 %v11058_v15, %v17136_v40  ;;  %v17150_v55 = vadd.f32 %v9772_v38, %v9612_v63  ;;  %v9774_v25 = vpop.f32.mrb[69].mxu1 }
 0x6a9   : > { %v9775_v37 = vpop.f32.mrb[70].mxu1 }
 0x6aa   : > { %v9728_v60 = vadd.f32 %v9727_v8, %v9567_v19  ;;  %v9777_v35 = vpop.f32.mrb[71].mxu1  ;;  %v17154_v31 = vadd.f32 %v9775_v37, %v9615_v61  ;;  %v9883_v59 = vmul.f32 0.2, %v9725_v17  ;;  %vm9851_vm7 = vcmp.ge.f32.partialorder %v9725_v17, 0.0 }
 0x6ac   : > { %v9884_v15 = vmul.f32 0.2, %v9728_v60  ;;  %v9915_v61 = vsel %vm9851_vm7, %v9725_v17, %v9883_v59  ;;  %vm9852_vm14 = vcmp.ge.f32.partialorder %v9728_v60, 0.0 }
 0x6ae   : > { %v11059_v7 = vpop.f32.mrb[84].mxu0 }
 0x6af   : > { %v11060_v3 = vpop.f32.mrb[85].mxu0  ;;  %v9780_v41 = vpop.f32.mrb[72].mxu1 }
 0x6b0   : > { %v11061_v44 = vadd.f32 %v11060_v3, %v11059_v7  ;;  %v17158_v45 = vadd.f32 %v9780_v41, %v9620_v27  ;;  %v11062_v26 = vpop.f32.mrb[86].mxu0  ;;  %v9782_v33 = vpop.f32.mrb[73].mxu1 }
 0x6b1   : > { %v11063_v29 = vpop.f32.mrb[87].mxu0  ;;  %v9783_v49 = vpop.f32.mrb[74].mxu1 }
 0x6b2   : > { %v9572_v8 = vadd.f32 %v11061_v44, %v17136_v40  ;;  %v11064_v9 = vadd.f32 %v11063_v29, %v11062_v26  ;;  %v9785_v54 = vpop.f32.mrb[75].mxu1  ;;  %v17163_v30 = vadd.f32 %v9783_v49, %v9623_v43  ;;  %v9916_v26 = vsel %vm9852_vm14, %v9728_v60, %v9884_v15 }
 0x6b4   : > { %v9733_v18 = vadd.f32 %v9732_v28, %v9572_v8  ;;  %v9575_v22 = vadd.f32 %v11064_v9, %v17136_v40 }
 0x6b6   : > { %v17166_v13 = vadd.f32 %v9735_v52, %v9575_v22  ;;  %v9885_v17 = vmul.f32 0.2, %v9733_v18  ;;  %v9639_v22 = vadd.f32 %v17095_v46, %v17136_v40  ;;  %vm9853_vm5 = vcmp.ge.f32.partialorder %v9733_v18, 0.0 }
 0x6b7   : > { %v9788_v32 = vpop.f32.mrb[76].mxu1  ;;  %v9644_v46 = vadd.f32 %v17097_v5, %v17136_v40  ;;  %v9647_v5 = vadd.f32 %v17099_v20, %v17136_v40 }
 0x6b8   : > { %v9789_v11 = vadd.f32 %v9788_v32, %v9628_v23  ;;  %v9790_v24 = vpop.f32.mrb[77].mxu1  ;;  %v9886_v32 = vmul.f32 0.2, %v17166_v13  ;;  %vm9854_vm2 = vcmp.ge.f32.partialorder %v17166_v13, 0.0 }
 0x6b9   : > { %v9791_v63 = vpop.f32.mrb[78].mxu1  ;;  %v9917_v24 = vsel %vm9853_vm5, %v9733_v18, %v9885_v17 }
 0x6ba   : > { %vm9867_vm9 = vcmp.ge.f32.partialorder %v9789_v11, 0.0  ;;  %v9899_v38 = vmul.f32 0.2, %v9789_v11  ;;  %v9792_v28 = vadd.f32 %v9791_v63, %v9631_v34  ;;  %v11065_v19 = vpop.f32.mrb[88].mxu0  ;;  %v9793_v25 = vpop.f32.mrb[79].mxu1 }
 0x6bb   : > { %v11066_v52 = vpop.f32.mrb[89].mxu0  ;;  %v9918_v25 = vsel %vm9854_vm2, %v17166_v13, %v9886_v32  ;;  %vm9861_vm2 = vcmp.ge.f32.partialorder %v17140_v6, 0.0 }
 0x6bc   : > { %vm9868_vm3 = vcmp.ge.f32.partialorder %v9792_v28, 0.0  ;;  %v9900_v12 = vmul.f32 0.2, %v9792_v28  ;;  %v11067_v37 = vadd.f32 %v11066_v52, %v11065_v19  ;;  %v11068_v35 = vpop.f32.mrb[90].mxu0  ;;  %v9931_v7 = vsel %vm9867_vm9, %v9789_v11, %v9899_v38 }
 0x6bd   : > { %v11069_v27 = vpop.f32.mrb[91].mxu0  ;;  %v11545_v3 = vpack.i.bf16 %v9931_v7, %v9915_v61  ;;  %v11683_v38 = vmov 0.0   ;;  %vm11684_vm9 = vmmov 0  }
 0x6be   : > { %v9580_v41 = vadd.f32 %v11067_v37, %v17136_v40  ;;  %v11070_v44 = vadd.f32 %v11069_v27, %v11068_v35  ;;  %v9932_v33 = vsel %vm9868_vm3, %v9792_v28, %v9900_v12  ;;  %11247 = vmatprep.subr.bf16.mxu0 %v11683_v38  ;;  %11253 = vmatprep.mubr.msk.bf16.mxu0 %vm11684_vm9, %v11683_v38 }
 0x6bf   : > { %11546 = vxpose.xlu0.b32.start [1/16] (narrow) %v11545_v3, 48  ;;  %v9796_v29 = vpop.f32.mrb[80].mxu1  ;;  %v11547_v43 = vpack.i.bf16 %v9932_v33, %v9916_v26 }
 0x6c0   : > { %v9741_v49 = vadd.f32 %v17121_v10, %v9580_v41  ;;  %v9583_v8 = vadd.f32 %v11070_v44, %v17136_v40  ;;  %v9797_v9 = vadd.f32 %v9796_v29, %v9636_v56  ;;  %v9798_v54 = vpop.f32.mrb[81].mxu1 }
 0x6c1   : > { %v9799_v23 = vpop.f32.mrb[82].mxu1  ;;  %v9652_v54 = vadd.f32 %v17101_v51, %v17136_v40 }
 0x6c2   : > { %v9744_v2 = vadd.f32 %v17123_v58, %v9583_v8  ;;  %vm9869_vm4 = vcmp.ge.f32.partialorder %v9797_v9, 0.0  ;;  %v9901_v60 = vmul.f32 0.2, %v9797_v9  ;;  %v9801_v59 = vpop.f32.mrb[83].mxu1  ;;  %v9800_v11 = vadd.f32 %v9799_v23, %v9639_v22 }
 0x6c3   : > { %11548 = vxpose.xlu0.b32.cont [2/16] (narrow) %v11547_v43, 48  ;;  %v9887_v58 = vmul.f32 0.2, %v9741_v49  ;;  %vm9855_vm6 = vcmp.ge.f32.partialorder %v9741_v49, 0.0 }
 0x6c4   : > { %v9933_v10 = vsel %vm9869_vm4, %v9797_v9, %v9901_v60  ;;  %vm9870_vm0 = vcmp.ge.f32.partialorder %v9800_v11, 0.0  ;;  %v9902_v34 = vmul.f32 0.2, %v9800_v11  ;;  %v9888_v26 = vmul.f32 0.2, %v9744_v2 }
 0x6c5   : > { %v11549_v15 = vpack.i.bf16 %v9933_v10, %v9917_v24  ;;  %v9919_v33 = vsel %vm9855_vm6, %v9741_v49, %v9887_v58  ;;  %vm9856_vm13 = vcmp.ge.f32.partialorder %v9744_v2, 0.0  ;;  %vm9862_vm6 = vcmp.ge.f32.partialorder %v17144_v57, 0.0 }
 0x6c6   : > { %v11071_v63 = vpop.f32.mrb[92].mxu0  ;;  %v9934_v18 = vsel %vm9870_vm0, %v9800_v11, %v9902_v34  ;;  %v9920_v60 = vsel %vm9856_vm13, %v9744_v2, %v9888_v26  ;;  %vm9863_vm13 = vcmp.ge.f32.partialorder %v17150_v55, 0.0 }
 0x6c7   : > { %11550 = vxpose.xlu0.b32.cont [3/16] (narrow) %v11549_v15, 48  ;;  %v11072_v28 = vpop.f32.mrb[93].mxu0  ;;  %v9804_v19 = vpop.f32.mrb[84].mxu1  ;;  %v11551_v35 = vpack.i.bf16 %v9934_v18, %v9918_v25  ;;  %v9660_v18 = vadd.f32 %v17105_v14, %v17136_v40 }
 0x6c8   : > { %v11073_v52 = vadd.f32 %v11072_v28, %v11071_v63  ;;  %v9805_v61 = vadd.f32 %v9804_v19, %v9644_v46  ;;  %v11074_v12 = vpop.f32.mrb[94].mxu0  ;;  %v9806_v37 = vpop.f32.mrb[85].mxu1 }
 0x6c9   : > { %v11075_v7 = vpop.f32.mrb[95].mxu0  ;;  %v9807_v27 = vpop.f32.mrb[86].mxu1 }
 0x6ca   : > { %v9588_v3 = vadd.f32 %v11073_v52, %v17136_v40  ;;  %vm9871_vm8 = vcmp.ge.f32.partialorder %v9805_v61, 0.0  ;;  %v9903_v56 = vmul.f32 0.2, %v9805_v61  ;;  %v11076_v41 = vadd.f32 %v11075_v7, %v11074_v12  ;;  %v9809_v44 = vpop.f32.mrb[87].mxu1 }
 0x6cb   : > { %v9808_v13 = vadd.f32 %v9807_v27, %v9647_v5  ;;  %11552 = vxpose.xlu0.b32.cont [4/16] (narrow) %v11551_v35, 48 }
 0x6cc   : > { %v9749_v29 = vadd.f32 %v17125_v39, %v9588_v3  ;;  %v9591_v43 = vadd.f32 %v11076_v41, %v17136_v40  ;;  %v9935_v17 = vsel %vm9871_vm8, %v9805_v61, %v9903_v56  ;;  %v9655_v39 = vadd.f32 %v17103_v47, %v17136_v40 }
 0x6cd   : > { %vm9872_vm1 = vcmp.ge.f32.partialorder %v9808_v13, 0.0  ;;  %v9904_v8 = vmul.f32 0.2, %v9808_v13  ;;  %v11553_v20 = vpack.i.bf16 %v9935_v17, %v9919_v33  ;;  %v9663_v41 = vadd.f32 %v17107_v4, %v17136_v40 }
 0x6ce   : > { %v9752_v9 = vadd.f32 %v17127_v53, %v9591_v43  ;;  %v9889_v22 = vmul.f32 0.2, %v9749_v29  ;;  %vm9857_vm10 = vcmp.ge.f32.partialorder %v9749_v29, 0.0 }
 0x6cf   : > { %11554 = vxpose.xlu0.b32.cont [5/16] (narrow) %v11553_v20, 48  ;;  %v9812_v23 = vpop.f32.mrb[88].mxu1  ;;  %v9936_v59 = vsel %vm9872_vm1, %v9808_v13, %v9904_v8  ;;  %v9668_v20 = vadd.f32 %v17109_v0, %v17136_v40 }
 0x6d0   : > { %v9813_v49 = vadd.f32 %v9812_v23, %v9652_v54  ;;  %v9814_v32 = vpop.f32.mrb[89].mxu1  ;;  %v11555_v11 = vpack.i.bf16 %v9936_v59, %v9920_v60  ;;  %v9890_v24 = vmul.f32 0.2, %v9752_v9  ;;  %v9921_v46 = vsel %vm9857_vm10, %v9749_v29, %v9889_v22 }
 0x6d1   : > { %v9815_v10 = vpop.f32.mrb[90].mxu1  ;;  %vm9858_vm15 = vcmp.ge.f32.partialorder %v9752_v9, 0.0  ;;  %v9893_v22 = vmul.f32 0.2, %v17140_v6  ;;  %v9671_v59 = vadd.f32 %v17111_v42, %v17136_v40  ;;  %v9676_v42 = vadd.f32 %v17113_v21, %v17136_v40 }
 0x6d2   : > { %vm9873_vm12 = vcmp.ge.f32.partialorder %v9813_v49, 0.0  ;;  %v9905_v34 = vmul.f32 0.2, %v9813_v49  ;;  %v9816_v53 = vadd.f32 %v9815_v10, %v9655_v39  ;;  %v11077_v15 = vpop.f32.mrb[96].mxu0  ;;  %v9817_v63 = vpop.f32.mrb[91].mxu1  ;;  %v9922_v12 = vsel %vm9858_vm15, %v9752_v9, %v9890_v24 }
 0x6d3   : > { %11556 = vxpose.xlu0.b32.cont [6/16] (narrow) %v11555_v11, 48  ;;  %v11078_v51 = vpop.f32.mrb[97].mxu0  ;;  %v9894_v39 = vmul.f32 0.2, %v17144_v57  ;;  %vm9864_vm10 = vcmp.ge.f32.partialorder %v17154_v31, 0.0  ;;  %vm9865_vm15 = vcmp.ge.f32.partialorder %v17158_v45, 0.0 }
 0x6d4   : > { %vm9874_vm7 = vcmp.ge.f32.partialorder %v9816_v53, 0.0  ;;  %v9906_v2 = vmul.f32 0.2, %v9816_v53  ;;  %v11079_v58 = vadd.f32 %v11078_v51, %v11077_v15  ;;  %v11080_v28 = vpop.f32.mrb[98].mxu0  ;;  %v9937_v19 = vsel %vm9873_vm12, %v9813_v49, %v9905_v34 }
 0x6d5   : > { %v11081_v25 = vpop.f32.mrb[99].mxu0  ;;  %v11557_v47 = vpack.i.bf16 %v9937_v19, %v9921_v46  ;;  %v9925_v34 = vsel %vm9861_vm2, %v17140_v6, %v9893_v22  ;;  %v9926_v63 = vsel %vm9862_vm6, %v17144_v57, %v9894_v39  ;;  %v9679_v6 = vadd.f32 %v17115_v50, %v17136_v40  ;;  %v10069_v57 = vld [vmem:[%s17284_s6] sm:$0x7] }
 0x6d6   : > { %v9596_v52 = vadd.f32 %v11079_v58, %v17136_v40  ;;  %v11082_v61 = vadd.f32 %v11081_v25, %v11080_v28  ;;  %v9938_v37 = vsel %vm9874_vm7, %v9816_v53, %v9906_v2  ;;  %v9983_v58 = vld [vmem:[%s17284_s6] sm:$0x7]  ;;  %v9895_v28 = vmul.f32 0.2, %v17150_v55 }
 0x6d7   : > { %11558 = vxpose.xlu0.b32.cont [7/16] (narrow) %v11557_v47, 48  ;;  %v9820_v35 = vpop.f32.mrb[92].mxu1  ;;  %v11559_v7 = vpack.i.bf16 %v9938_v37, %v9922_v12  ;;  %9986 = vperm.xlu1 %11607, %v9983_v58   ;;  %v9896_v47 = vmul.f32 0.2, %v17154_v31 }
 0x6d8   : > { %v9757_v5 = vadd.f32 %v17129_v16, %v9596_v52  ;;  %v9599_v27 = vadd.f32 %v11082_v61, %v17136_v40  ;;  %v9821_v3 = vadd.f32 %v9820_v35, %v9660_v18  ;;  %v9822_v56 = vpop.f32.mrb[93].mxu1  ;;  %v9927_v50 = vsel %vm9863_vm13, %v17150_v55, %v9895_v28 }
 0x6d9   : > { %v9823_v44 = vpop.f32.mrb[94].mxu1 }
 0x6da   : > { %v9891_v14 = vmul.f32 0.2, %v9757_v5  ;;  %v9760_v26 = vadd.f32 %v17131_v48, %v9599_v27  ;;  %vm9875_vm14 = vcmp.ge.f32.partialorder %v9821_v3, 0.0  ;;  %v9907_v13 = vmul.f32 0.2, %v9821_v3  ;;  %v9825_v33 = vpop.f32.mrb[95].mxu1 }
 0x6db   : > { %v9824_v29 = vadd.f32 %v9823_v44, %v9663_v41  ;;  %11560 = vxpose.xlu0.b32.cont [8/16] (narrow) %v11559_v7, 48  ;;  %vm9859_vm3 = vcmp.ge.f32.partialorder %v9757_v5, 0.0  ;;  %10072 = vperm.xlu1 %11607, %v10069_v57   ;;  %v9684_v7 = vadd.f32 %v17117_v1, %v17136_v40  ;;  %v9897_v41 = vmul.f32 0.2, %v17158_v45 }
 0x6dc   : > { %v9892_v16 = vmul.f32 0.2, %v9760_v26  ;;  %v9923_v43 = vsel %vm9859_vm3, %v9757_v5, %v9891_v14  ;;  %v9939_v17 = vsel %vm9875_vm14, %v9821_v3, %v9907_v13  ;;  %vm9860_vm5 = vcmp.ge.f32.partialorder %v9760_v26, 0.0 }
 0x6dd   : > { %vm9876_vm4 = vcmp.ge.f32.partialorder %v9824_v29, 0.0  ;;  %v9908_v4 = vmul.f32 0.2, %v9824_v29  ;;  %v11561_v8 = vpack.i.bf16 %v9939_v17, %v9923_v43  ;;  %v9928_v5 = vsel %vm9864_vm10, %v17154_v31, %v9896_v47 }
 0x6de   : > { %v9924_v9 = vsel %vm9860_vm5, %v9760_v26, %v9892_v16  ;;  %v9687_v26 = vadd.f32 %v17119_v62, %v17136_v40  ;;  %v9898_v13 = vmul.f32 0.2, %v17163_v30  ;;  %vm9866_vm14 = vcmp.ge.f32.partialorder %v17163_v30, 0.0 }
 0x6df   : > { %11562 = vxpose.xlu0.b32.cont [9/16] (narrow) %v11561_v8, 48  ;;  %v9828_v54 = vpop.f32.mrb[96].mxu1  ;;  %v9940_v48 = vsel %vm9876_vm4, %v9824_v29, %v9908_v4  ;;  %v9929_v16 = vsel %vm9865_vm15, %v17158_v45, %v9897_v41 }
 0x6e0   : > { %v9829_v23 = vadd.f32 %v9828_v54, %v9668_v20  ;;  %v9830_v60 = vpop.f32.mrb[97].mxu1  ;;  %v11563_v49 = vpack.i.bf16 %v9940_v48, %v9924_v9  ;;  %v9930_v62 = vsel %vm9866_vm14, %v17163_v30, %v9898_v13 }
 0x6e1   : > { %v9831_v32 = vpop.f32.mrb[98].mxu1 }
 0x6e2   : > { %vm9877_vm0 = vcmp.ge.f32.partialorder %v9829_v23, 0.0  ;;  %v9909_v11 = vmul.f32 0.2, %v9829_v23  ;;  %v9832_v0 = vadd.f32 %v9831_v32, %v9671_v59  ;;  %v9833_v24 = vpop.f32.mrb[99].mxu1 }
 0x6e3   : > { %11564 = vxpose.xlu0.b32.cont [10/16] (narrow) %v11563_v49, 48  ;;  %v9982_v24 = vld [vmem:[%s17283_s5] sm:$0x3] }
 0x6e4   : > { %vm9878_vm8 = vcmp.ge.f32.partialorder %v9832_v0, 0.0  ;;  %v9910_v10 = vmul.f32 0.2, %v9832_v0  ;;  %v9941_v53 = vsel %vm9877_vm0, %v9829_v23, %v9909_v11 }
 0x6e5   : > { %v11565_v15 = vpack.i.bf16 %v9941_v53, %v9925_v34 }
 0x6e6   : > { %v9942_v51 = vsel %vm9878_vm8, %v9832_v0, %v9910_v10 }
 0x6e7   : > { %11566 = vxpose.xlu0.b32.cont [11/16] (narrow) %v11565_v15, 48  ;;  %v9836_v46 = vpop.f32.mrb[100].mxu1  ;;  %v11567_v2 = vpack.i.bf16 %v9942_v51, %v9926_v63 }
 0x6e8   : > { %v9837_v19 = vadd.f32 %v9836_v46, %v9676_v42  ;;  %v9838_v25 = vpop.f32.mrb[101].mxu1  ;;  %v10068_v46 = vld [vmem:[%s17283_s5] sm:$0x3] }
 0x6e9   : > { %v9839_v21 = vpop.f32.mrb[102].mxu1 }
 0x6ea   : > { %vm9879_vm1 = vcmp.ge.f32.partialorder %v9837_v19, 0.0  ;;  %v9911_v18 = vmul.f32 0.2, %v9837_v19  ;;  %v9840_v52 = vadd.f32 %v9839_v21, %v9679_v6  ;;  %v9841_v61 = vpop.f32.mrb[103].mxu1 }
 0x6eb   : > { %11568 = vxpose.xlu0.b32.cont [12/16] (narrow) %v11567_v2, 48 }
 0x6ec   : > { %vm9880_vm12 = vcmp.ge.f32.partialorder %v9840_v52, 0.0  ;;  %v9912_v12 = vmul.f32 0.2, %v9840_v52  ;;  %v9943_v37 = vsel %vm9879_vm1, %v9837_v19, %v9911_v18 }
 0x6ed   : > { %v11569_v35 = vpack.i.bf16 %v9943_v37, %v9927_v50 }
 0x6ee   : > { %v9944_v27 = vsel %vm9880_vm12, %v9840_v52, %v9912_v12 }
 0x6ef   : > { %11570 = vxpose.xlu0.b32.cont [13/16] (narrow) %v11569_v35, 48  ;;  %v9844_v3 = vpop.f32.mrb[104].mxu1  ;;  %v11571_v56 = vpack.i.bf16 %v9944_v27, %v9928_v5 }
 0x6f0   : > { %v9845_v44 = vadd.f32 %v9844_v3, %v9684_v7  ;;  %v9846_v14 = vpop.f32.mrb[105].mxu1 }
 0x6f1   : > { %v9847_v55 = vpop.f32.mrb[106].mxu1 }
 0x6f2   : > { %vm9881_vm7 = vcmp.ge.f32.partialorder %v9845_v44, 0.0  ;;  %v9913_v1 = vmul.f32 0.2, %v9845_v44  ;;  %v9848_v33 = vadd.f32 %v9847_v55, %v9687_v26  ;;  %v9849_v31 = vpop.f32.mrb[107].mxu1 }
 0x6f3   : > { %11572 = vxpose.xlu0.b32.cont [14/16] (narrow) %v11571_v56, 48 }
 0x6f4   : > { %vm9882_vm3 = vcmp.ge.f32.partialorder %v9848_v33, 0.0  ;;  %v9914_v29 = vmul.f32 0.2, %v9848_v33  ;;  %v9945_v43 = vsel %vm9881_vm7, %v9845_v44, %v9913_v1 }
 0x6f5   : > { %v11573_v17 = vpack.i.bf16 %v9945_v43, %v9929_v16 }
 0x6f6   : > { %v9946_v40 = vsel %vm9882_vm3, %v9848_v33, %v9914_v29 }
 0x6f7   : > { %11574 = vxpose.xlu0.b32.cont [15/16] (narrow) %v11573_v17, 48  ;;  %v11575_v4 = vpack.i.bf16 %v9946_v40, %v9930_v62 }
 0x6fb   : > { %11576 = vxpose.xlu0.b32.end [16/16] (narrow) %v11575_v4, 48 }
 0x724   : > { %11608 = vset.pattern.permute.xlu0 %v11681_v36 }
 0x73f   : > { %v11577_v8 = vpop.trf.xlu0 }
 0x740   : > { %v11578_v9 = vunpack.i.l.bf16 %v11577_v8  ;;  %v11581_v0 = vunpack.i.h.bf16 %v11577_v8 }
 0x743   : > { %v11582_v20 = vpop.trf.xlu0 }
 0x744   : > { %v11583_v54 = vunpack.i.l.bf16 %v11582_v20  ;;  %v11586_v39 = vunpack.i.h.bf16 %v11582_v20 }
 0x746   : > { %v9979_v48 = vpack.c.bf16 %v11583_v54, %v11578_v9  ;;  %v10065_v34 = vpack.c.bf16 %v11586_v39, %v11581_v0 }
 0x747   : > { %v11587_v22 = vpop.trf.xlu0 }
 0x748   : > { %11248 = vmatpush3.bf16.msra.mxu0 %v9979_v48  ;;  %v11588_v23 = vunpack.i.l.bf16 %v11587_v22  ;;  %v11591_v53 = vunpack.i.h.bf16 %v11587_v22 }
 0x749   : > { %11249 = vmatprep.subr.bf16.mxu0 %v11683_v38 }
 0x74b   : > { %v11592_v45 = vpop.trf.xlu0 }
 0x74c   : > { %v11593_v60 = vunpack.i.l.bf16 %v11592_v45  ;;  %v11596_v10 = vunpack.i.h.bf16 %v11592_v45 }
 0x74e   : > { %v9980_v59 = vpack.c.bf16 %v11593_v60, %v11588_v23  ;;  %v10066_v42 = vpack.c.bf16 %v11596_v10, %v11591_v53 }
 0x74f   : > { %v11597_v30 = vpop.trf.xlu0 }
 0x750   : > { %11250 = vmatpush3.bf16.msra.mxu0 %v9980_v59  ;;  %v11598_v32 = vunpack.i.l.bf16 %v11597_v30  ;;  %v11601_v63 = vunpack.i.h.bf16 %v11597_v30 }
 0x751   : > { %11251 = vmatprep.subr.bf16.mxu0 %v11683_v38 }
 0x753   : > { %v11602_v49 = vpop.trf.xlu0 }
 0x754   : > { %v11603_v36 = vunpack.i.l.bf16 %v11602_v49  ;;  %v11606_v15 = vunpack.i.h.bf16 %v11602_v49 }
 0x756   : > { %v9981_v11 = vpack.c.bf16 %v11603_v36, %v11598_v32  ;;  %v10067_v51 = vpack.c.bf16 %v11606_v15, %v11601_v63  ;;  %v9987_v2 = vpop.permute.xlu1 %9986 }
 0x758   : > { %11252 = vmatpush3.bf16.msra.mxu0 %v9981_v11 }
 0x759   : > { %11257 = vmatprep.subr.bf16.mxu0 %v11683_v38 }
 0x75a   : > { %v10073_v57 = vpop.permute.xlu1 %10072 }
 0x75b   : > { %11254 = vmatmul.mubr.msk.bf16.vlgmr.msra.gmra.mrb[100].mxu0 %vm6577_vm11, %v9982_v24 }
 0x75c   : > { %11258 = vmatpush3.bf16.msra.mxu0 %v10065_v34  ;;  %11263 = vmatprep.mubr.msk.bf16.mxu0 %vm11684_vm9, %v11683_v38 }
 0x75d   : > { %11259 = vmatprep.subr.bf16.mxu0 %v11683_v38 }
 0x760   : > { %11260 = vmatpush3.bf16.msra.mxu0 %v10066_v42 }
 0x761   : > { %11261 = vmatprep.subr.bf16.mxu0 %v11683_v38 }
 0x764   : > { %11262 = vmatpush3.bf16.msra.mxu0 %v10067_v51 }
 0x767   : > { %11264 = vmatmul.mubr.msk.bf16.vlgmr.msra.gmra.mrb[104].mxu0 %vm6577_vm11, %v10068_v46 }
 0x82e   : > { %v10026_v58 = vpop.f32.mrb[100].mxu0 }
 0x82f   : > { %v11255_v28 = vpop.f32.mrb[101].mxu0  ;;  %v10027_v19 = vadd.f32 %v10026_v58, %v9987_v2 }
 0x830   : > { %v10029_v25 = vpop.f32.mrb[102].mxu0 }
 0x831   : > { %v11256_v6 = vpop.f32.mrb[103].mxu0  ;;  %10032 = vst [vmem:[%s16342_s13] sm:$0x7] %v10027_v19 }
 0x837   : > { %10126 = sbr.rel (!%p11750_p4) target bundleno = 2118 (0x846), region = 60 }
 0x838   : > { %v10144_v61 = vld [vmem:[%s16342_s13] sm:$0xf] (%p11750_p4) }
 0x839   : > { %10145 = vst [vmem:[%s10128_s22] sm:$0xf] (%p11750_p4), %v10144_v61 }
 0x83a   : > { %v10112_v21 = vpop.f32.mrb[104].mxu0 }
 0x83b   : > { %v10113_v47 = vadd.f32 %v10112_v21, %v10073_v57  ;;  %v11265_v38 = vpop.f32.mrb[105].mxu0 }
 0x83c   : > { %v10115_v18 = vpop.f32.mrb[106].mxu0 }
 0x83d   : > { %10986 = vst [vmem:[%s16342_s13 + $0x4] sm:$0x7] %v10113_v47  ;;  %v11266_v52 = vpop.f32.mrb[107].mxu0 }
 0x844   : > { %v10146_v12 = vld [vmem:[%s16342_s13 + $0x4] sm:$0xf] }
 0x845   : > { %10147 = vst [vmem:[%s10128_s22 + $0x8] sm:$0xf] %v10146_v12 }
 0x846 PF: > { %p14_p9 = scmp.ge.s32.totalorder %s11740_s28, 4   ;;  %s17734_s24 = smov %s11663_s25 }
 0x847   : > { %s17735_s25 = smov %s11748_s8  ;;  %s17736_s26 = smov %s11740_s28 }
 0x848   :  { %16 = sbr.rel (!%p14_p9) target bundleno = 2 (0x2), region = 131 }

</bundles_post_ra>
